<compile_context>
chip_gen: v6e
topology: v6e:2x2x1
jax: 0.10.0
libtpu: 0.0.40
codegen_flags: <defaults>
</compile_context>

<pallas_src>
import functools

import jax
import jax.numpy as jnp
import numpy as np
from jax import lax
from jax.experimental import pallas as pl
from jax.experimental.pallas import tpu as pltpu


# TODO(synk): re-derive per generation (v7x physical VMEM is 64 MiB); 40 MiB is
# safe everywhere and far above what the toy shapes here need.
VMEM_LIMIT = 40 * 1024 * 1024
CT2_COUT_PAD = 64          # 2 phases * 64 = 128-lane-dense final stores


def _round_up(x, m):
    return (x + m - 1) // m * m


def _pick_strip(h, target):
    s = min(h, target)
    while h % s:
        s -= 1
    return s


# ---------------------------------------------------------------------------
# Fused ResidualBlock kernel:  out = x + Conv1x1( ReLU( Conv3x3( ReLU(x) ) ) )
# grid = (N, H // strip_h); the intermediate never touches HBM.
# ---------------------------------------------------------------------------
def _make_residual_kernel(H, W, C, strip_h):
    HW = strip_h * W

    def kernel(x_ref, w1_ref, b1_ref, w2_ref, b2_ref, out_ref, xp_ref):
        s = pl.program_id(1)

        @pl.when(s == 0)
        def _init():
            # Build ReLU(x), zero-padded by 1 pixel, once per batch element,
            # entirely in VMEM (no HBM pad round trip).
            xp_ref[...] = jnp.zeros_like(xp_ref)
            xp_ref[1:H + 1, 1:W + 1, :] = jnp.maximum(x_ref[0], 0)

        row0 = pl.multiple_of(s * strip_h, strip_h)

        # im2col in VMEM: one (strip*W, 9C) @ (9C, C) MXU pass.  Accumulation
        # is folded into the contraction (no f32 accumulator RMW passes).
        taps = []
        for dy in range(3):
            for dx in range(3):
                t = xp_ref[pl.ds(row0 + dy, strip_h), dx:dx + W, :]
                taps.append(t.reshape(HW, C))
        patch = jnp.concatenate(taps, axis=-1)                     # (HW, 9C) bf16

        acc = jnp.dot(patch, w1_ref[...],
                      preferred_element_type=jnp.float32)          # (HW, C) f32
        h = jnp.maximum(acc + b1_ref[...], 0.0)                    # bias+ReLU f32
        y = jnp.dot(h.astype(jnp.bfloat16), w2_ref[...],
                    preferred_element_type=jnp.float32) + b2_ref[...]

        x_res = x_ref[0, pl.ds(row0, strip_h), :, :].reshape(HW, C)
        out_ref[0] = (x_res.astype(jnp.float32) + y).reshape(
            strip_h, W, C).astype(out_ref.dtype)

    return kernel


def fused_residual_block(x, w1, b1, w2, b2, *, strip_target=4):
    """x: (N,H,W,C) bf16; w1: (9*C,C) bf16; w2: (C,C) bf16; b*: (1,C) f32."""
    N, H, W, C = x.shape
    strip_h = _pick_strip(H, strip_target)
    S = H // strip_h
    Wp = _round_up(W + 2, 8)   # sublane-aligned padded-W extent for the scratch

    return pl.pallas_call(
        _make_residual_kernel(H, W, C, strip_h),
        out_shape=jax.ShapeDtypeStruct((N, H, W, C), x.dtype),
        grid=(N, S),
        in_specs=[
            pl.BlockSpec((1, H, W, C), lambda n, s: (n, 0, 0, 0)),
            pl.BlockSpec((9 * C, C), lambda n, s: (0, 0)),
            pl.BlockSpec((1, C), lambda n, s: (0, 0)),
            pl.BlockSpec((C, C), lambda n, s: (0, 0)),
            pl.BlockSpec((1, C), lambda n, s: (0, 0)),
        ],
        out_specs=pl.BlockSpec((1, strip_h, W, C), lambda n, s: (n, s, 0, 0)),
        scratch_shapes=[pltpu.VMEM((H + 2, Wp, C), jnp.bfloat16)],
        compiler_params=pltpu.CompilerParams(
            dimension_semantics=("parallel", "arbitrary"),
            vmem_limit_bytes=VMEM_LIMIT),
    )(x, w1, b1, w2, b2)


# ---------------------------------------------------------------------------
# ConvTranspose2d(K=4, stride=2, pad=1) via stride-phase decomposition.
#
# With the spatially-flipped, channel-transposed kernel wf (4,4,Cin,Cout) and
# xpad = x zero-padded by 1 pixel:
#   out[2q+ry, 2p+rx] = sum_{a,b in {0,1}} xpad[q+ry+a, p+rx+b] * wf[2a+ry, 2b+rx]
# Per phase this is one (HW, 4*Cin) @ (4*Cin, Cout) matmul (weights pre-packed
# as (2,2,4*Cin,Cout) at prep time).  Phase (ry,rx) lands at
# out[:, q, ry, p, rx*Cout:(rx+1)*Cout] so the wrapper reshape to
# (N, 2H, 2W, Cout) is a pure (free) dim merge.
# ---------------------------------------------------------------------------
def _make_convt_kernel(H, W, Cin, Cout, strip_h, input_relu):
    HW = strip_h * W

    def kernel(x_ref, w_ref, b_ref, out_ref, xp_ref):
        s = pl.program_id(1)

        @pl.when(s == 0)
        def _init():
            xp_ref[...] = jnp.zeros_like(xp_ref)
            xv = x_ref[0]
            if input_relu:
                xv = jnp.maximum(xv, 0)    # standalone ReLU fused into halo fill
            xp_ref[1:H + 1, 1:W + 1, :] = xv

        row0 = pl.multiple_of(s * strip_h, strip_h)
        bias = b_ref[...]                                    # (1, Cout) f32

        # 9 distinct shifted taps, materialized once, reused by all 4 phases.
        taps = [[xp_ref[pl.ds(row0 + a, strip_h), b:b + W, :].reshape(HW, Cin)
                 for b in range(3)] for a in range(3)]

        for ry in range(2):
            row_parts = []
            for rx in range(2):
                patch = jnp.concatenate(
                    [taps[ry + ta][rx + tb]
                     for ta in range(2) for tb in range(2)], axis=-1)  # (HW,4Cin)
                acc = jnp.dot(patch, w_ref[ry, rx],
                              preferred_element_type=jnp.float32) + bias
                row_parts.append(acc.reshape(strip_h, W, Cout))
            # Full-lane-width store: (strip_h, W, 2*Cout) with 2*Cout >= 128.
            out_ref[0, :, ry, :, :] = jnp.concatenate(
                row_parts, axis=-1).astype(out_ref.dtype)

    return kernel


def conv_transpose2d_phase(x, w_phase, bias, *, input_relu, out_dtype=None,
                           strip_target=4):
    """x: (N,H,W,Cin) bf16; w_phase: (2,2,4*Cin,Cout) bf16; bias: (1,Cout) f32."""
    N, H, W, Cin = x.shape
    Cout = w_phase.shape[-1]
    out_dtype = x.dtype if out_dtype is None else out_dtype
    strip_h = _pick_strip(H, strip_target)
    S = H // strip_h
    Wp = _round_up(W + 2, 8)

    out = pl.pallas_call(
        _make_convt_kernel(H, W, Cin, Cout, strip_h, input_relu),
        out_shape=jax.ShapeDtypeStruct((N, H, 2, W, 2 * Cout), out_dtype),
        grid=(N, S),
        in_specs=[
            pl.BlockSpec((1, H, W, Cin), lambda n, s: (n, 0, 0, 0)),
            pl.BlockSpec((2, 2, 4 * Cin, Cout), lambda n, s: (0, 0, 0, 0)),
            pl.BlockSpec((1, Cout), lambda n, s: (0, 0)),
        ],
        out_specs=pl.BlockSpec((1, strip_h, 2, W, 2 * Cout),
                               lambda n, s: (n, s, 0, 0, 0)),
        scratch_shapes=[pltpu.VMEM((H + 2, Wp, Cin), jnp.bfloat16)],
        compiler_params=pltpu.CompilerParams(
            dimension_semantics=("parallel", "arbitrary"),
            vmem_limit_bytes=VMEM_LIMIT),
    )(x, w_phase, bias)

    # (N, H, 2, W, 2*Cout) -> (N, 2H, 2W, Cout): contiguous dim merge, free.
    return out.reshape(N, 2 * H, 2 * W, Cout)


# ---------------------------------------------------------------------------
# Decoder forward:
#   ResidualBlock(d,d), ResidualBlock(d,d),
#   ConvTranspose2d(d,d,4,2,1), ReLU, ConvTranspose2d(d,img_ch,4,2,1)
# ---------------------------------------------------------------------------
def decoder_forward(prep, x_nchw, img_channels=3):
    x = jnp.transpose(x_nchw, (0, 2, 3, 1)).astype(jnp.bfloat16)  # NCHW -> NHWC

    x = fused_residual_block(x, prep["rb1_w1"], prep["rb1_b1"],
                             prep["rb1_w2"], prep["rb1_b2"])
    x = fused_residual_block(x, prep["rb2_w1"], prep["rb2_b1"],
                             prep["rb2_w2"], prep["rb2_b2"])

    x = conv_transpose2d_phase(x, prep["ct1_w"], prep["ct1_b"], input_relu=False)
    # TODO(synk): fuse ct1 + ReLU + ct2 into one pallas_call per strip to drop
    # the intermediate HBM round trip entirely (biggest residual win on v5e).
    x = conv_transpose2d_phase(x, prep["ct2_w"], prep["ct2_b"], input_relu=True,
                               out_dtype=jnp.bfloat16)

    x = x[..., :img_channels].astype(jnp.float32)   # fuses with transpose below
    return jnp.transpose(x, (0, 3, 1, 2))           # NHWC -> NCHW


# ---------------------------------------------------------------------------
# Parameter init (PyTorch-style ranges) and prep (bf16 cast, kernel flip +
# phase packing for transposed convs, im2col weight reshape, final-layer pad).
# ---------------------------------------------------------------------------
def init_params(key, dim_hidden, img_channels):
    ks = jax.random.split(key, 12)

    def u(k, shape, fan_in):
        b = 1.0 / (fan_in ** 0.5)
        return jax.random.uniform(k, shape, jnp.float32, -b, b)

    d = dim_hidden
    return {
        # ResidualBlock 1: Conv2d(d,d,3,p=1) (HWIO), Conv2d(d,d,1) as (Cin,Cout)
        "rb1_w1": u(ks[0], (3, 3, d, d), d * 9), "rb1_b1": u(ks[1], (d,), d * 9),
        "rb1_w2": u(ks[2], (d, d), d),           "rb1_b2": u(ks[3], (d,), d),
        # ResidualBlock 2
        "rb2_w1": u(ks[4], (3, 3, d, d), d * 9), "rb2_b1": u(ks[5], (d,), d * 9),
        "rb2_w2": u(ks[6], (d, d), d),           "rb2_b2": u(ks[7], (d,), d),
        # ConvTranspose2d weights in PyTorch layout (Cin, Cout, K, K)
        "ct1_w": u(ks[8], (d, d, 4, 4), d * 16), "ct1_b": u(ks[9], (d,), d * 16),
        "ct2_w": u(ks[10], (d, img_channels, 4, 4), d * 16),
        "ct2_b": u(ks[11], (img_channels,), d * 16),
    }


def _flip_ct(wt):  # (Cin, Cout, K, K) -> (K, K, Cin, Cout), spatially flipped
    return jnp.transpose(wt, (2, 3, 0, 1))[::-1, ::-1, :, :]


def prepare_params(params, img_channels, cout_pad=CT2_COUT_PAD):
    bf, f32 = jnp.bfloat16, jnp.float32
    d = params["rb1_w2"].shape[0]

    def phase_pack(wf):  # (4,4,Cin,Cout) -> (2,2, 4*Cin, Cout), tap order (ta,tb)
        return jnp.stack([
            jnp.stack([
                jnp.concatenate([wf[2 * ta + ry, 2 * tb + rx]
                                 for ta in range(2) for tb in range(2)], axis=0)
                for rx in range(2)], axis=0)
            for ry in range(2)], axis=0)

    prep = {}
    for rb in ("rb1", "rb2"):
        prep[f"{rb}_w1"] = params[f"{rb}_w1"].reshape(9 * d, d).astype(bf)
        prep[f"{rb}_b1"] = params[f"{rb}_b1"].reshape(1, -1).astype(f32)
        prep[f"{rb}_w2"] = params[f"{rb}_w2"].astype(bf)
        prep[f"{rb}_b2"] = params[f"{rb}_b2"].reshape(1, -1).astype(f32)

    prep["ct1_w"] = phase_pack(_flip_ct(params["ct1_w"])).astype(bf)
    prep["ct1_b"] = params["ct1_b"].reshape(1, -1).astype(f32)

    pad_c = max(cout_pad, img_channels) - img_channels
    ct2_wf = jnp.pad(_flip_ct(params["ct2_w"]),
                     ((0, 0), (0, 0), (0, 0), (0, pad_c)))
    prep["ct2_w"] = phase_pack(ct2_wf).astype(bf)
    prep["ct2_b"] = jnp.pad(params["ct2_b"], (0, pad_c)).reshape(1, -1).astype(f32)
    return prep


# ---------------------------------------------------------------------------
# Pure-JAX reference (same bf16/f32 mixed precision) for a correctness check.
# Transposed conv is expressed independently as an lhs-dilated convolution.
# ---------------------------------------------------------------------------
def _ref_convt(x, w_flip, b, input_relu):
    if input_relu:
        x = jnp.maximum(x, 0)
    y = lax.conv_general_dilated(
        x, w_flip, window_strides=(1, 1), padding=[(2, 2), (2, 2)],
        lhs_dilation=(2, 2), dimension_numbers=("NHWC", "HWIO", "NHWC"),
        preferred_element_type=jnp.float32)
    return y + b


def _ref_residual_block(x, w1, b1, w2, b2):
    xr = jnp.maximum(x, 0)
    h = lax.conv_general_dilated(
        xr, w1, window_strides=(1, 1), padding=[(1, 1), (1, 1)],
        dimension_numbers=("NHWC", "HWIO", "NHWC"),
        preferred_element_type=jnp.float32) + b1
    h = jnp.maximum(h, 0).astype(x.dtype)
    n, hh, ww, c = h.shape
    y = jnp.dot(h.reshape(-1, c), w2,
                preferred_element_type=jnp.float32).reshape(n, hh, ww, -1) + b2
    return (x.astype(jnp.float32) + y).astype(x.dtype)


def decoder_reference(params, x_nchw, img_channels=3):
    bf = jnp.bfloat16
    x = jnp.transpose(x_nchw, (0, 2, 3, 1)).astype(bf)
    x = _ref_residual_block(x, params["rb1_w1"].astype(bf), params["rb1_b1"],
                            params["rb1_w2"].astype(bf), params["rb1_b2"])
    x = _ref_residual_block(x, params["rb2_w1"].astype(bf), params["rb2_b1"],
                            params["rb2_w2"].astype(bf), params["rb2_b2"])
    x = _ref_convt(x, _flip_ct(params["ct1_w"]).astype(bf),
                   params["ct1_b"], False).astype(bf)
    x = _ref_convt(x, _flip_ct(params["ct2_w"]).astype(bf),
                   params["ct2_b"], True)
    return jnp.transpose(x, (0, 3, 1, 2))


if __name__ == "__main__":
    dim_hidden = 128      # lane-dense stand-in for the real 256
    img_channels = 3
    batch, spatial = 2, 8

    key = jax.random.PRNGKey(0)
    k_param, k_x = jax.random.split(key)
    params = init_params(k_param, dim_hidden, img_channels)
    prep = prepare_params(params, img_channels)
    x = jax.random.normal(k_x, (batch, dim_hidden, spatial, spatial), jnp.float32)

    fwd = jax.jit(functools.partial(decoder_forward, img_channels=img_channels))
    out = jax.block_until_ready(fwd(prep, x))

    expected_shape = (batch, img_channels, spatial * 4, spatial * 4)
    assert out.shape == expected_shape, (out.shape, expected_shape)
    assert bool(jnp.all(jnp.isfinite(out)))

    ref = jax.jit(functools.partial(decoder_reference,
                                    img_channels=img_channels))(params, x)
    np.testing.assert_allclose(np.asarray(out),
                               np.asarray(ref, dtype=np.float32),
                               rtol=0.1, atol=0.05)

    print("KERNEL_OK")
</pallas_src>

<mosaic_0001>
module attributes {stable_mosaic.version = 11 : i64} {
  func.func @kernel(%arg0: i32, %arg1: i32, %arg2: memref<1x8x8x128xbf16, #tpu.memory_space<vmem>>, %arg3: memref<1152x128xbf16, #tpu.memory_space<vmem>>, %arg4: memref<1x128xf32, #tpu.memory_space<vmem>>, %arg5: memref<128x128xbf16, #tpu.memory_space<vmem>>, %arg6: memref<1x128xf32, #tpu.memory_space<vmem>>, %arg7: memref<1x4x8x128xbf16, #tpu.memory_space<vmem>>, %arg8: memref<10x16x128xbf16, #tpu.memory_space<vmem>>) attributes {dimension_semantics = [#tpu.dimension_semantics<parallel>, #tpu.dimension_semantics<arbitrary>], iteration_bounds = array<i64: 2, 2>, scalar_prefetch = 0 : i64, scratch_operands = 1 : i64, tpu.core_type = #tpu.core_type<tc>, window_params = [{transform_indices = @transform_0, window_bounds = array<i64: 1, 8, 8, 128>}, {pipeline_mode = #tpu.pipeline_mode<synchronous>, transform_indices = @transform_1, window_bounds = array<i64: 1152, 128>}, {pipeline_mode = #tpu.pipeline_mode<synchronous>, transform_indices = @transform_2, window_bounds = array<i64: 1, 128>}, {pipeline_mode = #tpu.pipeline_mode<synchronous>, transform_indices = @transform_3, window_bounds = array<i64: 128, 128>}, {pipeline_mode = #tpu.pipeline_mode<synchronous>, transform_indices = @transform_4, window_bounds = array<i64: 1, 128>}, {transform_indices = @transform_5, window_bounds = array<i64: 1, 4, 8, 128>}]} {
    %c0_i32 = arith.constant 0 : i32
    %0 = arith.cmpi eq, %arg1, %c0_i32 : i32
    %1 = arith.extui %0 : i1 to i32
    %c0_i32_0 = arith.constant 0 : i32
    %2 = arith.cmpi ne, %1, %c0_i32_0 : i32
    scf.if %2 {
      %cst_40 = arith.constant 0.000000e+00 : bf16
      %66 = vector.broadcast %cst_40 : bf16 to vector<10x16x128xbf16>
      %c0_41 = arith.constant 0 : index
      %c0_42 = arith.constant 0 : index
      %c0_43 = arith.constant 0 : index
      %67 = vector.load %arg8[%c0_41, %c0_42, %c0_43] : memref<10x16x128xbf16, #tpu.memory_space<vmem>>, vector<10x16x128xbf16>
      tpu.vector_store %arg8[%c0_41, %c0_42, %c0_43], %66 {strides = array<i32>} : memref<10x16x128xbf16, #tpu.memory_space<vmem>>, vector<10x16x128xbf16>,
      %c0_44 = arith.constant 0 : index
      %c0_45 = arith.constant 0 : index
      %c0_46 = arith.constant 0 : index
      %c0_47 = arith.constant 0 : index
      %68 = vector.load %arg2[%c0_44, %c0_45, %c0_46, %c0_47] : memref<1x8x8x128xbf16, #tpu.memory_space<vmem>>, vector<1x8x8x128xbf16>
      %69 = vector.shape_cast %68 : vector<1x8x8x128xbf16> to vector<8x8x128xbf16>
      %cst_48 = arith.constant 0.000000e+00 : bf16
      %70 = vector.broadcast %cst_48 : bf16 to vector<8x8x128xbf16>
      %71 = arith.maximumf %69, %70 : vector<8x8x128xbf16>
      %c1_49 = arith.constant 1 : index
      %c1_50 = arith.constant 1 : index
      %c0_51 = arith.constant 0 : index
      %72 = vector.load %arg8[%c1_49, %c1_50, %c0_51] : memref<10x16x128xbf16, #tpu.memory_space<vmem>>, vector<8x8x128xbf16>
      tpu.vector_store %arg8[%c1_49, %c1_50, %c0_51], %71 {strides = array<i32>} : memref<10x16x128xbf16, #tpu.memory_space<vmem>>, vector<8x8x128xbf16>,
    } else {
    }
    %c4_i32 = arith.constant 4 : i32
    %3 = arith.muli %arg1, %c4_i32 : i32
    %4 = tpu.assume_multiple %3, 4 : i32
    %c0_i32_1 = arith.constant 0 : i32
    %5 = arith.addi %4, %c0_i32_1 : i32
    %6 = arith.index_cast %5 : i32 to index
    %c0 = arith.constant 0 : index
    %c0_2 = arith.constant 0 : index
    %7 = vector.load %arg8[%6, %c0, %c0_2] : memref<10x16x128xbf16, #tpu.memory_space<vmem>>, vector<4x8x128xbf16>
    %8 = vector.shape_cast %7 : vector<4x8x128xbf16> to vector<32x128xbf16>
    %c0_i32_3 = arith.constant 0 : i32
    %9 = arith.addi %4, %c0_i32_3 : i32
    %10 = arith.index_cast %9 : i32 to index
    %c1 = arith.constant 1 : index
    %c0_4 = arith.constant 0 : index
    %11 = vector.load %arg8[%10, %c1, %c0_4] : memref<10x16x128xbf16, #tpu.memory_space<vmem>>, vector<4x8x128xbf16>
    %12 = vector.shape_cast %11 : vector<4x8x128xbf16> to vector<32x128xbf16>
    %c0_i32_5 = arith.constant 0 : i32
    %13 = arith.addi %4, %c0_i32_5 : i32
    %14 = arith.index_cast %13 : i32 to index
    %c2 = arith.constant 2 : index
    %c0_6 = arith.constant 0 : index
    %15 = vector.load %arg8[%14, %c2, %c0_6] : memref<10x16x128xbf16, #tpu.memory_space<vmem>>, vector<4x8x128xbf16>
    %16 = vector.shape_cast %15 : vector<4x8x128xbf16> to vector<32x128xbf16>
    %c1_i32 = arith.constant 1 : i32
    %17 = arith.addi %4, %c1_i32 : i32
    %18 = arith.index_cast %17 : i32 to index
    %c0_7 = arith.constant 0 : index
    %c0_8 = arith.constant 0 : index
    %19 = vector.load %arg8[%18, %c0_7, %c0_8] : memref<10x16x128xbf16, #tpu.memory_space<vmem>>, vector<4x8x128xbf16>
    %20 = vector.shape_cast %19 : vector<4x8x128xbf16> to vector<32x128xbf16>
    %c1_i32_9 = arith.constant 1 : i32
    %21 = arith.addi %4, %c1_i32_9 : i32
    %22 = arith.index_cast %21 : i32 to index
    %c1_10 = arith.constant 1 : index
    %c0_11 = arith.constant 0 : index
    %23 = vector.load %arg8[%22, %c1_10, %c0_11] : memref<10x16x128xbf16, #tpu.memory_space<vmem>>, vector<4x8x128xbf16>
    %24 = vector.shape_cast %23 : vector<4x8x128xbf16> to vector<32x128xbf16>
    %c1_i32_12 = arith.constant 1 : i32
    %25 = arith.addi %4, %c1_i32_12 : i32
    %26 = arith.index_cast %25 : i32 to index
    %c2_13 = arith.constant 2 : index
    %c0_14 = arith.constant 0 : index
    %27 = vector.load %arg8[%26, %c2_13, %c0_14] : memref<10x16x128xbf16, #tpu.memory_space<vmem>>, vector<4x8x128xbf16>
    %28 = vector.shape_cast %27 : vector<4x8x128xbf16> to vector<32x128xbf16>
    %c2_i32 = arith.constant 2 : i32
    %29 = arith.addi %4, %c2_i32 : i32
    %30 = arith.index_cast %29 : i32 to index
    %c0_15 = arith.constant 0 : index
    %c0_16 = arith.constant 0 : index
    %31 = vector.load %arg8[%30, %c0_15, %c0_16] : memref<10x16x128xbf16, #tpu.memory_space<vmem>>, vector<4x8x128xbf16>
    %32 = vector.shape_cast %31 : vector<4x8x128xbf16> to vector<32x128xbf16>
    %c2_i32_17 = arith.constant 2 : i32
    %33 = arith.addi %4, %c2_i32_17 : i32
    %34 = arith.index_cast %33 : i32 to index
    %c1_18 = arith.constant 1 : index
    %c0_19 = arith.constant 0 : index
    %35 = vector.load %arg8[%34, %c1_18, %c0_19] : memref<10x16x128xbf16, #tpu.memory_space<vmem>>, vector<4x8x128xbf16>
    %36 = vector.shape_cast %35 : vector<4x8x128xbf16> to vector<32x128xbf16>
    %c2_i32_20 = arith.constant 2 : i32
    %37 = arith.addi %4, %c2_i32_20 : i32
    %38 = arith.index_cast %37 : i32 to index
    %c2_21 = arith.constant 2 : index
    %c0_22 = arith.constant 0 : index
    %39 = vector.load %arg8[%38, %c2_21, %c0_22] : memref<10x16x128xbf16, #tpu.memory_space<vmem>>, vector<4x8x128xbf16>
    %40 = vector.shape_cast %39 : vector<4x8x128xbf16> to vector<32x128xbf16>
    %41 = tpu.concatenate %8, %12, %16, %20, %24, %28, %32, %36, %40 in 1 : vector<32x128xbf16>, vector<32x128xbf16>, vector<32x128xbf16>, vector<32x128xbf16>, vector<32x128xbf16>, vector<32x128xbf16>, vector<32x128xbf16>, vector<32x128xbf16>, vector<32x128xbf16> -> vector<32x1152xbf16>
    %c0_23 = arith.constant 0 : index
    %c0_24 = arith.constant 0 : index
    %42 = vector.load %arg3[%c0_23, %c0_24] : memref<1152x128xbf16, #tpu.memory_space<vmem>>, vector<1152x128xbf16>
    %cst = arith.constant dense<0.000000e+00> : vector<32x128xf32>
    %43 = tpu.matmul %41, %42, %cst {dimension_numbers = #tpu.dot_dimension_numbers<[1], [0], [0], [1], [0, 0, 1, 1], [], []>} : vector<32x1152xbf16>, vector<1152x128xbf16>, vector<32x128xf32> -> vector<32x128xf32>
    %c0_25 = arith.constant 0 : index
    %c0_26 = arith.constant 0 : index
    %44 = vector.load %arg4[%c0_25, %c0_26] : memref<1x128xf32, #tpu.memory_space<vmem>>, vector<1x128xf32>
    %45 = vector.broadcast %44 : vector<1x128xf32> to vector<32x128xf32>
    %46 = arith.addf %43, %45 : vector<32x128xf32>
    %cst_27 = arith.constant 0.000000e+00 : f32
    %47 = vector.broadcast %cst_27 : f32 to vector<32x128xf32>
    %48 = arith.maximumf %46, %47 : vector<32x128xf32>
    %49 = arith.truncf %48 : vector<32x128xf32> to vector<32x128xbf16>
    %c0_28 = arith.constant 0 : index
    %c0_29 = arith.constant 0 : index
    %50 = vector.load %arg5[%c0_28, %c0_29] : memref<128x128xbf16, #tpu.memory_space<vmem>>, vector<128x128xbf16>
    %cst_30 = arith.constant dense<0.000000e+00> : vector<32x128xf32>
    %51 = tpu.matmul %49, %50, %cst_30 {dimension_numbers = #tpu.dot_dimension_numbers<[1], [0], [0], [1], [0, 0, 1, 1], [], []>} : vector<32x128xbf16>, vector<128x128xbf16>, vector<32x128xf32> -> vector<32x128xf32>
    %c0_31 = arith.constant 0 : index
    %c0_32 = arith.constant 0 : index
    %52 = vector.load %arg6[%c0_31, %c0_32] : memref<1x128xf32, #tpu.memory_space<vmem>>, vector<1x128xf32>
    %53 = vector.broadcast %52 : vector<1x128xf32> to vector<32x128xf32>
    %54 = arith.addf %51, %53 : vector<32x128xf32>
    %c0_33 = arith.constant 0 : index
    %55 = arith.index_cast %4 : i32 to index
    %c0_34 = arith.constant 0 : index
    %c0_35 = arith.constant 0 : index
    %56 = vector.load %arg2[%c0_33, %55, %c0_34, %c0_35] : memref<1x8x8x128xbf16, #tpu.memory_space<vmem>>, vector<1x4x8x128xbf16>
    %57 = vector.shape_cast %56 : vector<1x4x8x128xbf16> to vector<4x8x128xbf16>
    %58 = vector.shape_cast %57 : vector<4x8x128xbf16> to vector<32x128xbf16>
    %59 = arith.extf %58 : vector<32x128xbf16> to vector<32x128xf32>
    %60 = arith.addf %59, %54 : vector<32x128xf32>
    %61 = vector.shape_cast %60 : vector<32x128xf32> to vector<4x8x128xf32>
    %62 = arith.truncf %61 : vector<4x8x128xf32> to vector<4x8x128xbf16>
    %c0_36 = arith.constant 0 : index
    %c0_37 = arith.constant 0 : index
    %c0_38 = arith.constant 0 : index
    %c0_39 = arith.constant 0 : index
    %63 = vector.load %arg7[%c0_36, %c0_37, %c0_38, %c0_39] : memref<1x4x8x128xbf16, #tpu.memory_space<vmem>>, vector<1x4x8x128xbf16>
    %64 = vector.shape_cast %63 : vector<1x4x8x128xbf16> to vector<4x8x128xbf16>
    %65 = vector.shape_cast %62 : vector<4x8x128xbf16> to vector<1x4x8x128xbf16>
    tpu.vector_store %arg7[%c0_36, %c0_37, %c0_38, %c0_39], %65 {strides = array<i32>} : memref<1x4x8x128xbf16, #tpu.memory_space<vmem>>, vector<1x4x8x128xbf16>,
    return
  }
  func.func @transform_0(%arg0: i32, %arg1: i32) -> (i32, i32, i32, i32) {
    %c0_i32 = arith.constant 0 : i32
    %c0_i32_0 = arith.constant 0 : i32
    %c0_i32_1 = arith.constant 0 : i32
    %c0_i32_2 = arith.constant 0 : i32
    return %arg0, %c0_i32, %c0_i32_0, %c0_i32_1 : i32, i32, i32, i32
  }
  func.func @transform_1(%arg0: i32, %arg1: i32) -> (i32, i32) {
    %c0_i32 = arith.constant 0 : i32
    %c0_i32_0 = arith.constant 0 : i32
    %c0_i32_1 = arith.constant 0 : i32
    return %c0_i32, %c0_i32_0 : i32, i32
  }
  func.func @transform_2(%arg0: i32, %arg1: i32) -> (i32, i32) {
    %c0_i32 = arith.constant 0 : i32
    %c0_i32_0 = arith.constant 0 : i32
    %c0_i32_1 = arith.constant 0 : i32
    return %c0_i32, %c0_i32_0 : i32, i32
  }
  func.func @transform_3(%arg0: i32, %arg1: i32) -> (i32, i32) {
    %c0_i32 = arith.constant 0 : i32
    %c0_i32_0 = arith.constant 0 : i32
    %c0_i32_1 = arith.constant 0 : i32
    return %c0_i32, %c0_i32_0 : i32, i32
  }
  func.func @transform_4(%arg0: i32, %arg1: i32) -> (i32, i32) {
    %c0_i32 = arith.constant 0 : i32
    %c0_i32_0 = arith.constant 0 : i32
    %c0_i32_1 = arith.constant 0 : i32
    return %c0_i32, %c0_i32_0 : i32, i32
  }
  func.func @transform_5(%arg0: i32, %arg1: i32) -> (i32, i32, i32, i32) {
    %c0_i32 = arith.constant 0 : i32
    %c0_i32_0 = arith.constant 0 : i32
    %c0_i32_1 = arith.constant 0 : i32
    return %arg0, %arg1, %c0_i32, %c0_i32_0 : i32, i32, i32, i32
  }
}

module attributes {stable_mosaic.version = 11 : i64} {
  func.func @kernel(%arg0: i32, %arg1: i32, %arg2: memref<1x8x8x128xbf16, #tpu.memory_space<vmem>>, %arg3: memref<1152x128xbf16, #tpu.memory_space<vmem>>, %arg4: memref<1x128xf32, #tpu.memory_space<vmem>>, %arg5: memref<128x128xbf16, #tpu.memory_space<vmem>>, %arg6: memref<1x128xf32, #tpu.memory_space<vmem>>, %arg7: memref<1x4x8x128xbf16, #tpu.memory_space<vmem>>, %arg8: memref<10x16x128xbf16, #tpu.memory_space<vmem>>) attributes {dimension_semantics = [#tpu.dimension_semantics<parallel>, #tpu.dimension_semantics<arbitrary>], iteration_bounds = array<i64: 2, 2>, scalar_prefetch = 0 : i64, scratch_operands = 1 : i64, tpu.core_type = #tpu.core_type<tc>, window_params = [{transform_indices = @transform_0, window_bounds = array<i64: 1, 8, 8, 128>}, {pipeline_mode = #tpu.pipeline_mode<synchronous>, transform_indices = @transform_1, window_bounds = array<i64: 1152, 128>}, {pipeline_mode = #tpu.pipeline_mode<synchronous>, transform_indices = @transform_2, window_bounds = array<i64: 1, 128>}, {pipeline_mode = #tpu.pipeline_mode<synchronous>, transform_indices = @transform_3, window_bounds = array<i64: 128, 128>}, {pipeline_mode = #tpu.pipeline_mode<synchronous>, transform_indices = @transform_4, window_bounds = array<i64: 1, 128>}, {transform_indices = @transform_5, window_bounds = array<i64: 1, 4, 8, 128>}]} {
    %c0_i32 = arith.constant 0 : i32
    %0 = arith.cmpi eq, %arg1, %c0_i32 : i32
    %1 = arith.extui %0 : i1 to i32
    %c0_i32_0 = arith.constant 0 : i32
    %2 = arith.cmpi ne, %1, %c0_i32_0 : i32
    scf.if %2 {
      %cst_40 = arith.constant 0.000000e+00 : bf16
      %66 = vector.broadcast %cst_40 : bf16 to vector<10x16x128xbf16>
      %c0_41 = arith.constant 0 : index
      %c0_42 = arith.constant 0 : index
      %c0_43 = arith.constant 0 : index
      %67 = vector.load %arg8[%c0_41, %c0_42, %c0_43] : memref<10x16x128xbf16, #tpu.memory_space<vmem>>, vector<10x16x128xbf16>
      tpu.vector_store %arg8[%c0_41, %c0_42, %c0_43], %66 {strides = array<i32>} : memref<10x16x128xbf16, #tpu.memory_space<vmem>>, vector<10x16x128xbf16>,
      %c0_44 = arith.constant 0 : index
      %c0_45 = arith.constant 0 : index
      %c0_46 = arith.constant 0 : index
      %c0_47 = arith.constant 0 : index
      %68 = vector.load %arg2[%c0_44, %c0_45, %c0_46, %c0_47] : memref<1x8x8x128xbf16, #tpu.memory_space<vmem>>, vector<1x8x8x128xbf16>
      %69 = vector.shape_cast %68 : vector<1x8x8x128xbf16> to vector<8x8x128xbf16>
      %cst_48 = arith.constant 0.000000e+00 : bf16
      %70 = vector.broadcast %cst_48 : bf16 to vector<8x8x128xbf16>
      %71 = arith.maximumf %69, %70 : vector<8x8x128xbf16>
      %c1_49 = arith.constant 1 : index
      %c1_50 = arith.constant 1 : index
      %c0_51 = arith.constant 0 : index
      %72 = vector.load %arg8[%c1_49, %c1_50, %c0_51] : memref<10x16x128xbf16, #tpu.memory_space<vmem>>, vector<8x8x128xbf16>
      tpu.vector_store %arg8[%c1_49, %c1_50, %c0_51], %71 {strides = array<i32>} : memref<10x16x128xbf16, #tpu.memory_space<vmem>>, vector<8x8x128xbf16>,
    } else {
    }
    %c4_i32 = arith.constant 4 : i32
    %3 = arith.muli %arg1, %c4_i32 : i32
    %4 = tpu.assume_multiple %3, 4 : i32
    %c0_i32_1 = arith.constant 0 : i32
    %5 = arith.addi %4, %c0_i32_1 : i32
    %6 = arith.index_cast %5 : i32 to index
    %c0 = arith.constant 0 : index
    %c0_2 = arith.constant 0 : index
    %7 = vector.load %arg8[%6, %c0, %c0_2] : memref<10x16x128xbf16, #tpu.memory_space<vmem>>, vector<4x8x128xbf16>
    %8 = vector.shape_cast %7 : vector<4x8x128xbf16> to vector<32x128xbf16>
    %c0_i32_3 = arith.constant 0 : i32
    %9 = arith.addi %4, %c0_i32_3 : i32
    %10 = arith.index_cast %9 : i32 to index
    %c1 = arith.constant 1 : index
    %c0_4 = arith.constant 0 : index
    %11 = vector.load %arg8[%10, %c1, %c0_4] : memref<10x16x128xbf16, #tpu.memory_space<vmem>>, vector<4x8x128xbf16>
    %12 = vector.shape_cast %11 : vector<4x8x128xbf16> to vector<32x128xbf16>
    %c0_i32_5 = arith.constant 0 : i32
    %13 = arith.addi %4, %c0_i32_5 : i32
    %14 = arith.index_cast %13 : i32 to index
    %c2 = arith.constant 2 : index
    %c0_6 = arith.constant 0 : index
    %15 = vector.load %arg8[%14, %c2, %c0_6] : memref<10x16x128xbf16, #tpu.memory_space<vmem>>, vector<4x8x128xbf16>
    %16 = vector.shape_cast %15 : vector<4x8x128xbf16> to vector<32x128xbf16>
    %c1_i32 = arith.constant 1 : i32
    %17 = arith.addi %4, %c1_i32 : i32
    %18 = arith.index_cast %17 : i32 to index
    %c0_7 = arith.constant 0 : index
    %c0_8 = arith.constant 0 : index
    %19 = vector.load %arg8[%18, %c0_7, %c0_8] : memref<10x16x128xbf16, #tpu.memory_space<vmem>>, vector<4x8x128xbf16>
    %20 = vector.shape_cast %19 : vector<4x8x128xbf16> to vector<32x128xbf16>
    %c1_i32_9 = arith.constant 1 : i32
    %21 = arith.addi %4, %c1_i32_9 : i32
    %22 = arith.index_cast %21 : i32 to index
    %c1_10 = arith.constant 1 : index
    %c0_11 = arith.constant 0 : index
    %23 = vector.load %arg8[%22, %c1_10, %c0_11] : memref<10x16x128xbf16, #tpu.memory_space<vmem>>, vector<4x8x128xbf16>
    %24 = vector.shape_cast %23 : vector<4x8x128xbf16> to vector<32x128xbf16>
    %c1_i32_12 = arith.constant 1 : i32
    %25 = arith.addi %4, %c1_i32_12 : i32
    %26 = arith.index_cast %25 : i32 to index
    %c2_13 = arith.constant 2 : index
    %c0_14 = arith.constant 0 : index
    %27 = vector.load %arg8[%26, %c2_13, %c0_14] : memref<10x16x128xbf16, #tpu.memory_space<vmem>>, vector<4x8x128xbf16>
    %28 = vector.shape_cast %27 : vector<4x8x128xbf16> to vector<32x128xbf16>
    %c2_i32 = arith.constant 2 : i32
    %29 = arith.addi %4, %c2_i32 : i32
    %30 = arith.index_cast %29 : i32 to index
    %c0_15 = arith.constant 0 : index
    %c0_16 = arith.constant 0 : index
    %31 = vector.load %arg8[%30, %c0_15, %c0_16] : memref<10x16x128xbf16, #tpu.memory_space<vmem>>, vector<4x8x128xbf16>
    %32 = vector.shape_cast %31 : vector<4x8x128xbf16> to vector<32x128xbf16>
    %c2_i32_17 = arith.constant 2 : i32
    %33 = arith.addi %4, %c2_i32_17 : i32
    %34 = arith.index_cast %33 : i32 to index
    %c1_18 = arith.constant 1 : index
    %c0_19 = arith.constant 0 : index
    %35 = vector.load %arg8[%34, %c1_18, %c0_19] : memref<10x16x128xbf16, #tpu.memory_space<vmem>>, vector<4x8x128xbf16>
    %36 = vector.shape_cast %35 : vector<4x8x128xbf16> to vector<32x128xbf16>
    %c2_i32_20 = arith.constant 2 : i32
    %37 = arith.addi %4, %c2_i32_20 : i32
    %38 = arith.index_cast %37 : i32 to index
    %c2_21 = arith.constant 2 : index
    %c0_22 = arith.constant 0 : index
    %39 = vector.load %arg8[%38, %c2_21, %c0_22] : memref<10x16x128xbf16, #tpu.memory_space<vmem>>, vector<4x8x128xbf16>
    %40 = vector.shape_cast %39 : vector<4x8x128xbf16> to vector<32x128xbf16>
    %41 = tpu.concatenate %8, %12, %16, %20, %24, %28, %32, %36, %40 in 1 : vector<32x128xbf16>, vector<32x128xbf16>, vector<32x128xbf16>, vector<32x128xbf16>, vector<32x128xbf16>, vector<32x128xbf16>, vector<32x128xbf16>, vector<32x128xbf16>, vector<32x128xbf16> -> vector<32x1152xbf16>
    %c0_23 = arith.constant 0 : index
    %c0_24 = arith.constant 0 : index
    %42 = vector.load %arg3[%c0_23, %c0_24] : memref<1152x128xbf16, #tpu.memory_space<vmem>>, vector<1152x128xbf16>
    %cst = arith.constant dense<0.000000e+00> : vector<32x128xf32>
    %43 = tpu.matmul %41, %42, %cst {dimension_numbers = #tpu.dot_dimension_numbers<[1], [0], [0], [1], [0, 0, 1, 1], [], []>} : vector<32x1152xbf16>, vector<1152x128xbf16>, vector<32x128xf32> -> vector<32x128xf32>
    %c0_25 = arith.constant 0 : index
    %c0_26 = arith.constant 0 : index
    %44 = vector.load %arg4[%c0_25, %c0_26] : memref<1x128xf32, #tpu.memory_space<vmem>>, vector<1x128xf32>
    %45 = vector.broadcast %44 : vector<1x128xf32> to vector<32x128xf32>
    %46 = arith.addf %43, %45 : vector<32x128xf32>
    %cst_27 = arith.constant 0.000000e+00 : f32
    %47 = vector.broadcast %cst_27 : f32 to vector<32x128xf32>
    %48 = arith.maximumf %46, %47 : vector<32x128xf32>
    %49 = arith.truncf %48 : vector<32x128xf32> to vector<32x128xbf16>
    %c0_28 = arith.constant 0 : index
    %c0_29 = arith.constant 0 : index
    %50 = vector.load %arg5[%c0_28, %c0_29] : memref<128x128xbf16, #tpu.memory_space<vmem>>, vector<128x128xbf16>
    %cst_30 = arith.constant dense<0.000000e+00> : vector<32x128xf32>
    %51 = tpu.matmul %49, %50, %cst_30 {dimension_numbers = #tpu.dot_dimension_numbers<[1], [0], [0], [1], [0, 0, 1, 1], [], []>} : vector<32x128xbf16>, vector<128x128xbf16>, vector<32x128xf32> -> vector<32x128xf32>
    %c0_31 = arith.constant 0 : index
    %c0_32 = arith.constant 0 : index
    %52 = vector.load %arg6[%c0_31, %c0_32] : memref<1x128xf32, #tpu.memory_space<vmem>>, vector<1x128xf32>
    %53 = vector.broadcast %52 : vector<1x128xf32> to vector<32x128xf32>
    %54 = arith.addf %51, %53 : vector<32x128xf32>
    %c0_33 = arith.constant 0 : index
    %55 = arith.index_cast %4 : i32 to index
    %c0_34 = arith.constant 0 : index
    %c0_35 = arith.constant 0 : index
    %56 = vector.load %arg2[%c0_33, %55, %c0_34, %c0_35] : memref<1x8x8x128xbf16, #tpu.memory_space<vmem>>, vector<1x4x8x128xbf16>
    %57 = vector.shape_cast %56 : vector<1x4x8x128xbf16> to vector<4x8x128xbf16>
    %58 = vector.shape_cast %57 : vector<4x8x128xbf16> to vector<32x128xbf16>
    %59 = arith.extf %58 : vector<32x128xbf16> to vector<32x128xf32>
    %60 = arith.addf %59, %54 : vector<32x128xf32>
    %61 = vector.shape_cast %60 : vector<32x128xf32> to vector<4x8x128xf32>
    %62 = arith.truncf %61 : vector<4x8x128xf32> to vector<4x8x128xbf16>
    %c0_36 = arith.constant 0 : index
    %c0_37 = arith.constant 0 : index
    %c0_38 = arith.constant 0 : index
    %c0_39 = arith.constant 0 : index
    %63 = vector.load %arg7[%c0_36, %c0_37, %c0_38, %c0_39] : memref<1x4x8x128xbf16, #tpu.memory_space<vmem>>, vector<1x4x8x128xbf16>
    %64 = vector.shape_cast %63 : vector<1x4x8x128xbf16> to vector<4x8x128xbf16>
    %65 = vector.shape_cast %62 : vector<4x8x128xbf16> to vector<1x4x8x128xbf16>
    tpu.vector_store %arg7[%c0_36, %c0_37, %c0_38, %c0_39], %65 {strides = array<i32>} : memref<1x4x8x128xbf16, #tpu.memory_space<vmem>>, vector<1x4x8x128xbf16>,
    return
  }
  func.func @transform_0(%arg0: i32, %arg1: i32) -> (i32, i32, i32, i32) {
    %c0_i32 = arith.constant 0 : i32
    %c0_i32_0 = arith.constant 0 : i32
    %c0_i32_1 = arith.constant 0 : i32
    %c0_i32_2 = arith.constant 0 : i32
    return %arg0, %c0_i32, %c0_i32_0, %c0_i32_1 : i32, i32, i32, i32
  }
  func.func @transform_1(%arg0: i32, %arg1: i32) -> (i32, i32) {
    %c0_i32 = arith.constant 0 : i32
    %c0_i32_0 = arith.constant 0 : i32
    %c0_i32_1 = arith.constant 0 : i32
    return %c0_i32, %c0_i32_0 : i32, i32
  }
  func.func @transform_2(%arg0: i32, %arg1: i32) -> (i32, i32) {
    %c0_i32 = arith.constant 0 : i32
    %c0_i32_0 = arith.constant 0 : i32
    %c0_i32_1 = arith.constant 0 : i32
    return %c0_i32, %c0_i32_0 : i32, i32
  }
  func.func @transform_3(%arg0: i32, %arg1: i32) -> (i32, i32) {
    %c0_i32 = arith.constant 0 : i32
    %c0_i32_0 = arith.constant 0 : i32
    %c0_i32_1 = arith.constant 0 : i32
    return %c0_i32, %c0_i32_0 : i32, i32
  }
  func.func @transform_4(%arg0: i32, %arg1: i32) -> (i32, i32) {
    %c0_i32 = arith.constant 0 : i32
    %c0_i32_0 = arith.constant 0 : i32
    %c0_i32_1 = arith.constant 0 : i32
    return %c0_i32, %c0_i32_0 : i32, i32
  }
  func.func @transform_5(%arg0: i32, %arg1: i32) -> (i32, i32, i32, i32) {
    %c0_i32 = arith.constant 0 : i32
    %c0_i32_0 = arith.constant 0 : i32
    %c0_i32_1 = arith.constant 0 : i32
    return %arg0, %arg1, %c0_i32, %c0_i32_0 : i32, i32, i32, i32
  }
}

module attributes {stable_mosaic.version = 11 : i64} {
  func.func @kernel(%arg0: i32, %arg1: i32, %arg2: memref<1x8x8x128xbf16, #tpu.memory_space<vmem>>, %arg3: memref<2x2x512x128xbf16, #tpu.memory_space<vmem>>, %arg4: memref<1x128xf32, #tpu.memory_space<vmem>>, %arg5: memref<1x4x2x8x256xbf16, #tpu.memory_space<vmem>>, %arg6: memref<10x16x128xbf16, #tpu.memory_space<vmem>>) attributes {dimension_semantics = [#tpu.dimension_semantics<parallel>, #tpu.dimension_semantics<arbitrary>], iteration_bounds = array<i64: 2, 2>, scalar_prefetch = 0 : i64, scratch_operands = 1 : i64, tpu.core_type = #tpu.core_type<tc>, window_params = [{transform_indices = @transform_0, window_bounds = array<i64: 1, 8, 8, 128>}, {pipeline_mode = #tpu.pipeline_mode<synchronous>, transform_indices = @transform_1, window_bounds = array<i64: 2, 2, 512, 128>}, {pipeline_mode = #tpu.pipeline_mode<synchronous>, transform_indices = @transform_2, window_bounds = array<i64: 1, 128>}, {transform_indices = @transform_3, window_bounds = array<i64: 1, 4, 2, 8, 256>}]} {
    %c0_i32 = arith.constant 0 : i32
    %0 = arith.cmpi eq, %arg1, %c0_i32 : i32
    %1 = arith.extui %0 : i1 to i32
    %c0_i32_0 = arith.constant 0 : i32
    %2 = arith.cmpi ne, %1, %c0_i32_0 : i32
    scf.if %2 {
      %cst_54 = arith.constant 0.000000e+00 : bf16
      %80 = vector.broadcast %cst_54 : bf16 to vector<10x16x128xbf16>
      %c0_55 = arith.constant 0 : index
      %c0_56 = arith.constant 0 : index
      %c0_57 = arith.constant 0 : index
      %81 = vector.load %arg6[%c0_55, %c0_56, %c0_57] : memref<10x16x128xbf16, #tpu.memory_space<vmem>>, vector<10x16x128xbf16>
      tpu.vector_store %arg6[%c0_55, %c0_56, %c0_57], %80 {strides = array<i32>} : memref<10x16x128xbf16, #tpu.memory_space<vmem>>, vector<10x16x128xbf16>,
      %c0_58 = arith.constant 0 : index
      %c0_59 = arith.constant 0 : index
      %c0_60 = arith.constant 0 : index
      %c0_61 = arith.constant 0 : index
      %82 = vector.load %arg2[%c0_58, %c0_59, %c0_60, %c0_61] : memref<1x8x8x128xbf16, #tpu.memory_space<vmem>>, vector<1x8x8x128xbf16>
      %83 = vector.shape_cast %82 : vector<1x8x8x128xbf16> to vector<8x8x128xbf16>
      %c1_62 = arith.constant 1 : index
      %c1_63 = arith.constant 1 : index
      %c0_64 = arith.constant 0 : index
      %84 = vector.load %arg6[%c1_62, %c1_63, %c0_64] : memref<10x16x128xbf16, #tpu.memory_space<vmem>>, vector<8x8x128xbf16>
      tpu.vector_store %arg6[%c1_62, %c1_63, %c0_64], %83 {strides = array<i32>} : memref<10x16x128xbf16, #tpu.memory_space<vmem>>, vector<8x8x128xbf16>,
    } else {
    }
    %c4_i32 = arith.constant 4 : i32
    %3 = arith.muli %arg1, %c4_i32 : i32
    %4 = tpu.assume_multiple %3, 4 : i32
    %c0 = arith.constant 0 : index
    %c0_1 = arith.constant 0 : index
    %5 = vector.load %arg4[%c0, %c0_1] : memref<1x128xf32, #tpu.memory_space<vmem>>, vector<1x128xf32>
    %c0_i32_2 = arith.constant 0 : i32
    %6 = arith.addi %4, %c0_i32_2 : i32
    %7 = arith.index_cast %6 : i32 to index
    %c0_3 = arith.constant 0 : index
    %c0_4 = arith.constant 0 : index
    %8 = vector.load %arg6[%7, %c0_3, %c0_4] : memref<10x16x128xbf16, #tpu.memory_space<vmem>>, vector<4x8x128xbf16>
    %9 = vector.shape_cast %8 : vector<4x8x128xbf16> to vector<32x128xbf16>
    %c0_i32_5 = arith.constant 0 : i32
    %10 = arith.addi %4, %c0_i32_5 : i32
    %11 = arith.index_cast %10 : i32 to index
    %c1 = arith.constant 1 : index
    %c0_6 = arith.constant 0 : index
    %12 = vector.load %arg6[%11, %c1, %c0_6] : memref<10x16x128xbf16, #tpu.memory_space<vmem>>, vector<4x8x128xbf16>
    %13 = vector.shape_cast %12 : vector<4x8x128xbf16> to vector<32x128xbf16>
    %c0_i32_7 = arith.constant 0 : i32
    %14 = arith.addi %4, %c0_i32_7 : i32
    %15 = arith.index_cast %14 : i32 to index
    %c2 = arith.constant 2 : index
    %c0_8 = arith.constant 0 : index
    %16 = vector.load %arg6[%15, %c2, %c0_8] : memref<10x16x128xbf16, #tpu.memory_space<vmem>>, vector<4x8x128xbf16>
    %17 = vector.shape_cast %16 : vector<4x8x128xbf16> to vector<32x128xbf16>
    %c1_i32 = arith.constant 1 : i32
    %18 = arith.addi %4, %c1_i32 : i32
    %19 = arith.index_cast %18 : i32 to index
    %c0_9 = arith.constant 0 : index
    %c0_10 = arith.constant 0 : index
    %20 = vector.load %arg6[%19, %c0_9, %c0_10] : memref<10x16x128xbf16, #tpu.memory_space<vmem>>, vector<4x8x128xbf16>
    %21 = vector.shape_cast %20 : vector<4x8x128xbf16> to vector<32x128xbf16>
    %c1_i32_11 = arith.constant 1 : i32
    %22 = arith.addi %4, %c1_i32_11 : i32
    %23 = arith.index_cast %22 : i32 to index
    %c1_12 = arith.constant 1 : index
    %c0_13 = arith.constant 0 : index
    %24 = vector.load %arg6[%23, %c1_12, %c0_13] : memref<10x16x128xbf16, #tpu.memory_space<vmem>>, vector<4x8x128xbf16>
    %25 = vector.shape_cast %24 : vector<4x8x128xbf16> to vector<32x128xbf16>
    %c1_i32_14 = arith.constant 1 : i32
    %26 = arith.addi %4, %c1_i32_14 : i32
    %27 = arith.index_cast %26 : i32 to index
    %c2_15 = arith.constant 2 : index
    %c0_16 = arith.constant 0 : index
    %28 = vector.load %arg6[%27, %c2_15, %c0_16] : memref<10x16x128xbf16, #tpu.memory_space<vmem>>, vector<4x8x128xbf16>
    %29 = vector.shape_cast %28 : vector<4x8x128xbf16> to vector<32x128xbf16>
    %c2_i32 = arith.constant 2 : i32
    %30 = arith.addi %4, %c2_i32 : i32
    %31 = arith.index_cast %30 : i32 to index
    %c0_17 = arith.constant 0 : index
    %c0_18 = arith.constant 0 : index
    %32 = vector.load %arg6[%31, %c0_17, %c0_18] : memref<10x16x128xbf16, #tpu.memory_space<vmem>>, vector<4x8x128xbf16>
    %33 = vector.shape_cast %32 : vector<4x8x128xbf16> to vector<32x128xbf16>
    %c2_i32_19 = arith.constant 2 : i32
    %34 = arith.addi %4, %c2_i32_19 : i32
    %35 = arith.index_cast %34 : i32 to index
    %c1_20 = arith.constant 1 : index
    %c0_21 = arith.constant 0 : index
    %36 = vector.load %arg6[%35, %c1_20, %c0_21] : memref<10x16x128xbf16, #tpu.memory_space<vmem>>, vector<4x8x128xbf16>
    %37 = vector.shape_cast %36 : vector<4x8x128xbf16> to vector<32x128xbf16>
    %c2_i32_22 = arith.constant 2 : i32
    %38 = arith.addi %4, %c2_i32_22 : i32
    %39 = arith.index_cast %38 : i32 to index
    %c2_23 = arith.constant 2 : index
    %c0_24 = arith.constant 0 : index
    %40 = vector.load %arg6[%39, %c2_23, %c0_24] : memref<10x16x128xbf16, #tpu.memory_space<vmem>>, vector<4x8x128xbf16>
    %41 = vector.shape_cast %40 : vector<4x8x128xbf16> to vector<32x128xbf16>
    %42 = tpu.concatenate %9, %13, %21, %25 in 1 : vector<32x128xbf16>, vector<32x128xbf16>, vector<32x128xbf16>, vector<32x128xbf16> -> vector<32x512xbf16>
    %c0_25 = arith.constant 0 : index
    %c0_26 = arith.constant 0 : index
    %c0_27 = arith.constant 0 : index
    %c0_28 = arith.constant 0 : index
    %43 = vector.load %arg3[%c0_25, %c0_26, %c0_27, %c0_28] : memref<2x2x512x128xbf16, #tpu.memory_space<vmem>>, vector<1x1x512x128xbf16>
    %44 = vector.shape_cast %43 : vector<1x1x512x128xbf16> to vector<512x128xbf16>
    %cst = arith.constant dense<0.000000e+00> : vector<32x128xf32>
    %45 = tpu.matmul %42, %44, %cst {dimension_numbers = #tpu.dot_dimension_numbers<[1], [0], [0], [1], [0, 0, 1, 1], [], []>} : vector<32x512xbf16>, vector<512x128xbf16>, vector<32x128xf32> -> vector<32x128xf32>
    %46 = vector.broadcast %5 : vector<1x128xf32> to vector<32x128xf32>
    %47 = arith.addf %45, %46 : vector<32x128xf32>
    %48 = vector.shape_cast %47 : vector<32x128xf32> to vector<4x8x128xf32>
    %49 = tpu.concatenate %13, %17, %25, %29 in 1 : vector<32x128xbf16>, vector<32x128xbf16>, vector<32x128xbf16>, vector<32x128xbf16> -> vector<32x512xbf16>
    %c0_29 = arith.constant 0 : index
    %c1_30 = arith.constant 1 : index
    %c0_31 = arith.constant 0 : index
    %c0_32 = arith.constant 0 : index
    %50 = vector.load %arg3[%c0_29, %c1_30, %c0_31, %c0_32] : memref<2x2x512x128xbf16, #tpu.memory_space<vmem>>, vector<1x1x512x128xbf16>
    %51 = vector.shape_cast %50 : vector<1x1x512x128xbf16> to vector<512x128xbf16>
    %cst_33 = arith.constant dense<0.000000e+00> : vector<32x128xf32>
    %52 = tpu.matmul %49, %51, %cst_33 {dimension_numbers = #tpu.dot_dimension_numbers<[1], [0], [0], [1], [0, 0, 1, 1], [], []>} : vector<32x512xbf16>, vector<512x128xbf16>, vector<32x128xf32> -> vector<32x128xf32>
    %53 = vector.broadcast %5 : vector<1x128xf32> to vector<32x128xf32>
    %54 = arith.addf %52, %53 : vector<32x128xf32>
    %55 = vector.shape_cast %54 : vector<32x128xf32> to vector<4x8x128xf32>
    %56 = tpu.concatenate %48, %55 in 2 : vector<4x8x128xf32>, vector<4x8x128xf32> -> vector<4x8x256xf32>
    %57 = arith.truncf %56 : vector<4x8x256xf32> to vector<4x8x256xbf16>
    %c0_34 = arith.constant 0 : index
    %c0_35 = arith.constant 0 : index
    %c0_36 = arith.constant 0 : index
    %c0_37 = arith.constant 0 : index
    %c0_38 = arith.constant 0 : index
    %58 = vector.load %arg5[%c0_34, %c0_35, %c0_36, %c0_37, %c0_38] : memref<1x4x2x8x256xbf16, #tpu.memory_space<vmem>>, vector<1x4x1x8x256xbf16>
    %59 = vector.shape_cast %58 : vector<1x4x1x8x256xbf16> to vector<4x8x256xbf16>
    %60 = vector.shape_cast %57 : vector<4x8x256xbf16> to vector<1x4x1x8x256xbf16>
    tpu.vector_store %arg5[%c0_34, %c0_35, %c0_36, %c0_37, %c0_38], %60 {strides = array<i32>} : memref<1x4x2x8x256xbf16, #tpu.memory_space<vmem>>, vector<1x4x1x8x256xbf16>,
    %61 = tpu.concatenate %21, %25, %33, %37 in 1 : vector<32x128xbf16>, vector<32x128xbf16>, vector<32x128xbf16>, vector<32x128xbf16> -> vector<32x512xbf16>
    %c1_39 = arith.constant 1 : index
    %c0_40 = arith.constant 0 : index
    %c0_41 = arith.constant 0 : index
    %c0_42 = arith.constant 0 : index
    %62 = vector.load %arg3[%c1_39, %c0_40, %c0_41, %c0_42] : memref<2x2x512x128xbf16, #tpu.memory_space<vmem>>, vector<1x1x512x128xbf16>
    %63 = vector.shape_cast %62 : vector<1x1x512x128xbf16> to vector<512x128xbf16>
    %cst_43 = arith.constant dense<0.000000e+00> : vector<32x128xf32>
    %64 = tpu.matmul %61, %63, %cst_43 {dimension_numbers = #tpu.dot_dimension_numbers<[1], [0], [0], [1], [0, 0, 1, 1], [], []>} : vector<32x512xbf16>, vector<512x128xbf16>, vector<32x128xf32> -> vector<32x128xf32>
    %65 = vector.broadcast %5 : vector<1x128xf32> to vector<32x128xf32>
    %66 = arith.addf %64, %65 : vector<32x128xf32>
    %67 = vector.shape_cast %66 : vector<32x128xf32> to vector<4x8x128xf32>
    %68 = tpu.concatenate %25, %29, %37, %41 in 1 : vector<32x128xbf16>, vector<32x128xbf16>, vector<32x128xbf16>, vector<32x128xbf16> -> vector<32x512xbf16>
    %c1_44 = arith.constant 1 : index
    %c1_45 = arith.constant 1 : index
    %c0_46 = arith.constant 0 : index
    %c0_47 = arith.constant 0 : index
    %69 = vector.load %arg3[%c1_44, %c1_45, %c0_46, %c0_47] : memref<2x2x512x128xbf16, #tpu.memory_space<vmem>>, vector<1x1x512x128xbf16>
    %70 = vector.shape_cast %69 : vector<1x1x512x128xbf16> to vector<512x128xbf16>
    %cst_48 = arith.constant dense<0.000000e+00> : vector<32x128xf32>
    %71 = tpu.matmul %68, %70, %cst_48 {dimension_numbers = #tpu.dot_dimension_numbers<[1], [0], [0], [1], [0, 0, 1, 1], [], []>} : vector<32x512xbf16>, vector<512x128xbf16>, vector<32x128xf32> -> vector<32x128xf32>
    %72 = vector.broadcast %5 : vector<1x128xf32> to vector<32x128xf32>
    %73 = arith.addf %71, %72 : vector<32x128xf32>
    %74 = vector.shape_cast %73 : vector<32x128xf32> to vector<4x8x128xf32>
    %75 = tpu.concatenate %67, %74 in 2 : vector<4x8x128xf32>, vector<4x8x128xf32> -> vector<4x8x256xf32>
    %76 = arith.truncf %75 : vector<4x8x256xf32> to vector<4x8x256xbf16>
    %c0_49 = arith.constant 0 : index
    %c0_50 = arith.constant 0 : index
    %c1_51 = arith.constant 1 : index
    %c0_52 = arith.constant 0 : index
    %c0_53 = arith.constant 0 : index
    %77 = vector.load %arg5[%c0_49, %c0_50, %c1_51, %c0_52, %c0_53] : memref<1x4x2x8x256xbf16, #tpu.memory_space<vmem>>, vector<1x4x1x8x256xbf16>
    %78 = vector.shape_cast %77 : vector<1x4x1x8x256xbf16> to vector<4x8x256xbf16>
    %79 = vector.shape_cast %76 : vector<4x8x256xbf16> to vector<1x4x1x8x256xbf16>
    tpu.vector_store %arg5[%c0_49, %c0_50, %c1_51, %c0_52, %c0_53], %79 {strides = array<i32>} : memref<1x4x2x8x256xbf16, #tpu.memory_space<vmem>>, vector<1x4x1x8x256xbf16>,
    return
  }
  func.func @transform_0(%arg0: i32, %arg1: i32) -> (i32, i32, i32, i32) {
    %c0_i32 = arith.constant 0 : i32
    %c0_i32_0 = arith.constant 0 : i32
    %c0_i32_1 = arith.constant 0 : i32
    %c0_i32_2 = arith.constant 0 : i32
    return %arg0, %c0_i32, %c0_i32_0, %c0_i32_1 : i32, i32, i32, i32
  }
  func.func @transform_1(%arg0: i32, %arg1: i32) -> (i32, i32, i32, i32) {
    %c0_i32 = arith.constant 0 : i32
    %c0_i32_0 = arith.constant 0 : i32
    %c0_i32_1 = arith.constant 0 : i32
    %c0_i32_2 = arith.constant 0 : i32
    %c0_i32_3 = arith.constant 0 : i32
    return %c0_i32, %c0_i32_0, %c0_i32_1, %c0_i32_2 : i32, i32, i32, i32
  }
  func.func @transform_2(%arg0: i32, %arg1: i32) -> (i32, i32) {
    %c0_i32 = arith.constant 0 : i32
    %c0_i32_0 = arith.constant 0 : i32
    %c0_i32_1 = arith.constant 0 : i32
    return %c0_i32, %c0_i32_0 : i32, i32
  }
  func.func @transform_3(%arg0: i32, %arg1: i32) -> (i32, i32, i32, i32, i32) {
    %c0_i32 = arith.constant 0 : i32
    %c0_i32_0 = arith.constant 0 : i32
    %c0_i32_1 = arith.constant 0 : i32
    %c0_i32_2 = arith.constant 0 : i32
    return %arg0, %arg1, %c0_i32, %c0_i32_0, %c0_i32_1 : i32, i32, i32, i32, i32
  }
}

module attributes {stable_mosaic.version = 11 : i64} {
  func.func @kernel(%arg0: i32, %arg1: i32, %arg2: memref<1x16x16x128xbf16, #tpu.memory_space<vmem>>, %arg3: memref<2x2x512x64xbf16, #tpu.memory_space<vmem>>, %arg4: memref<1x64xf32, #tpu.memory_space<vmem>>, %arg5: memref<1x4x2x16x128xbf16, #tpu.memory_space<vmem>>, %arg6: memref<18x24x128xbf16, #tpu.memory_space<vmem>>) attributes {dimension_semantics = [#tpu.dimension_semantics<parallel>, #tpu.dimension_semantics<arbitrary>], iteration_bounds = array<i64: 2, 4>, scalar_prefetch = 0 : i64, scratch_operands = 1 : i64, tpu.core_type = #tpu.core_type<tc>, window_params = [{transform_indices = @transform_0, window_bounds = array<i64: 1, 16, 16, 128>}, {pipeline_mode = #tpu.pipeline_mode<synchronous>, transform_indices = @transform_1, window_bounds = array<i64: 2, 2, 512, 64>}, {pipeline_mode = #tpu.pipeline_mode<synchronous>, transform_indices = @transform_2, window_bounds = array<i64: 1, 64>}, {transform_indices = @transform_3, window_bounds = array<i64: 1, 4, 2, 16, 128>}]} {
    %c0_i32 = arith.constant 0 : i32
    %0 = arith.cmpi eq, %arg1, %c0_i32 : i32
    %1 = arith.extui %0 : i1 to i32
    %c0_i32_0 = arith.constant 0 : i32
    %2 = arith.cmpi ne, %1, %c0_i32_0 : i32
    scf.if %2 {
      %cst_54 = arith.constant 0.000000e+00 : bf16
      %80 = vector.broadcast %cst_54 : bf16 to vector<18x24x128xbf16>
      %c0_55 = arith.constant 0 : index
      %c0_56 = arith.constant 0 : index
      %c0_57 = arith.constant 0 : index
      %81 = vector.load %arg6[%c0_55, %c0_56, %c0_57] : memref<18x24x128xbf16, #tpu.memory_space<vmem>>, vector<18x24x128xbf16>
      tpu.vector_store %arg6[%c0_55, %c0_56, %c0_57], %80 {strides = array<i32>} : memref<18x24x128xbf16, #tpu.memory_space<vmem>>, vector<18x24x128xbf16>,
      %c0_58 = arith.constant 0 : index
      %c0_59 = arith.constant 0 : index
      %c0_60 = arith.constant 0 : index
      %c0_61 = arith.constant 0 : index
      %82 = vector.load %arg2[%c0_58, %c0_59, %c0_60, %c0_61] : memref<1x16x16x128xbf16, #tpu.memory_space<vmem>>, vector<1x16x16x128xbf16>
      %83 = vector.shape_cast %82 : vector<1x16x16x128xbf16> to vector<16x16x128xbf16>
      %cst_62 = arith.constant 0.000000e+00 : bf16
      %84 = vector.broadcast %cst_62 : bf16 to vector<16x16x128xbf16>
      %85 = arith.maximumf %83, %84 : vector<16x16x128xbf16>
      %c1_63 = arith.constant 1 : index
      %c1_64 = arith.constant 1 : index
      %c0_65 = arith.constant 0 : index
      %86 = vector.load %arg6[%c1_63, %c1_64, %c0_65] : memref<18x24x128xbf16, #tpu.memory_space<vmem>>, vector<16x16x128xbf16>
      tpu.vector_store %arg6[%c1_63, %c1_64, %c0_65], %85 {strides = array<i32>} : memref<18x24x128xbf16, #tpu.memory_space<vmem>>, vector<16x16x128xbf16>,
    } else {
    }
    %c4_i32 = arith.constant 4 : i32
    %3 = arith.muli %arg1, %c4_i32 : i32
    %4 = tpu.assume_multiple %3, 4 : i32
    %c0 = arith.constant 0 : index
    %c0_1 = arith.constant 0 : index
    %5 = vector.load %arg4[%c0, %c0_1] : memref<1x64xf32, #tpu.memory_space<vmem>>, vector<1x64xf32>
    %c0_i32_2 = arith.constant 0 : i32
    %6 = arith.addi %4, %c0_i32_2 : i32
    %7 = arith.index_cast %6 : i32 to index
    %c0_3 = arith.constant 0 : index
    %c0_4 = arith.constant 0 : index
    %8 = vector.load %arg6[%7, %c0_3, %c0_4] : memref<18x24x128xbf16, #tpu.memory_space<vmem>>, vector<4x16x128xbf16>
    %9 = vector.shape_cast %8 : vector<4x16x128xbf16> to vector<64x128xbf16>
    %c0_i32_5 = arith.constant 0 : i32
    %10 = arith.addi %4, %c0_i32_5 : i32
    %11 = arith.index_cast %10 : i32 to index
    %c1 = arith.constant 1 : index
    %c0_6 = arith.constant 0 : index
    %12 = vector.load %arg6[%11, %c1, %c0_6] : memref<18x24x128xbf16, #tpu.memory_space<vmem>>, vector<4x16x128xbf16>
    %13 = vector.shape_cast %12 : vector<4x16x128xbf16> to vector<64x128xbf16>
    %c0_i32_7 = arith.constant 0 : i32
    %14 = arith.addi %4, %c0_i32_7 : i32
    %15 = arith.index_cast %14 : i32 to index
    %c2 = arith.constant 2 : index
    %c0_8 = arith.constant 0 : index
    %16 = vector.load %arg6[%15, %c2, %c0_8] : memref<18x24x128xbf16, #tpu.memory_space<vmem>>, vector<4x16x128xbf16>
    %17 = vector.shape_cast %16 : vector<4x16x128xbf16> to vector<64x128xbf16>
    %c1_i32 = arith.constant 1 : i32
    %18 = arith.addi %4, %c1_i32 : i32
    %19 = arith.index_cast %18 : i32 to index
    %c0_9 = arith.constant 0 : index
    %c0_10 = arith.constant 0 : index
    %20 = vector.load %arg6[%19, %c0_9, %c0_10] : memref<18x24x128xbf16, #tpu.memory_space<vmem>>, vector<4x16x128xbf16>
    %21 = vector.shape_cast %20 : vector<4x16x128xbf16> to vector<64x128xbf16>
    %c1_i32_11 = arith.constant 1 : i32
    %22 = arith.addi %4, %c1_i32_11 : i32
    %23 = arith.index_cast %22 : i32 to index
    %c1_12 = arith.constant 1 : index
    %c0_13 = arith.constant 0 : index
    %24 = vector.load %arg6[%23, %c1_12, %c0_13] : memref<18x24x128xbf16, #tpu.memory_space<vmem>>, vector<4x16x128xbf16>
    %25 = vector.shape_cast %24 : vector<4x16x128xbf16> to vector<64x128xbf16>
    %c1_i32_14 = arith.constant 1 : i32
    %26 = arith.addi %4, %c1_i32_14 : i32
    %27 = arith.index_cast %26 : i32 to index
    %c2_15 = arith.constant 2 : index
    %c0_16 = arith.constant 0 : index
    %28 = vector.load %arg6[%27, %c2_15, %c0_16] : memref<18x24x128xbf16, #tpu.memory_space<vmem>>, vector<4x16x128xbf16>
    %29 = vector.shape_cast %28 : vector<4x16x128xbf16> to vector<64x128xbf16>
    %c2_i32 = arith.constant 2 : i32
    %30 = arith.addi %4, %c2_i32 : i32
    %31 = arith.index_cast %30 : i32 to index
    %c0_17 = arith.constant 0 : index
    %c0_18 = arith.constant 0 : index
    %32 = vector.load %arg6[%31, %c0_17, %c0_18] : memref<18x24x128xbf16, #tpu.memory_space<vmem>>, vector<4x16x128xbf16>
    %33 = vector.shape_cast %32 : vector<4x16x128xbf16> to vector<64x128xbf16>
    %c2_i32_19 = arith.constant 2 : i32
    %34 = arith.addi %4, %c2_i32_19 : i32
    %35 = arith.index_cast %34 : i32 to index
    %c1_20 = arith.constant 1 : index
    %c0_21 = arith.constant 0 : index
    %36 = vector.load %arg6[%35, %c1_20, %c0_21] : memref<18x24x128xbf16, #tpu.memory_space<vmem>>, vector<4x16x128xbf16>
    %37 = vector.shape_cast %36 : vector<4x16x128xbf16> to vector<64x128xbf16>
    %c2_i32_22 = arith.constant 2 : i32
    %38 = arith.addi %4, %c2_i32_22 : i32
    %39 = arith.index_cast %38 : i32 to index
    %c2_23 = arith.constant 2 : index
    %c0_24 = arith.constant 0 : index
    %40 = vector.load %arg6[%39, %c2_23, %c0_24] : memref<18x24x128xbf16, #tpu.memory_space<vmem>>, vector<4x16x128xbf16>
    %41 = vector.shape_cast %40 : vector<4x16x128xbf16> to vector<64x128xbf16>
    %42 = tpu.concatenate %9, %13, %21, %25 in 1 : vector<64x128xbf16>, vector<64x128xbf16>, vector<64x128xbf16>, vector<64x128xbf16> -> vector<64x512xbf16>
    %c0_25 = arith.constant 0 : index
    %c0_26 = arith.constant 0 : index
    %c0_27 = arith.constant 0 : index
    %c0_28 = arith.constant 0 : index
    %43 = vector.load %arg3[%c0_25, %c0_26, %c0_27, %c0_28] : memref<2x2x512x64xbf16, #tpu.memory_space<vmem>>, vector<1x1x512x64xbf16>
    %44 = vector.shape_cast %43 : vector<1x1x512x64xbf16> to vector<512x64xbf16>
    %cst = arith.constant dense<0.000000e+00> : vector<64x64xf32>
    %45 = tpu.matmul %42, %44, %cst {dimension_numbers = #tpu.dot_dimension_numbers<[1], [0], [0], [1], [0, 0, 1, 1], [], []>} : vector<64x512xbf16>, vector<512x64xbf16>, vector<64x64xf32> -> vector<64x64xf32>
    %46 = vector.broadcast %5 : vector<1x64xf32> to vector<64x64xf32>
    %47 = arith.addf %45, %46 : vector<64x64xf32>
    %48 = vector.shape_cast %47 : vector<64x64xf32> to vector<4x16x64xf32>
    %49 = tpu.concatenate %13, %17, %25, %29 in 1 : vector<64x128xbf16>, vector<64x128xbf16>, vector<64x128xbf16>, vector<64x128xbf16> -> vector<64x512xbf16>
    %c0_29 = arith.constant 0 : index
    %c1_30 = arith.constant 1 : index
    %c0_31 = arith.constant 0 : index
    %c0_32 = arith.constant 0 : index
    %50 = vector.load %arg3[%c0_29, %c1_30, %c0_31, %c0_32] : memref<2x2x512x64xbf16, #tpu.memory_space<vmem>>, vector<1x1x512x64xbf16>
    %51 = vector.shape_cast %50 : vector<1x1x512x64xbf16> to vector<512x64xbf16>
    %cst_33 = arith.constant dense<0.000000e+00> : vector<64x64xf32>
    %52 = tpu.matmul %49, %51, %cst_33 {dimension_numbers = #tpu.dot_dimension_numbers<[1], [0], [0], [1], [0, 0, 1, 1], [], []>} : vector<64x512xbf16>, vector<512x64xbf16>, vector<64x64xf32> -> vector<64x64xf32>
    %53 = vector.broadcast %5 : vector<1x64xf32> to vector<64x64xf32>
    %54 = arith.addf %52, %53 : vector<64x64xf32>
    %55 = vector.shape_cast %54 : vector<64x64xf32> to vector<4x16x64xf32>
    %56 = tpu.concatenate %48, %55 in 2 : vector<4x16x64xf32>, vector<4x16x64xf32> -> vector<4x16x128xf32>
    %57 = arith.truncf %56 : vector<4x16x128xf32> to vector<4x16x128xbf16>
    %c0_34 = arith.constant 0 : index
    %c0_35 = arith.constant 0 : index
    %c0_36 = arith.constant 0 : index
    %c0_37 = arith.constant 0 : index
    %c0_38 = arith.constant 0 : index
    %58 = vector.load %arg5[%c0_34, %c0_35, %c0_36, %c0_37, %c0_38] : memref<1x4x2x16x128xbf16, #tpu.memory_space<vmem>>, vector<1x4x1x16x128xbf16>
    %59 = vector.shape_cast %58 : vector<1x4x1x16x128xbf16> to vector<4x16x128xbf16>
    %60 = vector.shape_cast %57 : vector<4x16x128xbf16> to vector<1x4x1x16x128xbf16>
    tpu.vector_store %arg5[%c0_34, %c0_35, %c0_36, %c0_37, %c0_38], %60 {strides = array<i32>} : memref<1x4x2x16x128xbf16, #tpu.memory_space<vmem>>, vector<1x4x1x16x128xbf16>,
    %61 = tpu.concatenate %21, %25, %33, %37 in 1 : vector<64x128xbf16>, vector<64x128xbf16>, vector<64x128xbf16>, vector<64x128xbf16> -> vector<64x512xbf16>
    %c1_39 = arith.constant 1 : index
    %c0_40 = arith.constant 0 : index
    %c0_41 = arith.constant 0 : index
    %c0_42 = arith.constant 0 : index
    %62 = vector.load %arg3[%c1_39, %c0_40, %c0_41, %c0_42] : memref<2x2x512x64xbf16, #tpu.memory_space<vmem>>, vector<1x1x512x64xbf16>
    %63 = vector.shape_cast %62 : vector<1x1x512x64xbf16> to vector<512x64xbf16>
    %cst_43 = arith.constant dense<0.000000e+00> : vector<64x64xf32>
    %64 = tpu.matmul %61, %63, %cst_43 {dimension_numbers = #tpu.dot_dimension_numbers<[1], [0], [0], [1], [0, 0, 1, 1], [], []>} : vector<64x512xbf16>, vector<512x64xbf16>, vector<64x64xf32> -> vector<64x64xf32>
    %65 = vector.broadcast %5 : vector<1x64xf32> to vector<64x64xf32>
    %66 = arith.addf %64, %65 : vector<64x64xf32>
    %67 = vector.shape_cast %66 : vector<64x64xf32> to vector<4x16x64xf32>
    %68 = tpu.concatenate %25, %29, %37, %41 in 1 : vector<64x128xbf16>, vector<64x128xbf16>, vector<64x128xbf16>, vector<64x128xbf16> -> vector<64x512xbf16>
    %c1_44 = arith.constant 1 : index
    %c1_45 = arith.constant 1 : index
    %c0_46 = arith.constant 0 : index
    %c0_47 = arith.constant 0 : index
    %69 = vector.load %arg3[%c1_44, %c1_45, %c0_46, %c0_47] : memref<2x2x512x64xbf16, #tpu.memory_space<vmem>>, vector<1x1x512x64xbf16>
    %70 = vector.shape_cast %69 : vector<1x1x512x64xbf16> to vector<512x64xbf16>
    %cst_48 = arith.constant dense<0.000000e+00> : vector<64x64xf32>
    %71 = tpu.matmul %68, %70, %cst_48 {dimension_numbers = #tpu.dot_dimension_numbers<[1], [0], [0], [1], [0, 0, 1, 1], [], []>} : vector<64x512xbf16>, vector<512x64xbf16>, vector<64x64xf32> -> vector<64x64xf32>
    %72 = vector.broadcast %5 : vector<1x64xf32> to vector<64x64xf32>
    %73 = arith.addf %71, %72 : vector<64x64xf32>
    %74 = vector.shape_cast %73 : vector<64x64xf32> to vector<4x16x64xf32>
    %75 = tpu.concatenate %67, %74 in 2 : vector<4x16x64xf32>, vector<4x16x64xf32> -> vector<4x16x128xf32>
    %76 = arith.truncf %75 : vector<4x16x128xf32> to vector<4x16x128xbf16>
    %c0_49 = arith.constant 0 : index
    %c0_50 = arith.constant 0 : index
    %c1_51 = arith.constant 1 : index
    %c0_52 = arith.constant 0 : index
    %c0_53 = arith.constant 0 : index
    %77 = vector.load %arg5[%c0_49, %c0_50, %c1_51, %c0_52, %c0_53] : memref<1x4x2x16x128xbf16, #tpu.memory_space<vmem>>, vector<1x4x1x16x128xbf16>
    %78 = vector.shape_cast %77 : vector<1x4x1x16x128xbf16> to vector<4x16x128xbf16>
    %79 = vector.shape_cast %76 : vector<4x16x128xbf16> to vector<1x4x1x16x128xbf16>
    tpu.vector_store %arg5[%c0_49, %c0_50, %c1_51, %c0_52, %c0_53], %79 {strides = array<i32>} : memref<1x4x2x16x128xbf16, #tpu.memory_space<vmem>>, vector<1x4x1x16x128xbf16>,
    return
  }
  func.func @transform_0(%arg0: i32, %arg1: i32) -> (i32, i32, i32, i32) {
    %c0_i32 = arith.constant 0 : i32
    %c0_i32_0 = arith.constant 0 : i32
    %c0_i32_1 = arith.constant 0 : i32
    %c0_i32_2 = arith.constant 0 : i32
    return %arg0, %c0_i32, %c0_i32_0, %c0_i32_1 : i32, i32, i32, i32
  }
  func.func @transform_1(%arg0: i32, %arg1: i32) -> (i32, i32, i32, i32) {
    %c0_i32 = arith.constant 0 : i32
    %c0_i32_0 = arith.constant 0 : i32
    %c0_i32_1 = arith.constant 0 : i32
    %c0_i32_2 = arith.constant 0 : i32
    %c0_i32_3 = arith.constant 0 : i32
    return %c0_i32, %c0_i32_0, %c0_i32_1, %c0_i32_2 : i32, i32, i32, i32
  }
  func.func @transform_2(%arg0: i32, %arg1: i32) -> (i32, i32) {
    %c0_i32 = arith.constant 0 : i32
    %c0_i32_0 = arith.constant 0 : i32
    %c0_i32_1 = arith.constant 0 : i32
    return %c0_i32, %c0_i32_0 : i32, i32
  }
  func.func @transform_3(%arg0: i32, %arg1: i32) -> (i32, i32, i32, i32, i32) {
    %c0_i32 = arith.constant 0 : i32
    %c0_i32_0 = arith.constant 0 : i32
    %c0_i32_1 = arith.constant 0 : i32
    %c0_i32_2 = arith.constant 0 : i32
    return %arg0, %arg1, %c0_i32, %c0_i32_0, %c0_i32_1 : i32, i32, i32, i32, i32
  }
}

</mosaic_0001>

<bundles_post_ra>
// kernel: decoder_forward.4
= control target key start
LH: loop header
LB: loop body
LE: loop exit
PB: predicated region body
PF: predicated region fallthrough
CT: control target
= control target key end

     0   :  { %10 = vsyncpa [#allocation4], 0  ;;  %s3045_s0 = inlined_call_operand.vmem [shape: bf16[2,8,8,128], index: 0, kind: input, shape index: {}]   ;;  %s3046_s1 = inlined_call_operand.hbm [shape: bf16[1152,128], index: 1, kind: input, shape index: {}]   ;;  %s3047_s2 = inlined_call_operand.hbm [shape: f32[1,128], index: 2, kind: input, shape index: {}]   ;;  %s3048_s3 = inlined_call_operand.hbm [shape: bf16[128,128], index: 3, kind: input, shape index: {}]   ;;  %s3049_s4 = inlined_call_operand.hbm [shape: f32[1,128], index: 4, kind: input, shape index: {}]   ;;  %s3050_s5 = inlined_call_operand.vmem [shape: bf16[2,8,8,128], index: 5, kind: output, shape index: {}]  }
   0x1   :  { %11 = vsyncpa [#allocation6], 0 }
   0x2   :  { %12 = vsyncpa [#allocation9], 0  ;;  %s2696_s18 = smov 0   ;;  %s2698_s19 = smov 0  }
   0x3   :  { %s2700_s20 = smov 0   ;;  %s2702_s21 = smov 0  }
   0x4   :  { %s2704_s22 = smov 0  }
   0x5 LB: > { %s2659_s23 = smov [#allocation5]   ;;  %s1970_s25 = sadd.s32 4294967295, %s2657_s22   ;;  %s2657_s22 = sphi %s2704_s22, %s18_s22   ;;  %s2653_s21 = sphi %s2702_s21, %s3066_s21   ;;  %s2649_s20 = sphi %s2700_s20, %s3065_s20   ;;  %s2645_s19 = sphi %s2698_s19, %s3064_s19   ;;  %s2641_s18 = sphi %s2696_s18, %s3063_s18  }
   0x6   : > { %s199_s24 = sshll.u32 %s2659_s23, 4  ;;  %p1972_p0 = scmp.ge.s32.totalorder %s2657_s22, 1  ;;  %s200_s24 = int_to_ptr.vmem [resolvable:$true] %s199_s24 }
   0x7   : > { %p173_p1 = scmp.lt.s32.totalorder %s2657_s22, 5  ;;  %p2724_p2 = scmp.eq.s32.totalorder %s1970_s25, 0 }
   0x8   : > { %s27_s29 = sadd.s32 1, %s2649_s20  ;;  %s2514_s6 = scalar_lea.vmem %s200_s24, 16 }
   0x9   : > { %p2728_p3 = pnand %p1972_p0, %p173_p1  ;;  %p2741_p6 = scmp.ge.s32.totalorder %s27_s29, 2 }
   0xa   : > { %p2515_p8 = scmp.ne.s32.totalorder %s200_s24, %s2514_s6  ;;  %s2521_s7 = scalar_lea.vmem %s200_s24, 32 }
   0xb   : > { %p2349_p4 = pneg %p2728_p3  ;;  %p2522_p11 = scmp.lt.s32.totalorder %s200_s24, %s200_s24 }
   0xc   : > { %p2523_p12 = scmp.lt.s32.totalorder %s2521_s7, %s2514_s6 }
   0xd   : > { %p2736_p5 = pnand %p2724_p2, %p2349_p4 }
   0xe   : > { %p2524_p13 = por %p2523_p12, %p2522_p11 }
   0xf   : > { %p2505_p7 = pneg %p2736_p5 }
  0x11   : > { %p2517_p9 = pnand %p2515_p8, %p2505_p7 }
  0x13   : > { %p2518_p10 = pneg %p2517_p9 }
  0x15   : > { %p2525_p0 = pnand %p2524_p13, %p2518_p10 }
  0x17   : > { %2528 = shalt.err (!%p2525_p0)
}
  0x18   : > { %2355 = dma.hbm_to_vmem [thread:$0]  (!%p2736_p5), %s3047_s2, 16, %s200_s24, [#allocation6]  }
  0x19   : > { %s3068_s29 = smov (%p2741_p6, %s27_s29), 0  ;;  %s30_s10 = sadd.s32 1, %s2653_s21 }
  0x1a   : > { %s3070_s10 = smov (!%p2741_p6, %s30_s10), %s2653_s21  ;;  %s2660_s11 = smov [#allocation3]  }
  0x1b   : > { %s185_s12 = sshll.u32 %s2660_s11, 4  ;;  %p32_p1 = scmp.ge.s32.totalorder %s3070_s10, 2  ;;  %s186_s12 = int_to_ptr.vmem [resolvable:$true] %s185_s12 }
  0x1c   : > { %s2540_s13 = scalar_lea.vmem %s186_s12, 9216  ;;  %p2548_p10 = scmp.lt.s32.totalorder %s186_s12, %s186_s12 }
  0x1d   : > { %s3072_s10 = smov (%p32_p1, %s3070_s10), 0  ;;  %p2541_p4 = scmp.ne.s32.totalorder %s186_s12, %s2540_s13 }
  0x1e   : > { %p2549_p11 = scmp.lt.s32.totalorder %s2540_s13, %s2540_s13 }
  0x1f   : > { %p2543_p8 = pnand %p2541_p4, %p2505_p7 }
  0x20   : > { %p2550_p12 = por %p2549_p11, %p2548_p10 }
  0x21   : > { %p2544_p9 = pneg %p2543_p8 }
  0x23   : > { %p2551_p13 = pnand %p2550_p12, %p2544_p9 }
  0x25   : > { %2554 = shalt.err (!%p2551_p13)
}
  0x26   : > { %s2661_s14 = smov 64   ;;  %s2662_s15 = smov 4  }
  0x27   : > { %2352 = dma.hbm_to_vmem [thread:$0]  (!%p2736_p5), %s3046_s1, 9216, %s186_s12, [#allocation4], %s2661_s14, %s2661_s14, %s2662_s15  }
  0x28   : > { %s2663_s23 = smov [#allocation7]   ;;  %s2664_s25 = smov [#allocation8]  }
  0x29   : > { %s209_s24 = sshll.u32 %s2663_s23, 4  ;;  %s223_s30 = sshll.u32 %s2664_s25, 4  ;;  %s210_s24 = int_to_ptr.vmem [resolvable:$true] %s209_s24  ;;  %s224_s30 = int_to_ptr.vmem [resolvable:$true] %s223_s30 }
  0x2a   : > { %s2566_s6 = scalar_lea.vmem %s210_s24, 1024  ;;  %p2574_p4 = scmp.lt.s32.totalorder %s210_s24, %s210_s24 }
  0x2b   : > { %p2567_p6 = scmp.ne.s32.totalorder %s210_s24, %s2566_s6  ;;  %p2575_p8 = scmp.lt.s32.totalorder %s2566_s6, %s2566_s6 }
  0x2d   : > { %p2569_p0 = pnand %p2567_p6, %p2505_p7  ;;  %p2576_p9 = por %p2575_p8, %p2574_p4 }
  0x2f   : > { %p2570_p1 = pneg %p2569_p0 }
  0x31   : > { %p2577_p10 = pnand %p2576_p9, %p2570_p1 }
  0x33   : > { %2580 = shalt.err (!%p2577_p10)
}
  0x34   : > { %2358 = dma.hbm_to_vmem [thread:$0]  (!%p2736_p5), %s3048_s3, 1024, %s210_s24, [#allocation6], %s2661_s14, %s2661_s14, %s2662_s15  }
  0x35   : > { %s2592_s9 = scalar_lea.vmem %s224_s30, 16  ;;  %s2599_s11 = scalar_lea.vmem %s224_s30, 32 }
  0x36   : > { %p2593_p11 = scmp.ne.s32.totalorder %s224_s30, %s2592_s9  ;;  %p2600_p6 = scmp.lt.s32.totalorder %s224_s30, %s224_s30 }
  0x37   : > { %p2601_p0 = scmp.lt.s32.totalorder %s2599_s11, %s2592_s9 }
  0x38   : > { %p2595_p12 = pnand %p2593_p11, %p2505_p7 }
  0x39   : > { %p2602_p4 = por %p2601_p0, %p2600_p6 }
  0x3a   : > { %p2596_p13 = pneg %p2595_p12 }
  0x3c   : > { %p2603_p1 = pnand %p2602_p4, %p2596_p13 }
  0x3e   : > { %2606 = shalt.err (!%p2603_p1)
}
  0x3f   : > { %2361 = dma.hbm_to_vmem [thread:$0]  (!%p2736_p5), %s3049_s4, 16, %s224_s30, [#allocation9]  }
  0x40   : > { %244 = sbr.rel (%p2728_p3) target bundleno = 623 (0x26f), region = 40 }
  0x45   : > { %2628 = dma.done.wait (%p2724_p2), [#allocation4], 9216  }
  0x46   : > { %2630 = vsyncadd (%p2724_p2), [#allocation4], 4294958080 }
  0x47   : > { %2632 = dma.done.wait (%p2724_p2), [#allocation6], 1040  }
  0x48   : > { %2634 = vsyncadd (%p2724_p2), [#allocation6], 4294966256 }
  0x49   : > { %2636 = dma.done.wait (%p2724_p2), [#allocation9], 16  }
  0x4a   : > { %2638 = vsyncadd (%p2724_p2), [#allocation9], 4294967280  ;;  %p288_p3 = scmp.lt.s32.totalorder %s2645_s19, 1  ;;  %s1985_s27 = sshll.u32 %s2641_s18, 2 }
  0x4b   : > { %p296_p5 = scmp.lt.s32.totalorder %s1985_s27, 7  ;;  %p1988_p2 = scmp.ne.s32.totalorder %s2641_s18, 0 }
  0x4c   : > { %s3074_s19 = smov (!%p288_p3, %s2645_s19), 1 }
  0x4d   : > { %s3076_s27 = smov (!%p296_p5, %s1985_s27), 7  ;;  %s2135_s28 = sshll.u32 %s3074_s19, 5 }
  0x4e   : > { %s1986_s14 = sshll.u32 %s3074_s19, 3  ;;  %s2809_s17 = scalar_lea.vmem %s3045_s0, %s2135_s28 }
  0x4f   : > { %s299_s23 = sadd.s32 %s1986_s14, %s3076_s27  ;;  %307 = sbr.rel (%p1988_p2) target bundleno = 114 (0x72), region = 60 }
  0x50   : > { %s1987_s24 = sshll.u32 %s299_s23, 2 }
  0x51   : > { %s2814_s30 = scalar_lea.vmem %s3050_s5, %s1987_s24 }
  0x54   : > { %v328_v0 = vld [vmem:[%s2809_s17] sm:$0xf]  ;;  %v2665_v1 = vmov 0   ;;  %vm425_vm0 = vcmask 1043456   ;;  %vm426_vm1 = vsmask.f32 7938 }
  0x55   : > { %310 = vst [vmem:[#allocation2 + $0x8] sm:$0xf] %v2665_v1  ;;  %308 = vst [vmem:[#allocation2] sm:$0xf] %v2665_v1  ;;  %v336_v2 = vmax.bf16 %v2665_v1, %v328_v0  ;;  %vm431_vm2 = vcmask 1040384  }
  0x56   : > { %309 = vst [vmem:[#allocation2 + $0x4] sm:$0xf] %v2665_v1  ;;  %311 = vst [vmem:[#allocation2 + $0xc] sm:$0xf] %v2665_v1  ;;  %v329_v3 = vld [vmem:[%s2809_s17 + $0x4] sm:$0xf] }
  0x57   : > { %312 = vst [vmem:[#allocation2 + $0x10] sm:$0xf] %v2665_v1  ;;  %313 = vst [vmem:[#allocation2 + $0x14] sm:$0xf] %v2665_v1  ;;  %vm432_vm3 = vsmask.f32 256  ;;  %v337_v4 = vmax.bf16 %v2665_v1, %v329_v3 }
  0x58   : > { %314 = vst [vmem:[#allocation2 + $0x18] sm:$0xf] %v2665_v1  ;;  %315 = vst [vmem:[#allocation2 + $0x1c] sm:$0xf] %v2665_v1  ;;  %v330_v5 = vld [vmem:[%s2809_s17 + $0x8] sm:$0xf] }
  0x59   : > { %316 = vst [vmem:[#allocation2 + $0x20] sm:$0xf] %v2665_v1  ;;  %317 = vst [vmem:[#allocation2 + $0x24] sm:$0xf] %v2665_v1  ;;  %v331_v6 = vld [vmem:[%s2809_s17 + $0xc] sm:$0xf]  ;;  %v338_v9 = vmax.bf16 %v2665_v1, %v330_v5 }
  0x5a   : > { %318 = vst [vmem:[#allocation2 + $0x28] sm:$0xf] %v2665_v1  ;;  %319 = vst [vmem:[#allocation2 + $0x2c] sm:$0xf] %v2665_v1  ;;  %v345_v7 = vshrl.u32 %v336_v2, 16  ;;  %v348_v8 = vshll.u32 %v336_v2, 16  ;;  %v339_v10 = vmax.bf16 %v2665_v1, %v331_v6 }
  0x5b   : > { %320 = vst [vmem:[#allocation2 + $0x30] sm:$0xf] %v2665_v1  ;;  %321 = vst [vmem:[#allocation2 + $0x34] sm:$0xf] %v2665_v1  ;;  %v332_v11 = vld [vmem:[%s2809_s17 + $0x10] sm:$0xf] }
  0x5c   : > { %322 = vst [vmem:[#allocation2 + $0x38] sm:$0xf] %v2665_v1  ;;  %323 = vst [vmem:[#allocation2 + $0x3c] sm:$0xf] %v2665_v1  ;;  %v333_v12 = vld [vmem:[%s2809_s17 + $0x14] sm:$0xf]  ;;  %v340_v15 = vmax.bf16 %v2665_v1, %v332_v11 }
  0x5d   : > { %324 = vst [vmem:[#allocation2 + $0x40] sm:$0xf] %v2665_v1  ;;  %325 = vst [vmem:[#allocation2 + $0x44] sm:$0xf] %v2665_v1  ;;  %v353_v13 = vshrl.u32 %v337_v4, 16  ;;  %v356_v14 = vshll.u32 %v337_v4, 16  ;;  %v2823_v16 = vmax.bf16 %v2665_v1, %v333_v12 }
  0x5e   : > { %326 = vst [vmem:[#allocation2 + $0x48] sm:$0xf] %v2665_v1  ;;  %327 = vst [vmem:[#allocation2 + $0x4c] sm:$0xf] %v2665_v1  ;;  %v334_v17 = vld [vmem:[%s2809_s17 + $0x18] sm:$0xf] }
  0x5f   : > { %v347_v18 = vrot.slane %v345_v7, 7  ;;  %vm2828_vm4 = vmand %vm425_vm0, %vm426_vm1  ;;  %v361_v20 = vshrl.u32 %v338_v9, 16  ;;  %v364_v21 = vshll.u32 %v338_v9, 16  ;;  %v369_v22 = vshrl.u32 %v339_v10, 16  ;;  %v335_v23 = vld [vmem:[%s2809_s17 + $0x1c] sm:$0xf] }
  0x60   : > { %vm2835_vm5 = vmand %vm431_vm2, %vm432_vm3  ;;  %v355_v25 = vrot.slane %v353_v13, 7  ;;  %v372_v26 = vshll.u32 %v339_v10, 16  ;;  %v377_v27 = vshrl.u32 %v340_v15, 16  ;;  %v380_v28 = vshll.u32 %v340_v15, 16  ;;  %v428_v33 = vld [vmem:[#allocation2 + $0x8] sm:$0xf] }
  0x61   : > { %v350_v29 = vor.u32 %v348_v8, %v347_v18  ;;  %v351_v30 = vrot.slane %v347_v18, 4  ;;  %v363_v31 = vrot.slane %v361_v20, 7  ;;  %v371_v32 = vrot.slane %v369_v22, 7  ;;  %v434_v34 = vld [vmem:[#allocation2 + $0xc] sm:$0x1] }
  0x62   : > { %v358_v35 = vor.u32 %v356_v14, %v355_v25  ;;  %v437_v36 = vld [vmem:[#allocation2 + $0x10] sm:$0xf]  ;;  %v342_v37 = vmax.bf16 %v2665_v1, %v334_v17  ;;  %v343_v38 = vmax.bf16 %v2665_v1, %v335_v23  ;;  %v359_v41 = vrot.slane %v355_v25, 4  ;;  %v440_v42 = vld [vmem:[#allocation2 + $0x14] sm:$0x1] }
  0x63   : > { %v429_v39 = vsel %vm2828_vm4, %v350_v29, %v428_v33  ;;  %v435_v40 = vsel %vm2835_vm5, %v351_v30, %v434_v34  ;;  %v366_v43 = vor.u32 %v364_v21, %v363_v31  ;;  %v443_v44 = vld [vmem:[#allocation2 + $0x18] sm:$0xf]  ;;  %v367_v46 = vrot.slane %v363_v31, 4  ;;  %v446_v47 = vld [vmem:[#allocation2 + $0x1c] sm:$0x1] }
  0x64   : > { %430 = vst [vmem:[#allocation2 + $0x8] sm:$0xf] %v429_v39  ;;  %436 = vst [vmem:[#allocation2 + $0xc] sm:$0x1] %v435_v40  ;;  %v438_v45 = vsel %vm2828_vm4, %v358_v35, %v437_v36  ;;  %v374_v48 = vor.u32 %v372_v26, %v371_v32  ;;  %v449_v49 = vld [vmem:[#allocation2 + $0x20] sm:$0xf]  ;;  %v441_v51 = vsel %vm2835_vm5, %v359_v41, %v440_v42 }
  0x65   : > { %v375_v50 = vrot.slane %v371_v32, 4  ;;  %439 = vst [vmem:[#allocation2 + $0x10] sm:$0xf] %v438_v45  ;;  %v444_v52 = vsel %vm2828_vm4, %v366_v43, %v443_v44  ;;  %v452_v53 = vld [vmem:[#allocation2 + $0x24] sm:$0x1]  ;;  %v379_v54 = vrot.slane %v377_v27, 7  ;;  %v447_v56 = vsel %vm2835_vm5, %v367_v46, %v446_v47 }
  0x66   : > { %v385_v55 = vshrl.u32 %v2823_v16, 16  ;;  %442 = vst [vmem:[#allocation2 + $0x14] sm:$0x1] %v441_v51  ;;  %445 = vst [vmem:[#allocation2 + $0x18] sm:$0xf] %v444_v52  ;;  %v450_v57 = vsel %vm2828_vm4, %v374_v48, %v449_v49  ;;  %v388_v61 = vshll.u32 %v2823_v16, 16 }
  0x67   : > { %v453_v58 = vsel %vm2835_vm5, %v375_v50, %v452_v53  ;;  %v455_v59 = vld [vmem:[#allocation2 + $0x28] sm:$0xf]  ;;  %v458_v60 = vld [vmem:[#allocation2 + $0x2c] sm:$0x1]  ;;  %448 = vst [vmem:[#allocation2 + $0x1c] sm:$0x1] %v447_v56  ;;  %v382_v62 = vor.u32 %v380_v28, %v379_v54 }
  0x68   : > { %451 = vst [vmem:[#allocation2 + $0x20] sm:$0xf] %v450_v57  ;;  %454 = vst [vmem:[#allocation2 + $0x24] sm:$0x1] %v453_v58  ;;  %v383_v63 = vrot.slane %v379_v54, 4  ;;  %v387_v0 = vrot.slane %v385_v55, 7 }
  0x69   : > { %v393_v1 = vshrl.u32 %v342_v37, 16  ;;  %v461_v2 = vld [vmem:[#allocation2 + $0x30] sm:$0xf]  ;;  %v464_v3 = vld [vmem:[#allocation2 + $0x34] sm:$0x1]  ;;  %v396_v4 = vshll.u32 %v342_v37, 16  ;;  %v456_v6 = vsel %vm2828_vm4, %v382_v62, %v455_v59 }
  0x6a   : > { %v401_v5 = vshrl.u32 %v343_v38, 16  ;;  %v459_v7 = vsel %vm2835_vm5, %v383_v63, %v458_v60  ;;  %v390_v8 = vor.u32 %v388_v61, %v387_v0  ;;  %v391_v9 = vrot.slane %v387_v0, 4  ;;  %457 = vst [vmem:[#allocation2 + $0x28] sm:$0xf] %v456_v6  ;;  %v467_v11 = vld [vmem:[#allocation2 + $0x38] sm:$0xf] }
  0x6b   : > { %460 = vst [vmem:[#allocation2 + $0x2c] sm:$0x1] %v459_v7  ;;  %v395_v10 = vrot.slane %v393_v1, 7  ;;  %v404_v13 = vshll.u32 %v343_v38, 16  ;;  %v470_v16 = vld [vmem:[#allocation2 + $0x3c] sm:$0x1] }
  0x6c   : > { %v403_v12 = vrot.slane %v401_v5, 7  ;;  %v462_v14 = vsel %vm2828_vm4, %v390_v8, %v461_v2  ;;  %v465_v15 = vsel %vm2835_vm5, %v391_v9, %v464_v3  ;;  %v473_v17 = vld [vmem:[#allocation2 + $0x40] sm:$0xf]  ;;  %v476_v18 = vld [vmem:[#allocation2 + $0x44] sm:$0x1] }
  0x6d   : > { %463 = vst [vmem:[#allocation2 + $0x30] sm:$0xf] %v462_v14  ;;  %466 = vst [vmem:[#allocation2 + $0x34] sm:$0x1] %v465_v15  ;;  %v398_v20 = vor.u32 %v396_v4, %v395_v10  ;;  %v399_v21 = vrot.slane %v395_v10, 4 }
  0x6e   : > { %v406_v22 = vor.u32 %v404_v13, %v403_v12  ;;  %v407_v23 = vrot.slane %v403_v12, 4 }
  0x6f   : > { %v468_v25 = vsel %vm2828_vm4, %v398_v20, %v467_v11  ;;  %v471_v26 = vsel %vm2835_vm5, %v399_v21, %v470_v16 }
  0x70   : > { %v474_v27 = vsel %vm2828_vm4, %v406_v22, %v473_v17  ;;  %v477_v28 = vsel %vm2835_vm5, %v407_v23, %v476_v18  ;;  %469 = vst [vmem:[#allocation2 + $0x38] sm:$0xf] %v468_v25  ;;  %472 = vst [vmem:[#allocation2 + $0x3c] sm:$0x1] %v471_v26 }
  0x71   : > { %475 = vst [vmem:[#allocation2 + $0x40] sm:$0xf] %v474_v27  ;;  %478 = vst [vmem:[#allocation2 + $0x44] sm:$0x1] %v477_v28 }
  0x72 PF: > { %v2417_v29 = vld [vmem:[#allocation3 + $0x78] sm:$0xff]   ;;  %v2421_v33 = vld [vmem:[#allocation3 + $0x70] sm:$0xff]   ;;  %v2425_v35 = vld [vmem:[#allocation3 + $0x68] sm:$0xff]   ;;  %s2137_s19 = sshll.u32 %s2641_s18, 5  ;;  %vm491_vm6 = vsmask.f32 3328 }
  0x73   : > { %v2418_v30 = vld [vmem:[#allocation3 + $0x38] sm:$0xff]   ;;  %2161 = vmatprep.subr.bf16.mxu0 %v2417_v29  ;;  %v2422_v34 = vld [vmem:[#allocation3 + $0x30] sm:$0xff]   ;;  %v2426_v36 = vld [vmem:[#allocation3 + $0x28] sm:$0xff]   ;;  %s2874_s6 = scalar_lea.vmem [#allocation2], %s2137_s19  ;;  %vm562_vm7 = vcmask 1042432   ;;  %vm563_vm9 = vcmask 1046532  }
  0x74   : > { %v2419_v31 = vld [vmem:[#allocation3 + $0xf8] sm:$0xff]   ;;  %2162 = vmatpush3.bf16.msra.mxu0 %v2418_v30  ;;  %v2423_v19 = vld [vmem:[#allocation3 + $0xf0] sm:$0xff]   ;;  %v2427_v37 = vld [vmem:[#allocation3 + $0xe8] sm:$0xff]   ;;  %vm492_vm8 = vsmask.f32 7440  ;;  %s2140_s7 = sshll.u32 %s2641_s18, 4 }
  0x75   : > { %v2420_v32 = vld [vmem:[#allocation3 + $0xb8] sm:$0xff]   ;;  %2189 = vmatprep.subr.bf16.mxu1 %v2419_v31  ;;  %2163 = vmatprep.subr.bf16.mxu0 %v2421_v33  ;;  %v2424_v24 = vld [vmem:[#allocation3 + $0xb0] sm:$0xff]   ;;  %v2428_v38 = vld [vmem:[#allocation3 + $0xa8] sm:$0xff]   ;;  %s1812_s8 = scalar_lea.vmem %s2809_s17, %s2140_s7 }
  0x76   : > { %2190 = vmatpush3.bf16.msra.mxu1 %v2420_v32  ;;  %v2429_v39 = vld [vmem:[#allocation3 + $0x60] sm:$0xff]   ;;  %v2433_v43 = vld [vmem:[#allocation3 + $0x58] sm:$0xff]   ;;  %v2437_v47 = vld [vmem:[#allocation3 + $0x50] sm:$0xff]  }
  0x77   : > { %2191 = vmatprep.subr.bf16.mxu1 %v2423_v19  ;;  %v2430_v40 = vld [vmem:[#allocation3 + $0x20] sm:$0xff]   ;;  %v2434_v44 = vld [vmem:[#allocation3 + $0x18] sm:$0xff]   ;;  %v2438_v48 = vld [vmem:[#allocation3 + $0x10] sm:$0xff]  }
  0x78   : > { %2164 = vmatpush3.bf16.msra.mxu0 %v2422_v34  ;;  %v2431_v41 = vld [vmem:[#allocation3 + $0xe0] sm:$0xff]   ;;  %v2435_v45 = vld [vmem:[#allocation3 + $0xd8] sm:$0xff]   ;;  %v2439_v49 = vld [vmem:[#allocation3 + $0xd0] sm:$0xff]  }
  0x79   : > { %2165 = vmatprep.subr.bf16.mxu0 %v2425_v35  ;;  %v2432_v42 = vld [vmem:[#allocation3 + $0xa0] sm:$0xff]   ;;  %v2436_v46 = vld [vmem:[#allocation3 + $0x98] sm:$0xff]   ;;  %v2440_v50 = vld [vmem:[#allocation3 + $0x90] sm:$0xff]  }
  0x7a   : > { %2192 = vmatpush3.bf16.msra.mxu1 %v2424_v24  ;;  %v2441_v51 = vld [vmem:[#allocation3 + $0x48] sm:$0xff]   ;;  %v2445_v55 = vld [vmem:[#allocation3 + $0x40] sm:$0xff]   ;;  %v483_v58 = vld [vmem:[%s2874_s6] sm:$0xf] }
  0x7b   : > { %2193 = vmatprep.subr.bf16.mxu1 %v2427_v37  ;;  %v2442_v52 = vld [vmem:[#allocation3 + $0x8] sm:$0xff]   ;;  %v2446_v56 = vld [vmem:[#allocation3] sm:$0xff]   ;;  %v484_v59 = vld [vmem:[%s2874_s6 + $0x8] sm:$0xf]  ;;  %v495_v62 = vshrl.u32 %v483_v58, 16  ;;  %v498_v63 = vshll.u32 %v483_v58, 16 }
  0x7c   : > { %2166 = vmatpush3.bf16.msra.mxu0 %v2426_v36  ;;  %v2443_v53 = vld [vmem:[#allocation3 + $0xc8] sm:$0xff]   ;;  %v2447_v57 = vld [vmem:[#allocation3 + $0xc0] sm:$0xff]   ;;  %v487_v60 = vld [vmem:[%s2874_s6 + $0x4] sm:$0x1]  ;;  %v509_v1 = vshrl.u32 %v484_v59, 16  ;;  %v512_v2 = vshll.u32 %v484_v59, 16  ;;  %v2032_v32 = vcombine.low %v483_v58, %v484_v59 }
  0x7d   : > { %2167 = vmatprep.subr.bf16.mxu0 %v2429_v39  ;;  %v2444_v54 = vld [vmem:[#allocation3 + $0x88] sm:$0xff]   ;;  %v488_v61 = vld [vmem:[%s2874_s6 + $0xc] sm:$0x1]  ;;  %v504_v0 = vshll.u32 %v487_v60, 16  ;;  %v497_v4 = vrot.slane %v495_v62, 4  ;;  %v500_v5 = vrot.slane %v498_v63, 5  ;;  %vm2888_vm10 = vmor %vm491_vm6, %vm492_vm8 }
  0x7e   : > { %2194 = vmatpush3.bf16.msra.mxu1 %v2428_v38  ;;  %v518_v3 = vshll.u32 %v488_v61, 16  ;;  %v511_v6 = vrot.slane %v509_v1, 4  ;;  %v2448_v7 = vld [vmem:[#allocation3 + $0x80] sm:$0xff]   ;;  %v2450_v8 = vld [vmem:[#allocation3 + $0x178] sm:$0xff]   ;;  %v514_v10 = vrot.slane %v512_v2, 5  ;;  %v567_v17 = vrot.slane %v487_v60, 5  ;;  %vm2898_vm11 = vmor %vm562_vm7, %vm563_vm9 }
  0x7f   : > { %2195 = vmatprep.subr.bf16.mxu1 %v2431_v41  ;;  %v506_v9 = vrot.slane %v504_v0, 5  ;;  %v501_v11 = vor.u32 %v500_v5, %v497_v4  ;;  %v2881_v12 = vld [vmem:[%s2874_s6 + $0x8] sm:$0xf]  ;;  %v2884_v13 = vld [vmem:[%s2874_s6 + $0x10] sm:$0xf]  ;;  %v571_v20 = vrot.slane %v488_v61, 5 }
  0x80   : > { %2168 = vmatpush3.bf16.msra.mxu0 %v2430_v40  ;;  %v515_v15 = vor.u32 %v514_v10, %v511_v6  ;;  %v520_v16 = vrot.slane %v518_v3, 5  ;;  %v2038_v21 = vcombine.low %v2881_v12, %v2884_v13  ;;  %v550_v22 = vld [vmem:[%s2874_s6] sm:$0xe]  ;;  %v551_v23 = vld [vmem:[%s2874_s6 + $0x8] sm:$0xe]  ;;  %v2459_v41 = vld [vmem:[#allocation3 + $0x168] sm:$0xff]  }
  0x81   : > { %2169 = vmatprep.subr.bf16.mxu0 %v2433_v43  ;;  %v502_v18 = vrot.slane %v501_v11, 4  ;;  %v1992_v28 = vrot.slane %v550_v22, 9  ;;  %v1993_v29 = vrot.slane %v551_v23, 9  ;;  %v2453_v30 = vld [vmem:[#allocation3 + $0x1f8] sm:$0xff]   ;;  %v2455_v37 = vld [vmem:[#allocation3 + $0x170] sm:$0xff]   ;;  %v2460_v43 = vld [vmem:[#allocation3 + $0x128] sm:$0xff]  }
  0x82   : > { %2196 = vmatpush3.bf16.msra.mxu1 %v2432_v42  ;;  %v516_v25 = vrot.slane %v515_v15, 4  ;;  %1521 = vmatprep.mubr.bf16.mxu1 %v2038_v21  ;;  %v2452_v33 = vld [vmem:[#allocation3 + $0x138] sm:$0xff]   ;;  %v2457_v38 = vld [vmem:[#allocation3 + $0x1f0] sm:$0xff]   ;;  %v2461_v42 = vld [vmem:[#allocation3 + $0x1e8] sm:$0xff]  }
  0x83   : > { %2197 = vmatprep.subr.bf16.mxu1 %v2435_v45  ;;  %v507_v27 = vsel %vm2888_vm10, %v502_v18, %v506_v9  ;;  %v568_v19 = vsel %vm2898_vm11, %v1992_v28, %v567_v17  ;;  %v572_v24 = vsel %vm2898_vm11, %v1993_v29, %v571_v20  ;;  %v2454_v35 = vld [vmem:[#allocation3 + $0x1b8] sm:$0xff]   ;;  %v2456_v39 = vld [vmem:[#allocation3 + $0x130] sm:$0xff]   ;;  %v2463_v45 = vld [vmem:[#allocation3 + $0x160] sm:$0xff]  }
  0x84   : > { %2170 = vmatpush3.bf16.msra.mxu0 %v2434_v44  ;;  %v521_v31 = vsel %vm2888_vm10, %v516_v25, %v520_v16  ;;  %v2036_v36 = vcombine.low %v568_v19, %v572_v24  ;;  %v2458_v40 = vld [vmem:[#allocation3 + $0x1b0] sm:$0xff]   ;;  %v2462_v44 = vld [vmem:[#allocation3 + $0x1a8] sm:$0xff]   ;;  %v2469_v5 = vld [vmem:[#allocation3 + $0x1d8] sm:$0xff]  }
  0x85   : > { %2171 = vmatprep.subr.bf16.mxu0 %v2437_v47  ;;  %v2034_v34 = vcombine.low %v507_v27, %v521_v31  ;;  %v2465_v47 = vld [vmem:[#allocation3 + $0x1e0] sm:$0xff]   ;;  %v490_v58 = vld [vmem:[%s2874_s6 + $0x1c] sm:$0x1]  ;;  %v2471_v6 = vld [vmem:[#allocation3 + $0x198] sm:$0xff]  }
  0x86   : > { %2198 = vmatpush3.bf16.msra.mxu1 %v2436_v46  ;;  %v594_v46 = vshrl.u32 %v2881_v12, 16  ;;  %v546_v0 = vshll.u32 %v490_v58, 16  ;;  %v2000_v10 = vld [vmem:[%s2874_s6 + $0x18] sm:$0xf]  ;;  %v2001_v11 = vld [vmem:[%s2874_s6 + $0x20] sm:$0xf] }
  0x87   : > { %2199 = vmatprep.subr.bf16.mxu1 %v2439_v49  ;;  %1472 = vmatprep.mubr.bf16.mxu0 %v2034_v34  ;;  %v2464_v49 = vld [vmem:[#allocation3 + $0x120] sm:$0xff]   ;;  %v622_v16 = vshrl.u32 %v2000_v10, 16  ;;  %v2473_v17 = vld [vmem:[#allocation3 + $0x150] sm:$0xff]   ;;  %v625_v20 = vshll.u32 %v2000_v10, 16  ;;  %v2039_v21 = vcombine.low %v2000_v10, %v2001_v11  ;;  %v553_v23 = vld [vmem:[%s2874_s6 + $0x18] sm:$0xe] }
  0x88   : > { %2172 = vmatpush3.bf16.msra.mxu0 %v2438_v48  ;;  %v597_v48 = vshll.u32 %v2881_v12, 16  ;;  %v596_v1 = vrot.slane %v594_v46, 4  ;;  %v548_v15 = vrot.slane %v546_v0, 5  ;;  %v552_v22 = vld [vmem:[%s2874_s6 + $0x10] sm:$0xe]  ;;  %v1995_v24 = vrot.slane %v553_v23, 9 }
  0x89   : > { %2173 = vmatprep.subr.bf16.mxu0 %v2441_v51  ;;  %v2466_v51 = vld [vmem:[#allocation3 + $0x1a0] sm:$0xff]   ;;  %v1994_v31 = vrot.slane %v552_v22, 9  ;;  %v2477_v46 = vld [vmem:[#allocation3 + $0x148] sm:$0xff]   ;;  %v2006_v0 = vld [vmem:[%s2874_s6 + $0x8] sm:$0xe] }
  0x8a   : > { %2200 = vmatpush3.bf16.msra.mxu1 %v2440_v50  ;;  %v608_v50 = vshrl.u32 %v2884_v13, 16  ;;  %v599_v12 = vrot.slane %v597_v48, 5  ;;  %v2478_v48 = vld [vmem:[#allocation3 + $0x108] sm:$0xff]   ;;  %v2500_v26 = vld [vmem:[#allocation7 + $0x10] sm:$0xff]  }
  0x8b   : > { %2201 = vmatprep.subr.bf16.mxu1 %v2443_v53  ;;  %v2467_v53 = vld [vmem:[#allocation3 + $0x158] sm:$0xff]  }
  0x8c   : > { %2174 = vmatpush3.bf16.msra.mxu0 %v2442_v52  ;;  %v611_v52 = vshll.u32 %v2884_v13, 16  ;;  %v610_v25 = vrot.slane %v608_v50, 4  ;;  %v2479_v50 = vld [vmem:[#allocation3 + $0x1c8] sm:$0xff]  }
  0x8d   : > { %2175 = vmatprep.subr.bf16.mxu0 %v2445_v55  ;;  %v2915_v55 = vld [vmem:[%s2874_s6 + $0x10] sm:$0xf] }
  0x8e   : > { %2202 = vmatpush3.bf16.msra.mxu1 %v2444_v54  ;;  %v2468_v54 = vld [vmem:[#allocation3 + $0x118] sm:$0xff]   ;;  %v523_v59 = vshrl.u32 %v2915_v55, 16  ;;  %v526_v60 = vshll.u32 %v2915_v55, 16  ;;  %v613_v27 = vrot.slane %v611_v52, 5 }
  0x8f   : > { %2203 = vmatprep.subr.bf16.mxu1 %v2447_v57  ;;  %v489_v57 = vld [vmem:[%s2874_s6 + $0x14] sm:$0x1] }
  0x90   : > { %2176 = vmatpush3.bf16.msra.mxu0 %v2446_v56  ;;  %v2918_v56 = vld [vmem:[%s2874_s6 + $0x18] sm:$0xf]  ;;  %v532_v61 = vshll.u32 %v489_v57, 16  ;;  %v525_v2 = vrot.slane %v523_v59, 4  ;;  %v528_v3 = vrot.slane %v526_v60, 5 }
  0x91   : > { %2217 = vmatprep.subr.bf16.mxu0 %v2450_v8  ;;  %v537_v62 = vshrl.u32 %v2918_v56, 16  ;;  %v540_v63 = vshll.u32 %v2918_v56, 16  ;;  %v2033_v19 = vcombine.low %v2915_v55, %v2918_v56  ;;  %v2481_v55 = vld [vmem:[#allocation3 + $0x140] sm:$0xff]   ;;  %v2002_v59 = vld [vmem:[%s2874_s6 + $0xc] sm:$0x1] }
  0x92   : > { %2204 = vmatpush3.bf16.msra.mxu1 %v2448_v7  ;;  %v534_v7 = vrot.slane %v532_v61, 5  ;;  %v529_v9 = vor.u32 %v528_v3, %v525_v2  ;;  %v2003_v60 = vld [vmem:[%s2874_s6 + $0x14] sm:$0x1]  ;;  %v2010_v2 = vrot.slane %v2006_v0, 9  ;;  %v663_v3 = vrot.slane %v2002_v59, 5 }
  0x93   : > { %2245 = vmatprep.subr.bf16.mxu1 %v2453_v30  ;;  %1473 = vmatmul.mubr.bf16.vlgmr.msra.gmra.mxu0 %v2032_v32  ;;  %v539_v4 = vrot.slane %v537_v62, 4  ;;  %v542_v8 = vrot.slane %v540_v63, 5  ;;  %v624_v30 = vrot.slane %v622_v16, 4  ;;  %v575_v32 = vrot.slane %v489_v57, 5  ;;  %v2482_v57 = vld [vmem:[#allocation3 + $0x100] sm:$0xff]  }
  0x94   : > { %2218 = vmatpush3.bf16.msra.mxu0 %v2452_v33  ;;  %v530_v18 = vrot.slane %v529_v9, 4  ;;  %v2474_v33 = vld [vmem:[#allocation3 + $0x110] sm:$0xff]   ;;  %v603_v62 = vshll.u32 %v2002_v59, 16  ;;  %v617_v63 = vshll.u32 %v2003_v60, 16  ;;  %v2485_v9 = vld [vmem:[#allocation3 + $0x238] sm:$0xff]  }
  0x95   : > { %1522 = vmatmul.mubr.bf16.vlgmr.msra.gmra.mxu1 %v2036_v36  ;;  %2219 = vmatprep.subr.bf16.mxu0 %v2455_v37  ;;  %v543_v13 = vor.u32 %v542_v8, %v539_v4  ;;  %v600_v36 = vor.u32 %v599_v12, %v596_v1  ;;  %v2007_v1 = vld [vmem:[%s2874_s6 + $0x10] sm:$0xe]  ;;  %v2987_v59 = vld [vmem:[%s2874_s6 + $0x24] sm:$0x1]  ;;  %v2995_v0 = vld [vmem:[%s2874_s6 + $0x2c] sm:$0x1] }
  0x96   : > { %2246 = vmatpush3.bf16.msra.mxu1 %v2454_v35  ;;  %v535_v29 = vsel %vm2888_vm10, %v530_v18, %v534_v7  ;;  %1529 = vmatprep.mubr.bf16.mxu1 %v2039_v21  ;;  %v579_v35 = vrot.slane %v490_v58, 5  ;;  %v2483_v58 = vld [vmem:[#allocation3 + $0x1c0] sm:$0xff]   ;;  %v2011_v4 = vrot.slane %v2007_v1, 9  ;;  %v619_v7 = vrot.slane %v617_v63, 5  ;;  %v2958_v18 = vld [vmem:[%s2874_s6 + $0x18] sm:$0xf] }
  0x97   : > { %2247 = vmatprep.subr.bf16.mxu1 %v2457_v38  ;;  %v544_v28 = vrot.slane %v543_v13, 4  ;;  %v627_v38 = vrot.slane %v625_v20, 5  ;;  %v2484_v8 = vld [vmem:[#allocation3 + $0x180] sm:$0xff]   ;;  %v2964_v21 = vld [vmem:[%s2874_s6 + $0x1c] sm:$0x1] }
  0x98   : > { %2220 = vmatpush3.bf16.msra.mxu0 %v2456_v39  ;;  %v576_v39 = vsel %vm2898_vm11, %v1994_v31, %v575_v32  ;;  %v2951_v13 = vld [vmem:[%s2874_s6 + $0x10] sm:$0xf]  ;;  %v2961_v20 = vld [vmem:[%s2874_s6 + $0x14] sm:$0x1]  ;;  %v713_v31 = vshll.u32 %v2964_v21, 16 }
  0x99   : > { %2221 = vmatprep.subr.bf16.mxu0 %v2459_v41  ;;  %v549_v34 = vsel %vm2888_vm10, %v544_v28, %v548_v15  ;;  %v614_v41 = vor.u32 %v613_v27, %v610_v25  ;;  %v690_v23 = vshrl.u32 %v2951_v13, 16  ;;  %v693_v25 = vshll.u32 %v2951_v13, 16  ;;  %v2487_v28 = vld [vmem:[#allocation3 + $0x230] sm:$0xff]  }
  0x9a   : > { %2248 = vmatpush3.bf16.msra.mxu1 %v2458_v40  ;;  %v2035_v37 = vcombine.low %v535_v29, %v549_v34  ;;  %v2475_v40 = vld [vmem:[#allocation3 + $0x1d0] sm:$0xff]   ;;  %v699_v27 = vshll.u32 %v2961_v20, 16  ;;  %v704_v29 = vshrl.u32 %v2958_v18, 16 }
  0x9b   : > { %2249 = vmatprep.subr.bf16.mxu1 %v2461_v42  ;;  %v580_v42 = vsel %vm2898_vm11, %v1995_v24, %v579_v35  ;;  %v615_v52 = vrot.slane %v614_v41, 4  ;;  %v695_v34 = vrot.slane %v693_v25, 5  ;;  %v2004_v24 = vld [vmem:[%s2874_s6 + $0x1c] sm:$0x1]  ;;  %v759_v25 = vrot.slane %v2961_v20, 5 }
  0x9c   : > { %2222 = vmatpush3.bf16.msra.mxu0 %v2460_v43  ;;  %v2476_v43 = vld [vmem:[#allocation3 + $0x190] sm:$0xff]   ;;  %1480 = vmatprep.mubr.bf16.mxu0 %v2035_v37  ;;  %v2488_v35 = vld [vmem:[#allocation3 + $0x228] sm:$0xff]  }
  0x9d   : > { %2223 = vmatprep.subr.bf16.mxu0 %v2463_v45  ;;  %v2037_v45 = vcombine.low %v576_v39, %v580_v42  ;;  %1481 = vmatmul.mubr.bf16.gmra.mxu0 %v2033_v19  ;;  %v701_v19 = vrot.slane %v699_v27, 5  ;;  %v2005_v39 = vld [vmem:[%s2874_s6 + $0x24] sm:$0x1]  ;;  %v2008_v42 = vld [vmem:[%s2874_s6 + $0x18] sm:$0xe] }
  0x9e   : > { %2250 = vmatpush3.bf16.msra.mxu1 %v2462_v44  ;;  %v636_v44 = vshrl.u32 %v2001_v11, 16 }
  0x9f   : > { %2251 = vmatprep.subr.bf16.mxu1 %v2465_v47  ;;  %v639_v47 = vshll.u32 %v2001_v11, 16  ;;  %1530 = vmatmul.mubr.bf16.gmra.mxu1 %v2037_v45  ;;  %v664_v11 = vsel %vm2898_vm11, %v2010_v2, %v663_v3  ;;  %v631_v45 = vshll.u32 %v2004_v24, 16  ;;  %v2490_v2 = vld [vmem:[#allocation3 + $0x220] sm:$0xff]  }
  0xa0   : > { %2224 = vmatpush3.bf16.msra.mxu0 %v2464_v49  ;;  %v601_v49 = vrot.slane %v600_v36, 4  ;;  %v706_v36 = vrot.slane %v704_v29, 4  ;;  %v2025_v29 = vld [vmem:[%s2874_s6 + $0x18] sm:$0xe] }
  0xa1   : > { %2225 = vmatprep.subr.bf16.mxu0 %v2467_v53  ;;  %v2480_v53 = vld [vmem:[#allocation3 + $0x188] sm:$0xff]   ;;  %v641_v56 = vrot.slane %v639_v47, 5  ;;  %v2012_v47 = vrot.slane %v2008_v42, 9  ;;  %v771_v42 = vrot.slane %v2995_v0, 5 }
  0xa2   : > { %2252 = vmatpush3.bf16.msra.mxu1 %v2466_v51  ;;  %v628_v51 = vor.u32 %v627_v38, %v624_v30  ;;  %v707_v30 = vshll.u32 %v2958_v18, 16  ;;  %v715_v38 = vrot.slane %v713_v31, 5  ;;  %v763_v31 = vrot.slane %v2964_v21, 5 }
  0xa3   : > { %2253 = vmatprep.subr.bf16.mxu1 %v2469_v5  ;;  %v667_v5 = vrot.slane %v2003_v60, 5 }
  0xa4   : > { %2226 = vmatpush3.bf16.msra.mxu0 %v2468_v54  ;;  %v638_v54 = vrot.slane %v636_v44, 4  ;;  %v2942_v61 = vrot.slane %v628_v51, 4  ;;  %v709_v37 = vrot.slane %v707_v30, 5  ;;  %v675_v44 = vrot.slane %v2005_v39, 5 }
  0xa5   : > { %2227 = vmatprep.subr.bf16.mxu0 %v2473_v17  ;;  %v668_v12 = vsel %vm2898_vm11, %v2011_v4, %v667_v5  ;;  %v620_v17 = vsel %vm2888_vm10, %v615_v52, %v619_v7  ;;  %v2044_v51 = vcombine.low %v2951_v13, %v2958_v18  ;;  %v633_v52 = vrot.slane %v631_v45, 5  ;;  %v2494_v45 = vld [vmem:[#allocation3 + $0x200] sm:$0xff]  }
  0xa6   : > { %2254 = vmatpush3.bf16.msra.mxu1 %v2471_v6  ;;  %v605_v6 = vrot.slane %v603_v62, 5  ;;  %v642_v10 = vor.u32 %v641_v56, %v638_v54  ;;  %v2042_v15 = vcombine.low %v664_v11, %v668_v12  ;;  %v741_v12 = vshll.u32 %v2995_v0, 16 }
  0xa7   : > { %2255 = vmatprep.subr.bf16.mxu1 %v2475_v40  ;;  %v671_v40 = vrot.slane %v2004_v24, 5  ;;  %v634_v63 = vsel %vm2888_vm10, %v2942_v61, %v633_v52  ;;  %v2499_v52 = vld [vmem:[#allocation7 + $0x18] sm:$0xff]  }
  0xa8   : > { %2228 = vmatpush3.bf16.msra.mxu0 %v2474_v33  ;;  %v606_v16 = vsel %vm2888_vm10, %v601_v49, %v605_v6  ;;  %1570 = vmatprep.mubr.bf16.mxu0 %v2042_v15  ;;  %v643_v32 = vrot.slane %v642_v10, 4  ;;  %v692_v33 = vrot.slane %v690_v23, 4  ;;  %v645_v49 = vshll.u32 %v2005_v39, 16  ;;  %v2491_v15 = vld [vmem:[#allocation3 + $0x218] sm:$0xff]   ;;  %v2024_v23 = vld [vmem:[%s2874_s6 + $0x10] sm:$0xe] }
  0xa9   : > { %2229 = vmatprep.subr.bf16.mxu0 %v2477_v46  ;;  %v2040_v22 = vcombine.low %v606_v16, %v620_v17  ;;  %v710_v46 = vor.u32 %v709_v37, %v706_v36  ;;  %v727_v6 = vshll.u32 %v2987_v59, 16  ;;  %v2028_v30 = vrot.slane %v2024_v23, 9  ;;  %v2026_v36 = vld [vmem:[%s2874_s6 + $0x20] sm:$0xe]  ;;  %v2027_v37 = vld [vmem:[%s2874_s6 + $0x28] sm:$0xe] }
  0xaa   : > { %2256 = vmatpush3.bf16.msra.mxu1 %v2476_v43  ;;  %v696_v41 = vor.u32 %v695_v34, %v692_v33  ;;  %v2009_v43 = vld [vmem:[%s2874_s6 + $0x20] sm:$0xe]  ;;  %v2029_v33 = vrot.slane %v2025_v29, 9 }
  0xab   : > { %2257 = vmatprep.subr.bf16.mxu1 %v2479_v50  ;;  %v711_v54 = vrot.slane %v710_v46, 4  ;;  %v729_v17 = vrot.slane %v727_v6, 5  ;;  %v760_v24 = vsel %vm2898_vm11, %v2028_v30, %v759_v25 }
  0xac   : > { %2230 = vmatpush3.bf16.msra.mxu0 %v2478_v48  ;;  %v2013_v48 = vrot.slane %v2009_v43, 9  ;;  %v697_v50 = vrot.slane %v696_v41, 4  ;;  %v764_v20 = vsel %vm2898_vm11, %v2029_v33, %v763_v31  ;;  %v767_v41 = vrot.slane %v2987_v59, 5 }
  0xad   : > { %2231 = vmatprep.subr.bf16.mxu0 %v2481_v55  ;;  %v672_v55 = vsel %vm2898_vm11, %v2012_v47, %v671_v40  ;;  %v716_v3 = vsel %vm2888_vm10, %v711_v54, %v715_v38  ;;  %v2048_v39 = vcombine.low %v760_v24, %v764_v20  ;;  %v2030_v43 = vrot.slane %v2026_v36, 9  ;;  %v2502_v54 = vld [vmem:[#allocation7] sm:$0xff]  }
  0xae   : > { %2258 = vmatpush3.bf16.msra.mxu1 %v2480_v53  ;;  %v2979_v53 = vld [vmem:[%s2874_s6 + $0x20] sm:$0xf]  ;;  %v676_v56 = vsel %vm2898_vm11, %v2013_v48, %v675_v44  ;;  %v702_v60 = vsel %vm2888_vm10, %v697_v50, %v701_v19  ;;  %v2031_v44 = vrot.slane %v2027_v37, 9  ;;  %v2495_v48 = vld [vmem:[#allocation7 + $0x38] sm:$0xff]  }
  0xaf   : > { %2259 = vmatprep.subr.bf16.mxu1 %v2483_v58  ;;  %v2019_v58 = vld [vmem:[%s2874_s6 + $0x28] sm:$0xf]  ;;  %v2043_v62 = vcombine.low %v672_v55, %v676_v56  ;;  %v718_v1 = vshrl.u32 %v2979_v53, 16  ;;  %v721_v5 = vshll.u32 %v2979_v53, 16  ;;  %v2046_v7 = vcombine.low %v702_v60, %v716_v3  ;;  %v2497_v50 = vld [vmem:[#allocation7 + $0x28] sm:$0xff]  }
  0xb0   : > { %2232 = vmatpush3.bf16.msra.mxu0 %v2482_v57  ;;  %v647_v57 = vrot.slane %v645_v49, 5  ;;  %v735_v11 = vshll.u32 %v2019_v58, 16  ;;  %v2045_v21 = vcombine.low %v2979_v53, %v2019_v58  ;;  %v768_v14 = vsel %vm2898_vm11, %v2030_v43, %v767_v41  ;;  %v2496_v49 = vld [vmem:[#allocation7 + $0x30] sm:$0xff]   ;;  %v2501_v53 = vld [vmem:[#allocation7 + $0x8] sm:$0xff]  }
  0xb1   : > { %2293 = vmatprep.subr.bf16.mxu0 %v2485_v9  ;;  %v720_v61 = vrot.slane %v718_v1, 4  ;;  %v723_v10 = vrot.slane %v721_v5, 5  ;;  %1619 = vmatprep.mubr.bf16.mxu1 %v2046_v7  ;;  %v772_v46 = vsel %vm2898_vm11, %v2031_v44, %v771_v42 }
  0xb2   : > { %2260 = vmatpush3.bf16.msra.mxu1 %v2484_v8  ;;  %v648_v4 = vsel %vm2888_vm10, %v643_v32, %v647_v57  ;;  %v737_v18 = vrot.slane %v735_v11, 5  ;;  %v2492_v32 = vld [vmem:[#allocation3 + $0x210] sm:$0xff]   ;;  %v2049_v47 = vcombine.low %v768_v14, %v772_v46 }
  0xb3   : > { %1571 = vmatmul.mubr.bf16.vlgmr.msra.gmra.mxu0 %v2040_v22  ;;  %v2041_v8 = vcombine.low %v634_v63, %v648_v4  ;;  %v724_v16 = vor.u32 %v723_v10, %v720_v61  ;;  %v743_v22 = vrot.slane %v741_v12, 5  ;;  %2313 = vmatprep.subr.bf16.mxu1 %v2495_v48 }
  0xb4   : > { %2294 = vmatpush3.bf16.msra.mxu0 %v2485_v9  ;;  %1578 = vmatprep.mubr.bf16.mxu0 %v2043_v62  ;;  %v732_v9 = vshrl.u32 %v2019_v58, 16 }
  0xb5   : > { %2295 = vmatprep.subr.bf16.mxu0 %v2487_v28  ;;  %1620 = vmatmul.mubr.bf16.vlgmr.msra.gmra.mxu1 %v2044_v51  ;;  %v725_v27 = vrot.slane %v724_v16, 4  ;;  %v2498_v51 = vld [vmem:[#allocation7 + $0x20] sm:$0xff]  }
  0xb6   : > { %v734_v13 = vrot.slane %v732_v9, 4  ;;  %2314 = vmatpush3.bf16.msra.mxu1 %v2495_v48 }
  0xb7   : > { %v730_v34 = vsel %vm2888_vm10, %v725_v27, %v729_v17  ;;  %2315 = vmatprep.subr.bf16.mxu1 %v2496_v49  ;;  %v2050_v27 = vld [vmem:[#allocation5] ss:$0 sm:$0xff] }
  0xb8   : > { %2296 = vmatpush3.bf16.msra.mxu0 %v2487_v28  ;;  %v738_v28 = vor.u32 %v737_v18, %v734_v13 }
  0xb9   : > { %2297 = vmatprep.subr.bf16.mxu0 %v2488_v35 }
  0xba   : > { %v739_v19 = vrot.slane %v738_v28, 4  ;;  %2316 = vmatpush3.bf16.msra.mxu1 %v2496_v49 }
  0xbb   : > { %1579 = vmatmul.mubr.bf16.gmra.mxu0 %v2041_v8  ;;  %2317 = vmatprep.subr.bf16.mxu1 %v2497_v50 }
  0xbc   : > { %2298 = vmatpush3.bf16.msra.mxu0 %v2488_v35  ;;  %v2493_v35 = vld [vmem:[#allocation3 + $0x208] sm:$0xff]   ;;  %v744_v38 = vsel %vm2888_vm10, %v739_v19, %v743_v22  ;;  %2309 = vmatprep.mubr.bf16.mxu0 %v2048_v39 }
  0xbd   : > { %2299 = vmatprep.subr.bf16.mxu0 %v2490_v2  ;;  %v2047_v40 = vcombine.low %v730_v34, %v744_v38 }
  0xbe   : > { %2318 = vmatpush3.bf16.msra.mxu1 %v2497_v50 }
  0xbf   : > { %1627 = vmatprep.mubr.bf16.mxu1 %v2047_v40  ;;  %2319 = vmatprep.subr.bf16.mxu1 %v2498_v51 }
  0xc0   : > { %2300 = vmatpush3.bf16.msra.mxu0 %v2490_v2  ;;  %1628 = vmatmul.mubr.bf16.gmra.mxu1 %v2045_v21 }
  0xc1   : > { %2301 = vmatprep.subr.bf16.mxu0 %v2491_v15 }
  0xc2   : > { %2320 = vmatpush3.bf16.msra.mxu1 %v2498_v51 }
  0xc3   : > { %2321 = vmatprep.subr.bf16.mxu1 %v2499_v52 }
  0xc4   : > { %2302 = vmatpush3.bf16.msra.mxu0 %v2491_v15 }
  0xc5   : > { %2303 = vmatprep.subr.bf16.mxu0 %v2492_v32 }
  0xc6   : > { %2322 = vmatpush3.bf16.msra.mxu1 %v2499_v52 }
  0xc7   : > { %2323 = vmatprep.subr.bf16.mxu1 %v2500_v26 }
  0xc8   : > { %2304 = vmatpush3.bf16.msra.mxu0 %v2492_v32 }
  0xc9   : > { %2305 = vmatprep.subr.bf16.mxu0 %v2493_v35 }
  0xca   : > { %2324 = vmatpush3.bf16.msra.mxu1 %v2500_v26 }
  0xcb   : > { %2325 = vmatprep.subr.bf16.mxu1 %v2501_v53 }
  0xcc   : > { %2306 = vmatpush3.bf16.msra.mxu0 %v2493_v35 }
  0xcd   : > { %2307 = vmatprep.subr.bf16.mxu0 %v2494_v45 }
  0xce   : > { %2326 = vmatpush3.bf16.msra.mxu1 %v2501_v53 }
  0xcf   : > { %2327 = vmatprep.subr.bf16.mxu1 %v2502_v54 }
  0xd0   : > { %2308 = vmatpush3.bf16.msra.mxu0 %v2494_v45 }
  0xd2   : > { %2328 = vmatpush3.bf16.msra.mxu1 %v2502_v54 }
  0xd3   : > { %2310 = vmatmul.mubr.bf16.vlgmr.msra.gmra.mxu0 %v2049_v47 }
 0x153   : > { %v2177_v55 = vpop.f32.mrf.mxu0 }
 0x155   : > { %v2178_v56 = vpop.f32.mrf.mxu0  ;;  %v2205_v58 = vpop.f32.mrf.mxu1 }
 0x156   : > { %v2179_v22 = vadd.f32 %v2178_v56, %v2177_v55 }
 0x157   : > { %v2180_v57 = vpop.f32.mrf.mxu0  ;;  %v2206_v60 = vpop.f32.mrf.mxu1 }
 0x158   : > { %v1475_v32 = vadd.f32 %v2179_v22, %v2050_v27  ;;  %v2207_v33 = vadd.f32 %v2206_v60, %v2205_v58 }
 0x159   : > { %v2181_v59 = vpop.f32.mrf.mxu0  ;;  %v2208_v0 = vpop.f32.mrf.mxu1 }
 0x15a   : > { %v2182_v28 = vadd.f32 %v2181_v59, %v2180_v57  ;;  %v1524_v41 = vadd.f32 %v2207_v33, %v1475_v32 }
 0x15b   : > { %v2209_v2 = vpop.f32.mrf.mxu1 }
 0x15c   : > { %v1478_v35 = vadd.f32 %v2182_v28, %v2050_v27  ;;  %v2210_v20 = vadd.f32 %v2209_v2, %v2208_v0 }
 0x15d   : > { %v2183_v62 = vpop.f32.mrf.mxu0 }
 0x15e   : > { %v1527_v44 = vadd.f32 %v2210_v20, %v1478_v35 }
 0x15f   : > { %v2184_v63 = vpop.f32.mrf.mxu0  ;;  %v2211_v3 = vpop.f32.mrf.mxu1 }
 0x160   : > { %v2185_v29 = vadd.f32 %v2184_v63, %v2183_v62 }
 0x161   : > { %v2186_v1 = vpop.f32.mrf.mxu0  ;;  %v2212_v6 = vpop.f32.mrf.mxu1 }
 0x162   : > { %v1483_v36 = vadd.f32 %v2185_v29, %v2050_v27  ;;  %v2213_v37 = vadd.f32 %v2212_v6, %v2211_v3 }
 0x163   : > { %v2187_v4 = vpop.f32.mrf.mxu0  ;;  %v2214_v61 = vpop.f32.mrf.mxu1 }
 0x164   : > { %v2188_v23 = vadd.f32 %v2187_v4, %v2186_v1  ;;  %v1532_v45 = vadd.f32 %v2213_v37, %v1483_v36 }
 0x165   : > { %v2215_v10 = vpop.f32.mrf.mxu1 }
 0x166   : > { %v1486_v34 = vadd.f32 %v2188_v23, %v2050_v27  ;;  %v2216_v19 = vadd.f32 %v2215_v10, %v2214_v61  ;;  %v2159_v61 = vld [vmem:[%s1812_s8 + $0x8] sm:$0xff]   ;;  %v2142_v10 = vld [vmem:[%s1812_s8] sm:$0xff]  }
 0x167   : > { %v2144_v22 = vunpack.c.h.bf16 %v2142_v10 }
 0x168   : > { %v1535_v42 = vadd.f32 %v2216_v19, %v1486_v34 }
 0x173   : > { %v2233_v5 = vpop.f32.mrf.mxu0 }
 0x175   : > { %v2234_v7 = vpop.f32.mrf.mxu0  ;;  %v2261_v11 = vpop.f32.mrf.mxu1 }
 0x176   : > { %v2235_v38 = vadd.f32 %v2234_v7, %v2233_v5 }
 0x177   : > { %v2236_v8 = vpop.f32.mrf.mxu0  ;;  %v2262_v13 = vpop.f32.mrf.mxu1 }
 0x178   : > { %v1573_v14 = vadd.f32 %v2235_v38, %v1524_v41  ;;  %v2263_v46 = vadd.f32 %v2262_v13, %v2261_v11  ;;  %v2148_v13 = vunpack.c.h.bf16 %v2159_v61 }
 0x179   : > { %v2237_v9 = vpop.f32.mrf.mxu0  ;;  %v2264_v15 = vpop.f32.mrf.mxu1 }
 0x17a   : > { %v2238_v43 = vadd.f32 %v2237_v9, %v2236_v8  ;;  %v1622_v54 = vadd.f32 %v2263_v46, %v1573_v14  ;;  %v2123_v8 = vld [vmem:[#allocation8] ss:$0 sm:$0xff] }
 0x17b   : > { %v2239_v12 = vpop.f32.mrf.mxu0  ;;  %v2265_v17 = vpop.f32.mrf.mxu1 }
 0x17c   : > { %v1576_v52 = vadd.f32 %v2238_v43, %v1527_v44  ;;  %v2266_v26 = vadd.f32 %v2265_v17, %v2264_v15  ;;  %v2143_v17 = vunpack.c.l.bf16 %v2142_v10 }
 0x17d   : > { %v2240_v16 = vpop.f32.mrf.mxu0 }
 0x17e   : > { %v2241_v39 = vadd.f32 %v2240_v16, %v2239_v12  ;;  %v1625_v60 = vadd.f32 %v2266_v26, %v1576_v52  ;;  %v2147_v12 = vunpack.c.l.bf16 %v2159_v61 }
 0x17f   : > { %v2242_v18 = vpop.f32.mrf.mxu0 }
 0x180   : > { %v2267_v25 = vpop.f32.mrf.mxu1  ;;  %v1581_v49 = vadd.f32 %v2241_v39, %v1532_v45 }
 0x181   : > { %v2243_v31 = vpop.f32.mrf.mxu0 }
 0x182   : > { %v2268_v30 = vpop.f32.mrf.mxu1  ;;  %v2244_v21 = vadd.f32 %v2243_v31, %v2242_v18 }
 0x183   : > { %v2269_v50 = vadd.f32 %v2268_v30, %v2267_v25 }
 0x184   : > { %v2270_v24 = vpop.f32.mrf.mxu1  ;;  %v1584_v47 = vadd.f32 %v2244_v21, %v1535_v42 }
 0x185   : > { %v1630_v56 = vadd.f32 %v2269_v50, %v1581_v49 }
 0x186   : > { %v2271_v40 = vpop.f32.mrf.mxu1 }
 0x187   : > { %v2272_v48 = vadd.f32 %v2271_v40, %v2270_v24 }
 0x189   : > { %v1633_v55 = vadd.f32 %v2272_v48, %v1584_v47 }
 0x193   : > { %v2311_v51 = vpop.f32.mrf.mxu0 }
 0x194   : > { %v1679_v62 = vadd.f32 %v2311_v51, %v1630_v56 }
 0x195   : > { %v1670_v53 = vpop.f32.mrf.mxu0 }
 0x196   : > { %v1671_v58 = vadd.f32 %v1670_v53, %v1622_v54  ;;  %v1687_v4 = vmax.f32 %v1679_v62, 0.0 }
 0x197   : > { %v2312_v57 = vpop.f32.mrf.mxu0 }
 0x198   : > { %v1682_v59 = vadd.f32 %v2312_v57, %v1633_v55  ;;  %v1685_v2 = vmax.f32 %v1671_v58, 0.0 }
 0x199   : > { %v1673_v63 = vpop.f32.mrf.mxu0 }
 0x19a   : > { %v1674_v0 = vadd.f32 %v1673_v63, %v1625_v60  ;;  %v1688_v1 = vmax.f32 %v1682_v59, 0.0 }
 0x19c   : > { %v1686_v3 = vmax.f32 %v1674_v0, 0.0  ;;  %v1690_v6 = vpack.c.bf16 %v1688_v1, %v1687_v4 }
 0x19e   : > { %v1689_v5 = vpack.c.bf16 %v1686_v3, %v1685_v2 }
 0x1a0   : > { %2329 = vmatprep.mubr.bf16.mxu1 %v1689_v5 }
 0x1a1   : > { %2330 = vmatmul.mubr.bf16.vlgmr.msra.gmra.mxu1 %v1690_v6 }
 0x261   : > { %v2331_v7 = vpop.f32.mrf.mxu1 }
 0x262   : > { %v1805_v11 = vadd.f32 %v2331_v7, %v2123_v8 }
 0x263   : > { %v1796_v9 = vpop.f32.mrf.mxu1 }
 0x264   : > { %v1797_v16 = vadd.f32 %v2123_v8, %v1796_v9  ;;  %v1823_v25 = vadd.f32 %v2147_v12, %v1805_v11 }
 0x265   : > { %v2332_v15 = vpop.f32.mrf.mxu1 }
 0x266   : > { %v1808_v18 = vadd.f32 %v2332_v15, %v2123_v8  ;;  %v1821_v29 = vadd.f32 %v2143_v17, %v1797_v16 }
 0x267   : > { %v1799_v23 = vpop.f32.mrf.mxu1 }
 0x268   : > { %v1824_v27 = vadd.f32 %v2148_v13, %v1808_v18  ;;  %v1800_v28 = vadd.f32 %v2123_v8, %v1799_v23 }
 0x26a   : > { %v2157_v30 = vpack.c.bf16 %v1824_v27, %v1823_v25  ;;  %v1822_v31 = vadd.f32 %v2144_v22, %v1800_v28 }
 0x26c   : > { %2160 = vst [vmem:[%s2814_s30 + $0x8] sm:$0xff] %v2157_v30   ;;  %v2152_v32 = vpack.c.bf16 %v1822_v31, %v1821_v29 }
 0x26e   : > { %2153 = vst [vmem:[%s2814_s30] sm:$0xff] %v2152_v32  }
 0x26f PF: > { %s18_s22 = sadd.s32 1, %s2657_s22   ;;  %s3063_s18 = smov %s2649_s20 }
 0x270   : > { %p15_p7 = scmp.ge.s32.totalorder %s18_s22, 6   ;;  %s3064_s19 = smov %s2653_s21 }
 0x271   : > { %s3065_s20 = smov %s3068_s29  ;;  %s3066_s21 = smov %s3072_s10 }
 0x272   :  { %17 = sbr.rel (!%p15_p7) target bundleno = 5 (0x5), region = 96 }
 0x277   :  { %1863 = vsyncpa [#allocation4], 1 }
 0x278   :  { %1865 = vsyncpa [#allocation4 + $0x1], 1 }
 0x279   :  { %1866 = vsyncpa [#allocation6], 1 }
 0x27a   :  { %1867 = vsyncpa [#allocation9], 1 }

// kernel: decoder_forward.5
= control target key start
LH: loop header
LB: loop body
LE: loop exit
PB: predicated region body
PF: predicated region fallthrough
CT: control target
= control target key end

     0   :  { %s2427_s18 = smov 0   ;;  %s2429_s19 = smov 0   ;;  %s2945_s0 = inlined_call_operand.vmem [shape: bf16[2,8,8,128], index: 0, kind: input, shape index: {}]   ;;  %s2946_s1 = inlined_call_operand.vmem [shape: bf16[1152,128], index: 1, kind: input, shape index: {}]   ;;  %s2947_s2 = inlined_call_operand.vmem [shape: f32[1,128], index: 2, kind: input, shape index: {}]   ;;  %s2948_s3 = inlined_call_operand.vmem [shape: bf16[128,128], index: 3, kind: input, shape index: {}]   ;;  %s2949_s4 = inlined_call_operand.vmem [shape: f32[1,128], index: 4, kind: input, shape index: {}]   ;;  %s2950_s5 = inlined_call_operand.vmem [shape: bf16[2,8,8,128], index: 5, kind: output, shape index: {}]  }
   0x1   :  { %s2431_s20 = smov 0   ;;  %s2433_s21 = smov 0  }
   0x2   :  { %s2435_s22 = smov 0  }
   0x3 LB: > { %s24_s23 = sadd.s32 1, %s2386_s20  ;;  %s27_s24 = sadd.s32 1, %s2390_s21  ;;  %s2394_s22 = sphi %s2435_s22, %s15_s22   ;;  %s2390_s21 = sphi %s2433_s21, %s2962_s21   ;;  %s2386_s20 = sphi %s2431_s20, %s2961_s20   ;;  %s2382_s19 = sphi %s2429_s19, %s2960_s19   ;;  %s2378_s18 = sphi %s2427_s18, %s2959_s18  }
   0x4   : > { %p25_p0 = scmp.ge.s32.totalorder %s24_s23, 2  ;;  %p1878_p1 = scmp.ge.s32.totalorder %s2394_s22, 1 }
   0x5   : > { %p201_p2 = scmp.lt.s32.totalorder %s2394_s22, 5 }
   0x6   : > { %s2964_s23 = smov (%p25_p0, %s24_s23), 0  ;;  %s2966_s24 = smov (!%p25_p0, %s27_s24), %s2390_s21 }
   0x7   : > { %p202_p3 = pnand %p1878_p1, %p201_p2  ;;  %p29_p4 = scmp.ge.s32.totalorder %s2966_s24, 2 }
   0x8   : > { %p233_p5 = scmp.lt.s32.totalorder (!%p202_p3), %s2382_s19, 1  ;;  %s1881_s25 = sshll.u32 (!%p202_p3), %s2378_s18, 2 }
   0x9   : > { %s2968_s24 = smov (%p29_p4, %s2966_s24), 0  ;;  %205 = sbr.rel (%p202_p3) target bundleno = 561 (0x231), region = 40 }
   0xa   : > { %p241_p6 = scmp.lt.s32.totalorder (!%p202_p3), %s1881_s25, 7  ;;  %p1884_p7 = scmp.ne.s32.totalorder (!%p202_p3), %s2378_s18, 0 }
   0xe   : > { %s2970_s19 = smov (!%p233_p5, %s2382_s19), 1  ;;  %s2972_s25 = smov (!%p241_p6, %s1881_s25), 7 }
   0xf   : > { %s2031_s26 = sshll.u32 %s2970_s19, 5  ;;  %s1882_s27 = sshll.u32 %s2970_s19, 3 }
  0x10   : > { %s2463_s30 = scalar_lea.vmem %s2945_s0, %s2031_s26  ;;  %s244_s6 = sadd.s32 %s1882_s27, %s2972_s25 }
  0x11   : > { %s1883_s7 = sshll.u32 %s244_s6, 2  ;;  %252 = sbr.rel (%p1884_p7) target bundleno = 52 (0x34), region = 44 }
  0x12   : > { %s2468_s10 = scalar_lea.vmem %s2950_s5, %s1883_s7 }
  0x16   : > { %v273_v0 = vld [vmem:[%s2463_s30] sm:$0xf]  ;;  %v2396_v1 = vmov 0   ;;  %vm370_vm0 = vcmask 1043456   ;;  %vm371_vm1 = vsmask.f32 7938 }
  0x17   : > { %255 = vst [vmem:[#allocation2 + $0x8] sm:$0xf] %v2396_v1  ;;  %253 = vst [vmem:[#allocation2] sm:$0xf] %v2396_v1  ;;  %v281_v2 = vmax.bf16 %v2396_v1, %v273_v0  ;;  %vm376_vm2 = vcmask 1040384  }
  0x18   : > { %254 = vst [vmem:[#allocation2 + $0x4] sm:$0xf] %v2396_v1  ;;  %256 = vst [vmem:[#allocation2 + $0xc] sm:$0xf] %v2396_v1  ;;  %v274_v3 = vld [vmem:[%s2463_s30 + $0x4] sm:$0xf] }
  0x19   : > { %257 = vst [vmem:[#allocation2 + $0x10] sm:$0xf] %v2396_v1  ;;  %258 = vst [vmem:[#allocation2 + $0x14] sm:$0xf] %v2396_v1  ;;  %vm377_vm3 = vsmask.f32 256  ;;  %v282_v4 = vmax.bf16 %v2396_v1, %v274_v3 }
  0x1a   : > { %259 = vst [vmem:[#allocation2 + $0x18] sm:$0xf] %v2396_v1  ;;  %260 = vst [vmem:[#allocation2 + $0x1c] sm:$0xf] %v2396_v1  ;;  %v275_v5 = vld [vmem:[%s2463_s30 + $0x8] sm:$0xf] }
  0x1b   : > { %261 = vst [vmem:[#allocation2 + $0x20] sm:$0xf] %v2396_v1  ;;  %262 = vst [vmem:[#allocation2 + $0x24] sm:$0xf] %v2396_v1  ;;  %v276_v6 = vld [vmem:[%s2463_s30 + $0xc] sm:$0xf]  ;;  %v283_v9 = vmax.bf16 %v2396_v1, %v275_v5 }
  0x1c   : > { %263 = vst [vmem:[#allocation2 + $0x28] sm:$0xf] %v2396_v1  ;;  %264 = vst [vmem:[#allocation2 + $0x2c] sm:$0xf] %v2396_v1  ;;  %v290_v7 = vshrl.u32 %v281_v2, 16  ;;  %v293_v8 = vshll.u32 %v281_v2, 16  ;;  %v284_v10 = vmax.bf16 %v2396_v1, %v276_v6 }
  0x1d   : > { %265 = vst [vmem:[#allocation2 + $0x30] sm:$0xf] %v2396_v1  ;;  %266 = vst [vmem:[#allocation2 + $0x34] sm:$0xf] %v2396_v1  ;;  %v277_v11 = vld [vmem:[%s2463_s30 + $0x10] sm:$0xf] }
  0x1e   : > { %267 = vst [vmem:[#allocation2 + $0x38] sm:$0xf] %v2396_v1  ;;  %268 = vst [vmem:[#allocation2 + $0x3c] sm:$0xf] %v2396_v1  ;;  %v278_v12 = vld [vmem:[%s2463_s30 + $0x14] sm:$0xf]  ;;  %v285_v15 = vmax.bf16 %v2396_v1, %v277_v11 }
  0x1f   : > { %269 = vst [vmem:[#allocation2 + $0x40] sm:$0xf] %v2396_v1  ;;  %270 = vst [vmem:[#allocation2 + $0x44] sm:$0xf] %v2396_v1  ;;  %v298_v13 = vshrl.u32 %v282_v4, 16  ;;  %v301_v14 = vshll.u32 %v282_v4, 16  ;;  %v2477_v16 = vmax.bf16 %v2396_v1, %v278_v12 }
  0x20   : > { %271 = vst [vmem:[#allocation2 + $0x48] sm:$0xf] %v2396_v1  ;;  %272 = vst [vmem:[#allocation2 + $0x4c] sm:$0xf] %v2396_v1  ;;  %v279_v17 = vld [vmem:[%s2463_s30 + $0x18] sm:$0xf] }
  0x21   : > { %v292_v18 = vrot.slane %v290_v7, 7  ;;  %vm2482_vm4 = vmand %vm370_vm0, %vm371_vm1  ;;  %v306_v20 = vshrl.u32 %v283_v9, 16  ;;  %v309_v21 = vshll.u32 %v283_v9, 16  ;;  %v314_v22 = vshrl.u32 %v284_v10, 16  ;;  %v280_v23 = vld [vmem:[%s2463_s30 + $0x1c] sm:$0xf] }
  0x22   : > { %vm2489_vm5 = vmand %vm376_vm2, %vm377_vm3  ;;  %v300_v25 = vrot.slane %v298_v13, 7  ;;  %v317_v26 = vshll.u32 %v284_v10, 16  ;;  %v322_v27 = vshrl.u32 %v285_v15, 16  ;;  %v325_v28 = vshll.u32 %v285_v15, 16  ;;  %v373_v33 = vld [vmem:[#allocation2 + $0x8] sm:$0xf] }
  0x23   : > { %v295_v29 = vor.u32 %v293_v8, %v292_v18  ;;  %v296_v30 = vrot.slane %v292_v18, 4  ;;  %v308_v31 = vrot.slane %v306_v20, 7  ;;  %v316_v32 = vrot.slane %v314_v22, 7  ;;  %v379_v34 = vld [vmem:[#allocation2 + $0xc] sm:$0x1] }
  0x24   : > { %v303_v35 = vor.u32 %v301_v14, %v300_v25  ;;  %v382_v36 = vld [vmem:[#allocation2 + $0x10] sm:$0xf]  ;;  %v287_v37 = vmax.bf16 %v2396_v1, %v279_v17  ;;  %v288_v38 = vmax.bf16 %v2396_v1, %v280_v23  ;;  %v304_v41 = vrot.slane %v300_v25, 4  ;;  %v385_v42 = vld [vmem:[#allocation2 + $0x14] sm:$0x1] }
  0x25   : > { %v374_v39 = vsel %vm2482_vm4, %v295_v29, %v373_v33  ;;  %v380_v40 = vsel %vm2489_vm5, %v296_v30, %v379_v34  ;;  %v311_v43 = vor.u32 %v309_v21, %v308_v31  ;;  %v388_v44 = vld [vmem:[#allocation2 + $0x18] sm:$0xf]  ;;  %v312_v46 = vrot.slane %v308_v31, 4  ;;  %v391_v47 = vld [vmem:[#allocation2 + $0x1c] sm:$0x1] }
  0x26   : > { %375 = vst [vmem:[#allocation2 + $0x8] sm:$0xf] %v374_v39  ;;  %381 = vst [vmem:[#allocation2 + $0xc] sm:$0x1] %v380_v40  ;;  %v383_v45 = vsel %vm2482_vm4, %v303_v35, %v382_v36  ;;  %v319_v48 = vor.u32 %v317_v26, %v316_v32  ;;  %v394_v49 = vld [vmem:[#allocation2 + $0x20] sm:$0xf]  ;;  %v386_v51 = vsel %vm2489_vm5, %v304_v41, %v385_v42 }
  0x27   : > { %v320_v50 = vrot.slane %v316_v32, 4  ;;  %384 = vst [vmem:[#allocation2 + $0x10] sm:$0xf] %v383_v45  ;;  %v389_v52 = vsel %vm2482_vm4, %v311_v43, %v388_v44  ;;  %v397_v53 = vld [vmem:[#allocation2 + $0x24] sm:$0x1]  ;;  %v324_v54 = vrot.slane %v322_v27, 7  ;;  %v392_v56 = vsel %vm2489_vm5, %v312_v46, %v391_v47 }
  0x28   : > { %v330_v55 = vshrl.u32 %v2477_v16, 16  ;;  %387 = vst [vmem:[#allocation2 + $0x14] sm:$0x1] %v386_v51  ;;  %390 = vst [vmem:[#allocation2 + $0x18] sm:$0xf] %v389_v52  ;;  %v395_v57 = vsel %vm2482_vm4, %v319_v48, %v394_v49  ;;  %v333_v61 = vshll.u32 %v2477_v16, 16 }
  0x29   : > { %v398_v58 = vsel %vm2489_vm5, %v320_v50, %v397_v53  ;;  %v400_v59 = vld [vmem:[#allocation2 + $0x28] sm:$0xf]  ;;  %v403_v60 = vld [vmem:[#allocation2 + $0x2c] sm:$0x1]  ;;  %393 = vst [vmem:[#allocation2 + $0x1c] sm:$0x1] %v392_v56  ;;  %v327_v62 = vor.u32 %v325_v28, %v324_v54 }
  0x2a   : > { %396 = vst [vmem:[#allocation2 + $0x20] sm:$0xf] %v395_v57  ;;  %399 = vst [vmem:[#allocation2 + $0x24] sm:$0x1] %v398_v58  ;;  %v328_v63 = vrot.slane %v324_v54, 4  ;;  %v332_v0 = vrot.slane %v330_v55, 7 }
  0x2b   : > { %v338_v1 = vshrl.u32 %v287_v37, 16  ;;  %v406_v2 = vld [vmem:[#allocation2 + $0x30] sm:$0xf]  ;;  %v409_v3 = vld [vmem:[#allocation2 + $0x34] sm:$0x1]  ;;  %v341_v4 = vshll.u32 %v287_v37, 16  ;;  %v401_v6 = vsel %vm2482_vm4, %v327_v62, %v400_v59 }
  0x2c   : > { %v346_v5 = vshrl.u32 %v288_v38, 16  ;;  %v404_v7 = vsel %vm2489_vm5, %v328_v63, %v403_v60  ;;  %v335_v8 = vor.u32 %v333_v61, %v332_v0  ;;  %v336_v9 = vrot.slane %v332_v0, 4  ;;  %402 = vst [vmem:[#allocation2 + $0x28] sm:$0xf] %v401_v6  ;;  %v412_v11 = vld [vmem:[#allocation2 + $0x38] sm:$0xf] }
  0x2d   : > { %405 = vst [vmem:[#allocation2 + $0x2c] sm:$0x1] %v404_v7  ;;  %v340_v10 = vrot.slane %v338_v1, 7  ;;  %v349_v13 = vshll.u32 %v288_v38, 16  ;;  %v415_v16 = vld [vmem:[#allocation2 + $0x3c] sm:$0x1] }
  0x2e   : > { %v348_v12 = vrot.slane %v346_v5, 7  ;;  %v407_v14 = vsel %vm2482_vm4, %v335_v8, %v406_v2  ;;  %v410_v15 = vsel %vm2489_vm5, %v336_v9, %v409_v3  ;;  %v418_v17 = vld [vmem:[#allocation2 + $0x40] sm:$0xf]  ;;  %v421_v18 = vld [vmem:[#allocation2 + $0x44] sm:$0x1] }
  0x2f   : > { %408 = vst [vmem:[#allocation2 + $0x30] sm:$0xf] %v407_v14  ;;  %411 = vst [vmem:[#allocation2 + $0x34] sm:$0x1] %v410_v15  ;;  %v343_v20 = vor.u32 %v341_v4, %v340_v10  ;;  %v344_v21 = vrot.slane %v340_v10, 4 }
  0x30   : > { %v351_v22 = vor.u32 %v349_v13, %v348_v12  ;;  %v352_v23 = vrot.slane %v348_v12, 4 }
  0x31   : > { %v413_v25 = vsel %vm2482_vm4, %v343_v20, %v412_v11  ;;  %v416_v26 = vsel %vm2489_vm5, %v344_v21, %v415_v16 }
  0x32   : > { %v419_v27 = vsel %vm2482_vm4, %v351_v22, %v418_v17  ;;  %v422_v28 = vsel %vm2489_vm5, %v352_v23, %v421_v18  ;;  %414 = vst [vmem:[#allocation2 + $0x38] sm:$0xf] %v413_v25  ;;  %417 = vst [vmem:[#allocation2 + $0x3c] sm:$0x1] %v416_v26 }
  0x33   : > { %420 = vst [vmem:[#allocation2 + $0x40] sm:$0xf] %v419_v27  ;;  %423 = vst [vmem:[#allocation2 + $0x44] sm:$0x1] %v422_v28 }
  0x34 PF: > { %v2270_v29 = vld [vmem:[%s2946_s1 + $0x78] sm:$0xff]   ;;  %v2274_v31 = vld [vmem:[%s2946_s1 + $0x70] sm:$0xff]   ;;  %v2278_v35 = vld [vmem:[%s2946_s1 + $0x68] sm:$0xff]   ;;  %s2033_s12 = sshll.u32 %s2378_s18, 5  ;;  %vm436_vm6 = vsmask.f32 3328 }
  0x35   : > { %v2271_v30 = vld [vmem:[%s2946_s1 + $0x38] sm:$0xff]   ;;  %2057 = vmatprep.subr.bf16.mxu0 %v2270_v29  ;;  %v2275_v32 = vld [vmem:[%s2946_s1 + $0x30] sm:$0xff]   ;;  %v2279_v36 = vld [vmem:[%s2946_s1 + $0x28] sm:$0xff]   ;;  %s2621_s29 = scalar_lea.vmem [#allocation2], %s2033_s12  ;;  %vm507_vm7 = vcmask 1042432   ;;  %vm508_vm9 = vcmask 1046532  }
  0x36   : > { %v2272_v19 = vld [vmem:[%s2946_s1 + $0xf8] sm:$0xff]   ;;  %2058 = vmatpush3.bf16.msra.mxu0 %v2271_v30  ;;  %v2276_v33 = vld [vmem:[%s2946_s1 + $0xf0] sm:$0xff]   ;;  %v2280_v37 = vld [vmem:[%s2946_s1 + $0xe8] sm:$0xff]   ;;  %vm437_vm8 = vsmask.f32 7440  ;;  %s2036_s8 = sshll.u32 %s2378_s18, 4 }
  0x37   : > { %v2273_v24 = vld [vmem:[%s2946_s1 + $0xb8] sm:$0xff]   ;;  %2085 = vmatprep.subr.bf16.mxu1 %v2272_v19  ;;  %2059 = vmatprep.subr.bf16.mxu0 %v2274_v31  ;;  %v2277_v34 = vld [vmem:[%s2946_s1 + $0xb0] sm:$0xff]   ;;  %v2281_v38 = vld [vmem:[%s2946_s1 + $0xa8] sm:$0xff]   ;;  %s1757_s9 = scalar_lea.vmem %s2463_s30, %s2036_s8 }
  0x38   : > { %2086 = vmatpush3.bf16.msra.mxu1 %v2273_v24  ;;  %v2282_v39 = vld [vmem:[%s2946_s1 + $0x60] sm:$0xff]   ;;  %v2286_v43 = vld [vmem:[%s2946_s1 + $0x58] sm:$0xff]   ;;  %v2290_v47 = vld [vmem:[%s2946_s1 + $0x50] sm:$0xff]  }
  0x39   : > { %2087 = vmatprep.subr.bf16.mxu1 %v2276_v33  ;;  %v2283_v40 = vld [vmem:[%s2946_s1 + $0x20] sm:$0xff]   ;;  %v2287_v44 = vld [vmem:[%s2946_s1 + $0x18] sm:$0xff]   ;;  %v2291_v48 = vld [vmem:[%s2946_s1 + $0x10] sm:$0xff]  }
  0x3a   : > { %2060 = vmatpush3.bf16.msra.mxu0 %v2275_v32  ;;  %v2284_v41 = vld [vmem:[%s2946_s1 + $0xe0] sm:$0xff]   ;;  %v2288_v45 = vld [vmem:[%s2946_s1 + $0xd8] sm:$0xff]   ;;  %v2292_v49 = vld [vmem:[%s2946_s1 + $0xd0] sm:$0xff]  }
  0x3b   : > { %2061 = vmatprep.subr.bf16.mxu0 %v2278_v35  ;;  %v2285_v42 = vld [vmem:[%s2946_s1 + $0xa0] sm:$0xff]   ;;  %v2289_v46 = vld [vmem:[%s2946_s1 + $0x98] sm:$0xff]   ;;  %v2293_v50 = vld [vmem:[%s2946_s1 + $0x90] sm:$0xff]  }
  0x3c   : > { %2088 = vmatpush3.bf16.msra.mxu1 %v2277_v34  ;;  %v2294_v51 = vld [vmem:[%s2946_s1 + $0x48] sm:$0xff]   ;;  %v2298_v55 = vld [vmem:[%s2946_s1 + $0x40] sm:$0xff]   ;;  %v2303_v8 = vld [vmem:[%s2946_s1 + $0x178] sm:$0xff]  }
  0x3d   : > { %2089 = vmatprep.subr.bf16.mxu1 %v2280_v37  ;;  %v2295_v52 = vld [vmem:[%s2946_s1 + $0x8] sm:$0xff]   ;;  %v2299_v56 = vld [vmem:[%s2946_s1] sm:$0xff]   ;;  %v2637_v13 = vld [vmem:[%s2621_s29 + $0x10] sm:$0xf] }
  0x3e   : > { %2062 = vmatpush3.bf16.msra.mxu0 %v2279_v36  ;;  %v2296_v53 = vld [vmem:[%s2946_s1 + $0xc8] sm:$0xff]   ;;  %v2300_v57 = vld [vmem:[%s2946_s1 + $0xc0] sm:$0xff]   ;;  %vm2641_vm10 = vmor %vm436_vm6, %vm437_vm8 }
  0x3f   : > { %2063 = vmatprep.subr.bf16.mxu0 %v2282_v39  ;;  %v2297_v54 = vld [vmem:[%s2946_s1 + $0x88] sm:$0xff]   ;;  %v428_v58 = vld [vmem:[%s2621_s29] sm:$0xf]  ;;  %v432_v60 = vld [vmem:[%s2621_s29 + $0x4] sm:$0x1] }
  0x40   : > { %2090 = vmatpush3.bf16.msra.mxu1 %v2281_v38  ;;  %v429_v59 = vld [vmem:[%s2621_s29 + $0x8] sm:$0xf]  ;;  %v433_v61 = vld [vmem:[%s2621_s29 + $0xc] sm:$0x1]  ;;  %v440_v62 = vshrl.u32 %v428_v58, 16  ;;  %v443_v63 = vshll.u32 %v428_v58, 16  ;;  %vm2651_vm11 = vmor %vm507_vm7, %vm508_vm9 }
  0x41   : > { %2091 = vmatprep.subr.bf16.mxu1 %v2284_v41  ;;  %v449_v0 = vshll.u32 %v432_v60, 16  ;;  %v454_v1 = vshrl.u32 %v429_v59, 16  ;;  %v457_v2 = vshll.u32 %v429_v59, 16  ;;  %v463_v3 = vshll.u32 %v433_v61, 16  ;;  %v2301_v7 = vld [vmem:[%s2946_s1 + $0x80] sm:$0xff]   ;;  %v2306_v30 = vld [vmem:[%s2946_s1 + $0x1f8] sm:$0xff]  }
  0x42   : > { %2064 = vmatpush3.bf16.msra.mxu0 %v2283_v40  ;;  %v442_v4 = vrot.slane %v440_v62, 4  ;;  %v445_v5 = vrot.slane %v443_v63, 5  ;;  %v2634_v12 = vld [vmem:[%s2621_s29 + $0x8] sm:$0xf]  ;;  %v512_v17 = vrot.slane %v432_v60, 5  ;;  %v516_v20 = vrot.slane %v433_v61, 5 }
  0x43   : > { %2065 = vmatprep.subr.bf16.mxu0 %v2286_v43  ;;  %v456_v6 = vrot.slane %v454_v1, 4  ;;  %v451_v9 = vrot.slane %v449_v0, 5  ;;  %v459_v10 = vrot.slane %v457_v2, 5  ;;  %v465_v16 = vrot.slane %v463_v3, 5  ;;  %v495_v22 = vld [vmem:[%s2621_s29] sm:$0xe] }
  0x44   : > { %2092 = vmatpush3.bf16.msra.mxu1 %v2285_v42  ;;  %v446_v11 = vor.u32 %v445_v5, %v442_v4  ;;  %v1934_v21 = vcombine.low %v2634_v12, %v2637_v13  ;;  %v496_v23 = vld [vmem:[%s2621_s29 + $0x8] sm:$0xe]  ;;  %v1888_v28 = vrot.slane %v495_v22, 9  ;;  %v1928_v24 = vcombine.low %v428_v58, %v429_v59  ;;  %v2305_v31 = vld [vmem:[%s2946_s1 + $0x138] sm:$0xff]   ;;  %v2308_v37 = vld [vmem:[%s2946_s1 + $0x170] sm:$0xff]  }
  0x45   : > { %2093 = vmatprep.subr.bf16.mxu1 %v2288_v45  ;;  %v460_v15 = vor.u32 %v459_v10, %v456_v6  ;;  %v1889_v29 = vrot.slane %v496_v23, 9  ;;  %v2307_v35 = vld [vmem:[%s2946_s1 + $0x1b8] sm:$0xff]   ;;  %v2310_v38 = vld [vmem:[%s2946_s1 + $0x1f0] sm:$0xff]   ;;  %v2312_v41 = vld [vmem:[%s2946_s1 + $0x168] sm:$0xff]  }
  0x46   : > { %2066 = vmatpush3.bf16.msra.mxu0 %v2287_v44  ;;  %v447_v18 = vrot.slane %v446_v11, 4  ;;  %1466 = vmatprep.mubr.bf16.mxu1 %v1934_v21  ;;  %v513_v33 = vsel %vm2651_vm11, %v1888_v28, %v512_v17  ;;  %v2309_v39 = vld [vmem:[%s2946_s1 + $0x130] sm:$0xff]   ;;  %v2314_v42 = vld [vmem:[%s2946_s1 + $0x1e8] sm:$0xff]   ;;  %v2316_v45 = vld [vmem:[%s2946_s1 + $0x160] sm:$0xff]  }
  0x47   : > { %2067 = vmatprep.subr.bf16.mxu0 %v2290_v47  ;;  %v461_v25 = vrot.slane %v460_v15, 4  ;;  %v517_v34 = vsel %vm2651_vm11, %v1889_v29, %v516_v20  ;;  %v2311_v40 = vld [vmem:[%s2946_s1 + $0x1b0] sm:$0xff]   ;;  %v2313_v43 = vld [vmem:[%s2946_s1 + $0x128] sm:$0xff]   ;;  %v2318_v47 = vld [vmem:[%s2946_s1 + $0x1e0] sm:$0xff]  }
  0x48   : > { %2094 = vmatpush3.bf16.msra.mxu1 %v2289_v46  ;;  %v452_v27 = vsel %vm2641_vm10, %v447_v18, %v451_v9  ;;  %v1932_v36 = vcombine.low %v513_v33, %v517_v34  ;;  %v2315_v44 = vld [vmem:[%s2946_s1 + $0x1a8] sm:$0xff]   ;;  %v539_v46 = vshrl.u32 %v2634_v12, 16  ;;  %v435_v58 = vld [vmem:[%s2621_s29 + $0x1c] sm:$0x1]  ;;  %v1896_v10 = vld [vmem:[%s2621_s29 + $0x18] sm:$0xf] }
  0x49   : > { %2095 = vmatprep.subr.bf16.mxu1 %v2292_v49  ;;  %v466_v19 = vsel %vm2641_vm10, %v461_v25, %v465_v16  ;;  %v2317_v49 = vld [vmem:[%s2946_s1 + $0x120] sm:$0xff]   ;;  %v491_v0 = vshll.u32 %v435_v58, 16  ;;  %v2322_v5 = vld [vmem:[%s2946_s1 + $0x1d8] sm:$0xff]   ;;  %v567_v16 = vshrl.u32 %v1896_v10, 16  ;;  %v2326_v17 = vld [vmem:[%s2946_s1 + $0x150] sm:$0xff]   ;;  %v570_v20 = vshll.u32 %v1896_v10, 16 }
  0x4a   : > { %2068 = vmatpush3.bf16.msra.mxu0 %v2291_v48  ;;  %v1930_v32 = vcombine.low %v452_v27, %v466_v19  ;;  %v542_v48 = vshll.u32 %v2634_v12, 16  ;;  %v541_v1 = vrot.slane %v539_v46, 4  ;;  %v2324_v6 = vld [vmem:[%s2946_s1 + $0x198] sm:$0xff]   ;;  %v1897_v11 = vld [vmem:[%s2621_s29 + $0x20] sm:$0xf]  ;;  %v2330_v46 = vld [vmem:[%s2946_s1 + $0x148] sm:$0xff]  }
  0x4b   : > { %2069 = vmatprep.subr.bf16.mxu0 %v2294_v51  ;;  %v2319_v51 = vld [vmem:[%s2946_s1 + $0x1a0] sm:$0xff]   ;;  %v493_v15 = vrot.slane %v491_v0, 5  ;;  %v1935_v21 = vcombine.low %v1896_v10, %v1897_v11  ;;  %v497_v22 = vld [vmem:[%s2621_s29 + $0x10] sm:$0xe]  ;;  %v498_v23 = vld [vmem:[%s2621_s29 + $0x18] sm:$0xe] }
  0x4c   : > { %2096 = vmatpush3.bf16.msra.mxu1 %v2293_v50  ;;  %1417 = vmatprep.mubr.bf16.mxu0 %v1930_v32  ;;  %v553_v50 = vshrl.u32 %v2637_v13, 16  ;;  %v544_v12 = vrot.slane %v542_v48, 5  ;;  %v1890_v19 = vrot.slane %v497_v22, 9  ;;  %v1891_v34 = vrot.slane %v498_v23, 9  ;;  %v2331_v48 = vld [vmem:[%s2946_s1 + $0x108] sm:$0xff]   ;;  %v2347_v14 = vld [vmem:[%s2946_s1 + $0x200] sm:$0xff]  }
  0x4d   : > { %2097 = vmatprep.subr.bf16.mxu1 %v2296_v53  ;;  %v2320_v53 = vld [vmem:[%s2946_s1 + $0x158] sm:$0xff]   ;;  %v1902_v0 = vld [vmem:[%s2621_s29 + $0x8] sm:$0xe]  ;;  %v2351_v26 = vld [vmem:[%s2948_s3 + $0x20] sm:$0xff]  }
  0x4e   : > { %2070 = vmatpush3.bf16.msra.mxu0 %v2295_v52  ;;  %v556_v52 = vshll.u32 %v2637_v13, 16  ;;  %v555_v25 = vrot.slane %v553_v50, 4  ;;  %v2332_v50 = vld [vmem:[%s2946_s1 + $0x1c8] sm:$0xff]  }
  0x4f   : > { %2071 = vmatprep.subr.bf16.mxu0 %v2298_v55  ;;  %v2719_v55 = vld [vmem:[%s2621_s29 + $0x10] sm:$0xf] }
  0x50   : > { %2098 = vmatpush3.bf16.msra.mxu1 %v2297_v54  ;;  %v2321_v54 = vld [vmem:[%s2946_s1 + $0x118] sm:$0xff]   ;;  %v468_v59 = vshrl.u32 %v2719_v55, 16  ;;  %v471_v60 = vshll.u32 %v2719_v55, 16  ;;  %v558_v27 = vrot.slane %v556_v52, 5 }
  0x51   : > { %2099 = vmatprep.subr.bf16.mxu1 %v2300_v57  ;;  %v434_v57 = vld [vmem:[%s2621_s29 + $0x14] sm:$0x1] }
  0x52   : > { %2072 = vmatpush3.bf16.msra.mxu0 %v2299_v56  ;;  %v2722_v56 = vld [vmem:[%s2621_s29 + $0x18] sm:$0xf]  ;;  %v477_v61 = vshll.u32 %v434_v57, 16  ;;  %v470_v2 = vrot.slane %v468_v59, 4  ;;  %v473_v3 = vrot.slane %v471_v60, 5 }
  0x53   : > { %2113 = vmatprep.subr.bf16.mxu0 %v2303_v8  ;;  %v482_v62 = vshrl.u32 %v2722_v56, 16  ;;  %v485_v63 = vshll.u32 %v2722_v56, 16  ;;  %v1929_v33 = vcombine.low %v2719_v55, %v2722_v56  ;;  %v2334_v55 = vld [vmem:[%s2946_s1 + $0x140] sm:$0xff]   ;;  %v1898_v59 = vld [vmem:[%s2621_s29 + $0xc] sm:$0x1] }
  0x54   : > { %2100 = vmatpush3.bf16.msra.mxu1 %v2301_v7  ;;  %v479_v7 = vrot.slane %v477_v61, 5  ;;  %v474_v9 = vor.u32 %v473_v3, %v470_v2  ;;  %v1899_v60 = vld [vmem:[%s2621_s29 + $0x14] sm:$0x1]  ;;  %v1906_v2 = vrot.slane %v1902_v0, 9  ;;  %v608_v3 = vrot.slane %v1898_v59, 5 }
  0x55   : > { %2141 = vmatprep.subr.bf16.mxu1 %v2306_v30  ;;  %1418 = vmatmul.mubr.bf16.vlgmr.msra.gmra.mxu0 %v1928_v24  ;;  %v484_v4 = vrot.slane %v482_v62, 4  ;;  %v487_v8 = vrot.slane %v485_v63, 5  ;;  %v569_v30 = vrot.slane %v567_v16, 4  ;;  %v520_v24 = vrot.slane %v434_v57, 5  ;;  %v2335_v57 = vld [vmem:[%s2946_s1 + $0x100] sm:$0xff]  }
  0x56   : > { %2114 = vmatpush3.bf16.msra.mxu0 %v2305_v31  ;;  %v475_v18 = vrot.slane %v474_v9, 4  ;;  %v2327_v31 = vld [vmem:[%s2946_s1 + $0x110] sm:$0xff]   ;;  %v548_v62 = vshll.u32 %v1898_v59, 16  ;;  %v562_v63 = vshll.u32 %v1899_v60, 16  ;;  %v2338_v9 = vld [vmem:[%s2946_s1 + $0x238] sm:$0xff]  }
  0x57   : > { %1467 = vmatmul.mubr.bf16.vlgmr.msra.gmra.mxu1 %v1932_v36  ;;  %2115 = vmatprep.subr.bf16.mxu0 %v2308_v37  ;;  %v488_v13 = vor.u32 %v487_v8, %v484_v4  ;;  %v545_v36 = vor.u32 %v544_v12, %v541_v1  ;;  %v1903_v1 = vld [vmem:[%s2621_s29 + $0x10] sm:$0xe]  ;;  %v2337_v8 = vld [vmem:[%s2946_s1 + $0x180] sm:$0xff]   ;;  %v2850_v0 = vld [vmem:[%s2621_s29 + $0x2c] sm:$0x1] }
  0x58   : > { %2142 = vmatpush3.bf16.msra.mxu1 %v2307_v35  ;;  %v480_v29 = vsel %vm2641_vm10, %v475_v18, %v479_v7  ;;  %1474 = vmatprep.mubr.bf16.mxu1 %v1935_v21  ;;  %v524_v35 = vrot.slane %v435_v58, 5  ;;  %v2336_v58 = vld [vmem:[%s2946_s1 + $0x1c0] sm:$0xff]   ;;  %v1907_v4 = vrot.slane %v1903_v1, 9  ;;  %v564_v7 = vrot.slane %v562_v63, 5  ;;  %v2807_v18 = vld [vmem:[%s2621_s29 + $0x18] sm:$0xf] }
  0x59   : > { %2143 = vmatprep.subr.bf16.mxu1 %v2310_v38  ;;  %v489_v28 = vrot.slane %v488_v13, 4  ;;  %v572_v38 = vrot.slane %v570_v20, 5  ;;  %v2800_v13 = vld [vmem:[%s2621_s29 + $0x10] sm:$0xf]  ;;  %v2810_v20 = vld [vmem:[%s2621_s29 + $0x14] sm:$0x1] }
  0x5a   : > { %2116 = vmatpush3.bf16.msra.mxu0 %v2309_v39  ;;  %v521_v39 = vsel %vm2651_vm11, %v1890_v19, %v520_v24  ;;  %v2813_v21 = vld [vmem:[%s2621_s29 + $0x1c] sm:$0x1]  ;;  %v635_v23 = vshrl.u32 %v2800_v13, 16  ;;  %v2842_v59 = vld [vmem:[%s2621_s29 + $0x24] sm:$0x1] }
  0x5b   : > { %2117 = vmatprep.subr.bf16.mxu0 %v2312_v41  ;;  %v494_v32 = vsel %vm2641_vm10, %v489_v28, %v493_v15  ;;  %v559_v41 = vor.u32 %v558_v27, %v555_v25  ;;  %v638_v25 = vshll.u32 %v2800_v13, 16  ;;  %v644_v27 = vshll.u32 %v2810_v20, 16  ;;  %v2340_v28 = vld [vmem:[%s2946_s1 + $0x230] sm:$0xff]  }
  0x5c   : > { %2144 = vmatpush3.bf16.msra.mxu1 %v2311_v40  ;;  %v1931_v37 = vcombine.low %v480_v29, %v494_v32  ;;  %v2328_v40 = vld [vmem:[%s2946_s1 + $0x1d0] sm:$0xff]   ;;  %v649_v29 = vshrl.u32 %v2807_v18, 16  ;;  %v658_v19 = vshll.u32 %v2813_v21, 16 }
  0x5d   : > { %2145 = vmatprep.subr.bf16.mxu1 %v2314_v42  ;;  %v525_v42 = vsel %vm2651_vm11, %v1891_v34, %v524_v35  ;;  %v560_v52 = vrot.slane %v559_v41, 4  ;;  %v640_v32 = vrot.slane %v638_v25, 5  ;;  %v1900_v34 = vld [vmem:[%s2621_s29 + $0x1c] sm:$0x1]  ;;  %v2341_v35 = vld [vmem:[%s2946_s1 + $0x228] sm:$0xff]   ;;  %v704_v25 = vrot.slane %v2810_v20, 5 }
  0x5e   : > { %2118 = vmatpush3.bf16.msra.mxu0 %v2313_v43  ;;  %v2329_v43 = vld [vmem:[%s2946_s1 + $0x190] sm:$0xff]   ;;  %1425 = vmatprep.mubr.bf16.mxu0 %v1931_v37 }
  0x5f   : > { %2119 = vmatprep.subr.bf16.mxu0 %v2316_v45  ;;  %v1933_v45 = vcombine.low %v521_v39, %v525_v42  ;;  %1426 = vmatmul.mubr.bf16.gmra.mxu0 %v1929_v33  ;;  %v646_v33 = vrot.slane %v644_v27, 5  ;;  %v1901_v39 = vld [vmem:[%s2621_s29 + $0x24] sm:$0x1]  ;;  %v1904_v42 = vld [vmem:[%s2621_s29 + $0x18] sm:$0xe] }
  0x60   : > { %2146 = vmatpush3.bf16.msra.mxu1 %v2315_v44  ;;  %v581_v44 = vshrl.u32 %v1897_v11, 16 }
  0x61   : > { %2147 = vmatprep.subr.bf16.mxu1 %v2318_v47  ;;  %v584_v47 = vshll.u32 %v1897_v11, 16  ;;  %1475 = vmatmul.mubr.bf16.gmra.mxu1 %v1933_v45  ;;  %v609_v11 = vsel %vm2651_vm11, %v1906_v2, %v608_v3  ;;  %v576_v45 = vshll.u32 %v1900_v34, 16  ;;  %v2343_v2 = vld [vmem:[%s2946_s1 + $0x220] sm:$0xff]  }
  0x62   : > { %2120 = vmatpush3.bf16.msra.mxu0 %v2317_v49  ;;  %v546_v49 = vrot.slane %v545_v36, 4  ;;  %v651_v36 = vrot.slane %v649_v29, 4  ;;  %v1921_v29 = vld [vmem:[%s2621_s29 + $0x18] sm:$0xe] }
  0x63   : > { %2121 = vmatprep.subr.bf16.mxu0 %v2320_v53  ;;  %v2333_v53 = vld [vmem:[%s2946_s1 + $0x188] sm:$0xff]   ;;  %v586_v56 = vrot.slane %v584_v47, 5  ;;  %v1908_v47 = vrot.slane %v1904_v42, 9  ;;  %v716_v42 = vrot.slane %v2850_v0, 5 }
  0x64   : > { %2148 = vmatpush3.bf16.msra.mxu1 %v2319_v51  ;;  %v573_v51 = vor.u32 %v572_v38, %v569_v30  ;;  %v652_v30 = vshll.u32 %v2807_v18, 16  ;;  %v660_v38 = vrot.slane %v658_v19, 5  ;;  %v708_v19 = vrot.slane %v2813_v21, 5 }
  0x65   : > { %2149 = vmatprep.subr.bf16.mxu1 %v2322_v5  ;;  %v612_v5 = vrot.slane %v1899_v60, 5 }
  0x66   : > { %2122 = vmatpush3.bf16.msra.mxu0 %v2321_v54  ;;  %v583_v54 = vrot.slane %v581_v44, 4  ;;  %v2785_v61 = vrot.slane %v573_v51, 4  ;;  %v654_v37 = vrot.slane %v652_v30, 5  ;;  %v620_v44 = vrot.slane %v1901_v39, 5 }
  0x67   : > { %2123 = vmatprep.subr.bf16.mxu0 %v2326_v17  ;;  %v613_v12 = vsel %vm2651_vm11, %v1907_v4, %v612_v5  ;;  %v565_v17 = vsel %vm2641_vm10, %v560_v52, %v564_v7  ;;  %v1940_v51 = vcombine.low %v2800_v13, %v2807_v18  ;;  %v578_v52 = vrot.slane %v576_v45, 5 }
  0x68   : > { %2150 = vmatpush3.bf16.msra.mxu1 %v2324_v6  ;;  %v550_v6 = vrot.slane %v548_v62, 5  ;;  %v587_v10 = vor.u32 %v586_v56, %v583_v54  ;;  %v1938_v15 = vcombine.low %v609_v11, %v613_v12  ;;  %v686_v12 = vshll.u32 %v2850_v0, 16 }
  0x69   : > { %2151 = vmatprep.subr.bf16.mxu1 %v2328_v40  ;;  %v616_v40 = vrot.slane %v1900_v34, 5  ;;  %v579_v63 = vsel %vm2641_vm10, %v2785_v61, %v578_v52  ;;  %v2346_v34 = vld [vmem:[%s2946_s1 + $0x208] sm:$0xff]   ;;  %v2353_v52 = vld [vmem:[%s2948_s3 + $0x10] sm:$0xff]  }
  0x6a   : > { %2124 = vmatpush3.bf16.msra.mxu0 %v2327_v31  ;;  %v551_v16 = vsel %vm2641_vm10, %v546_v49, %v550_v6  ;;  %1515 = vmatprep.mubr.bf16.mxu0 %v1938_v15  ;;  %v588_v24 = vrot.slane %v587_v10, 4  ;;  %v637_v31 = vrot.slane %v635_v23, 4  ;;  %v590_v49 = vshll.u32 %v1901_v39, 16  ;;  %v2344_v15 = vld [vmem:[%s2946_s1 + $0x218] sm:$0xff]   ;;  %v1920_v23 = vld [vmem:[%s2621_s29 + $0x10] sm:$0xe] }
  0x6b   : > { %2125 = vmatprep.subr.bf16.mxu0 %v2330_v46  ;;  %v1936_v22 = vcombine.low %v551_v16, %v565_v17  ;;  %v655_v46 = vor.u32 %v654_v37, %v651_v36  ;;  %v672_v6 = vshll.u32 %v2842_v59, 16  ;;  %v1924_v30 = vrot.slane %v1920_v23, 9  ;;  %v1923_v36 = vld [vmem:[%s2621_s29 + $0x28] sm:$0xe] }
  0x6c   : > { %2152 = vmatpush3.bf16.msra.mxu1 %v2329_v43  ;;  %v641_v41 = vor.u32 %v640_v32, %v637_v31  ;;  %v1905_v43 = vld [vmem:[%s2621_s29 + $0x20] sm:$0xe]  ;;  %v1925_v31 = vrot.slane %v1921_v29, 9 }
  0x6d   : > { %2153 = vmatprep.subr.bf16.mxu1 %v2332_v50  ;;  %v656_v54 = vrot.slane %v655_v46, 4  ;;  %v674_v17 = vrot.slane %v672_v6, 5  ;;  %v705_v20 = vsel %vm2651_vm11, %v1924_v30, %v704_v25 }
  0x6e   : > { %2126 = vmatpush3.bf16.msra.mxu0 %v2331_v48  ;;  %v1909_v48 = vrot.slane %v1905_v43, 9  ;;  %v642_v50 = vrot.slane %v641_v41, 4  ;;  %v709_v21 = vsel %vm2651_vm11, %v1925_v31, %v708_v19  ;;  %v712_v41 = vrot.slane %v2842_v59, 5 }
  0x6f   : > { %2127 = vmatprep.subr.bf16.mxu0 %v2334_v55  ;;  %v617_v55 = vsel %vm2651_vm11, %v1908_v47, %v616_v40  ;;  %v661_v3 = vsel %vm2641_vm10, %v656_v54, %v660_v38  ;;  %v1944_v39 = vcombine.low %v705_v20, %v709_v21  ;;  %v2355_v54 = vld [vmem:[%s2948_s3] sm:$0xff]  }
  0x70   : > { %2154 = vmatpush3.bf16.msra.mxu1 %v2333_v53  ;;  %v2834_v53 = vld [vmem:[%s2621_s29 + $0x20] sm:$0xf]  ;;  %v621_v56 = vsel %vm2651_vm11, %v1909_v48, %v620_v44  ;;  %v647_v60 = vsel %vm2641_vm10, %v642_v50, %v646_v33  ;;  %v1927_v44 = vrot.slane %v1923_v36, 9  ;;  %v2348_v48 = vld [vmem:[%s2948_s3 + $0x38] sm:$0xff]   ;;  %v2350_v50 = vld [vmem:[%s2948_s3 + $0x28] sm:$0xff]  }
  0x71   : > { %2155 = vmatprep.subr.bf16.mxu1 %v2336_v58  ;;  %v1915_v58 = vld [vmem:[%s2621_s29 + $0x28] sm:$0xf]  ;;  %v1939_v62 = vcombine.low %v617_v55, %v621_v56  ;;  %v663_v1 = vshrl.u32 %v2834_v53, 16  ;;  %v666_v5 = vshll.u32 %v2834_v53, 16  ;;  %v1942_v61 = vcombine.low %v647_v60, %v661_v3 }
  0x72   : > { %2128 = vmatpush3.bf16.msra.mxu0 %v2335_v57  ;;  %v592_v57 = vrot.slane %v590_v49, 5  ;;  %v680_v11 = vshll.u32 %v1915_v58, 16  ;;  %v1941_v38 = vcombine.low %v2834_v53, %v1915_v58  ;;  %v717_v46 = vsel %vm2651_vm11, %v1927_v44, %v716_v42  ;;  %v2349_v49 = vld [vmem:[%s2948_s3 + $0x30] sm:$0xff]   ;;  %v2354_v53 = vld [vmem:[%s2948_s3 + $0x8] sm:$0xff]  }
  0x73   : > { %2189 = vmatprep.subr.bf16.mxu0 %v2338_v9  ;;  %v668_v10 = vrot.slane %v666_v5, 5  ;;  %1564 = vmatprep.mubr.bf16.mxu1 %v1942_v61 }
  0x74   : > { %2156 = vmatpush3.bf16.msra.mxu1 %v2337_v8  ;;  %v593_v4 = vsel %vm2641_vm10, %v588_v24, %v592_v57  ;;  %v665_v8 = vrot.slane %v663_v1, 4  ;;  %v682_v18 = vrot.slane %v680_v11, 5  ;;  %v2345_v24 = vld [vmem:[%s2946_s1 + $0x210] sm:$0xff]  }
  0x75   : > { %1516 = vmatmul.mubr.bf16.vlgmr.msra.gmra.mxu0 %v1936_v22  ;;  %v1937_v7 = vcombine.low %v579_v63, %v593_v4  ;;  %v688_v22 = vrot.slane %v686_v12, 5  ;;  %2209 = vmatprep.subr.bf16.mxu1 %v2348_v48 }
  0x76   : > { %2190 = vmatpush3.bf16.msra.mxu0 %v2338_v9  ;;  %1523 = vmatprep.mubr.bf16.mxu0 %v1939_v62  ;;  %v677_v9 = vshrl.u32 %v1915_v58, 16  ;;  %v669_v16 = vor.u32 %v668_v10, %v665_v8 }
  0x77   : > { %2191 = vmatprep.subr.bf16.mxu0 %v2340_v28  ;;  %1565 = vmatmul.mubr.bf16.vlgmr.msra.gmra.mxu1 %v1940_v51  ;;  %v2352_v51 = vld [vmem:[%s2948_s3 + $0x18] sm:$0xff]  }
  0x78   : > { %v679_v13 = vrot.slane %v677_v9, 4  ;;  %v670_v27 = vrot.slane %v669_v16, 4  ;;  %2210 = vmatpush3.bf16.msra.mxu1 %v2348_v48 }
  0x79   : > { %2211 = vmatprep.subr.bf16.mxu1 %v2349_v49 }
  0x7a   : > { %2192 = vmatpush3.bf16.msra.mxu0 %v2340_v28  ;;  %v683_v28 = vor.u32 %v682_v18, %v679_v13  ;;  %v675_v32 = vsel %vm2641_vm10, %v670_v27, %v674_v17  ;;  %v1946_v27 = vld [vmem:[%s2947_s2] ss:$0 sm:$0xff] }
  0x7b   : > { %2193 = vmatprep.subr.bf16.mxu0 %v2341_v35 }
  0x7c   : > { %v684_v33 = vrot.slane %v683_v28, 4  ;;  %2212 = vmatpush3.bf16.msra.mxu1 %v2349_v49 }
  0x7d   : > { %1524 = vmatmul.mubr.bf16.gmra.mxu0 %v1937_v7  ;;  %2213 = vmatprep.subr.bf16.mxu1 %v2350_v50 }
  0x7e   : > { %2194 = vmatpush3.bf16.msra.mxu0 %v2341_v35  ;;  %v1922_v35 = vld [vmem:[%s2621_s29 + $0x20] sm:$0xe]  ;;  %v689_v37 = vsel %vm2641_vm10, %v684_v33, %v688_v22  ;;  %2205 = vmatprep.mubr.bf16.mxu0 %v1944_v39 }
  0x7f   : > { %2195 = vmatprep.subr.bf16.mxu0 %v2343_v2  ;;  %v1943_v40 = vcombine.low %v675_v32, %v689_v37  ;;  %v1926_v43 = vrot.slane %v1922_v35, 9 }
  0x80   : > { %2214 = vmatpush3.bf16.msra.mxu1 %v2350_v50 }
  0x81   : > { %1572 = vmatprep.mubr.bf16.mxu1 %v1943_v40  ;;  %v713_v45 = vsel %vm2651_vm11, %v1926_v43, %v712_v41  ;;  %2215 = vmatprep.subr.bf16.mxu1 %v2351_v26 }
  0x82   : > { %2196 = vmatpush3.bf16.msra.mxu0 %v2343_v2  ;;  %1573 = vmatmul.mubr.bf16.gmra.mxu1 %v1941_v38  ;;  %v1945_v47 = vcombine.low %v713_v45, %v717_v46 }
  0x83   : > { %2197 = vmatprep.subr.bf16.mxu0 %v2344_v15 }
  0x84   : > { %2216 = vmatpush3.bf16.msra.mxu1 %v2351_v26 }
  0x85   : > { %2217 = vmatprep.subr.bf16.mxu1 %v2352_v51 }
  0x86   : > { %2198 = vmatpush3.bf16.msra.mxu0 %v2344_v15 }
  0x87   : > { %2199 = vmatprep.subr.bf16.mxu0 %v2345_v24 }
  0x88   : > { %2218 = vmatpush3.bf16.msra.mxu1 %v2352_v51 }
  0x89   : > { %2219 = vmatprep.subr.bf16.mxu1 %v2353_v52 }
  0x8a   : > { %2200 = vmatpush3.bf16.msra.mxu0 %v2345_v24 }
  0x8b   : > { %2201 = vmatprep.subr.bf16.mxu0 %v2346_v34 }
  0x8c   : > { %2220 = vmatpush3.bf16.msra.mxu1 %v2353_v52 }
  0x8d   : > { %2221 = vmatprep.subr.bf16.mxu1 %v2354_v53 }
  0x8e   : > { %2202 = vmatpush3.bf16.msra.mxu0 %v2346_v34 }
  0x8f   : > { %2203 = vmatprep.subr.bf16.mxu0 %v2347_v14 }
  0x90   : > { %2222 = vmatpush3.bf16.msra.mxu1 %v2354_v53 }
  0x91   : > { %2223 = vmatprep.subr.bf16.mxu1 %v2355_v54 }
  0x92   : > { %2204 = vmatpush3.bf16.msra.mxu0 %v2347_v14 }
  0x94   : > { %2224 = vmatpush3.bf16.msra.mxu1 %v2355_v54 }
  0x95   : > { %2206 = vmatmul.mubr.bf16.vlgmr.msra.gmra.mxu0 %v1945_v47 }
 0x115   : > { %v2073_v55 = vpop.f32.mrf.mxu0 }
 0x117   : > { %v2074_v56 = vpop.f32.mrf.mxu0  ;;  %v2101_v58 = vpop.f32.mrf.mxu1 }
 0x118   : > { %v2075_v22 = vadd.f32 %v2074_v56, %v2073_v55 }
 0x119   : > { %v2076_v57 = vpop.f32.mrf.mxu0  ;;  %v2102_v60 = vpop.f32.mrf.mxu1 }
 0x11a   : > { %v1420_v24 = vadd.f32 %v2075_v22, %v1946_v27  ;;  %v2103_v31 = vadd.f32 %v2102_v60, %v2101_v58 }
 0x11b   : > { %v2077_v59 = vpop.f32.mrf.mxu0  ;;  %v2104_v0 = vpop.f32.mrf.mxu1 }
 0x11c   : > { %v2078_v28 = vadd.f32 %v2077_v59, %v2076_v57  ;;  %v1469_v41 = vadd.f32 %v2103_v31, %v1420_v24 }
 0x11d   : > { %v2105_v2 = vpop.f32.mrf.mxu1 }
 0x11e   : > { %v1423_v34 = vadd.f32 %v2078_v28, %v1946_v27  ;;  %v2106_v21 = vadd.f32 %v2105_v2, %v2104_v0 }
 0x11f   : > { %v2079_v62 = vpop.f32.mrf.mxu0 }
 0x120   : > { %v1472_v44 = vadd.f32 %v2106_v21, %v1423_v34 }
 0x121   : > { %v2080_v63 = vpop.f32.mrf.mxu0  ;;  %v2107_v3 = vpop.f32.mrf.mxu1 }
 0x122   : > { %v2081_v29 = vadd.f32 %v2080_v63, %v2079_v62 }
 0x123   : > { %v2082_v1 = vpop.f32.mrf.mxu0  ;;  %v2108_v6 = vpop.f32.mrf.mxu1 }
 0x124   : > { %v1428_v35 = vadd.f32 %v2081_v29, %v1946_v27  ;;  %v2109_v36 = vadd.f32 %v2108_v6, %v2107_v3 }
 0x125   : > { %v2083_v4 = vpop.f32.mrf.mxu0  ;;  %v2110_v8 = vpop.f32.mrf.mxu1 }
 0x126   : > { %v2084_v23 = vadd.f32 %v2083_v4, %v2082_v1  ;;  %v1477_v14 = vadd.f32 %v2109_v36, %v1428_v35 }
 0x127   : > { %v2111_v10 = vpop.f32.mrf.mxu1 }
 0x128   : > { %v1431_v32 = vadd.f32 %v2084_v23, %v1946_v27  ;;  %v2112_v33 = vadd.f32 %v2111_v10, %v2110_v8  ;;  %v2055_v8 = vld [vmem:[%s1757_s9 + $0x8] sm:$0xff]   ;;  %v2038_v10 = vld [vmem:[%s1757_s9] sm:$0xff]  }
 0x129   : > { %v2040_v22 = vunpack.c.h.bf16 %v2038_v10 }
 0x12a   : > { %v1480_v42 = vadd.f32 %v2112_v33, %v1431_v32 }
 0x135   : > { %v2129_v5 = vpop.f32.mrf.mxu0 }
 0x137   : > { %v2130_v61 = vpop.f32.mrf.mxu0  ;;  %v2157_v11 = vpop.f32.mrf.mxu1 }
 0x138   : > { %v2131_v37 = vadd.f32 %v2130_v61, %v2129_v5 }
 0x139   : > { %v2132_v7 = vpop.f32.mrf.mxu0  ;;  %v2158_v13 = vpop.f32.mrf.mxu1 }
 0x13a   : > { %v1518_v45 = vadd.f32 %v2131_v37, %v1469_v41  ;;  %v2159_v46 = vadd.f32 %v2158_v13, %v2157_v11  ;;  %v2044_v13 = vunpack.c.h.bf16 %v2055_v8 }
 0x13b   : > { %v2133_v9 = vpop.f32.mrf.mxu0  ;;  %v2160_v15 = vpop.f32.mrf.mxu1 }
 0x13c   : > { %v2134_v43 = vadd.f32 %v2133_v9, %v2132_v7  ;;  %v1567_v54 = vadd.f32 %v2159_v46, %v1518_v45  ;;  %v2019_v7 = vld [vmem:[%s2949_s4] ss:$0 sm:$0xff] }
 0x13d   : > { %v2135_v12 = vpop.f32.mrf.mxu0  ;;  %v2161_v17 = vpop.f32.mrf.mxu1 }
 0x13e   : > { %v1521_v51 = vadd.f32 %v2134_v43, %v1472_v44  ;;  %v2162_v52 = vadd.f32 %v2161_v17, %v2160_v15  ;;  %v2039_v17 = vunpack.c.l.bf16 %v2038_v10 }
 0x13f   : > { %v2136_v16 = vpop.f32.mrf.mxu0 }
 0x140   : > { %v2137_v39 = vadd.f32 %v2136_v16, %v2135_v12  ;;  %v1570_v60 = vadd.f32 %v2162_v52, %v1521_v51  ;;  %v2043_v12 = vunpack.c.l.bf16 %v2055_v8 }
 0x141   : > { %v2138_v18 = vpop.f32.mrf.mxu0 }
 0x142   : > { %v2163_v25 = vpop.f32.mrf.mxu1  ;;  %v1526_v49 = vadd.f32 %v2137_v39, %v1477_v14 }
 0x143   : > { %v2139_v19 = vpop.f32.mrf.mxu0 }
 0x144   : > { %v2164_v30 = vpop.f32.mrf.mxu1  ;;  %v2140_v38 = vadd.f32 %v2139_v19, %v2138_v18 }
 0x145   : > { %v2165_v50 = vadd.f32 %v2164_v30, %v2163_v25 }
 0x146   : > { %v2166_v20 = vpop.f32.mrf.mxu1  ;;  %v1529_v47 = vadd.f32 %v2140_v38, %v1480_v42 }
 0x147   : > { %v1575_v56 = vadd.f32 %v2165_v50, %v1526_v49 }
 0x148   : > { %v2167_v40 = vpop.f32.mrf.mxu1 }
 0x149   : > { %v2168_v48 = vadd.f32 %v2167_v40, %v2166_v20 }
 0x14b   : > { %v1578_v55 = vadd.f32 %v2168_v48, %v1529_v47 }
 0x155   : > { %v2207_v26 = vpop.f32.mrf.mxu0 }
 0x156   : > { %v1624_v62 = vadd.f32 %v2207_v26, %v1575_v56 }
 0x157   : > { %v1615_v53 = vpop.f32.mrf.mxu0 }
 0x158   : > { %v1616_v58 = vadd.f32 %v1615_v53, %v1567_v54  ;;  %v1632_v4 = vmax.f32 %v1624_v62, 0.0 }
 0x159   : > { %v2208_v57 = vpop.f32.mrf.mxu0 }
 0x15a   : > { %v1627_v59 = vadd.f32 %v2208_v57, %v1578_v55  ;;  %v1630_v2 = vmax.f32 %v1616_v58, 0.0 }
 0x15b   : > { %v1618_v63 = vpop.f32.mrf.mxu0 }
 0x15c   : > { %v1619_v0 = vadd.f32 %v1618_v63, %v1570_v60  ;;  %v1633_v1 = vmax.f32 %v1627_v59, 0.0 }
 0x15e   : > { %v1631_v3 = vmax.f32 %v1619_v0, 0.0  ;;  %v1635_v6 = vpack.c.bf16 %v1633_v1, %v1632_v4 }
 0x160   : > { %v1634_v5 = vpack.c.bf16 %v1631_v3, %v1630_v2 }
 0x162   : > { %2225 = vmatprep.mubr.bf16.mxu1 %v1634_v5 }
 0x163   : > { %2226 = vmatmul.mubr.bf16.vlgmr.msra.gmra.mxu1 %v1635_v6 }
 0x223   : > { %v2227_v61 = vpop.f32.mrf.mxu1 }
 0x224   : > { %v1750_v11 = vadd.f32 %v2227_v61, %v2019_v7 }
 0x225   : > { %v1741_v9 = vpop.f32.mrf.mxu1 }
 0x226   : > { %v1742_v16 = vadd.f32 %v2019_v7, %v1741_v9  ;;  %v1768_v25 = vadd.f32 %v2043_v12, %v1750_v11 }
 0x227   : > { %v2228_v15 = vpop.f32.mrf.mxu1 }
 0x228   : > { %v1753_v18 = vadd.f32 %v2228_v15, %v2019_v7  ;;  %v1766_v29 = vadd.f32 %v2039_v17, %v1742_v16 }
 0x229   : > { %v1744_v23 = vpop.f32.mrf.mxu1 }
 0x22a   : > { %v1769_v27 = vadd.f32 %v2044_v13, %v1753_v18  ;;  %v1745_v28 = vadd.f32 %v2019_v7, %v1744_v23 }
 0x22c   : > { %v2053_v30 = vpack.c.bf16 %v1769_v27, %v1768_v25  ;;  %v1767_v19 = vadd.f32 %v2040_v22, %v1745_v28 }
 0x22e   : > { %2056 = vst [vmem:[%s2468_s10 + $0x8] sm:$0xff] %v2053_v30   ;;  %v2048_v24 = vpack.c.bf16 %v1767_v19, %v1766_v29 }
 0x230   : > { %2049 = vst [vmem:[%s2468_s10] sm:$0xff] %v2048_v24  }
 0x231 PF: > { %s15_s22 = sadd.s32 1, %s2394_s22   ;;  %s2959_s18 = smov %s2386_s20 }
 0x232   : > { %p12_p8 = scmp.ge.s32.totalorder %s15_s22, 6   ;;  %s2960_s19 = smov %s2390_s21 }
 0x233   : > { %s2961_s20 = smov %s2964_s23  ;;  %s2962_s21 = smov %s2968_s24 }
 0x234   :  { %14 = sbr.rel (!%p12_p8) target bundleno = 3 (0x3), region = 79 }

// kernel: decoder_forward.6
= control target key start
LH: loop header
LB: loop body
LE: loop exit
PB: predicated region body
PF: predicated region fallthrough
CT: control target
= control target key end

     0   :  { %s3222_s12 = smov 0   ;;  %s3224_s13 = smov 0   ;;  %s3943_s0 = inlined_call_operand.vmem [shape: bf16[2,8,8,128], index: 0, kind: input, shape index: {}]   ;;  %s3944_s1 = inlined_call_operand.vmem [shape: bf16[2,2,512,128], index: 1, kind: input, shape index: {}]   ;;  %s3945_s2 = inlined_call_operand.vmem [shape: f32[1,128], index: 2, kind: input, shape index: {}]   ;;  %s3946_s3 = inlined_call_operand.vmem [shape: bf16[2,8,2,8,256], index: 3, kind: output, shape index: {}]  }
   0x1   :  { %s3226_s14 = smov 0   ;;  %s3228_s15 = smov 0  }
   0x2   :  { %s3230_s16 = smov 0  }
   0x3 LB: > { %s22_s17 = sadd.s32 1, %s3191_s14  ;;  %s25_s18 = sadd.s32 1, %s3195_s15  ;;  %s3199_s16 = sphi %s3230_s16, %s13_s16   ;;  %s3195_s15 = sphi %s3228_s15, %s3958_s15   ;;  %s3191_s14 = sphi %s3226_s14, %s3957_s14   ;;  %s3187_s13 = sphi %s3224_s13, %s3956_s13   ;;  %s3183_s12 = sphi %s3222_s12, %s3955_s12  }
   0x4   : > { %p23_p0 = scmp.ge.s32.totalorder %s22_s17, 2  ;;  %p2345_p1 = scmp.ge.s32.totalorder %s3199_s16, 1 }
   0x5   : > { %p151_p2 = scmp.lt.s32.totalorder %s3199_s16, 5 }
   0x6   : > { %s3960_s17 = smov (%p23_p0, %s22_s17), 0  ;;  %s3962_s18 = smov (!%p23_p0, %s25_s18), %s3195_s15 }
   0x7   : > { %p152_p3 = pnand %p2345_p1, %p151_p2  ;;  %p27_p4 = scmp.ge.s32.totalorder %s3962_s18, 2 }
   0x8   : > { %p180_p5 = scmp.lt.s32.totalorder (!%p152_p3), %s3187_s13, 1  ;;  %s2348_s19 = sshll.u32 (!%p152_p3), %s3183_s12, 2 }
   0x9   : > { %s3964_s18 = smov (%p27_p4, %s3962_s18), 0  ;;  %155 = sbr.rel (%p152_p3) target bundleno = 400 (0x190), region = 32 }
   0xa   : > { %p188_p6 = scmp.lt.s32.totalorder (!%p152_p3), %s2348_s19, 7  ;;  %p2352_p7 = scmp.ne.s32.totalorder (!%p152_p3), %s3183_s12, 0 }
   0xe   : > { %s3966_s13 = smov (!%p180_p5, %s3187_s13), 1  ;;  %s3968_s19 = smov (!%p188_p6, %s2348_s19), 7 }
   0xf   : > { %s2749_s20 = sshll.u32 %s3966_s13, 5  ;;  %s2349_s24 = sshll.u32 %s3968_s19, 2 }
  0x10   : > { %s3258_s23 = scalar_lea.vmem %s3943_s0, %s2749_s20  ;;  %s192_s25 = sadd.s32 %s2749_s20, %s2349_s24 }
  0x11   : > { %s2351_s26 = sshll.u32 %s192_s25, 2  ;;  %200 = sbr.rel (%p2352_p7) target bundleno = 51 (0x33), region = 36 }
  0x12   : > { %s3263_s29 = scalar_lea.vmem %s3946_s3, %s2351_s26 }
  0x16   : > { %v221_v0 = vld [vmem:[%s3258_s23] sm:$0xf]  ;;  %vm310_vm0 = vcmask 1043456   ;;  %v3201_v1 = vmov 0   ;;  %vm311_vm1 = vsmask.f32 7938 }
  0x17   : > { %203 = vst [vmem:[#allocation2 + $0x8] sm:$0xf] %v3201_v1  ;;  %201 = vst [vmem:[#allocation2] sm:$0xf] %v3201_v1  ;;  %v230_v2 = vshrl.u32 %v221_v0, 16  ;;  %v233_v3 = vshll.u32 %v221_v0, 16 }
  0x18   : > { %202 = vst [vmem:[#allocation2 + $0x4] sm:$0xf] %v3201_v1  ;;  %204 = vst [vmem:[#allocation2 + $0xc] sm:$0xf] %v3201_v1  ;;  %vm316_vm2 = vcmask 1040384  }
  0x19   : > { %205 = vst [vmem:[#allocation2 + $0x10] sm:$0xf] %v3201_v1  ;;  %206 = vst [vmem:[#allocation2 + $0x14] sm:$0xf] %v3201_v1  ;;  %vm317_vm3 = vsmask.f32 256 }
  0x1a   : > { %207 = vst [vmem:[#allocation2 + $0x18] sm:$0xf] %v3201_v1  ;;  %208 = vst [vmem:[#allocation2 + $0x1c] sm:$0xf] %v3201_v1  ;;  %v222_v4 = vld [vmem:[%s3258_s23 + $0x4] sm:$0xf] }
  0x1b   : > { %209 = vst [vmem:[#allocation2 + $0x20] sm:$0xf] %v3201_v1  ;;  %210 = vst [vmem:[#allocation2 + $0x24] sm:$0xf] %v3201_v1  ;;  %v223_v5 = vld [vmem:[%s3258_s23 + $0x8] sm:$0xf] }
  0x1c   : > { %211 = vst [vmem:[#allocation2 + $0x28] sm:$0xf] %v3201_v1  ;;  %212 = vst [vmem:[#allocation2 + $0x2c] sm:$0xf] %v3201_v1  ;;  %v232_v6 = vrot.slane %v230_v2, 7  ;;  %v238_v7 = vshrl.u32 %v222_v4, 16 }
  0x1d   : > { %213 = vst [vmem:[#allocation2 + $0x30] sm:$0xf] %v3201_v1  ;;  %214 = vst [vmem:[#allocation2 + $0x34] sm:$0xf] %v3201_v1  ;;  %v241_v8 = vshll.u32 %v222_v4, 16  ;;  %v246_v9 = vshrl.u32 %v223_v5, 16 }
  0x1e   : > { %215 = vst [vmem:[#allocation2 + $0x38] sm:$0xf] %v3201_v1  ;;  %216 = vst [vmem:[#allocation2 + $0x3c] sm:$0xf] %v3201_v1  ;;  %v224_v10 = vld [vmem:[%s3258_s23 + $0xc] sm:$0xf]  ;;  %v235_v15 = vor.u32 %v233_v3, %v232_v6 }
  0x1f   : > { %217 = vst [vmem:[#allocation2 + $0x40] sm:$0xf] %v3201_v1  ;;  %218 = vst [vmem:[#allocation2 + $0x44] sm:$0xf] %v3201_v1  ;;  %v249_v11 = vshll.u32 %v223_v5, 16  ;;  %v254_v12 = vshrl.u32 %v224_v10, 16 }
  0x20   : > { %219 = vst [vmem:[#allocation2 + $0x48] sm:$0xf] %v3201_v1  ;;  %220 = vst [vmem:[#allocation2 + $0x4c] sm:$0xf] %v3201_v1  ;;  %v257_v13 = vshll.u32 %v224_v10, 16  ;;  %v236_v17 = vrot.slane %v232_v6, 4 }
  0x21   : > { %v225_v14 = vld [vmem:[%s3258_s23 + $0x10] sm:$0xf]  ;;  %vm3273_vm4 = vmand %vm310_vm0, %vm311_vm1  ;;  %v240_v18 = vrot.slane %v238_v7, 7  ;;  %v248_v19 = vrot.slane %v246_v9, 7  ;;  %v226_v20 = vld [vmem:[%s3258_s23 + $0x14] sm:$0xf] }
  0x22   : > { %vm3280_vm5 = vmand %vm316_vm2, %vm317_vm3  ;;  %v256_v22 = vrot.slane %v254_v12, 7  ;;  %v262_v23 = vshrl.u32 %v225_v14, 16  ;;  %v265_v24 = vshll.u32 %v225_v14, 16  ;;  %v270_v25 = vshrl.u32 %v226_v20, 16  ;;  %v227_v30 = vld [vmem:[%s3258_s23 + $0x18] sm:$0xf] }
  0x23   : > { %v243_v26 = vor.u32 %v241_v8, %v240_v18  ;;  %v244_v27 = vrot.slane %v240_v18, 4  ;;  %v251_v28 = vor.u32 %v249_v11, %v248_v19  ;;  %v252_v29 = vrot.slane %v248_v19, 4  ;;  %v313_v31 = vld [vmem:[#allocation2 + $0x8] sm:$0xf]  ;;  %v319_v32 = vld [vmem:[#allocation2 + $0xc] sm:$0x1] }
  0x24   : > { %v322_v33 = vld [vmem:[#allocation2 + $0x10] sm:$0xf]  ;;  %v259_v34 = vor.u32 %v257_v13, %v256_v22  ;;  %v314_v35 = vsel %vm3273_vm4, %v235_v15, %v313_v31  ;;  %v320_v36 = vsel %vm3280_vm5, %v236_v17, %v319_v32  ;;  %v325_v38 = vld [vmem:[#allocation2 + $0x14] sm:$0x1]  ;;  %v328_v39 = vld [vmem:[#allocation2 + $0x18] sm:$0xf] }
  0x25   : > { %v323_v37 = vsel %vm3273_vm4, %v243_v26, %v322_v33  ;;  %v331_v40 = vld [vmem:[#allocation2 + $0x1c] sm:$0x1]  ;;  %315 = vst [vmem:[#allocation2 + $0x8] sm:$0xf] %v314_v35  ;;  %321 = vst [vmem:[#allocation2 + $0xc] sm:$0x1] %v320_v36  ;;  %v326_v41 = vsel %vm3280_vm5, %v244_v27, %v325_v38  ;;  %v329_v42 = vsel %vm3273_vm4, %v251_v28, %v328_v39 }
  0x26   : > { %324 = vst [vmem:[#allocation2 + $0x10] sm:$0xf] %v323_v37  ;;  %v332_v43 = vsel %vm3280_vm5, %v252_v29, %v331_v40  ;;  %v334_v44 = vld [vmem:[#allocation2 + $0x20] sm:$0xf]  ;;  %v260_v45 = vrot.slane %v256_v22, 4  ;;  %v264_v48 = vrot.slane %v262_v23, 7 }
  0x27   : > { %v337_v46 = vld [vmem:[#allocation2 + $0x24] sm:$0x1]  ;;  %327 = vst [vmem:[#allocation2 + $0x14] sm:$0x1] %v326_v41  ;;  %330 = vst [vmem:[#allocation2 + $0x18] sm:$0xf] %v329_v42  ;;  %v335_v47 = vsel %vm3273_vm4, %v259_v34, %v334_v44 }
  0x28   : > { %333 = vst [vmem:[#allocation2 + $0x1c] sm:$0x1] %v332_v43  ;;  %v340_v49 = vld [vmem:[#allocation2 + $0x28] sm:$0xf]  ;;  %v272_v50 = vrot.slane %v270_v25, 7  ;;  %v338_v52 = vsel %vm3280_vm5, %v260_v45, %v337_v46  ;;  %v273_v54 = vshll.u32 %v226_v20, 16  ;;  %v267_v57 = vor.u32 %v265_v24, %v264_v48 }
  0x29   : > { %v228_v51 = vld [vmem:[%s3258_s23 + $0x1c] sm:$0xf]  ;;  %336 = vst [vmem:[#allocation2 + $0x20] sm:$0xf] %v335_v47  ;;  %v343_v53 = vld [vmem:[#allocation2 + $0x2c] sm:$0x1] }
  0x2a   : > { %v349_v55 = vld [vmem:[#allocation2 + $0x34] sm:$0x1]  ;;  %v278_v56 = vshrl.u32 %v227_v30, 16  ;;  %339 = vst [vmem:[#allocation2 + $0x24] sm:$0x1] %v338_v52  ;;  %v268_v58 = vrot.slane %v264_v48, 4  ;;  %v275_v62 = vor.u32 %v273_v54, %v272_v50  ;;  %v341_v2 = vsel %vm3273_vm4, %v267_v57, %v340_v49 }
  0x2b   : > { %v346_v59 = vld [vmem:[#allocation2 + $0x30] sm:$0xf]  ;;  %v276_v60 = vrot.slane %v272_v50, 4  ;;  %v281_v61 = vshll.u32 %v227_v30, 16  ;;  %v286_v0 = vshrl.u32 %v228_v51, 16  ;;  %v289_v1 = vshll.u32 %v228_v51, 16 }
  0x2c   : > { %v280_v63 = vrot.slane %v278_v56, 7  ;;  %v344_v3 = vsel %vm3280_vm5, %v268_v58, %v343_v53  ;;  %v352_v5 = vld [vmem:[#allocation2 + $0x38] sm:$0xf]  ;;  %v355_v6 = vld [vmem:[#allocation2 + $0x3c] sm:$0x1]  ;;  %v347_v7 = vsel %vm3273_vm4, %v275_v62, %v346_v59 }
  0x2d   : > { %v350_v4 = vsel %vm3280_vm5, %v276_v60, %v349_v55  ;;  %342 = vst [vmem:[#allocation2 + $0x28] sm:$0xf] %v341_v2  ;;  %345 = vst [vmem:[#allocation2 + $0x2c] sm:$0x1] %v344_v3  ;;  %v288_v10 = vrot.slane %v286_v0, 7 }
  0x2e   : > { %351 = vst [vmem:[#allocation2 + $0x34] sm:$0x1] %v350_v4  ;;  %v283_v8 = vor.u32 %v281_v61, %v280_v63  ;;  %v284_v9 = vrot.slane %v280_v63, 4  ;;  %348 = vst [vmem:[#allocation2 + $0x30] sm:$0xf] %v347_v7 }
  0x2f   : > { %v358_v11 = vld [vmem:[#allocation2 + $0x40] sm:$0xf]  ;;  %v361_v12 = vld [vmem:[#allocation2 + $0x44] sm:$0x1]  ;;  %v291_v15 = vor.u32 %v289_v1, %v288_v10  ;;  %v292_v17 = vrot.slane %v288_v10, 4 }
  0x30   : > { %v353_v13 = vsel %vm3273_vm4, %v283_v8, %v352_v5  ;;  %v356_v14 = vsel %vm3280_vm5, %v284_v9, %v355_v6 }
  0x31   : > { %354 = vst [vmem:[#allocation2 + $0x38] sm:$0xf] %v353_v13  ;;  %357 = vst [vmem:[#allocation2 + $0x3c] sm:$0x1] %v356_v14  ;;  %v359_v18 = vsel %vm3273_vm4, %v291_v15, %v358_v11  ;;  %v362_v19 = vsel %vm3280_vm5, %v292_v17, %v361_v12 }
  0x32   : > { %360 = vst [vmem:[#allocation2 + $0x40] sm:$0xf] %v359_v18  ;;  %363 = vst [vmem:[#allocation2 + $0x44] sm:$0x1] %v362_v19 }
  0x33 PF: > { %v3027_v20 = vld [vmem:[%s3944_s1 + $0x78] sm:$0xff]   ;;  %v3031_v23 = vld [vmem:[%s3944_s1 + $0x70] sm:$0xff]   ;;  %v3035_v27 = vld [vmem:[%s3944_s1 + $0x68] sm:$0xff]   ;;  %s2751_s23 = sshll.u32 %s3183_s12, 5  ;;  %vm377_vm6 = vsmask.f32 3328 }
  0x34   : > { %v3028_v22 = vld [vmem:[%s3944_s1 + $0xf8] sm:$0xff]   ;;  %2762 = vmatprep.subr.bf16.mxu0 %v3027_v20  ;;  %v3032_v24 = vld [vmem:[%s3944_s1 + $0xf0] sm:$0xff]   ;;  %v3036_v28 = vld [vmem:[%s3944_s1 + $0xe8] sm:$0xff]   ;;  %s3415_s7 = scalar_lea.vmem [#allocation2], %s2751_s23  ;;  %vm378_vm7 = vsmask.f32 7440 }
  0x35   : > { %v3029_v16 = vld [vmem:[%s3944_s1 + $0x38] sm:$0xff]   ;;  %2790 = vmatprep.subr.bf16.mxu1 %v3028_v22  ;;  %v3033_v25 = vld [vmem:[%s3944_s1 + $0x30] sm:$0xff]   ;;  %v3037_v29 = vld [vmem:[%s3944_s1 + $0x28] sm:$0xff]   ;;  %vm448_vm9 = vcmask 1042432   ;;  %vm449_vm10 = vcmask 1046532  }
  0x36   : > { %v3030_v21 = vld [vmem:[%s3944_s1 + $0xb8] sm:$0xff]   ;;  %2763 = vmatpush3.bf16.msra.mxu0 %v3029_v16  ;;  %v3034_v26 = vld [vmem:[%s3944_s1 + $0xb0] sm:$0xff]   ;;  %v3038_v30 = vld [vmem:[%s3944_s1 + $0xa8] sm:$0xff]  }
  0x37   : > { %2791 = vmatpush3.bf16.msra.mxu1 %v3030_v21  ;;  %2764 = vmatprep.subr.bf16.mxu0 %v3031_v23  ;;  %v3039_v31 = vld [vmem:[%s3944_s1 + $0x60] sm:$0xff]   ;;  %v3043_v35 = vld [vmem:[%s3944_s1 + $0x58] sm:$0xff]   ;;  %v3047_v39 = vld [vmem:[%s3944_s1 + $0x50] sm:$0xff]  }
  0x38   : > { %2792 = vmatprep.subr.bf16.mxu1 %v3032_v24  ;;  %v3040_v32 = vld [vmem:[%s3944_s1 + $0xe0] sm:$0xff]   ;;  %v3044_v36 = vld [vmem:[%s3944_s1 + $0xd8] sm:$0xff]   ;;  %v3048_v40 = vld [vmem:[%s3944_s1 + $0xd0] sm:$0xff]  }
  0x39   : > { %v3041_v33 = vld [vmem:[%s3944_s1 + $0x20] sm:$0xff]   ;;  %v3045_v37 = vld [vmem:[%s3944_s1 + $0x18] sm:$0xff]   ;;  %v3049_v41 = vld [vmem:[%s3944_s1 + $0x10] sm:$0xff]  }
  0x3a   : > { %2765 = vmatpush3.bf16.msra.mxu0 %v3033_v25  ;;  %v3042_v34 = vld [vmem:[%s3944_s1 + $0xa0] sm:$0xff]   ;;  %v3046_v38 = vld [vmem:[%s3944_s1 + $0x98] sm:$0xff]   ;;  %v3050_v42 = vld [vmem:[%s3944_s1 + $0x90] sm:$0xff]  }
  0x3b   : > { %2793 = vmatpush3.bf16.msra.mxu1 %v3034_v26  ;;  %2766 = vmatprep.subr.bf16.mxu0 %v3035_v27  ;;  %v3051_v43 = vld [vmem:[%s3944_s1 + $0x48] sm:$0xff]   ;;  %v3055_v47 = vld [vmem:[%s3944_s1 + $0x40] sm:$0xff]   ;;  %v2363_v62 = vld [vmem:[%s3415_s7 + $0x10] sm:$0xf] }
  0x3c   : > { %2794 = vmatprep.subr.bf16.mxu1 %v3036_v28  ;;  %v3052_v44 = vld [vmem:[%s3944_s1 + $0xc8] sm:$0xff]   ;;  %v3056_v48 = vld [vmem:[%s3944_s1 + $0xc0] sm:$0xff]   ;;  %v3433_v4 = vld [vmem:[%s3415_s7 + $0x14] sm:$0x1]  ;;  %v494_v11 = vshrl.u32 %v2363_v62, 16  ;;  %v497_v12 = vshll.u32 %v2363_v62, 16 }
  0x3d   : > { %v3053_v45 = vld [vmem:[%s3944_s1 + $0x8] sm:$0xff]   ;;  %v3057_v49 = vld [vmem:[%s3944_s1] sm:$0xff]   ;;  %v3061_v13 = vld [vmem:[%s3944_s1 + $0x178] sm:$0xff]   ;;  %v503_v19 = vshll.u32 %v3433_v4, 16 }
  0x3e   : > { %2767 = vmatpush3.bf16.msra.mxu0 %v3037_v29  ;;  %v3054_v46 = vld [vmem:[%s3944_s1 + $0x88] sm:$0xff]   ;;  %v3058_v50 = vld [vmem:[%s3944_s1 + $0x80] sm:$0xff]   ;;  %vm3441_vm8 = vmor %vm377_vm6, %vm378_vm7  ;;  %v496_v16 = vrot.slane %v494_v11, 4  ;;  %v499_v21 = vrot.slane %v497_v12, 5 }
  0x3f   : > { %2795 = vmatpush3.bf16.msra.mxu1 %v3038_v30  ;;  %2768 = vmatprep.subr.bf16.mxu0 %v3039_v31  ;;  %v369_v51 = vld [vmem:[%s3415_s7] sm:$0xf]  ;;  %v370_v52 = vld [vmem:[%s3415_s7 + $0x8] sm:$0xf]  ;;  %v3420_v53 = vld [vmem:[%s3415_s7 + $0x4] sm:$0x1] }
  0x40   : > { %2796 = vmatprep.subr.bf16.mxu1 %v3040_v32  ;;  %v3423_v54 = vld [vmem:[%s3415_s7 + $0xc] sm:$0x1]  ;;  %v381_v55 = vshrl.u32 %v369_v51, 16  ;;  %v384_v56 = vshll.u32 %v369_v51, 16  ;;  %v390_v57 = vshll.u32 %v3420_v53, 16  ;;  %v395_v58 = vshrl.u32 %v370_v52, 16  ;;  %vm3573_vm11 = vmor %vm448_vm9, %vm449_vm10 }
  0x41   : > { %v2362_v59 = vld [vmem:[%s3415_s7 + $0x8] sm:$0xf]  ;;  %v398_v60 = vshll.u32 %v370_v52, 16  ;;  %v404_v61 = vshll.u32 %v3423_v54, 16  ;;  %v3430_v63 = vld [vmem:[%s3415_s7 + $0xc] sm:$0x1]  ;;  %v500_v27 = vor.u32 %v499_v21, %v496_v16  ;;  %v2396_v31 = vcombine.low %v369_v51, %v370_v52 }
  0x42   : > { %2769 = vmatpush3.bf16.msra.mxu0 %v3041_v33  ;;  %v383_v0 = vrot.slane %v381_v55, 4  ;;  %v386_v1 = vrot.slane %v384_v56, 5  ;;  %v392_v2 = vrot.slane %v390_v57, 5  ;;  %v397_v3 = vrot.slane %v395_v58, 4  ;;  %v3062_v20 = vld [vmem:[%s3944_s1 + $0x1f8] sm:$0xff]   ;;  %v3076_v51 = vld [vmem:[%s3944_s1 + $0x1a0] sm:$0xff]  }
  0x43   : > { %2797 = vmatpush3.bf16.msra.mxu1 %v3042_v34  ;;  %2770 = vmatprep.subr.bf16.mxu0 %v3043_v35  ;;  %v400_v5 = vrot.slane %v398_v60, 5  ;;  %v406_v6 = vrot.slane %v404_v61, 5  ;;  %v480_v7 = vshrl.u32 %v2362_v59, 16  ;;  %v483_v8 = vshll.u32 %v2362_v59, 16  ;;  %v3063_v34 = vld [vmem:[%s3944_s1 + $0x138] sm:$0xff]   ;;  %v3082_v16 = vld [vmem:[%s3944_s1 + $0x150] sm:$0xff]  }
  0x44   : > { %2798 = vmatprep.subr.bf16.mxu1 %v3044_v36  ;;  %v387_v9 = vor.u32 %v386_v1, %v383_v0  ;;  %v489_v10 = vshll.u32 %v3430_v63, 16  ;;  %v505_v28 = vrot.slane %v503_v19, 5  ;;  %v501_v33 = vrot.slane %v500_v27, 4  ;;  %v3065_v36 = vld [vmem:[%s3944_s1 + $0x170] sm:$0xff]   ;;  %v3077_v52 = vld [vmem:[%s3944_s1 + $0x158] sm:$0xff]   ;;  %v3157_v14 = vld [vmem:[%s3944_s1 + $0x340] sm:$0xff]  }
  0x45   : > { %v401_v15 = vor.u32 %v400_v5, %v397_v3  ;;  %v482_v17 = vrot.slane %v480_v7, 4  ;;  %v485_v18 = vrot.slane %v483_v8, 5  ;;  %v3078_v55 = vld [vmem:[%s3944_s1 + $0x1d8] sm:$0xff]   ;;  %v3518_v57 = vld [vmem:[%s3415_s7 + $0x10] sm:$0xf] }
  0x46   : > { %2771 = vmatpush3.bf16.msra.mxu0 %v3045_v37  ;;  %v388_v22 = vrot.slane %v387_v9, 4  ;;  %v491_v25 = vrot.slane %v489_v10, 5  ;;  %v506_v37 = vsel %vm3441_vm8, %v501_v33, %v505_v28  ;;  %v3079_v56 = vld [vmem:[%s3944_s1 + $0x118] sm:$0xff]   ;;  %v409_v61 = vshrl.u32 %v3518_v57, 16  ;;  %v2365_v9 = vld [vmem:[%s3415_s7 + $0x20] sm:$0xf] }
  0x47   : > { %2799 = vmatpush3.bf16.msra.mxu1 %v3046_v38  ;;  %2772 = vmatprep.subr.bf16.mxu0 %v3047_v39  ;;  %v402_v23 = vrot.slane %v401_v15, 4  ;;  %v486_v24 = vor.u32 %v485_v18, %v482_v17  ;;  %v3466_v38 = vcombine.low %v2362_v59, %v2363_v62  ;;  %v3064_v39 = vld [vmem:[%s3944_s1 + $0x1b8] sm:$0xff]   ;;  %v3524_v59 = vld [vmem:[%s3415_s7 + $0x14] sm:$0x1]  ;;  %v412_v62 = vshll.u32 %v3518_v57, 16 }
  0x48   : > { %2800 = vmatprep.subr.bf16.mxu1 %v3048_v40  ;;  %v393_v26 = vsel %vm3441_vm8, %v388_v22, %v392_v2  ;;  %v3521_v58 = vld [vmem:[%s3415_s7 + $0x18] sm:$0xf]  ;;  %v3527_v60 = vld [vmem:[%s3415_s7 + $0x1c] sm:$0x1]  ;;  %v418_v1 = vshll.u32 %v3524_v59, 16  ;;  %v411_v7 = vrot.slane %v409_v61, 4 }
  0x49   : > { %v407_v29 = vsel %vm3441_vm8, %v402_v23, %v406_v6  ;;  %v487_v30 = vrot.slane %v486_v24, 4  ;;  %v3080_v0 = vld [vmem:[%s3944_s1 + $0x198] sm:$0xff]   ;;  %v423_v2 = vshrl.u32 %v3521_v58, 16  ;;  %v426_v3 = vshll.u32 %v3521_v58, 16  ;;  %v3544_v17 = vld [vmem:[%s3415_s7 + $0x24] sm:$0x1] }
  0x4a   : > { %2773 = vmatpush3.bf16.msra.mxu0 %v3049_v41  ;;  %v3453_v32 = vcombine.low %v393_v26, %v407_v29  ;;  %v3066_v41 = vld [vmem:[%s3944_s1 + $0x1f0] sm:$0xff]   ;;  %v432_v5 = vshll.u32 %v3527_v60, 16  ;;  %v2364_v6 = vld [vmem:[%s3415_s7 + $0x18] sm:$0xf]  ;;  %v414_v8 = vrot.slane %v412_v62, 5  ;;  %v420_v11 = vrot.slane %v418_v1, 5 }
  0x4b   : > { %2801 = vmatpush3.bf16.msra.mxu1 %v3050_v42  ;;  %2774 = vmatprep.subr.bf16.mxu0 %v3051_v43  ;;  %v492_v35 = vsel %vm3441_vm8, %v487_v30, %v491_v25  ;;  %v3067_v42 = vld [vmem:[%s3944_s1 + $0x130] sm:$0xff]   ;;  %v3069_v43 = vld [vmem:[%s3944_s1 + $0x168] sm:$0xff]   ;;  %v3541_v10 = vld [vmem:[%s3415_s7 + $0x1c] sm:$0x1]  ;;  %v425_v12 = vrot.slane %v423_v2, 4  ;;  %v508_v19 = vshrl.u32 %v2364_v6, 16 }
  0x4c   : > { %2802 = vmatprep.subr.bf16.mxu1 %v3052_v44  ;;  %993 = vmatprep.mubr.bf16.mxu0 %v3453_v32  ;;  %v3471_v40 = vcombine.low %v492_v35, %v506_v37  ;;  %v3068_v44 = vld [vmem:[%s3944_s1 + $0x1b0] sm:$0xff]   ;;  %v434_v15 = vrot.slane %v432_v5, 5  ;;  %v415_v18 = vor.u32 %v414_v8, %v411_v7  ;;  %v517_v22 = vshll.u32 %v3541_v10, 16  ;;  %v3091_v61 = vld [vmem:[%s3944_s1 + $0x140] sm:$0xff]   ;;  %v2370_v7 = vld [vmem:[%s3415_s7 + $0x8] sm:$0xe] }
  0x4d   : > { %v522_v23 = vshrl.u32 %v2365_v9, 16  ;;  %v525_v24 = vshll.u32 %v2365_v9, 16  ;;  %v531_v25 = vshll.u32 %v3544_v17, 16  ;;  %v3083_v26 = vld [vmem:[%s3944_s1 + $0x1d0] sm:$0xff]   ;;  %v510_v28 = vrot.slane %v508_v19, 4  ;;  %v3093_v2 = vld [vmem:[%s3944_s1 + $0x100] sm:$0xff]  }
  0x4e   : > { %2775 = vmatpush3.bf16.msra.mxu0 %v3053_v45  ;;  %1042 = vmatprep.mubr.bf16.mxu1 %v3471_v40  ;;  %v3070_v45 = vld [vmem:[%s3944_s1 + $0x1e8] sm:$0xff]   ;;  %v416_v27 = vrot.slane %v415_v18, 4  ;;  %v3085_v37 = vld [vmem:[%s3944_s1 + $0x110] sm:$0xff]   ;;  %v453_v62 = vrot.slane %v3420_v53, 5  ;;  %v457_v1 = vrot.slane %v3423_v54, 5  ;;  %v3094_v53 = vld [vmem:[%s3944_s1 + $0x180] sm:$0xff]  }
  0x4f   : > { %2803 = vmatpush3.bf16.msra.mxu1 %v3054_v46  ;;  %2776 = vmatprep.subr.bf16.mxu0 %v3055_v47  ;;  %v3071_v46 = vld [vmem:[%s3944_s1 + $0x128] sm:$0xff]   ;;  %v3073_v47 = vld [vmem:[%s3944_s1 + $0x160] sm:$0xff]   ;;  %v527_v33 = vrot.slane %v525_v24, 5  ;;  %v553_v5 = vrot.slane %v3433_v4, 5  ;;  %v3099_v24 = vld [vmem:[%s3944_s1 + $0x270] sm:$0xff]  }
  0x50   : > { %2804 = vmatprep.subr.bf16.mxu1 %v3056_v48  ;;  %v3072_v48 = vld [vmem:[%s3944_s1 + $0x1a8] sm:$0xff]   ;;  %v436_v54 = vld [vmem:[%s3415_s7] sm:$0xe] }
  0x51   : > { %v2356_v8 = vrot.slane %v436_v54, 9  ;;  %v3121_v54 = vld [vmem:[%s3944_s1 + $0x208] sm:$0xff]  }
  0x52   : > { %2777 = vmatpush3.bf16.msra.mxu0 %v3057_v49  ;;  %v3074_v49 = vld [vmem:[%s3944_s1 + $0x1e0] sm:$0xff]  }
  0x53   : > { %2805 = vmatpush3.bf16.msra.mxu1 %v3058_v50  ;;  %2818 = vmatprep.subr.bf16.mxu0 %v3061_v13  ;;  %v3075_v50 = vld [vmem:[%s3944_s1 + $0x120] sm:$0xff]   ;;  %v428_v13 = vrot.slane %v426_v3, 5  ;;  %v549_v3 = vrot.slane %v3430_v63, 5  ;;  %v3095_v63 = vld [vmem:[%s3944_s1 + $0x278] sm:$0xff]   ;;  %v454_v4 = vsel %vm3573_vm11, %v2356_v8, %v453_v62 }
  0x54   : > { %2846 = vmatprep.subr.bf16.mxu1 %v3062_v20  ;;  %v511_v20 = vshll.u32 %v2364_v6, 16  ;;  %v3114_v62 = vld [vmem:[%s3944_s1 + $0x298] sm:$0xff]   ;;  %v3124_v8 = vld [vmem:[%s3944_s1 + $0x2c0] sm:$0xff]  }
  0x55   : > { %994 = vmatmul.mubr.bf16.vlgmr.msra.gmra.mxu0 %v2396_v31  ;;  %v429_v21 = vor.u32 %v428_v13, %v425_v12  ;;  %v524_v31 = vrot.slane %v522_v23, 4  ;;  %v2374_v12 = vrot.slane %v2370_v7, 9  ;;  %v3098_v23 = vld [vmem:[%s3944_s1 + $0x2b8] sm:$0xff]   ;;  %v3123_v7 = vld [vmem:[%s3944_s1 + $0x240] sm:$0xff]  }
  0x56   : > { %2819 = vmatpush3.bf16.msra.mxu0 %v3063_v34  ;;  %1043 = vmatmul.mubr.bf16.vlgmr.msra.gmra.mxu1 %v3466_v38  ;;  %v513_v29 = vrot.slane %v511_v20, 5  ;;  %v421_v34 = vsel %vm3441_vm8, %v416_v27, %v420_v11  ;;  %v2371_v11 = vld [vmem:[%s3415_s7 + $0x10] sm:$0xe]  ;;  %v465_v27 = vrot.slane %v3527_v60, 5  ;;  %v561_v60 = vrot.slane %v3544_v17, 5 }
  0x57   : > { %2820 = vmatprep.subr.bf16.mxu0 %v3065_v36  ;;  %2847 = vmatpush3.bf16.msra.mxu1 %v3064_v39  ;;  %v430_v30 = vrot.slane %v429_v21, 4  ;;  %v519_v36 = vrot.slane %v517_v22, 5  ;;  %v2375_v13 = vrot.slane %v2371_v11, 9  ;;  %v550_v19 = vsel %vm3573_vm11, %v2374_v12, %v549_v3  ;;  %v3118_v3 = vld [vmem:[%s3944_s1 + $0x290] sm:$0xff]   ;;  %v3126_v11 = vld [vmem:[%s3944_s1 + $0x280] sm:$0xff]  }
  0x58   : > { %2848 = vmatprep.subr.bf16.mxu1 %v3066_v41  ;;  %v514_v35 = vor.u32 %v513_v29, %v510_v28  ;;  %v2397_v41 = vcombine.low %v3518_v57, %v3521_v58  ;;  %v3090_v57 = vld [vmem:[%s3944_s1 + $0x188] sm:$0xff]   ;;  %v3101_v28 = vld [vmem:[%s3944_s1 + $0x230] sm:$0xff]  }
  0x59   : > { %v435_v39 = vsel %vm3441_vm8, %v430_v30, %v434_v15  ;;  %v3096_v15 = vld [vmem:[%s3944_s1 + $0x2f8] sm:$0xff]   ;;  %v554_v22 = vsel %vm3573_vm11, %v2375_v13, %v553_v5  ;;  %v438_v29 = vld [vmem:[%s3415_s7 + $0x10] sm:$0xe]  ;;  %v3120_v5 = vld [vmem:[%s3944_s1 + $0x2c8] sm:$0xff]  }
  0x5a   : > { %2821 = vmatpush3.bf16.msra.mxu0 %v3067_v42  ;;  %v528_v42 = vor.u32 %v527_v33, %v524_v31  ;;  %v3634_v21 = vcombine.low %v550_v19, %v554_v22  ;;  %v439_v30 = vld [vmem:[%s3415_s7 + $0x18] sm:$0xe]  ;;  %v2358_v31 = vrot.slane %v438_v29, 9  ;;  %v3103_v33 = vld [vmem:[%s3944_s1 + $0x268] sm:$0xff]   ;;  %v2380_v12 = vld [vmem:[%s3415_s7 + $0x10] sm:$0xf] }
  0x5b   : > { %2822 = vmatprep.subr.bf16.mxu0 %v3069_v43  ;;  %2849 = vmatpush3.bf16.msra.mxu1 %v3068_v44  ;;  %v533_v43 = vrot.slane %v531_v25, 5  ;;  %v3086_v44 = vld [vmem:[%s3944_s1 + $0x190] sm:$0xff]   ;;  %v461_v25 = vrot.slane %v3524_v59, 5  ;;  %v557_v59 = vrot.slane %v3541_v10, 5  ;;  %v3104_v10 = vld [vmem:[%s3944_s1 + $0x2e8] sm:$0xff]  }
  0x5c   : > { %2850 = vmatprep.subr.bf16.mxu1 %v3070_v45  ;;  %v3566_v45 = vcombine.low %v421_v34, %v435_v39  ;;  %v2359_v34 = vrot.slane %v439_v30, 9  ;;  %v3751_v13 = vld [vmem:[%s3415_s7 + $0x14] sm:$0x1]  ;;  %v3130_v30 = vld [vmem:[%s3944_s1 + $0x338] sm:$0xff]  }
  0x5d   : > { %v585_v19 = vshll.u32 %v3751_v13, 16 }
  0x5e   : > { %2823 = vmatpush3.bf16.msra.mxu0 %v3071_v46  ;;  %v515_v46 = vrot.slane %v514_v35, 4  ;;  %1001 = vmatprep.mubr.bf16.mxu0 %v3566_v45  ;;  %v462_v35 = vsel %vm3573_vm11, %v2358_v31, %v461_v25  ;;  %v466_v17 = vsel %vm3573_vm11, %v2359_v34, %v465_v27  ;;  %v3128_v25 = vld [vmem:[%s3944_s1 + $0x378] sm:$0xff]   ;;  %v3132_v34 = vld [vmem:[%s3944_s1 + $0x370] sm:$0xff]  }
  0x5f   : > { %2824 = vmatprep.subr.bf16.mxu0 %v3073_v47  ;;  %2851 = vmatpush3.bf16.msra.mxu1 %v3072_v48  ;;  %v3087_v47 = vld [vmem:[%s3944_s1 + $0x148] sm:$0xff]   ;;  %v587_v27 = vrot.slane %v585_v19, 5 }
  0x60   : > { %2852 = vmatprep.subr.bf16.mxu1 %v3074_v49  ;;  %v529_v49 = vrot.slane %v528_v42, 4  ;;  %1002 = vmatmul.mubr.bf16.gmra.mxu0 %v2397_v41  ;;  %v2438_v42 = vcombine.low %v462_v35, %v466_v17 }
  0x62   : > { %2825 = vmatpush3.bf16.msra.mxu0 %v3075_v50  ;;  %v3088_v50 = vld [vmem:[%s3944_s1 + $0x1c8] sm:$0xff]  }
  0x63   : > { %2826 = vmatprep.subr.bf16.mxu0 %v3077_v52  ;;  %2853 = vmatpush3.bf16.msra.mxu1 %v3076_v51  ;;  %v520_v51 = vsel %vm3441_vm8, %v515_v46, %v519_v36  ;;  %v3089_v52 = vld [vmem:[%s3944_s1 + $0x108] sm:$0xff]   ;;  %v2372_v36 = vld [vmem:[%s3415_s7 + $0x18] sm:$0xe] }
  0x64   : > { %2854 = vmatprep.subr.bf16.mxu1 %v3078_v55  ;;  %v534_v55 = vsel %vm3441_vm8, %v529_v49, %v533_v43  ;;  %v2376_v39 = vrot.slane %v2372_v36, 9  ;;  %v3105_v43 = vld [vmem:[%s3944_s1 + $0x228] sm:$0xff]  }
  0x65   : > { %v3593_v58 = vcombine.low %v520_v51, %v534_v55  ;;  %v3108_v51 = vld [vmem:[%s3944_s1 + $0x2e0] sm:$0xff]  }
  0x66   : > { %2827 = vmatpush3.bf16.msra.mxu0 %v3079_v56  ;;  %v3588_v56 = vcombine.low %v2364_v6, %v2365_v9  ;;  %v437_v6 = vld [vmem:[%s3415_s7 + $0x8] sm:$0xe]  ;;  %v3110_v55 = vld [vmem:[%s3944_s1 + $0x2a0] sm:$0xff]  }
  0x67   : > { %2828 = vmatprep.subr.bf16.mxu0 %v3082_v16  ;;  %2855 = vmatpush3.bf16.msra.mxu1 %v3080_v0  ;;  %v3092_v0 = vld [vmem:[%s3944_s1 + $0x1c0] sm:$0xff]   ;;  %v2357_v9 = vrot.slane %v437_v6, 9  ;;  %v3097_v16 = vld [vmem:[%s3944_s1 + $0x238] sm:$0xff]   ;;  %v3122_v6 = vld [vmem:[%s3944_s1 + $0x288] sm:$0xff]  }
  0x68   : > { %2856 = vmatprep.subr.bf16.mxu1 %v3083_v26  ;;  %1050 = vmatprep.mubr.bf16.mxu1 %v3593_v58  ;;  %v3100_v26 = vld [vmem:[%s3944_s1 + $0x2f0] sm:$0xff]  }
  0x69   : > { %1051 = vmatmul.mubr.bf16.gmra.mxu1 %v3588_v56  ;;  %v458_v18 = vsel %vm3573_vm11, %v2357_v9, %v457_v1  ;;  %v3116_v1 = vld [vmem:[%s3944_s1 + $0x2d0] sm:$0xff]   ;;  %v3125_v9 = vld [vmem:[%s3944_s1 + $0x200] sm:$0xff]  }
  0x6a   : > { %2829 = vmatpush3.bf16.msra.mxu0 %v3085_v37  ;;  %v2437_v20 = vcombine.low %v454_v4, %v458_v18  ;;  %1413 = vmatprep.mubr.bf16.mxu1 %v3634_v21  ;;  %v2373_v37 = vld [vmem:[%s3415_s7 + $0x20] sm:$0xe]  ;;  %v576_v4 = vshrl.u32 %v2380_v12, 16  ;;  %v579_v18 = vshll.u32 %v2380_v12, 16 }
  0x6b   : > { %2857 = vmatpush3.bf16.msra.mxu1 %v3086_v44  ;;  %2830 = vmatprep.subr.bf16.mxu0 %v3087_v47  ;;  %v2377_v41 = vrot.slane %v2373_v37, 9  ;;  %v558_v44 = vsel %vm3573_vm11, %v2376_v39, %v557_v59  ;;  %v3106_v47 = vld [vmem:[%s3944_s1 + $0x2a8] sm:$0xff]   ;;  %v3134_v37 = vld [vmem:[%s3944_s1 + $0x330] sm:$0xff]  }
  0x6c   : > { %2858 = vmatprep.subr.bf16.mxu1 %v3088_v50  ;;  %1364 = vmatprep.mubr.bf16.mxu0 %v2437_v20  ;;  %v3107_v50 = vld [vmem:[%s3944_s1 + $0x260] sm:$0xff]   ;;  %v3133_v39 = vld [vmem:[%s3944_s1 + $0x3f0] sm:$0xff]  }
  0x6d   : > { %v562_v46 = vsel %vm3573_vm11, %v2377_v41, %v561_v60  ;;  %v3136_v41 = vld [vmem:[%s3944_s1 + $0x368] sm:$0xff]  }
  0x6e   : > { %2831 = vmatpush3.bf16.msra.mxu0 %v3089_v52  ;;  %v3682_v49 = vcombine.low %v558_v44, %v562_v46  ;;  %v3109_v52 = vld [vmem:[%s3944_s1 + $0x220] sm:$0xff]   ;;  %v3137_v44 = vld [vmem:[%s3944_s1 + $0x3e8] sm:$0xff]  }
  0x6f   : > { %2859 = vmatpush3.bf16.msra.mxu1 %v3090_v57  ;;  %2832 = vmatprep.subr.bf16.mxu0 %v3091_v61  ;;  %v3112_v57 = vld [vmem:[%s3944_s1 + $0x2d8] sm:$0xff]   ;;  %v3139_v46 = vld [vmem:[%s3944_s1 + $0x3a8] sm:$0xff]  }
  0x70   : > { %2860 = vmatprep.subr.bf16.mxu1 %v3092_v0  ;;  %v3113_v61 = vld [vmem:[%s3944_s1 + $0x218] sm:$0xff]   ;;  %v3115_v0 = vld [vmem:[%s3944_s1 + $0x250] sm:$0xff]  }
  0x72   : > { %2833 = vmatpush3.bf16.msra.mxu0 %v3093_v2  ;;  %v3117_v2 = vld [vmem:[%s3944_s1 + $0x210] sm:$0xff]  }
  0x73   : > { %2861 = vmatpush3.bf16.msra.mxu1 %v3094_v53  ;;  %2874 = vmatprep.subr.bf16.mxu0 %v3095_v63  ;;  %v3119_v53 = vld [vmem:[%s3944_s1 + $0x248] sm:$0xff]   ;;  %v2381_v63 = vld [vmem:[%s3415_s7 + $0x18] sm:$0xf] }
  0x74   : > { %2902 = vmatprep.subr.bf16.mxu1 %v3096_v15  ;;  %v3754_v15 = vld [vmem:[%s3415_s7 + $0x1c] sm:$0x1]  ;;  %v590_v20 = vshrl.u32 %v2381_v63, 16  ;;  %v593_v22 = vshll.u32 %v2381_v63, 16  ;;  %v2541_v36 = vcombine.low %v2380_v12, %v2381_v63  ;;  %v3150_v63 = vld [vmem:[%s3944_s1 + $0x3d0] sm:$0xff]  }
  0x75   : > { %1365 = vmatmul.mubr.bf16.vlgmr.msra.gmra.mxu0 %v3453_v32  ;;  %v3102_v32 = vld [vmem:[%s3944_s1 + $0x2b0] sm:$0xff]  }
  0x76   : > { %1414 = vmatmul.mubr.bf16.vlgmr.msra.gmra.mxu1 %v3471_v40  ;;  %2875 = vmatpush3.bf16.msra.mxu0 %v3097_v16  ;;  %v599_v16 = vshll.u32 %v3754_v15, 16  ;;  %v595_v59 = vrot.slane %v593_v22, 5 }
  0x77   : > { %2903 = vmatpush3.bf16.msra.mxu1 %v3098_v23  ;;  %2876 = vmatprep.subr.bf16.mxu0 %v3099_v24  ;;  %v578_v23 = vrot.slane %v576_v4, 4  ;;  %v581_v24 = vrot.slane %v579_v18, 5 }
  0x78   : > { %2904 = vmatprep.subr.bf16.mxu1 %v3100_v26  ;;  %1372 = vmatprep.mubr.bf16.mxu0 %v2438_v42  ;;  %v3129_v26 = vld [vmem:[%s3944_s1 + $0x3f8] sm:$0xff]   ;;  %v601_v60 = vrot.slane %v599_v16, 5  ;;  %v3135_v42 = vld [vmem:[%s3944_s1 + $0x3b0] sm:$0xff]  }
  0x79   : > { %1421 = vmatprep.mubr.bf16.mxu1 %v3682_v49  ;;  %v3152_v16 = vld [vmem:[%s3944_s1 + $0x390] sm:$0xff]  }
  0x7a   : > { %2877 = vmatpush3.bf16.msra.mxu0 %v3101_v28  ;;  %v592_v28 = vrot.slane %v590_v20, 4  ;;  %v3151_v20 = vld [vmem:[%s3944_s1 + $0x310] sm:$0xff]  }
  0x7b   : > { %2905 = vmatpush3.bf16.msra.mxu1 %v3102_v32  ;;  %2878 = vmatprep.subr.bf16.mxu0 %v3103_v33  ;;  %v582_v32 = vor.u32 %v581_v24, %v578_v23  ;;  %v3153_v24 = vld [vmem:[%s3944_s1 + $0x348] sm:$0xff]  }
  0x7c   : > { %2906 = vmatprep.subr.bf16.mxu1 %v3104_v10  ;;  %v596_v29 = vor.u32 %v595_v59, %v592_v28  ;;  %v3131_v10 = vld [vmem:[%s3944_s1 + $0x3b8] sm:$0xff]   ;;  %v3155_v59 = vld [vmem:[%s3944_s1 + $0x308] sm:$0xff]  }
  0x7d   : > { %1373 = vmatmul.mubr.bf16.gmra.mxu0 %v3566_v45  ;;  %v3111_v45 = vld [vmem:[%s3944_s1 + $0x258] sm:$0xff]   ;;  %v583_v31 = vrot.slane %v582_v32, 4 }
  0x7e   : > { %2879 = vmatpush3.bf16.msra.mxu0 %v3105_v43  ;;  %1422 = vmatmul.mubr.bf16.gmra.mxu1 %v3593_v58  ;;  %v597_v33 = vrot.slane %v596_v29, 4  ;;  %v3138_v43 = vld [vmem:[%s3944_s1 + $0x328] sm:$0xff]  }
  0x7f   : > { %2907 = vmatpush3.bf16.msra.mxu1 %v3106_v47  ;;  %2880 = vmatprep.subr.bf16.mxu0 %v3107_v50  ;;  %v3142_v47 = vld [vmem:[%s3944_s1 + $0x320] sm:$0xff]   ;;  %v3144_v50 = vld [vmem:[%s3944_s1 + $0x358] sm:$0xff]   ;;  %v3156_v29 = vld [vmem:[%s3944_s1 + $0x388] sm:$0xff]  }
  0x80   : > { %2908 = vmatprep.subr.bf16.mxu1 %v3108_v51  ;;  %1775 = vmatprep.mubr.bf16.mxu0 %v3471_v40  ;;  %v602_v35 = vsel %vm3441_vm8, %v597_v33, %v601_v60  ;;  %v3143_v51 = vld [vmem:[%s3944_s1 + $0x3a0] sm:$0xff]   ;;  %v645_v60 = vrot.slane %v3751_v13, 5 }
  0x81   : > { %v3159_v33 = vld [vmem:[%s3944_s1 + $0x300] sm:$0xff]  }
  0x82   : > { %2881 = vmatpush3.bf16.msra.mxu0 %v3109_v52  ;;  %v3146_v52 = vld [vmem:[%s3944_s1 + $0x318] sm:$0xff]   ;;  %v3160_v13 = vld [vmem:[%s3944_s1 + $0x380] sm:$0xff]  }
  0x83   : > { %2909 = vmatpush3.bf16.msra.mxu1 %v3110_v55  ;;  %2882 = vmatprep.subr.bf16.mxu0 %v3111_v45  ;;  %v3145_v55 = vld [vmem:[%s3944_s1 + $0x3d8] sm:$0xff]   ;;  %v2382_v45 = vld [vmem:[%s3415_s7 + $0x20] sm:$0xf] }
  0x84   : > { %2910 = vmatprep.subr.bf16.mxu1 %v3112_v57  ;;  %v2383_v57 = vld [vmem:[%s3415_s7 + $0x28] sm:$0xf] }
  0x85   : > { %v2542_v28 = vcombine.low %v2382_v45, %v2383_v57 }
  0x86   : > { %2883 = vmatpush3.bf16.msra.mxu0 %v3113_v61  ;;  %v3829_v61 = vld [vmem:[%s3415_s7 + $0x24] sm:$0x1] }
  0x87   : > { %2911 = vmatpush3.bf16.msra.mxu1 %v3114_v62  ;;  %2884 = vmatprep.subr.bf16.mxu0 %v3115_v0  ;;  %v3832_v62 = vld [vmem:[%s3415_s7 + $0x2c] sm:$0x1]  ;;  %v604_v0 = vshrl.u32 %v2382_v45, 16 }
  0x88   : > { %2912 = vmatprep.subr.bf16.mxu1 %v3116_v1  ;;  %v607_v1 = vshll.u32 %v2382_v45, 16 }
  0x8a   : > { %2885 = vmatpush3.bf16.msra.mxu0 %v3117_v2  ;;  %v613_v2 = vshll.u32 %v3829_v61, 16 }
  0x8b   : > { %2913 = vmatpush3.bf16.msra.mxu1 %v3118_v3  ;;  %2886 = vmatprep.subr.bf16.mxu0 %v3119_v53  ;;  %v618_v3 = vshrl.u32 %v2383_v57, 16  ;;  %v621_v53 = vshll.u32 %v2383_v57, 16 }
  0x8c   : > { %2914 = vmatprep.subr.bf16.mxu1 %v3120_v5  ;;  %v627_v5 = vshll.u32 %v3832_v62, 16 }
  0x8d   : > { %v623_v12 = vrot.slane %v621_v53, 5 }
  0x8e   : > { %2887 = vmatpush3.bf16.msra.mxu0 %v3121_v54  ;;  %v3147_v54 = vld [vmem:[%s3944_s1 + $0x398] sm:$0xff]   ;;  %v629_v19 = vrot.slane %v627_v5, 5 }
  0x8f   : > { %2915 = vmatpush3.bf16.msra.mxu1 %v3122_v6  ;;  %2888 = vmatprep.subr.bf16.mxu0 %v3123_v7  ;;  %v606_v6 = vrot.slane %v604_v0, 4  ;;  %v609_v7 = vrot.slane %v607_v1, 5 }
  0x90   : > { %2916 = vmatprep.subr.bf16.mxu1 %v3124_v8  ;;  %v3149_v8 = vld [vmem:[%s3944_s1 + $0x350] sm:$0xff]  }
  0x91   : > { %v610_v4 = vor.u32 %v609_v7, %v606_v6 }
  0x92   : > { %2889 = vmatpush3.bf16.msra.mxu0 %v3125_v9  ;;  %v615_v9 = vrot.slane %v613_v2, 5 }
  0x93   : > { %2917 = vmatpush3.bf16.msra.mxu1 %v3126_v11  ;;  %2930 = vmatprep.subr.bf16.mxu0 %v3128_v25  ;;  %v620_v11 = vrot.slane %v618_v3, 4  ;;  %v611_v22 = vrot.slane %v610_v4, 4 }
  0x94   : > { %2958 = vmatprep.subr.bf16.mxu1 %v3129_v26  ;;  %v3154_v26 = vld [vmem:[%s3944_s1 + $0x3c8] sm:$0xff]  }
  0x95   : > { %1776 = vmatmul.mubr.bf16.vlgmr.msra.gmra.mxu0 %v3466_v38  ;;  %v588_v38 = vsel %vm3441_vm8, %v583_v31, %v587_v27  ;;  %v624_v18 = vor.u32 %v623_v12, %v620_v11  ;;  %v616_v25 = vsel %vm3441_vm8, %v611_v22, %v615_v9  ;;  %v649_v31 = vrot.slane %v3754_v15, 5 }
  0x96   : > { %1783 = vmatprep.mubr.bf16.mxu0 %v3593_v58  ;;  %2931 = vmatpush3.bf16.msra.mxu0 %v3130_v30  ;;  %v3782_v17 = vcombine.low %v588_v38, %v602_v35  ;;  %v3158_v30 = vld [vmem:[%s3944_s1 + $0x3c0] sm:$0xff]   ;;  %v2388_v38 = vld [vmem:[%s3415_s7 + $0x10] sm:$0xe]  ;;  %v657_v35 = vrot.slane %v3832_v62, 5 }
  0x97   : > { %2932 = vmatprep.subr.bf16.mxu0 %v3132_v34  ;;  %v625_v23 = vrot.slane %v624_v18, 4  ;;  %v653_v34 = vrot.slane %v3829_v61, 5 }
  0x98   : > { %1824 = vmatprep.mubr.bf16.mxu1 %v3782_v17 }
  0x99   : > { %1825 = vmatmul.mubr.bf16.vlgmr.msra.gmra.mxu1 %v2541_v36  ;;  %v630_v27 = vsel %vm3441_vm8, %v625_v23, %v629_v19  ;;  %v2392_v36 = vrot.slane %v2388_v38, 9 }
  0x9a   : > { %2933 = vmatpush3.bf16.msra.mxu0 %v3134_v37  ;;  %2959 = vmatpush3.bf16.msra.mxu1 %v3131_v10  ;;  %v2544_v32 = vcombine.low %v616_v25, %v630_v27  ;;  %v2389_v10 = vld [vmem:[%s3415_s7 + $0x18] sm:$0xe]  ;;  %v2390_v37 = vld [vmem:[%s3415_s7 + $0x20] sm:$0xe] }
  0x9b   : > { %2934 = vmatprep.subr.bf16.mxu0 %v3136_v41  ;;  %2960 = vmatprep.subr.bf16.mxu1 %v3133_v39  ;;  %v2393_v15 = vrot.slane %v2389_v10, 9  ;;  %v2391_v39 = vld [vmem:[%s3415_s7 + $0x28] sm:$0xe]  ;;  %v2394_v41 = vrot.slane %v2390_v37, 9 }
  0x9c   : > { %1832 = vmatprep.mubr.bf16.mxu1 %v2544_v32 }
  0x9d   : > { %1784 = vmatmul.mubr.bf16.gmra.mxu0 %v3588_v56  ;;  %v3140_v56 = vld [vmem:[%s3944_s1 + $0x360] sm:$0xff]  }
  0x9e   : > { %2138 = vmatprep.mubr.bf16.mxu0 %v3634_v21  ;;  %2935 = vmatpush3.bf16.msra.mxu0 %v3138_v43  ;;  %v3141_v21 = vld [vmem:[%s3944_s1 + $0x3e0] sm:$0xff]   ;;  %v646_v43 = vsel %vm3573_vm11, %v2392_v36, %v645_v60 }
  0x9f   : > { %2936 = vmatprep.subr.bf16.mxu0 %v3140_v56  ;;  %2961 = vmatpush3.bf16.msra.mxu1 %v3135_v42  ;;  %v2395_v42 = vrot.slane %v2391_v39, 9 }
  0xa0   : > { %2962 = vmatprep.subr.bf16.mxu1 %v3137_v44  ;;  %v650_v44 = vsel %vm3573_vm11, %v2393_v15, %v649_v31 }
  0xa1   : > { %1833 = vmatmul.mubr.bf16.gmra.mxu1 %v2542_v28  ;;  %v2641_v56 = vcombine.low %v646_v43, %v650_v44 }
  0xa2   : > { %2937 = vmatpush3.bf16.msra.mxu0 %v3142_v47  ;;  %v658_v47 = vsel %vm3573_vm11, %v2395_v42, %v657_v35 }
  0xa3   : > { %2938 = vmatprep.subr.bf16.mxu0 %v3144_v50  ;;  %2963 = vmatpush3.bf16.msra.mxu1 %v3139_v46  ;;  %v654_v46 = vsel %vm3573_vm11, %v2394_v41, %v653_v34 }
  0xa4   : > { %2964 = vmatprep.subr.bf16.mxu1 %v3141_v21  ;;  %v2642_v21 = vcombine.low %v654_v46, %v658_v47  ;;  %2187 = vmatprep.mubr.bf16.mxu1 %v2641_v56 }
  0xa6   : > { %2939 = vmatpush3.bf16.msra.mxu0 %v3146_v52 }
  0xa7   : > { %2965 = vmatpush3.bf16.msra.mxu1 %v3143_v51  ;;  %2940 = vmatprep.subr.bf16.mxu0 %v3149_v8 }
  0xa8   : > { %2966 = vmatprep.subr.bf16.mxu1 %v3145_v55 }
  0xaa   : > { %2941 = vmatpush3.bf16.msra.mxu0 %v3151_v20 }
  0xab   : > { %2967 = vmatpush3.bf16.msra.mxu1 %v3147_v54  ;;  %2942 = vmatprep.subr.bf16.mxu0 %v3153_v24 }
  0xac   : > { %2968 = vmatprep.subr.bf16.mxu1 %v3150_v63 }
  0xae   : > { %2943 = vmatpush3.bf16.msra.mxu0 %v3155_v59 }
  0xaf   : > { %2969 = vmatpush3.bf16.msra.mxu1 %v3152_v16  ;;  %2944 = vmatprep.subr.bf16.mxu0 %v3157_v14 }
  0xb0   : > { %2970 = vmatprep.subr.bf16.mxu1 %v3154_v26 }
  0xb2   : > { %2945 = vmatpush3.bf16.msra.mxu0 %v3159_v33 }
  0xb3   : > { %2971 = vmatpush3.bf16.msra.mxu1 %v3156_v29 }
  0xb4   : > { %2972 = vmatprep.subr.bf16.mxu1 %v3158_v30 }
  0xb5   : > { %2139 = vmatmul.mubr.bf16.vlgmr.msra.gmra.mxu0 %v3471_v40 }
  0xb6   : > { %2146 = vmatprep.mubr.bf16.mxu0 %v3682_v49 }
  0xb7   : > { %2973 = vmatpush3.bf16.msra.mxu1 %v3160_v13 }
  0xba   : > { %2188 = vmatmul.mubr.bf16.vlgmr.msra.gmra.mxu1 %v3782_v17 }
  0xbb   : > { %2195 = vmatprep.mubr.bf16.mxu1 %v2642_v21 }
  0xbd   : > { %2147 = vmatmul.mubr.bf16.gmra.mxu0 %v3593_v58  ;;  %v3902_v58 = vld [vmem:[%s3945_s2] ss:$0 sm:$0xff] }
  0xc2   : > { %2196 = vmatmul.mubr.bf16.gmra.mxu1 %v2544_v32 }
 0x115   : > { %v2778_v50 = vpop.f32.mrf.mxu0 }
 0x116   : > { %v2806_v51 = vpop.f32.mrf.mxu1 }
 0x117   : > { %v2779_v40 = vpop.f32.mrf.mxu0 }
 0x118   : > { %v2807_v52 = vpop.f32.mrf.mxu1  ;;  %v2780_v17 = vadd.f32 %v2779_v40, %v2778_v50 }
 0x119   : > { %v2781_v55 = vpop.f32.mrf.mxu0  ;;  %v2808_v8 = vadd.f32 %v2807_v52, %v2806_v51 }
 0x11a   : > { %v2809_v45 = vpop.f32.mrf.mxu1  ;;  %v996_v7 = vadd.f32 %v2780_v17, %v3902_v58 }
 0x11b   : > { %v2782_v57 = vpop.f32.mrf.mxu0 }
 0x11c   : > { %v2810_v61 = vpop.f32.mrf.mxu1  ;;  %v2783_v9 = vadd.f32 %v2782_v57, %v2781_v55  ;;  %v1045_v22 = vadd.f32 %v2808_v8, %v996_v7 }
 0x11d   : > { %v2811_v27 = vadd.f32 %v2810_v61, %v2809_v45 }
 0x11e   : > { %v999_v16 = vadd.f32 %v2783_v9, %v3902_v58 }
 0x120   : > { %v2784_v48 = vpop.f32.mrf.mxu0  ;;  %v1048_v14 = vadd.f32 %v2811_v27, %v999_v16 }
 0x122   : > { %v2785_v62 = vpop.f32.mrf.mxu0 }
 0x123   : > { %v2786_v26 = vadd.f32 %v2785_v62, %v2784_v48 }
 0x124   : > { %v2787_v49 = vpop.f32.mrf.mxu0 }
 0x125   : > { %v1004_v30 = vadd.f32 %v2786_v26, %v3902_v58 }
 0x126   : > { %v2788_v3 = vpop.f32.mrf.mxu0 }
 0x127   : > { %v2789_v13 = vadd.f32 %v2788_v3, %v2787_v49 }
 0x129   : > { %v2812_v0 = vpop.f32.mrf.mxu1  ;;  %v1007_v43 = vadd.f32 %v2789_v13, %v3902_v58 }
 0x12b   : > { %v2813_v1 = vpop.f32.mrf.mxu1 }
 0x12c   : > { %v2814_v31 = vadd.f32 %v2813_v1, %v2812_v0 }
 0x12d   : > { %v2815_v2 = vpop.f32.mrf.mxu1 }
 0x12e   : > { %v1053_v39 = vadd.f32 %v2814_v31, %v1004_v30 }
 0x12f   : > { %v2816_v53 = vpop.f32.mrf.mxu1 }
 0x130   : > { %v2817_v44 = vadd.f32 %v2816_v53, %v2815_v2 }
 0x132   : > { %v1056_v40 = vadd.f32 %v2817_v44, %v1007_v43 }
 0x135   : > { %v2834_v5 = vpop.f32.mrf.mxu0 }
 0x136   : > { %v2862_v54 = vpop.f32.mrf.mxu1 }
 0x137   : > { %v2835_v6 = vpop.f32.mrf.mxu0 }
 0x138   : > { %v2836_v11 = vadd.f32 %v2835_v6, %v2834_v5  ;;  %v2863_v12 = vpop.f32.mrf.mxu1 }
 0x139   : > { %v2864_v63 = vadd.f32 %v2863_v12, %v2862_v54  ;;  %v2837_v4 = vpop.f32.mrf.mxu0 }
 0x13a   : > { %v1367_v18 = vadd.f32 %v2836_v11, %v3902_v58  ;;  %v2865_v19 = vpop.f32.mrf.mxu1 }
 0x13b   : > { %v2838_v20 = vpop.f32.mrf.mxu0 }
 0x13c   : > { %v1416_v23 = vadd.f32 %v2864_v63, %v1367_v18  ;;  %v2839_v24 = vadd.f32 %v2838_v20, %v2837_v4  ;;  %v2866_v25 = vpop.f32.mrf.mxu1 }
 0x13d   : > { %v2867_v32 = vadd.f32 %v2866_v25, %v2865_v19  ;;  %v2840_v29 = vpop.f32.mrf.mxu0 }
 0x13e   : > { %v2754_v28 = vpack.c.bf16 %v1416_v23, %v1045_v22  ;;  %v1370_v59 = vadd.f32 %v2839_v24, %v3902_v58  ;;  %v2868_v34 = vpop.f32.mrf.mxu1 }
 0x13f   : > { %v2841_v33 = vpop.f32.mrf.mxu0 }
 0x140   : > { %1462 = vst [vmem:[%s3263_s29] sm:$0xff] %v2754_v28  ;;  %v1419_v60 = vadd.f32 %v2867_v32, %v1370_v59  ;;  %v2842_v10 = vadd.f32 %v2841_v33, %v2840_v29  ;;  %v2869_v36 = vpop.f32.mrf.mxu1 }
 0x141   : > { %v2843_v35 = vpop.f32.mrf.mxu0  ;;  %v2870_v37 = vadd.f32 %v2869_v36, %v2868_v34 }
 0x142   : > { %v2755_v38 = vpack.c.bf16 %v1419_v60, %v1048_v14  ;;  %v1375_v15 = vadd.f32 %v2842_v10, %v3902_v58  ;;  %v2871_v42 = vpop.f32.mrf.mxu1 }
 0x143   : > { %v2844_v41 = vpop.f32.mrf.mxu0 }
 0x144   : > { %1463 = vst [vmem:[%s3263_s29 + $0x10] sm:$0xff] %v2755_v38  ;;  %v1424_v56 = vadd.f32 %v2870_v37, %v1375_v15  ;;  %v2845_v46 = vadd.f32 %v2844_v41, %v2843_v35  ;;  %v2872_v47 = vpop.f32.mrf.mxu1 }
 0x145   : > { %v2873_v51 = vadd.f32 %v2872_v47, %v2871_v42 }
 0x146   : > { %v2756_v21 = vpack.c.bf16 %v1424_v56, %v1053_v39  ;;  %v1378_v50 = vadd.f32 %v2845_v46, %v3902_v58 }
 0x148   : > { %1464 = vst [vmem:[%s3263_s29 + $0x20] sm:$0xff] %v2756_v21  ;;  %v1427_v52 = vadd.f32 %v2873_v51, %v1378_v50 }
 0x14a   : > { %v2757_v55 = vpack.c.bf16 %v1427_v52, %v1056_v40 }
 0x14c   : > { %1465 = vst [vmem:[%s3263_s29 + $0x30] sm:$0xff] %v2757_v55 }
 0x155   : > { %v2890_v45 = vpop.f32.mrf.mxu0 }
 0x157   : > { %v2891_v57 = vpop.f32.mrf.mxu0 }
 0x158   : > { %v2892_v8 = vadd.f32 %v2891_v57, %v2890_v45 }
 0x159   : > { %v2893_v48 = vpop.f32.mrf.mxu0  ;;  %v2918_v61 = vpop.f32.mrf.mxu1 }
 0x15a   : > { %v1778_v18 = vadd.f32 %v2892_v8, %v3902_v58 }
 0x15b   : > { %v2894_v62 = vpop.f32.mrf.mxu0  ;;  %v2919_v0 = vpop.f32.mrf.mxu1 }
 0x15c   : > { %v2920_v19 = vadd.f32 %v2919_v0, %v2918_v61  ;;  %v2895_v20 = vadd.f32 %v2894_v62, %v2893_v48 }
 0x15d   : > { %v2896_v49 = vpop.f32.mrf.mxu0  ;;  %v2921_v1 = vpop.f32.mrf.mxu1 }
 0x15e   : > { %v1827_v59 = vadd.f32 %v2920_v19, %v1778_v18  ;;  %v1781_v32 = vadd.f32 %v2895_v20, %v3902_v58 }
 0x15f   : > { %v2897_v2 = vpop.f32.mrf.mxu0  ;;  %v2922_v3 = vpop.f32.mrf.mxu1 }
 0x160   : > { %v2898_v26 = vadd.f32 %v2897_v2, %v2896_v49  ;;  %v2923_v31 = vadd.f32 %v2922_v3, %v2921_v1 }
 0x161   : > { %v2899_v17 = vpop.f32.mrf.mxu0  ;;  %v2924_v53 = vpop.f32.mrf.mxu1 }
 0x162   : > { %v1786_v38 = vadd.f32 %v2898_v26, %v3902_v58  ;;  %v1830_v15 = vadd.f32 %v2923_v31, %v1781_v32 }
 0x163   : > { %v2925_v5 = vpop.f32.mrf.mxu1  ;;  %v2900_v54 = vpop.f32.mrf.mxu0 }
 0x164   : > { %v2901_v10 = vadd.f32 %v2900_v54, %v2899_v17  ;;  %v2926_v37 = vadd.f32 %v2925_v5, %v2924_v53 }
 0x165   : > { %v2927_v6 = vpop.f32.mrf.mxu1 }
 0x166   : > { %v1789_v47 = vadd.f32 %v2901_v10, %v3902_v58  ;;  %v1835_v50 = vadd.f32 %v2926_v37, %v1786_v38 }
 0x167   : > { %v2928_v9 = vpop.f32.mrf.mxu1 }
 0x168   : > { %v2929_v51 = vadd.f32 %v2928_v9, %v2927_v6 }
 0x16a   : > { %v1838_v48 = vadd.f32 %v2929_v51, %v1789_v47 }
 0x175   : > { %v2946_v7 = vpop.f32.mrf.mxu0 }
 0x177   : > { %v2947_v11 = vpop.f32.mrf.mxu0 }
 0x178   : > { %v2948_v12 = vadd.f32 %v2947_v11, %v2946_v7 }
 0x179   : > { %v2949_v4 = vpop.f32.mrf.mxu0 }
 0x17a   : > { %v2974_v63 = vpop.f32.mrf.mxu1  ;;  %v2141_v22 = vadd.f32 %v2948_v12, %v3902_v58 }
 0x17b   : > { %v2950_v23 = vpop.f32.mrf.mxu0 }
 0x17c   : > { %v2975_v16 = vpop.f32.mrf.mxu1  ;;  %v2951_v25 = vadd.f32 %v2950_v23, %v2949_v4 }
 0x17d   : > { %v2976_v24 = vadd.f32 %v2975_v16, %v2974_v63  ;;  %v2952_v28 = vpop.f32.mrf.mxu0 }
 0x17e   : > { %v2977_v27 = vpop.f32.mrf.mxu1  ;;  %v2144_v14 = vadd.f32 %v2951_v25, %v3902_v58 }
 0x17f   : > { %v2190_v29 = vadd.f32 %v2976_v24, %v2141_v22  ;;  %v2953_v30 = vpop.f32.mrf.mxu0 }
 0x180   : > { %v2978_v60 = vpop.f32.mrf.mxu1  ;;  %v2954_v13 = vadd.f32 %v2953_v30, %v2952_v28 }
 0x181   : > { %v2758_v33 = vpack.c.bf16 %v2190_v29, %v1827_v59  ;;  %v2979_v34 = vadd.f32 %v2978_v60, %v2977_v27  ;;  %v2955_v36 = vpop.f32.mrf.mxu0 }
 0x182   : > { %v2980_v35 = vpop.f32.mrf.mxu1  ;;  %v2149_v41 = vadd.f32 %v2954_v13, %v3902_v58 }
 0x183   : > { %2743 = vst [vmem:[%s3263_s29 + $0x8] sm:$0xff] %v2758_v33  ;;  %v2193_v39 = vadd.f32 %v2979_v34, %v2144_v14  ;;  %v2956_v43 = vpop.f32.mrf.mxu0 }
 0x184   : > { %v2981_v42 = vpop.f32.mrf.mxu1  ;;  %v2957_v46 = vadd.f32 %v2956_v43, %v2955_v36 }
 0x185   : > { %v2759_v44 = vpack.c.bf16 %v2193_v39, %v1830_v15  ;;  %v2982_v56 = vadd.f32 %v2981_v42, %v2980_v35 }
 0x186   : > { %v2983_v21 = vpop.f32.mrf.mxu1  ;;  %v2152_v52 = vadd.f32 %v2957_v46, %v3902_v58 }
 0x187   : > { %2744 = vst [vmem:[%s3263_s29 + $0x18] sm:$0xff] %v2759_v44  ;;  %v2198_v40 = vadd.f32 %v2982_v56, %v2149_v41 }
 0x188   : > { %v2984_v55 = vpop.f32.mrf.mxu1 }
 0x189   : > { %v2760_v45 = vpack.c.bf16 %v2198_v40, %v1835_v50  ;;  %v2985_v57 = vadd.f32 %v2984_v55, %v2983_v21 }
 0x18b   : > { %2745 = vst [vmem:[%s3263_s29 + $0x28] sm:$0xff] %v2760_v45  ;;  %v2201_v61 = vadd.f32 %v2985_v57, %v2152_v52 }
 0x18d   : > { %v2761_v62 = vpack.c.bf16 %v2201_v61, %v1838_v48 }
 0x18f   : > { %2746 = vst [vmem:[%s3263_s29 + $0x38] sm:$0xff] %v2761_v62 }
 0x190 PF: > { %s13_s16 = sadd.s32 1, %s3199_s16   ;;  %s3955_s12 = smov %s3191_s14 }
 0x191   : > { %p10_p8 = scmp.ge.s32.totalorder %s13_s16, 6   ;;  %s3956_s13 = smov %s3195_s15 }
 0x192   : > { %s3957_s14 = smov %s3960_s17  ;;  %s3958_s15 = smov %s3964_s18 }
 0x193   :  { %12 = sbr.rel (!%p10_p8) target bundleno = 3 (0x3), region = 74 }

// kernel: decoder_forward.7
= control target key start
LH: loop header
LB: loop body
LE: loop exit
PB: predicated region body
PF: predicated region fallthrough
CT: control target
= control target key end

     0   :  { %s4321_s12 = smov 0   ;;  %s4323_s13 = smov 0   ;;  %s5511_s0 = inlined_call_operand.vmem [shape: bf16[2,16,16,128], index: 0, kind: input, shape index: {}]   ;;  %s5512_s1 = inlined_call_operand.vmem [shape: bf16[2,2,512,64], index: 1, kind: input, shape index: {}]   ;;  %s5513_s2 = inlined_call_operand.vmem [shape: f32[1,64], index: 2, kind: input, shape index: {}]   ;;  %s5514_s3 = inlined_call_operand.vmem [shape: bf16[2,16,2,16,128], index: 3, kind: output, shape index: {}]  }
   0x1   :  { %s4325_s14 = smov 0   ;;  %s4327_s15 = smov 0  }
   0x2   :  { %s4329_s16 = smov 0  }
   0x3 LB: > { %s22_s17 = sadd.s32 1, %s4289_s14  ;;  %s25_s18 = sadd.s32 1, %s4293_s15  ;;  %s4297_s16 = sphi %s4329_s16, %s13_s16   ;;  %s4293_s15 = sphi %s4327_s15, %s5528_s15   ;;  %s4289_s14 = sphi %s4325_s14, %s5527_s14   ;;  %s4285_s13 = sphi %s4323_s13, %s5526_s13   ;;  %s4281_s12 = sphi %s4321_s12, %s5525_s12  }
   0x4   : > { %p23_p0 = scmp.ge.s32.totalorder %s22_s17, 4  ;;  %p3210_p1 = scmp.ge.s32.totalorder %s4297_s16, 1 }
   0x5   : > { %p151_p2 = scmp.lt.s32.totalorder %s4297_s16, 9 }
   0x6   : > { %s5530_s17 = smov (%p23_p0, %s22_s17), 0  ;;  %s5532_s18 = smov (!%p23_p0, %s25_s18), %s4293_s15 }
   0x7   : > { %p152_p3 = pnand %p3210_p1, %p151_p2  ;;  %p27_p4 = scmp.ge.s32.totalorder %s5532_s18, 2 }
   0x8   : > { %p180_p5 = scmp.lt.s32.totalorder (!%p152_p3), %s4285_s13, 1  ;;  %s3213_s19 = sshll.u32 (!%p152_p3), %s4281_s12, 2 }
   0x9   : > { %s5534_s18 = smov (%p27_p4, %s5532_s18), 0  ;;  %155 = sbr.rel (%p152_p3) target bundleno = 598 (0x256), region = 32 }
   0xa   : > { %p188_p6 = scmp.lt.s32.totalorder (!%p152_p3), %s3213_s19, 15  ;;  %p3217_p7 = scmp.ne.s32.totalorder (!%p152_p3), %s4281_s12, 0 }
   0xe   : > { %s5536_s13 = smov (!%p180_p5, %s4285_s13), 1  ;;  %s5538_s19 = smov (!%p188_p6, %s3213_s19), 15 }
   0xf   : > { %s3652_s20 = sshll.u32 %s5536_s13, 7  ;;  %s3215_s21 = sshll.u32 %s5536_s13, 6 }
  0x10   : > { %s4357_s24 = scalar_lea.vmem %s5511_s0, %s3652_s20  ;;  %s3214_s25 = sshll.u32 %s5538_s19, 2 }
  0x11   : > { %s192_s26 = sadd.s32 %s3215_s21, %s3214_s25  ;;  %200 = sbr.rel (%p3217_p7) target bundleno = 108 (0x6c), region = 36 }
  0x12   : > { %s3216_s27 = sshll.u32 %s192_s26, 2 }
  0x13   : > { %s4362_s30 = scalar_lea.vmem %s5514_s3, %s3216_s27 }
  0x16   : > { %v255_v0 = vld [vmem:[%s4357_s24] sm:$0xf]  ;;  %vm644_vm0 = vsmask.f32 7938  ;;  %v4299_v1 = vmov 0   ;;  %vm643_vm3 = vcmask 1043456  }
  0x17   : > { %204 = vst [vmem:[#allocation2 + $0xc] sm:$0xf] %v4299_v1  ;;  %201 = vst [vmem:[#allocation2] sm:$0xf] %v4299_v1  ;;  %v287_v2 = vmax.bf16 %v4299_v1, %v255_v0  ;;  %v256_v3 = vld [vmem:[%s4357_s24 + $0x4] sm:$0xf] }
  0x18   : > { %202 = vst [vmem:[#allocation2 + $0x4] sm:$0xf] %v4299_v1  ;;  %203 = vst [vmem:[#allocation2 + $0x8] sm:$0xf] %v4299_v1  ;;  %vm319_vm1 = vsmask.f32 256  ;;  %v288_v4 = vmax.bf16 %v4299_v1, %v256_v3 }
  0x19   : > { %205 = vst [vmem:[#allocation2 + $0x10] sm:$0xf] %v4299_v1  ;;  %206 = vst [vmem:[#allocation2 + $0x14] sm:$0xf] %v4299_v1  ;;  %vm320_vm2 = vsmask.f32 4368 }
  0x1a   : > { %207 = vst [vmem:[#allocation2 + $0x18] sm:$0xf] %v4299_v1  ;;  %208 = vst [vmem:[#allocation2 + $0x1c] sm:$0xf] %v4299_v1  ;;  %vm650_vm4 = vcmask 1040384   ;;  %v323_v7 = vshrl.u32 %v287_v2, 16 }
  0x1b   : > { %209 = vst [vmem:[#allocation2 + $0x20] sm:$0xf] %v4299_v1  ;;  %210 = vst [vmem:[#allocation2 + $0x24] sm:$0xf] %v4299_v1  ;;  %v257_v5 = vld [vmem:[%s4357_s24 + $0x8] sm:$0xf] }
  0x1c   : > { %211 = vst [vmem:[#allocation2 + $0x28] sm:$0xf] %v4299_v1  ;;  %212 = vst [vmem:[#allocation2 + $0x2c] sm:$0xf] %v4299_v1  ;;  %v258_v6 = vld [vmem:[%s4357_s24 + $0xc] sm:$0xf]  ;;  %v289_v9 = vmax.bf16 %v4299_v1, %v257_v5 }
  0x1d   : > { %213 = vst [vmem:[#allocation2 + $0x30] sm:$0xf] %v4299_v1  ;;  %214 = vst [vmem:[#allocation2 + $0x34] sm:$0xf] %v4299_v1  ;;  %v326_v8 = vshll.u32 %v287_v2, 16  ;;  %v290_v10 = vmax.bf16 %v4299_v1, %v258_v6  ;;  %v331_v13 = vshrl.u32 %v288_v4, 16 }
  0x1e   : > { %215 = vst [vmem:[#allocation2 + $0x38] sm:$0xf] %v4299_v1  ;;  %216 = vst [vmem:[#allocation2 + $0x3c] sm:$0xf] %v4299_v1  ;;  %v259_v11 = vld [vmem:[%s4357_s24 + $0x10] sm:$0xf] }
  0x1f   : > { %217 = vst [vmem:[#allocation2 + $0x40] sm:$0xf] %v4299_v1  ;;  %218 = vst [vmem:[#allocation2 + $0x44] sm:$0xf] %v4299_v1  ;;  %v260_v12 = vld [vmem:[%s4357_s24 + $0x14] sm:$0xf]  ;;  %v291_v15 = vmax.bf16 %v4299_v1, %v259_v11 }
  0x20   : > { %219 = vst [vmem:[#allocation2 + $0x48] sm:$0xf] %v4299_v1  ;;  %220 = vst [vmem:[#allocation2 + $0x4c] sm:$0xf] %v4299_v1  ;;  %v334_v14 = vshll.u32 %v288_v4, 16  ;;  %v4431_v16 = vmax.bf16 %v4299_v1, %v260_v12  ;;  %v325_v17 = vrot.slane %v323_v7, 7 }
  0x21   : > { %221 = vst [vmem:[#allocation2 + $0x50] sm:$0xf] %v4299_v1  ;;  %222 = vst [vmem:[#allocation2 + $0x54] sm:$0xf] %v4299_v1  ;;  %v340_v19 = vshrl.u32 %v289_v9, 16  ;;  %v343_v20 = vshll.u32 %v289_v9, 16 }
  0x22   : > { %223 = vst [vmem:[#allocation2 + $0x58] sm:$0xf] %v4299_v1  ;;  %224 = vst [vmem:[#allocation2 + $0x5c] sm:$0xf] %v4299_v1  ;;  %v348_v21 = vshrl.u32 %v290_v10, 16  ;;  %v333_v24 = vrot.slane %v331_v13, 7  ;;  %v328_v28 = vor.u32 %v326_v8, %v325_v17 }
  0x23   : > { %225 = vst [vmem:[#allocation2 + $0x60] sm:$0xf] %v4299_v1  ;;  %226 = vst [vmem:[#allocation2 + $0x64] sm:$0xf] %v4299_v1  ;;  %v261_v22 = vld [vmem:[%s4357_s24 + $0x18] sm:$0xf] }
  0x24   : > { %227 = vst [vmem:[#allocation2 + $0x68] sm:$0xf] %v4299_v1  ;;  %228 = vst [vmem:[#allocation2 + $0x6c] sm:$0xf] %v4299_v1  ;;  %v351_v25 = vshll.u32 %v290_v10, 16  ;;  %v357_v26 = vshrl.u32 %v291_v15, 16  ;;  %v336_v34 = vor.u32 %v334_v14, %v333_v24  ;;  %v293_v38 = vmax.bf16 %v4299_v1, %v261_v22 }
  0x25   : > { %229 = vst [vmem:[#allocation2 + $0x70] sm:$0xf] %v4299_v1  ;;  %230 = vst [vmem:[#allocation2 + $0x74] sm:$0xf] %v4299_v1  ;;  %v360_v27 = vshll.u32 %v291_v15, 16  ;;  %v329_v29 = vrot.slane %v325_v17, 4 }
  0x26   : > { %231 = vst [vmem:[#allocation2 + $0x78] sm:$0xf] %v4299_v1  ;;  %232 = vst [vmem:[#allocation2 + $0x7c] sm:$0xf] %v4299_v1  ;;  %v342_v31 = vrot.slane %v340_v19, 7  ;;  %v350_v32 = vrot.slane %v348_v21, 7 }
  0x27   : > { %233 = vst [vmem:[#allocation2 + $0x80] sm:$0xf] %v4299_v1  ;;  %234 = vst [vmem:[#allocation2 + $0x84] sm:$0xf] %v4299_v1  ;;  %v646_v33 = vld [vmem:[#allocation2 + $0xc] sm:$0xf] }
  0x28   : > { %235 = vst [vmem:[#allocation2 + $0x88] sm:$0xf] %v4299_v1  ;;  %236 = vst [vmem:[#allocation2 + $0x8c] sm:$0xf] %v4299_v1  ;;  %v338_v35 = vrot.slane %v333_v24, 4  ;;  %v359_v37 = vrot.slane %v357_v26, 7  ;;  %v345_v41 = vor.u32 %v343_v20, %v342_v31  ;;  %v353_v44 = vor.u32 %v351_v25, %v350_v32 }
  0x29   : > { %237 = vst [vmem:[#allocation2 + $0x90] sm:$0xf] %v4299_v1  ;;  %238 = vst [vmem:[#allocation2 + $0x94] sm:$0xf] %v4299_v1  ;;  %v652_v36 = vld [vmem:[#allocation2 + $0x14] sm:$0x1] }
  0x2a   : > { %239 = vst [vmem:[#allocation2 + $0x98] sm:$0xf] %v4299_v1  ;;  %240 = vst [vmem:[#allocation2 + $0x9c] sm:$0xf] %v4299_v1  ;;  %v262_v39 = vld [vmem:[%s4357_s24 + $0x1c] sm:$0xf]  ;;  %v362_v49 = vor.u32 %v360_v27, %v359_v37 }
  0x2b   : > { %241 = vst [vmem:[#allocation2 + $0xa0] sm:$0xf] %v4299_v1  ;;  %242 = vst [vmem:[#allocation2 + $0xa4] sm:$0xf] %v4299_v1  ;;  %v655_v42 = vld [vmem:[#allocation2 + $0x18] sm:$0xf]  ;;  %v294_v0 = vmax.bf16 %v4299_v1, %v262_v39 }
  0x2c   : > { %243 = vst [vmem:[#allocation2 + $0xa8] sm:$0xf] %v4299_v1  ;;  %244 = vst [vmem:[#allocation2 + $0xac] sm:$0xf] %v4299_v1  ;;  %v346_v43 = vrot.slane %v342_v31, 4  ;;  %v355_v48 = vrot.slane %v350_v32, 4 }
  0x2d   : > { %245 = vst [vmem:[#allocation2 + $0xb0] sm:$0xf] %v4299_v1  ;;  %246 = vst [vmem:[#allocation2 + $0xb4] sm:$0xf] %v4299_v1  ;;  %v659_v45 = vld [vmem:[#allocation2 + $0x20] sm:$0x1] }
  0x2e   : > { %247 = vst [vmem:[#allocation2 + $0xb8] sm:$0xf] %v4299_v1  ;;  %248 = vst [vmem:[#allocation2 + $0xbc] sm:$0xf] %v4299_v1  ;;  %v662_v50 = vld [vmem:[#allocation2 + $0x24] sm:$0xf] }
  0x2f   : > { %249 = vst [vmem:[#allocation2 + $0xc0] sm:$0xf] %v4299_v1  ;;  %250 = vst [vmem:[#allocation2 + $0xc4] sm:$0xf] %v4299_v1  ;;  %v263_v51 = vld [vmem:[%s4357_s24 + $0x20] sm:$0xf] }
  0x30   : > { %251 = vst [vmem:[#allocation2 + $0xc8] sm:$0xf] %v4299_v1  ;;  %252 = vst [vmem:[#allocation2 + $0xcc] sm:$0xf] %v4299_v1  ;;  %v363_v54 = vrot.slane %v359_v37, 4  ;;  %v365_v55 = vshrl.u32 %v4431_v16, 16  ;;  %v295_v2 = vmax.bf16 %v4299_v1, %v263_v51 }
  0x31   : > { %253 = vst [vmem:[#allocation2 + $0xd0] sm:$0xf] %v4299_v1  ;;  %254 = vst [vmem:[#allocation2 + $0xd4] sm:$0xf] %v4299_v1  ;;  %v264_v56 = vld [vmem:[%s4357_s24 + $0x24] sm:$0xf] }
  0x32   : > { %vm4435_vm5 = vmand %vm643_vm3, %vm644_vm0  ;;  %v265_v57 = vld [vmem:[%s4357_s24 + $0x28] sm:$0xf]  ;;  %v368_v60 = vshll.u32 %v4431_v16, 16  ;;  %v374_v61 = vshrl.u32 %v293_v38, 16  ;;  %v367_v62 = vrot.slane %v365_v55, 7  ;;  %v377_v63 = vshll.u32 %v293_v38, 16 }
  0x33   : > { %vm4442_vm6 = vmor %vm319_vm1, %vm320_vm2  ;;  %v647_v40 = vsel %vm4435_vm5, %v328_v28, %v646_v33  ;;  %v656_v52 = vsel %vm4435_vm5, %v345_v41, %v655_v42  ;;  %v663_v59 = vsel %vm4435_vm5, %v362_v49, %v662_v50  ;;  %v266_v3 = vld [vmem:[%s4357_s24 + $0x2c] sm:$0xf]  ;;  %v296_v6 = vmax.bf16 %v4299_v1, %v264_v56  ;;  %v669_v11 = vld [vmem:[#allocation2 + $0x30] sm:$0xf] }
  0x34   : > { %vm4448_vm7 = vmand %vm650_vm4, %vm319_vm1  ;;  %648 = vst [vmem:[#allocation2 + $0xc] sm:$0xf] %v647_v40  ;;  %v337_v46 = vsel %vm4442_vm6, %v329_v29, %v336_v34  ;;  %v354_v53 = vsel %vm4442_vm6, %v346_v43, %v353_v44  ;;  %v666_v4 = vld [vmem:[#allocation2 + $0x2c] sm:$0x1]  ;;  %v376_v5 = vrot.slane %v374_v61, 7  ;;  %v297_v7 = vmax.bf16 %v4299_v1, %v265_v57 }
  0x35   : > { %v653_v47 = vsel %vm4448_vm7, %v338_v35, %v652_v36  ;;  %649 = vst [vmem:[#allocation2 + $0x10] sm:$0xf] %v337_v46  ;;  %657 = vst [vmem:[#allocation2 + $0x18] sm:$0xf] %v656_v52  ;;  %v660_v58 = vsel %vm4448_vm7, %v355_v48, %v659_v45  ;;  %v298_v8 = vmax.bf16 %v4299_v1, %v266_v3  ;;  %v372_v10 = vrot.slane %v367_v62, 4 }
  0x36   : > { %654 = vst [vmem:[#allocation2 + $0x14] sm:$0x1] %v653_v47  ;;  %658 = vst [vmem:[#allocation2 + $0x1c] sm:$0xf] %v354_v53  ;;  %v370_v9 = vor.u32 %v368_v60, %v367_v62  ;;  %v382_v12 = vshrl.u32 %v294_v0, 16  ;;  %v385_v13 = vshll.u32 %v294_v0, 16  ;;  %v379_v14 = vor.u32 %v377_v63, %v376_v5 }
  0x37   : > { %661 = vst [vmem:[#allocation2 + $0x20] sm:$0x1] %v660_v58  ;;  %664 = vst [vmem:[#allocation2 + $0x24] sm:$0xf] %v663_v59  ;;  %v380_v15 = vrot.slane %v376_v5, 4  ;;  %v391_v16 = vshrl.u32 %v295_v2, 16  ;;  %v667_v20 = vsel %vm4448_vm7, %v372_v10, %v666_v4 }
  0x38   : > { %v394_v17 = vshll.u32 %v295_v2, 16  ;;  %v371_v19 = vsel %vm4442_vm6, %v363_v54, %v370_v9  ;;  %v384_v21 = vrot.slane %v382_v12, 7  ;;  %v673_v22 = vld [vmem:[#allocation2 + $0x38] sm:$0x1]  ;;  %v676_v24 = vld [vmem:[#allocation2 + $0x3c] sm:$0xf]  ;;  %v670_v26 = vsel %vm4435_vm5, %v379_v14, %v669_v11 }
  0x39   : > { %v399_v25 = vshrl.u32 %v296_v6, 16  ;;  %665 = vst [vmem:[#allocation2 + $0x28] sm:$0xf] %v371_v19  ;;  %668 = vst [vmem:[#allocation2 + $0x2c] sm:$0x1] %v667_v20  ;;  %v393_v27 = vrot.slane %v391_v16, 7 }
  0x3a   : > { %v402_v28 = vshll.u32 %v296_v6, 16  ;;  %v680_v29 = vld [vmem:[#allocation2 + $0x44] sm:$0x1]  ;;  %v408_v31 = vshrl.u32 %v297_v7, 16  ;;  %671 = vst [vmem:[#allocation2 + $0x30] sm:$0xf] %v670_v26  ;;  %v387_v32 = vor.u32 %v385_v13, %v384_v21 }
  0x3b   : > { %v389_v33 = vrot.slane %v384_v21, 4  ;;  %v401_v34 = vrot.slane %v399_v25, 7  ;;  %v411_v35 = vshll.u32 %v297_v7, 16  ;;  %v683_v36 = vld [vmem:[#allocation2 + $0x48] sm:$0xf]  ;;  %v396_v37 = vor.u32 %v394_v17, %v393_v27 }
  0x3c   : > { %v397_v38 = vrot.slane %v393_v27, 4  ;;  %v410_v39 = vrot.slane %v408_v31, 7  ;;  %v416_v40 = vshrl.u32 %v298_v8, 16  ;;  %v267_v41 = vld [vmem:[%s4357_s24 + $0x30] sm:$0xf]  ;;  %v388_v42 = vsel %vm4442_vm6, %v380_v15, %v387_v32 }
  0x3d   : > { %v674_v43 = vsel %vm4448_vm7, %v389_v33, %v673_v22  ;;  %v404_v44 = vor.u32 %v402_v28, %v401_v34  ;;  %v406_v45 = vrot.slane %v401_v34, 4  ;;  %v268_v46 = vld [vmem:[%s4357_s24 + $0x34] sm:$0xf]  ;;  %v269_v47 = vld [vmem:[%s4357_s24 + $0x38] sm:$0xf]  ;;  %v677_v48 = vsel %vm4435_vm5, %v396_v37, %v676_v24 }
  0x3e   : > { %672 = vst [vmem:[#allocation2 + $0x34] sm:$0xf] %v388_v42  ;;  %675 = vst [vmem:[#allocation2 + $0x38] sm:$0x1] %v674_v43  ;;  %v413_v49 = vor.u32 %v411_v35, %v410_v39  ;;  %v414_v50 = vrot.slane %v410_v39, 4  ;;  %v418_v51 = vrot.slane %v416_v40, 7  ;;  %v299_v57 = vmax.bf16 %v4299_v1, %v267_v41 }
  0x3f   : > { %v270_v52 = vld [vmem:[%s4357_s24 + $0x3c] sm:$0xf]  ;;  %678 = vst [vmem:[#allocation2 + $0x3c] sm:$0xf] %v677_v48  ;;  %v405_v53 = vsel %vm4442_vm6, %v397_v38, %v404_v44  ;;  %v681_v54 = vsel %vm4448_vm7, %v406_v45, %v680_v29  ;;  %v419_v55 = vshll.u32 %v298_v8, 16  ;;  %v300_v60 = vmax.bf16 %v4299_v1, %v268_v46 }
  0x40   : > { %v687_v56 = vld [vmem:[#allocation2 + $0x50] sm:$0x1]  ;;  %679 = vst [vmem:[#allocation2 + $0x40] sm:$0xf] %v405_v53  ;;  %682 = vst [vmem:[#allocation2 + $0x44] sm:$0x1] %v681_v54  ;;  %v684_v58 = vsel %vm4435_vm5, %v413_v49, %v683_v36  ;;  %v301_v61 = vmax.bf16 %v4299_v1, %v269_v47  ;;  %v302_v2 = vmax.bf16 %v4299_v1, %v270_v52 }
  0x41   : > { %v423_v59 = vrot.slane %v418_v51, 4  ;;  %685 = vst [vmem:[#allocation2 + $0x48] sm:$0xf] %v684_v58  ;;  %v421_v62 = vor.u32 %v419_v55, %v418_v51  ;;  %v425_v63 = vshrl.u32 %v299_v57, 16  ;;  %v428_v0 = vshll.u32 %v299_v57, 16 }
  0x42   : > { %v271_v3 = vld [vmem:[%s4357_s24 + $0x40] sm:$0xf]  ;;  %v433_v5 = vshrl.u32 %v300_v60, 16  ;;  %v436_v6 = vshll.u32 %v300_v60, 16  ;;  %v442_v7 = vshrl.u32 %v301_v61, 16  ;;  %v445_v11 = vshll.u32 %v301_v61, 16 }
  0x43   : > { %v688_v4 = vsel %vm4448_vm7, %v423_v59, %v687_v56  ;;  %v272_v8 = vld [vmem:[%s4357_s24 + $0x44] sm:$0xf]  ;;  %v422_v9 = vsel %vm4442_vm6, %v414_v50, %v421_v62  ;;  %v427_v10 = vrot.slane %v425_v63, 7  ;;  %v450_v12 = vshrl.u32 %v302_v2, 16  ;;  %v690_v13 = vld [vmem:[#allocation2 + $0x54] sm:$0xf] }
  0x44   : > { %689 = vst [vmem:[#allocation2 + $0x50] sm:$0x1] %v688_v4  ;;  %686 = vst [vmem:[#allocation2 + $0x4c] sm:$0xf] %v422_v9  ;;  %v435_v14 = vrot.slane %v433_v5, 7  ;;  %v444_v15 = vrot.slane %v442_v7, 7  ;;  %v303_v17 = vmax.bf16 %v4299_v1, %v271_v3  ;;  %v304_v25 = vmax.bf16 %v4299_v1, %v272_v8 }
  0x45   : > { %v453_v16 = vshll.u32 %v302_v2, 16  ;;  %v430_v19 = vor.u32 %v428_v0, %v427_v10  ;;  %v431_v20 = vrot.slane %v427_v10, 4  ;;  %v694_v21 = vld [vmem:[#allocation2 + $0x5c] sm:$0x1]  ;;  %v697_v22 = vld [vmem:[#allocation2 + $0x60] sm:$0xf] }
  0x46   : > { %v452_v24 = vrot.slane %v450_v12, 7  ;;  %v438_v26 = vor.u32 %v436_v6, %v435_v14  ;;  %v440_v27 = vrot.slane %v435_v14, 4  ;;  %v447_v28 = vor.u32 %v445_v11, %v444_v15  ;;  %v701_v31 = vld [vmem:[#allocation2 + $0x68] sm:$0x1]  ;;  %v274_v37 = vld [vmem:[%s4357_s24 + $0x4c] sm:$0xf] }
  0x47   : > { %v448_v29 = vrot.slane %v444_v15, 4  ;;  %v273_v32 = vld [vmem:[%s4357_s24 + $0x48] sm:$0xf]  ;;  %v691_v33 = vsel %vm4435_vm5, %v430_v19, %v690_v13  ;;  %v459_v36 = vshrl.u32 %v303_v17, 16  ;;  %v275_v38 = vld [vmem:[%s4357_s24 + $0x50] sm:$0xf]  ;;  %v306_v51 = vmax.bf16 %v4299_v1, %v274_v37 }
  0x48   : > { %v455_v34 = vor.u32 %v453_v16, %v452_v24  ;;  %v457_v35 = vrot.slane %v452_v24, 4  ;;  %692 = vst [vmem:[#allocation2 + $0x54] sm:$0xf] %v691_v33  ;;  %v439_v39 = vsel %vm4442_vm6, %v431_v20, %v438_v26  ;;  %v695_v40 = vsel %vm4448_vm7, %v440_v27, %v694_v21  ;;  %v276_v43 = vld [vmem:[%s4357_s24 + $0x54] sm:$0xf] }
  0x49   : > { %v698_v41 = vsel %vm4435_vm5, %v447_v28, %v697_v22  ;;  %v462_v42 = vshll.u32 %v303_v17, 16  ;;  %693 = vst [vmem:[#allocation2 + $0x58] sm:$0xf] %v439_v39  ;;  %696 = vst [vmem:[#allocation2 + $0x5c] sm:$0x1] %v695_v40  ;;  %v461_v46 = vrot.slane %v459_v36, 7  ;;  %v305_v50 = vmax.bf16 %v4299_v1, %v273_v32 }
  0x4a   : > { %699 = vst [vmem:[#allocation2 + $0x60] sm:$0xf] %v698_v41  ;;  %v456_v44 = vsel %vm4442_vm6, %v448_v29, %v455_v34  ;;  %v702_v45 = vsel %vm4448_vm7, %v457_v35, %v701_v31  ;;  %v467_v47 = vshrl.u32 %v304_v25, 16  ;;  %v704_v48 = vld [vmem:[#allocation2 + $0x6c] sm:$0xf]  ;;  %v470_v49 = vshll.u32 %v304_v25, 16 }
  0x4b   : > { %700 = vst [vmem:[#allocation2 + $0x64] sm:$0xf] %v456_v44  ;;  %703 = vst [vmem:[#allocation2 + $0x68] sm:$0x1] %v702_v45  ;;  %v307_v52 = vmax.bf16 %v4299_v1, %v275_v38  ;;  %v464_v53 = vor.u32 %v462_v42, %v461_v46  ;;  %v465_v54 = vrot.slane %v461_v46, 4  ;;  %v308_v56 = vmax.bf16 %v4299_v1, %v276_v43 }
  0x4c   : > { %v469_v55 = vrot.slane %v467_v47, 7  ;;  %v708_v57 = vld [vmem:[#allocation2 + $0x74] sm:$0x1]  ;;  %v476_v58 = vshrl.u32 %v305_v50, 16  ;;  %v479_v59 = vshll.u32 %v305_v50, 16  ;;  %v484_v60 = vshrl.u32 %v306_v51, 16 }
  0x4d   : > { %v487_v61 = vshll.u32 %v306_v51, 16  ;;  %v705_v62 = vsel %vm4435_vm5, %v464_v53, %v704_v48  ;;  %v711_v2 = vld [vmem:[#allocation2 + $0x78] sm:$0xf]  ;;  %v493_v3 = vshrl.u32 %v307_v52, 16  ;;  %v496_v6 = vshll.u32 %v307_v52, 16 }
  0x4e   : > { %v472_v63 = vor.u32 %v470_v49, %v469_v55  ;;  %v474_v0 = vrot.slane %v469_v55, 4  ;;  %706 = vst [vmem:[#allocation2 + $0x6c] sm:$0xf] %v705_v62  ;;  %v478_v4 = vrot.slane %v476_v58, 7  ;;  %v486_v5 = vrot.slane %v484_v60, 7 }
  0x4f   : > { %v501_v7 = vshrl.u32 %v308_v56, 16  ;;  %v277_v8 = vld [vmem:[%s4357_s24 + $0x58] sm:$0xf]  ;;  %v715_v11 = vld [vmem:[#allocation2 + $0x80] sm:$0x1]  ;;  %v495_v12 = vrot.slane %v493_v3, 7 }
  0x50   : > { %v473_v9 = vsel %vm4442_vm6, %v465_v54, %v472_v63  ;;  %v709_v10 = vsel %vm4448_vm7, %v474_v0, %v708_v57  ;;  %v504_v13 = vshll.u32 %v308_v56, 16  ;;  %v278_v14 = vld [vmem:[%s4357_s24 + $0x5c] sm:$0xf]  ;;  %v481_v15 = vor.u32 %v479_v59, %v478_v4  ;;  %v718_v20 = vld [vmem:[#allocation2 + $0x84] sm:$0xf] }
  0x51   : > { %707 = vst [vmem:[#allocation2 + $0x70] sm:$0xf] %v473_v9  ;;  %710 = vst [vmem:[#allocation2 + $0x74] sm:$0x1] %v709_v10  ;;  %v482_v16 = vrot.slane %v478_v4, 4  ;;  %v489_v17 = vor.u32 %v487_v61, %v486_v5  ;;  %v491_v19 = vrot.slane %v486_v5, 4  ;;  %v498_v21 = vor.u32 %v496_v6, %v495_v12 }
  0x52   : > { %v499_v22 = vrot.slane %v495_v12, 4  ;;  %v503_v24 = vrot.slane %v501_v7, 7  ;;  %v309_v25 = vmax.bf16 %v4299_v1, %v277_v8  ;;  %v279_v26 = vld [vmem:[%s4357_s24 + $0x60] sm:$0xf]  ;;  %v712_v27 = vsel %vm4435_vm5, %v481_v15, %v711_v2  ;;  %v722_v31 = vld [vmem:[#allocation2 + $0x8c] sm:$0x1] }
  0x53   : > { %v490_v28 = vsel %vm4442_vm6, %v482_v16, %v489_v17  ;;  %v716_v29 = vsel %vm4448_vm7, %v491_v19, %v715_v11  ;;  %v310_v32 = vmax.bf16 %v4299_v1, %v278_v14  ;;  %v280_v33 = vld [vmem:[%s4357_s24 + $0x64] sm:$0xf]  ;;  %713 = vst [vmem:[#allocation2 + $0x78] sm:$0xf] %v712_v27  ;;  %v719_v34 = vsel %vm4435_vm5, %v498_v21, %v718_v20  ;;  %v281_v38 = vld [vmem:[%s4357_s24 + $0x68] sm:$0xf] }
  0x54   : > { %714 = vst [vmem:[#allocation2 + $0x7c] sm:$0xf] %v490_v28  ;;  %717 = vst [vmem:[#allocation2 + $0x80] sm:$0x1] %v716_v29  ;;  %v506_v35 = vor.u32 %v504_v13, %v503_v24  ;;  %v508_v36 = vrot.slane %v503_v24, 4  ;;  %v510_v37 = vshrl.u32 %v309_v25, 16  ;;  %v311_v42 = vmax.bf16 %v4299_v1, %v279_v26 }
  0x55   : > { %720 = vst [vmem:[#allocation2 + $0x84] sm:$0xf] %v719_v34  ;;  %v513_v39 = vshll.u32 %v309_v25, 16  ;;  %v518_v40 = vshrl.u32 %v310_v32, 16  ;;  %v521_v41 = vshll.u32 %v310_v32, 16  ;;  %v312_v47 = vmax.bf16 %v4299_v1, %v280_v33 }
  0x56   : > { %v507_v43 = vsel %vm4442_vm6, %v499_v22, %v506_v35  ;;  %v723_v44 = vsel %vm4448_vm7, %v508_v36, %v722_v31  ;;  %v512_v45 = vrot.slane %v510_v37, 7  ;;  %v725_v46 = vld [vmem:[#allocation2 + $0x90] sm:$0xf]  ;;  %v527_v49 = vshrl.u32 %v311_v42, 16  ;;  %v282_v52 = vld [vmem:[%s4357_s24 + $0x6c] sm:$0xf] }
  0x57   : > { %721 = vst [vmem:[#allocation2 + $0x88] sm:$0xf] %v507_v43  ;;  %724 = vst [vmem:[#allocation2 + $0x8c] sm:$0x1] %v723_v44  ;;  %v520_v48 = vrot.slane %v518_v40, 7  ;;  %v530_v50 = vshll.u32 %v311_v42, 16  ;;  %v313_v51 = vmax.bf16 %v4299_v1, %v281_v38  ;;  %v314_v3 = vmax.bf16 %v4299_v1, %v282_v52 }
  0x58   : > { %v515_v53 = vor.u32 %v513_v39, %v512_v45  ;;  %v516_v54 = vrot.slane %v512_v45, 4  ;;  %v729_v55 = vld [vmem:[#allocation2 + $0x98] sm:$0x1]  ;;  %v535_v56 = vshrl.u32 %v312_v47, 16  ;;  %v538_v57 = vshll.u32 %v312_v47, 16 }
  0x59   : > { %v523_v58 = vor.u32 %v521_v41, %v520_v48  ;;  %v525_v59 = vrot.slane %v520_v48, 4  ;;  %v529_v60 = vrot.slane %v527_v49, 7  ;;  %v732_v61 = vld [vmem:[#allocation2 + $0x9c] sm:$0xf]  ;;  %v544_v62 = vshrl.u32 %v313_v51, 16 }
  0x5a   : > { %v726_v63 = vsel %vm4435_vm5, %v515_v53, %v725_v46  ;;  %v537_v0 = vrot.slane %v535_v56, 7  ;;  %v547_v2 = vshll.u32 %v313_v51, 16  ;;  %v283_v4 = vld [vmem:[%s4357_s24 + $0x70] sm:$0xf]  ;;  %v284_v5 = vld [vmem:[%s4357_s24 + $0x74] sm:$0xf] }
  0x5b   : > { %727 = vst [vmem:[#allocation2 + $0x90] sm:$0xf] %v726_v63  ;;  %v524_v6 = vsel %vm4442_vm6, %v516_v54, %v523_v58  ;;  %v730_v7 = vsel %vm4448_vm7, %v525_v59, %v729_v55  ;;  %v532_v8 = vor.u32 %v530_v50, %v529_v60  ;;  %v533_v9 = vrot.slane %v529_v60, 4  ;;  %v736_v10 = vld [vmem:[#allocation2 + $0xa4] sm:$0x1] }
  0x5c   : > { %728 = vst [vmem:[#allocation2 + $0x94] sm:$0xf] %v524_v6  ;;  %731 = vst [vmem:[#allocation2 + $0x98] sm:$0x1] %v730_v7  ;;  %v540_v11 = vor.u32 %v538_v57, %v537_v0  ;;  %v542_v12 = vrot.slane %v537_v0, 4  ;;  %v546_v13 = vrot.slane %v544_v62, 7  ;;  %v315_v19 = vmax.bf16 %v4299_v1, %v283_v4 }
  0x5d   : > { %v739_v14 = vld [vmem:[#allocation2 + $0xa8] sm:$0xf]  ;;  %v552_v15 = vshrl.u32 %v314_v3, 16  ;;  %v733_v16 = vsel %vm4435_vm5, %v532_v8, %v732_v61  ;;  %v555_v17 = vshll.u32 %v314_v3, 16  ;;  %v316_v20 = vmax.bf16 %v4299_v1, %v284_v5  ;;  %v285_v21 = vld [vmem:[%s4357_s24 + $0x78] sm:$0xf] }
  0x5e   : > { %v286_v22 = vld [vmem:[%s4357_s24 + $0x7c] sm:$0xf]  ;;  %734 = vst [vmem:[#allocation2 + $0x9c] sm:$0xf] %v733_v16  ;;  %v541_v24 = vsel %vm4442_vm6, %v533_v9, %v540_v11  ;;  %v737_v25 = vsel %vm4448_vm7, %v542_v12, %v736_v10  ;;  %v549_v26 = vor.u32 %v547_v2, %v546_v13  ;;  %v550_v27 = vrot.slane %v546_v13, 4 }
  0x5f   : > { %735 = vst [vmem:[#allocation2 + $0xa0] sm:$0xf] %v541_v24  ;;  %738 = vst [vmem:[#allocation2 + $0xa4] sm:$0x1] %v737_v25  ;;  %v554_v28 = vrot.slane %v552_v15, 7  ;;  %v561_v29 = vshrl.u32 %v315_v19, 16  ;;  %v317_v36 = vmax.bf16 %v4299_v1, %v285_v21  ;;  %v318_v37 = vmax.bf16 %v4299_v1, %v286_v22 }
  0x60   : > { %v564_v31 = vshll.u32 %v315_v19, 16  ;;  %v569_v32 = vshrl.u32 %v316_v20, 16  ;;  %v740_v33 = vsel %vm4435_vm5, %v549_v26, %v739_v14  ;;  %v743_v34 = vld [vmem:[#allocation2 + $0xb0] sm:$0x1]  ;;  %v572_v35 = vshll.u32 %v316_v20, 16 }
  0x61   : > { %741 = vst [vmem:[#allocation2 + $0xa8] sm:$0xf] %v740_v33  ;;  %v557_v38 = vor.u32 %v555_v17, %v554_v28  ;;  %v559_v39 = vrot.slane %v554_v28, 4  ;;  %v563_v40 = vrot.slane %v561_v29, 7  ;;  %v746_v42 = vld [vmem:[#allocation2 + $0xb4] sm:$0xf] }
  0x62   : > { %v571_v41 = vrot.slane %v569_v32, 7  ;;  %v578_v43 = vshrl.u32 %v317_v36, 16  ;;  %v581_v44 = vshll.u32 %v317_v36, 16  ;;  %v586_v45 = vshrl.u32 %v318_v37, 16  ;;  %v750_v51 = vld [vmem:[#allocation2 + $0xbc] sm:$0x1] }
  0x63   : > { %v589_v46 = vshll.u32 %v318_v37, 16  ;;  %v558_v47 = vsel %vm4442_vm6, %v550_v27, %v557_v38  ;;  %v744_v48 = vsel %vm4448_vm7, %v559_v39, %v743_v34  ;;  %v566_v49 = vor.u32 %v564_v31, %v563_v40  ;;  %v753_v56 = vld [vmem:[#allocation2 + $0xc0] sm:$0xf]  ;;  %v757_v61 = vld [vmem:[#allocation2 + $0xc8] sm:$0x1] }
  0x64   : > { %v567_v50 = vrot.slane %v563_v40, 4  ;;  %742 = vst [vmem:[#allocation2 + $0xac] sm:$0xf] %v558_v47  ;;  %745 = vst [vmem:[#allocation2 + $0xb0] sm:$0x1] %v744_v48  ;;  %v574_v1 = vor.u32 %v572_v35, %v571_v41  ;;  %v576_v52 = vrot.slane %v571_v41, 4 }
  0x65   : > { %v580_v53 = vrot.slane %v578_v43, 7  ;;  %v588_v54 = vrot.slane %v586_v45, 7  ;;  %v747_v55 = vsel %vm4435_vm5, %v566_v49, %v746_v42 }
  0x66   : > { %748 = vst [vmem:[#allocation2 + $0xb4] sm:$0xf] %v747_v55  ;;  %v575_v57 = vsel %vm4442_vm6, %v567_v50, %v574_v1  ;;  %v751_v58 = vsel %vm4448_vm7, %v576_v52, %v750_v51 }
  0x67   : > { %v583_v59 = vor.u32 %v581_v44, %v580_v53  ;;  %v584_v60 = vrot.slane %v580_v53, 4  ;;  %749 = vst [vmem:[#allocation2 + $0xb8] sm:$0xf] %v575_v57  ;;  %752 = vst [vmem:[#allocation2 + $0xbc] sm:$0x1] %v751_v58  ;;  %v591_v62 = vor.u32 %v589_v46, %v588_v54  ;;  %v593_v63 = vrot.slane %v588_v54, 4 }
  0x69   : > { %v754_v0 = vsel %vm4435_vm5, %v583_v59, %v753_v56  ;;  %v592_v2 = vsel %vm4442_vm6, %v584_v60, %v591_v62  ;;  %v758_v3 = vsel %vm4448_vm7, %v593_v63, %v757_v61 }
  0x6a   : > { %755 = vst [vmem:[#allocation2 + $0xc0] sm:$0xf] %v754_v0  ;;  %756 = vst [vmem:[#allocation2 + $0xc4] sm:$0xf] %v592_v2 }
  0x6b   : > { %759 = vst [vmem:[#allocation2 + $0xc8] sm:$0x1] %v758_v3 }
  0x6c PF: > { %v4119_v4 = vld [vmem:[%s5512_s1 + $0x78] sm:$0xff]   ;;  %v4123_v30 = vld [vmem:[%s5512_s1 + $0x70] sm:$0xff]   ;;  %v4127_v9 = vld [vmem:[%s5512_s1 + $0x68] sm:$0xff]   ;;  %s3653_s22 = smul.u32 48, %s4281_s12  ;;  %vm777_vm8 = vsmask.f32 3328 }
  0x6d   : > { %v4120_v5 = vld [vmem:[%s5512_s1 + $0xf8] sm:$0xff]   ;;  %3717 = vmatprep.subr.bf16.mxu0 %v4119_v4  ;;  %v4124_v6 = vld [vmem:[%s5512_s1 + $0xf0] sm:$0xff]   ;;  %v4128_v10 = vld [vmem:[%s5512_s1 + $0xe8] sm:$0xff]   ;;  %vm778_vm9 = vsmask.f32 7440  ;;  %vm892_vm11 = vcmask 1042432  }
  0x6e   : > { %v4121_v18 = vld [vmem:[%s5512_s1 + $0x38] sm:$0xff]   ;;  %3757 = vmatprep.subr.bf16.mxu1 %v4120_v5  ;;  %v4125_v7 = vld [vmem:[%s5512_s1 + $0x30] sm:$0xff]   ;;  %v4129_v11 = vld [vmem:[%s5512_s1 + $0x28] sm:$0xff]   ;;  %s4698_s8 = scalar_lea.vmem [#allocation2], %s3653_s22  ;;  %vm893_vm12 = vcmask 1046532   ;;  %s4300_s28 = smov 64  }
  0x6f   : > { %v4122_v23 = vld [vmem:[%s5512_s1 + $0xb8] sm:$0xff]   ;;  %3718 = vmatpush3.bf16.msra.mxu0 %v4121_v18  ;;  %v4126_v8 = vld [vmem:[%s5512_s1 + $0xb0] sm:$0xff]   ;;  %v4130_v12 = vld [vmem:[%s5512_s1 + $0xa8] sm:$0xff]   ;;  %vm2150_vm14 = vcmask 523264  }
  0x70   : > { %3758 = vmatpush3.bf16.msra.mxu1 %v4122_v23  ;;  %3719 = vmatprep.subr.bf16.mxu0 %v4123_v30  ;;  %v4131_v13 = vld [vmem:[%s5512_s1 + $0x60] sm:$0xff]   ;;  %v4135_v17 = vld [vmem:[%s5512_s1 + $0x58] sm:$0xff]   ;;  %v4139_v22 = vld [vmem:[%s5512_s1 + $0x50] sm:$0xff]  }
  0x71   : > { %3759 = vmatprep.subr.bf16.mxu1 %v4124_v6  ;;  %v4132_v14 = vld [vmem:[%s5512_s1 + $0xe0] sm:$0xff]   ;;  %v4136_v19 = vld [vmem:[%s5512_s1 + $0xd8] sm:$0xff]   ;;  %v4140_v24 = vld [vmem:[%s5512_s1 + $0xd0] sm:$0xff]  }
  0x72   : > { %v4133_v15 = vld [vmem:[%s5512_s1 + $0x20] sm:$0xff]   ;;  %v4137_v20 = vld [vmem:[%s5512_s1 + $0x18] sm:$0xff]   ;;  %v4141_v25 = vld [vmem:[%s5512_s1 + $0x10] sm:$0xff]  }
  0x73   : > { %3720 = vmatpush3.bf16.msra.mxu0 %v4125_v7  ;;  %v4134_v16 = vld [vmem:[%s5512_s1 + $0xa0] sm:$0xff]   ;;  %v4138_v21 = vld [vmem:[%s5512_s1 + $0x98] sm:$0xff]   ;;  %v4142_v26 = vld [vmem:[%s5512_s1 + $0x90] sm:$0xff]  }
  0x74   : > { %3760 = vmatpush3.bf16.msra.mxu1 %v4126_v8  ;;  %3721 = vmatprep.subr.bf16.mxu0 %v4127_v9  ;;  %v4143_v27 = vld [vmem:[%s5512_s1 + $0x48] sm:$0xff]   ;;  %v4147_v32 = vld [vmem:[%s5512_s1 + $0x40] sm:$0xff]   ;;  %v4153_v45 = vld [vmem:[%s5512_s1 + $0x178] sm:$0xff]  }
  0x75   : > { %3761 = vmatprep.subr.bf16.mxu1 %v4128_v10  ;;  %v4144_v28 = vld [vmem:[%s5512_s1 + $0xc8] sm:$0xff]   ;;  %v4148_v33 = vld [vmem:[%s5512_s1 + $0xc0] sm:$0xff]   ;;  %v4715_v48 = vld [vmem:[%s4698_s8 + $0x10] sm:$0xf] }
  0x76   : > { %v4145_v29 = vld [vmem:[%s5512_s1 + $0x8] sm:$0xff]   ;;  %v4149_v34 = vld [vmem:[%s5512_s1] sm:$0xff]   ;;  %v4718_v49 = vld [vmem:[%s4698_s8 + $0x14] sm:$0x1]  ;;  %v949_v55 = vshll.u32 %v4715_v48, 16  ;;  %v953_v56 = vshrl.u32 %v4715_v48, 16 }
  0x77   : > { %3722 = vmatpush3.bf16.msra.mxu0 %v4129_v11  ;;  %v4146_v31 = vld [vmem:[%s5512_s1 + $0x88] sm:$0xff]   ;;  %v4150_v35 = vld [vmem:[%s5512_s1 + $0x80] sm:$0xff]   ;;  %v4154_v57 = vld [vmem:[%s5512_s1 + $0x1f8] sm:$0xff]   ;;  %v959_v61 = vshll.u32 %v4718_v49, 16 }
  0x78   : > { %3762 = vmatpush3.bf16.msra.mxu1 %v4130_v12  ;;  %3723 = vmatprep.subr.bf16.mxu0 %v4131_v13  ;;  %v765_v36 = vld [vmem:[%s4698_s8] sm:$0xf]  ;;  %v4702_v37 = vld [vmem:[%s4698_s8 + $0x4] sm:$0xf]  ;;  %v4705_v38 = vld [vmem:[%s4698_s8 + $0x8] sm:$0x1] }
  0x79   : > { %3763 = vmatprep.subr.bf16.mxu1 %v4132_v14  ;;  %v781_v39 = vshrl.u32 %v765_v36, 16  ;;  %v784_v40 = vshll.u32 %v765_v36, 16  ;;  %v790_v41 = vshll.u32 %v4702_v37, 16  ;;  %v794_v42 = vshrl.u32 %v4702_v37, 16  ;;  %v3227_v44 = vld [vmem:[%s4698_s8 + $0xc] sm:$0xf]  ;;  %vm4727_vm10 = vmor %vm777_vm8, %vm778_vm9 }
  0x7a   : > { %v800_v43 = vshll.u32 %v4705_v38, 16  ;;  %v940_v52 = vshrl.u32 %v3227_v44, 16  ;;  %v943_v54 = vshll.u32 %v3227_v44, 16  ;;  %v951_v0 = vrot.slane %v949_v55, 5  ;;  %v4155_v10 = vld [vmem:[%s5512_s1 + $0x138] sm:$0xff]   ;;  %v4157_v11 = vld [vmem:[%s5512_s1 + $0x170] sm:$0xff]   ;;  %vm4948_vm13 = vmor %vm892_vm11, %vm893_vm12 }
  0x7b   : > { %3724 = vmatpush3.bf16.msra.mxu0 %v4133_v15  ;;  %v783_v46 = vrot.slane %v781_v39, 4  ;;  %v786_v47 = vrot.slane %v784_v40, 5  ;;  %v792_v50 = vrot.slane %v790_v41, 5  ;;  %v796_v51 = vrot.slane %v794_v42, 4  ;;  %v4156_v12 = vld [vmem:[%s5512_s1 + $0x1b8] sm:$0xff]  }
  0x7c   : > { %3764 = vmatpush3.bf16.msra.mxu1 %v4134_v16  ;;  %3725 = vmatprep.subr.bf16.mxu0 %v4135_v17  ;;  %v802_v1 = vrot.slane %v800_v43, 5  ;;  %v942_v60 = vrot.slane %v940_v52, 4  ;;  %v945_v63 = vrot.slane %v943_v54, 5  ;;  %v955_v2 = vrot.slane %v953_v56, 4  ;;  %v4158_v16 = vld [vmem:[%s5512_s1 + $0x1f0] sm:$0xff]  }
  0x7d   : > { %3765 = vmatprep.subr.bf16.mxu1 %v4136_v19  ;;  %v787_v53 = vor.u32 %v786_v47, %v783_v46  ;;  %v797_v59 = vor.u32 %v796_v51, %v792_v50  ;;  %v961_v4 = vrot.slane %v959_v61, 5  ;;  %v3269_v6 = vcombine.low %v765_v36, %v4702_v37  ;;  %v4159_v17 = vld [vmem:[%s5512_s1 + $0x130] sm:$0xff]   ;;  %v4763_v19 = vld [vmem:[%s4698_s8 + $0xc] sm:$0xf]  ;;  %v4788_v36 = vld [vmem:[%s4698_s8 + $0x1c] sm:$0xf] }
  0x7e   : > { %v946_v18 = vor.u32 %v945_v63, %v942_v60  ;;  %v956_v23 = vor.u32 %v955_v2, %v951_v0  ;;  %v4754_v15 = vcombine.low %v3227_v44, %v4715_v48  ;;  %v4791_v39 = vld [vmem:[%s4698_s8 + $0x20] sm:$0x1]  ;;  %v973_v46 = vshll.u32 %v4788_v36, 16  ;;  %v4165_v60 = vld [vmem:[%s5512_s1 + $0x128] sm:$0xff]  }
  0x7f   : > { %3726 = vmatpush3.bf16.msra.mxu0 %v4137_v20  ;;  %v788_v62 = vrot.slane %v787_v53, 4  ;;  %v798_v3 = vrot.slane %v797_v59, 4  ;;  %v897_v20 = vrot.slane %v4702_v37, 5  ;;  %v977_v47 = vshrl.u32 %v4788_v36, 16  ;;  %v4166_v61 = vld [vmem:[%s5512_s1 + $0x1a8] sm:$0xff]   ;;  %v4193_v37 = vld [vmem:[%s5512_s1 + $0x238] sm:$0xff]  }
  0x80   : > { %3766 = vmatpush3.bf16.msra.mxu1 %v4138_v21  ;;  %3727 = vmatprep.subr.bf16.mxu0 %v4139_v22  ;;  %v947_v8 = vrot.slane %v946_v18, 4  ;;  %v957_v9 = vrot.slane %v956_v23, 4  ;;  %v4769_v22 = vld [vmem:[%s4698_s8 + $0x10] sm:$0xf]  ;;  %v983_v52 = vshll.u32 %v4791_v39, 16  ;;  %v975_v55 = vrot.slane %v973_v46, 5 }
  0x81   : > { %3767 = vmatprep.subr.bf16.mxu1 %v4140_v24  ;;  %v793_v5 = vsel %vm4727_vm10, %v788_v62, %v792_v50  ;;  %v803_v30 = vsel %vm4727_vm10, %v798_v3, %v802_v1  ;;  %v4772_v24 = vld [vmem:[%s4698_s8 + $0x14] sm:$0x1]  ;;  %v4164_v50 = vld [vmem:[%s5512_s1 + $0x1e8] sm:$0xff]   ;;  %v979_v56 = vrot.slane %v977_v47, 4  ;;  %v3270_v3 = vcombine.low %v4763_v19, %v4769_v22 }
  0x82   : > { %v4737_v7 = vcombine.low %v793_v5, %v803_v30  ;;  %v952_v13 = vsel %vm4727_vm10, %v947_v8, %v951_v0  ;;  %v962_v14 = vsel %vm4727_vm10, %v957_v9, %v961_v4  ;;  %v985_v59 = vrot.slane %v983_v52, 5  ;;  %v4167_v4 = vld [vmem:[%s5512_s1 + $0x160] sm:$0xff]  }
  0x83   : > { %3728 = vmatpush3.bf16.msra.mxu0 %v4141_v25  ;;  %v4766_v21 = vcombine.low %v952_v13, %v962_v14  ;;  %v805_v25 = vshrl.u32 %v4763_v19, 16  ;;  %v980_v0 = vor.u32 %v979_v56, %v975_v55  ;;  %v4817_v5 = vrot.slane %v897_v20, 4  ;;  %v4169_v8 = vld [vmem:[%s5512_s1 + $0x120] sm:$0xff]   ;;  %v4839_v13 = vld [vmem:[%s4698_s8 + $0x18] sm:$0xf] }
  0x84   : > { %3768 = vmatpush3.bf16.msra.mxu1 %v4142_v26  ;;  %3729 = vmatprep.subr.bf16.mxu0 %v4143_v27  ;;  %v808_v26 = vshll.u32 %v4763_v19, 16  ;;  %v814_v27 = vshll.u32 %v4769_v22, 16  ;;  %v1053_v14 = vrot.slane %v4715_v48, 5  ;;  %v4848_v19 = vld [vmem:[%s4698_s8 + $0x20] sm:$0x1]  ;;  %v1063_v48 = vrot.slane %v4791_v39, 5 }
  0x85   : > { %3769 = vmatprep.subr.bf16.mxu1 %v4144_v28  ;;  %1601 = vmatprep.mubr.bf16.mxu0 %v4737_v7  ;;  %v818_v28 = vshrl.u32 %v4769_v22, 16  ;;  %v981_v30 = vrot.slane %v980_v0, 4  ;;  %v877_v39 = vld [vmem:[%s4698_s8 + $0xc] sm:$0xe] }
  0x86   : > { %1666 = vmatprep.mubr.bf16.mxu1 %v4766_v21  ;;  %v816_v40 = vrot.slane %v814_v27, 5 }
  0x87   : > { %3730 = vmatpush3.bf16.msra.mxu0 %v4145_v29  ;;  %v824_v29 = vshll.u32 %v4772_v24, 16  ;;  %v820_v41 = vrot.slane %v818_v28, 4 }
  0x88   : > { %3770 = vmatpush3.bf16.msra.mxu1 %v4146_v31  ;;  %3731 = vmatprep.subr.bf16.mxu0 %v4147_v32  ;;  %v3229_v31 = vld [vmem:[%s4698_s8 + $0x18] sm:$0xf]  ;;  %v4163_v32 = vld [vmem:[%s5512_s1 + $0x168] sm:$0xff]  }
  0x89   : > { %3771 = vmatprep.subr.bf16.mxu1 %v4148_v33  ;;  %v4160_v33 = vld [vmem:[%s5512_s1 + $0x1b0] sm:$0xff]   ;;  %v826_v42 = vrot.slane %v824_v29, 5  ;;  %v964_v43 = vshrl.u32 %v3229_v31, 16  ;;  %v821_v51 = vor.u32 %v820_v41, %v816_v40  ;;  %v848_v29 = vshll.u32 %v4848_v19, 16 }
  0x8b   : > { %3732 = vmatpush3.bf16.msra.mxu0 %v4149_v34  ;;  %v807_v34 = vrot.slane %v805_v25, 4  ;;  %v966_v1 = vrot.slane %v964_v43, 4  ;;  %v829_v25 = vshrl.u32 %v4839_v13, 16  ;;  %v850_v43 = vrot.slane %v848_v29, 5 }
  0x8c   : > { %3772 = vmatpush3.bf16.msra.mxu1 %v4150_v35  ;;  %3797 = vmatprep.subr.bf16.mxu0 %v4153_v45  ;;  %v810_v35 = vrot.slane %v808_v26, 5  ;;  %v967_v45 = vshll.u32 %v3229_v31, 16  ;;  %v832_v26 = vshll.u32 %v4839_v13, 16  ;;  %v4913_v29 = vrot.slane %v1053_v14, 4 }
  0x8d   : > { %3837 = vmatprep.subr.bf16.mxu1 %v4154_v57  ;;  %v822_v57 = vrot.slane %v821_v51, 4  ;;  %v4174_v51 = vld [vmem:[%s5512_s1 + $0x1d8] sm:$0xff]  }
  0x8e   : > { %1602 = vmatmul.mubr.bf16.vlgmr.msra.gmra.mxu0 %v3269_v6  ;;  %v811_v44 = vor.u32 %v810_v35, %v807_v34  ;;  %v969_v54 = vrot.slane %v967_v45, 5  ;;  %v4168_v6 = vld [vmem:[%s5512_s1 + $0x1e0] sm:$0xff]   ;;  %v834_v34 = vrot.slane %v832_v26, 5  ;;  %v4861_v35 = vld [vmem:[%s4698_s8 + $0x28] sm:$0xf] }
  0x8f   : > { %3798 = vmatpush3.bf16.msra.mxu0 %v4155_v10  ;;  %1667 = vmatmul.mubr.bf16.vlgmr.msra.gmra.mxu1 %v4754_v15  ;;  %v827_v2 = vsel %vm4727_vm10, %v822_v57, %v826_v42  ;;  %v986_v10 = vsel %vm4727_vm10, %v981_v30, %v985_v59  ;;  %v997_v47 = vshll.u32 %v4861_v35, 16  ;;  %v900_v30 = vrot.slane %v4705_v38, 5  ;;  %v4192_v38 = vld [vmem:[%s5512_s1 + $0x2f8] sm:$0xff]  }
  0x90   : > { %3799 = vmatprep.subr.bf16.mxu0 %v4157_v11  ;;  %3838 = vmatpush3.bf16.msra.mxu1 %v4156_v12  ;;  %v812_v53 = vrot.slane %v811_v44, 4  ;;  %v970_v63 = vor.u32 %v969_v54, %v966_v1  ;;  %v4833_v11 = vcombine.low %v3229_v31, %v4788_v36  ;;  %v4170_v12 = vld [vmem:[%s5512_s1 + $0x1a0] sm:$0xff]  }
  0x91   : > { %3839 = vmatprep.subr.bf16.mxu1 %v4158_v16  ;;  %v3231_v31 = vld [vmem:[%s4698_s8 + $0x24] sm:$0xf]  ;;  %v999_v56 = vrot.slane %v997_v47, 5 }
  0x92   : > { %v817_v62 = vsel %vm4727_vm10, %v812_v53, %v816_v40  ;;  %v971_v23 = vrot.slane %v970_v63, 4  ;;  %v4864_v40 = vld [vmem:[%s4698_s8 + $0x2c] sm:$0x1]  ;;  %v988_v44 = vshrl.u32 %v3231_v31, 16  ;;  %v991_v46 = vshll.u32 %v3231_v31, 16 }
  0x93   : > { %3800 = vmatpush3.bf16.msra.mxu0 %v4159_v17  ;;  %v4819_v18 = vcombine.low %v817_v62, %v827_v2  ;;  %v4845_v17 = vld [vmem:[%s4698_s8 + $0x1c] sm:$0xf]  ;;  %v1007_v53 = vshll.u32 %v4864_v40, 16  ;;  %v4903_v26 = vcombine.low %v3231_v31, %v4861_v35  ;;  %v4921_v31 = vld [vmem:[%s4698_s8 + $0x2c] sm:$0x1] }
  0x94   : > { %3801 = vmatprep.subr.bf16.mxu0 %v4163_v32  ;;  %3840 = vmatpush3.bf16.msra.mxu1 %v4160_v33  ;;  %v976_v9 = vsel %vm4727_vm10, %v971_v23, %v975_v55  ;;  %v838_v27 = vshll.u32 %v4845_v17, 16  ;;  %v842_v28 = vshrl.u32 %v4845_v17, 16  ;;  %v4173_v32 = vld [vmem:[%s5512_s1 + $0x158] sm:$0xff]   ;;  %v831_v33 = vrot.slane %v829_v25, 4  ;;  %v4177_v23 = vld [vmem:[%s5512_s1 + $0x150] sm:$0xff]  }
  0x95   : > { %3841 = vmatprep.subr.bf16.mxu1 %v4164_v50  ;;  %1609 = vmatprep.mubr.bf16.mxu0 %v4819_v18  ;;  %v4842_v16 = vcombine.low %v976_v9, %v986_v10  ;;  %v1001_v50 = vshrl.u32 %v4861_v35, 16  ;;  %v990_v52 = vrot.slane %v988_v44, 4  ;;  %v993_v55 = vrot.slane %v991_v46, 5  ;;  %v4176_v62 = vld [vmem:[%s5512_s1 + $0x198] sm:$0xff]   ;;  %v4178_v10 = vld [vmem:[%s5512_s1 + $0x1d0] sm:$0xff]   ;;  %v4183_v46 = vld [vmem:[%s5512_s1 + $0x148] sm:$0xff]  }
  0x96   : > { %1610 = vmatmul.mubr.bf16.gmra.mxu0 %v3270_v3  ;;  %v840_v41 = vrot.slane %v838_v27, 5  ;;  %v844_v42 = vrot.slane %v842_v28, 4  ;;  %v835_v45 = vor.u32 %v834_v34, %v831_v33  ;;  %v4180_v27 = vld [vmem:[%s5512_s1 + $0x190] sm:$0xff]   ;;  %v4909_v28 = vld [vmem:[%s4698_s8 + $0x24] sm:$0xf]  ;;  %v872_v44 = vshll.u32 %v4921_v31, 16 }
  0x97   : > { %3802 = vmatpush3.bf16.msra.mxu0 %v4165_v60  ;;  %1674 = vmatprep.mubr.bf16.mxu1 %v4842_v16  ;;  %v1003_v57 = vrot.slane %v1001_v50, 4  ;;  %v1009_v60 = vrot.slane %v1007_v53, 5  ;;  %v994_v0 = vor.u32 %v993_v55, %v990_v52  ;;  %v4918_v33 = vld [vmem:[%s4698_s8 + $0x28] sm:$0xf]  ;;  %v853_v34 = vshrl.u32 %v4909_v28, 16 }
  0x98   : > { %3803 = vmatprep.subr.bf16.mxu0 %v4167_v4  ;;  %3842 = vmatpush3.bf16.msra.mxu1 %v4166_v61  ;;  %v845_v1 = vor.u32 %v844_v42, %v840_v41  ;;  %v836_v54 = vrot.slane %v835_v45, 4  ;;  %v4175_v61 = vld [vmem:[%s5512_s1 + $0x118] sm:$0xff]   ;;  %v3271_v4 = vcombine.low %v4839_v13, %v4845_v17  ;;  %v862_v42 = vshll.u32 %v4918_v33, 16  ;;  %v3233_v45 = vld [vmem:[%s4698_s8 + $0x30] sm:$0xf] }
  0x99   : > { %3843 = vmatprep.subr.bf16.mxu1 %v4168_v6  ;;  %1675 = vmatmul.mubr.bf16.gmra.mxu1 %v4833_v11  ;;  %v1004_v2 = vor.u32 %v1003_v57, %v999_v56  ;;  %v855_v47 = vrot.slane %v853_v34, 4  ;;  %v1012_v55 = vshrl.u32 %v3233_v45, 16  ;;  %v1015_v57 = vshll.u32 %v3233_v45, 16 }
  0x9a   : > { %v846_v59 = vrot.slane %v845_v1, 4  ;;  %v841_v63 = vsel %vm4727_vm10, %v836_v54, %v840_v41  ;;  %v856_v41 = vshll.u32 %v4909_v28, 16  ;;  %v4937_v1 = vld [vmem:[%s4698_s8 + $0x38] sm:$0x1]  ;;  %v864_v52 = vrot.slane %v862_v42, 5 }
  0x9b   : > { %3804 = vmatpush3.bf16.msra.mxu0 %v4169_v8  ;;  %v995_v8 = vrot.slane %v994_v0, 4  ;;  %v1005_v9 = vrot.slane %v1004_v2, 4  ;;  %v874_v54 = vrot.slane %v872_v44, 5  ;;  %v1031_v0 = vshll.u32 %v4937_v1, 16 }
  0x9c   : > { %3805 = vmatprep.subr.bf16.mxu0 %v4173_v32  ;;  %3844 = vmatpush3.bf16.msra.mxu1 %v4170_v12  ;;  %v851_v3 = vsel %vm4727_vm10, %v846_v59, %v850_v43  ;;  %v4179_v12 = vld [vmem:[%s5512_s1 + $0x110] sm:$0xff]   ;;  %v866_v43 = vshrl.u32 %v4918_v33, 16  ;;  %v858_v50 = vrot.slane %v856_v41, 5  ;;  %v3272_v42 = vcombine.low %v4909_v28, %v4918_v33  ;;  %v4189_v28 = vld [vmem:[%s5512_s1 + $0x100] sm:$0xff]  }
  0x9d   : > { %3845 = vmatprep.subr.bf16.mxu1 %v4174_v51  ;;  %v4889_v6 = vcombine.low %v841_v63, %v851_v3  ;;  %v1000_v13 = vsel %vm4727_vm10, %v995_v8, %v999_v56  ;;  %v1010_v25 = vsel %vm4727_vm10, %v1005_v9, %v1009_v60  ;;  %v4934_v51 = vld [vmem:[%s4698_s8 + $0x34] sm:$0xf]  ;;  %v1014_v63 = vrot.slane %v1012_v55, 4  ;;  %v4190_v55 = vld [vmem:[%s5512_s1 + $0x180] sm:$0xff]  }
  0x9e   : > { %v4915_v32 = vcombine.low %v1000_v13, %v1010_v25  ;;  %v868_v53 = vrot.slane %v866_v43, 4  ;;  %v859_v56 = vor.u32 %v858_v50, %v855_v47  ;;  %v1021_v59 = vshll.u32 %v4934_v51, 16  ;;  %v4186_v13 = vld [vmem:[%s5512_s1 + $0x188] sm:$0xff]   ;;  %v4187_v43 = vld [vmem:[%s5512_s1 + $0x140] sm:$0xff]  }
  0x9f   : > { %3806 = vmatpush3.bf16.msra.mxu0 %v4175_v61  ;;  %1617 = vmatprep.mubr.bf16.mxu0 %v4889_v6  ;;  %v1025_v60 = vshrl.u32 %v4934_v51, 16  ;;  %v4184_v61 = vld [vmem:[%s5512_s1 + $0x1c8] sm:$0xff]   ;;  %v1017_v3 = vrot.slane %v1015_v57, 5  ;;  %v1056_v44 = vrot.slane %v4718_v49, 5  ;;  %v904_v57 = vrot.slane %v4769_v22, 5 }
  0xa0   : > { %3846 = vmatpush3.bf16.msra.mxu1 %v4176_v62  ;;  %3807 = vmatprep.subr.bf16.mxu0 %v4177_v23  ;;  %v869_v62 = vor.u32 %v868_v53, %v864_v52  ;;  %v860_v2 = vrot.slane %v859_v56, 4  ;;  %v876_v56 = vld [vmem:[%s4698_s8] sm:$0xe] }
  0xa1   : > { %3847 = vmatprep.subr.bf16.mxu1 %v4178_v10  ;;  %1618 = vmatmul.mubr.bf16.gmra.mxu0 %v3271_v4  ;;  %v1023_v4 = vrot.slane %v1021_v59, 5  ;;  %v1027_v23 = vrot.slane %v1025_v60, 4  ;;  %v1033_v10 = vrot.slane %v1031_v0, 5  ;;  %v3221_v60 = vrot.slane %v876_v56, 9  ;;  %v4205_v56 = vld [vmem:[%s5512_s1 + $0x220] sm:$0xff]  }
  0xa2   : > { %1682 = vmatprep.mubr.bf16.mxu1 %v4915_v32  ;;  %v870_v9 = vrot.slane %v869_v62, 4  ;;  %v865_v25 = vsel %vm4727_vm10, %v860_v2, %v864_v52  ;;  %v4188_v52 = vld [vmem:[%s5512_s1 + $0x1c0] sm:$0xff]   ;;  %v4191_v62 = vld [vmem:[%s5512_s1 + $0x278] sm:$0xff]   ;;  %v1057_v22 = vsel %vm4948_vm13, %v4913_v29, %v1056_v44  ;;  %v906_v0 = vrot.slane %v904_v57, 4 }
  0xa3   : > { %3808 = vmatpush3.bf16.msra.mxu0 %v4179_v12  ;;  %1683 = vmatmul.mubr.bf16.gmra.mxu1 %v4903_v26  ;;  %v4185_v12 = vld [vmem:[%s5512_s1 + $0x108] sm:$0xff]   ;;  %v1028_v34 = vor.u32 %v1027_v23, %v1023_v4 }
  0xa4   : > { %3848 = vmatpush3.bf16.msra.mxu1 %v4180_v27  ;;  %3809 = vmatprep.subr.bf16.mxu0 %v4183_v46  ;;  %v1018_v27 = vor.u32 %v1017_v3, %v1014_v63  ;;  %v875_v41 = vsel %vm4727_vm10, %v870_v9, %v874_v54  ;;  %v4982_v54 = vcombine.low %v3233_v45, %v4934_v51  ;;  %v3239_v45 = vld [vmem:[%s4698_s8 + $0xc] sm:$0xe]  ;;  %v907_v3 = vrot.slane %v4772_v24, 5  ;;  %v4197_v24 = vld [vmem:[%s5512_s1 + $0x230] sm:$0xff]   ;;  %v3240_v9 = vld [vmem:[%s4698_s8 + $0x18] sm:$0xe] }
  0xa5   : > { %3849 = vmatprep.subr.bf16.mxu1 %v4184_v61  ;;  %v4968_v46 = vcombine.low %v865_v25, %v875_v41  ;;  %v1029_v50 = vrot.slane %v1028_v34, 4  ;;  %v901_v61 = vsel %vm4948_vm13, %v4817_v5, %v900_v30  ;;  %v3243_v63 = vrot.slane %v3239_v45, 9 }
  0xa6   : > { %v1019_v47 = vrot.slane %v1018_v27, 4  ;;  %v898_v5 = vsel %vm4948_vm13, %v3221_v60, %v897_v20  ;;  %v1060_v20 = vrot.slane %v4788_v36, 5  ;;  %v4196_v36 = vld [vmem:[%s5512_s1 + $0x2f0] sm:$0xff]   ;;  %v3244_v25 = vrot.slane %v3240_v9, 9  ;;  %v3241_v60 = vld [vmem:[%s4698_s8 + $0x24] sm:$0xe] }
  0xa7   : > { %3810 = vmatpush3.bf16.msra.mxu0 %v4185_v12  ;;  %1625 = vmatprep.mubr.bf16.mxu0 %v4968_v46  ;;  %v1034_v49 = vsel %vm4727_vm10, %v1029_v50, %v1033_v10  ;;  %v3318_v30 = vcombine.low %v898_v5, %v901_v61  ;;  %v1054_v29 = vsel %vm4948_vm13, %v3243_v63, %v1053_v14  ;;  %v4194_v14 = vld [vmem:[%s5512_s1 + $0x2b8] sm:$0xff]   ;;  %v911_v10 = vrot.slane %v4845_v17, 5 }
  0xa8   : > { %3850 = vmatpush3.bf16.msra.mxu1 %v4186_v13  ;;  %3811 = vmatprep.subr.bf16.mxu0 %v4187_v43  ;;  %v1024_v53 = vsel %vm4727_vm10, %v1019_v47, %v1023_v4  ;;  %v5016_v2 = vcombine.low %v1054_v29, %v1057_v22  ;;  %v4195_v4 = vld [vmem:[%s5512_s1 + $0x270] sm:$0xff]   ;;  %v1062_v23 = vrot.slane %v1060_v20, 4  ;;  %v3222_v12 = vrot.slane %v877_v39, 9  ;;  %v4207_v22 = vld [vmem:[%s5512_s1 + $0x258] sm:$0xff]  }
  0xa9   : > { %3851 = vmatprep.subr.bf16.mxu1 %v4188_v52  ;;  %v4989_v59 = vcombine.low %v1024_v53, %v1034_v49  ;;  %1626 = vmatmul.mubr.bf16.gmra.mxu0 %v3272_v42  ;;  %v908_v13 = vsel %vm4948_vm13, %v906_v0, %v907_v3  ;;  %v914_v34 = vrot.slane %v4848_v19, 5  ;;  %v1061_v41 = vsel %vm4948_vm13, %v3244_v25, %v1060_v20  ;;  %v4199_v42 = vld [vmem:[%s5512_s1 + $0x268] sm:$0xff]   ;;  %v4208_v5 = vld [vmem:[%s5512_s1 + $0x2d8] sm:$0xff]  }
  0xaa   : > { %2020 = vmatprep.mubr.bf16.mxu0 %v3318_v30  ;;  %v1064_v27 = vsel %vm4948_vm13, %v1062_v23, %v1063_v48  ;;  %v905_v17 = vsel %vm4948_vm13, %v3222_v12, %v904_v57  ;;  %v1067_v43 = vrot.slane %v4861_v35, 5  ;;  %v4200_v19 = vld [vmem:[%s5512_s1 + $0x2e8] sm:$0xff]   ;;  %v913_v50 = vrot.slane %v911_v10, 4  ;;  %v4203_v35 = vld [vmem:[%s5512_s1 + $0x260] sm:$0xff]   ;;  %v878_v57 = vld [vmem:[%s4698_s8 + $0x18] sm:$0xe] }
  0xab   : > { %3812 = vmatpush3.bf16.msra.mxu0 %v4189_v28  ;;  %1690 = vmatprep.mubr.bf16.mxu1 %v4989_v59  ;;  %v3319_v44 = vcombine.low %v905_v17, %v908_v13  ;;  %v5058_v47 = vcombine.low %v1061_v41, %v1064_v27  ;;  %v4201_v52 = vld [vmem:[%s5512_s1 + $0x228] sm:$0xff]   ;;  %v1070_v28 = vrot.slane %v4864_v40, 5  ;;  %v4204_v40 = vld [vmem:[%s5512_s1 + $0x2e0] sm:$0xff]   ;;  %v1074_v61 = vrot.slane %v4934_v51, 5  ;;  %v4210_v3 = vld [vmem:[%s5512_s1 + $0x298] sm:$0xff]  }
  0xac   : > { %3852 = vmatpush3.bf16.msra.mxu1 %v4190_v55  ;;  %3877 = vmatprep.subr.bf16.mxu0 %v4191_v62  ;;  %v1069_v53 = vrot.slane %v1067_v43, 4  ;;  %v4202_v49 = vld [vmem:[%s5512_s1 + $0x2a8] sm:$0xff]   ;;  %v918_v55 = vrot.slane %v4918_v33, 5  ;;  %v3223_v45 = vrot.slane %v878_v57, 9  ;;  %v915_v62 = vsel %vm4948_vm13, %v913_v50, %v914_v34  ;;  %v4213_v23 = vld [vmem:[%s5512_s1 + $0x210] sm:$0xff]  }
  0xad   : > { %1691 = vmatmul.mubr.bf16.gmra.mxu1 %v4982_v54  ;;  %3917 = vmatprep.subr.bf16.mxu1 %v4192_v38  ;;  %v3245_v33 = vrot.slane %v3241_v60, 9  ;;  %v921_v30 = vrot.slane %v4921_v31, 5  ;;  %v1076_v48 = vrot.slane %v1074_v61, 4  ;;  %v4211_v31 = vld [vmem:[%s5512_s1 + $0x250] sm:$0xff]   ;;  %v4215_v12 = vld [vmem:[%s5512_s1 + $0x248] sm:$0xff]  }
  0xae   : > { %2085 = vmatprep.mubr.bf16.mxu1 %v5016_v2  ;;  %v1071_v63 = vsel %vm4948_vm13, %v1069_v53, %v1070_v28  ;;  %v912_v51 = vsel %vm4948_vm13, %v3223_v45, %v911_v10  ;;  %v920_v20 = vrot.slane %v918_v55, 4  ;;  %v4216_v27 = vld [vmem:[%s5512_s1 + $0x2c8] sm:$0xff]   ;;  %v3249_v50 = vld [vmem:[%s4698_s8 + $0x18] sm:$0xf] }
  0xaf   : > { %v1068_v38 = vsel %vm4948_vm13, %v3245_v33, %v1067_v43  ;;  %v3320_v29 = vcombine.low %v912_v51, %v915_v62  ;;  %v4217_v17 = vld [vmem:[%s5512_s1 + $0x208] sm:$0xff]   ;;  %v4220_v43 = vld [vmem:[%s5512_s1 + $0x2c0] sm:$0xff]   ;;  %v1096_v28 = vshrl.u32 %v3249_v50, 16 }
  0xb0   : > { %v5104_v0 = vcombine.low %v1068_v38, %v1071_v63  ;;  %v922_v39 = vsel %vm4948_vm13, %v920_v20, %v921_v30  ;;  %v4218_v41 = vld [vmem:[%s5512_s1 + $0x288] sm:$0xff]   ;;  %v4226_v63 = vld [vmem:[%s5512_s1 + $0x338] sm:$0xff]   ;;  %v4228_v38 = vld [vmem:[%s5512_s1 + $0x370] sm:$0xff]  }
  0xb1   : > { %2021 = vmatmul.mubr.bf16.vlgmr.msra.gmra.mxu0 %v4737_v7  ;;  %v4198_v7 = vld [vmem:[%s5512_s1 + $0x2b0] sm:$0xff]  }
  0xb2   : > { %3878 = vmatpush3.bf16.msra.mxu0 %v4193_v37  ;;  %2028 = vmatprep.mubr.bf16.mxu0 %v3319_v44  ;;  %v4209_v37 = vld [vmem:[%s5512_s1 + $0x218] sm:$0xff]   ;;  %v4221_v44 = vld [vmem:[%s5512_s1 + $0x200] sm:$0xff]  }
  0xb3   : > { %3879 = vmatprep.subr.bf16.mxu0 %v4195_v4  ;;  %v4212_v4 = vld [vmem:[%s5512_s1 + $0x2d0] sm:$0xff]  }
  0xb5   : > { %2086 = vmatmul.mubr.bf16.vlgmr.msra.gmra.mxu1 %v4766_v21 }
  0xb6   : > { %3918 = vmatpush3.bf16.msra.mxu1 %v4194_v14  ;;  %3880 = vmatpush3.bf16.msra.mxu0 %v4197_v24  ;;  %v1077_v14 = vrot.slane %v4937_v1, 5  ;;  %v879_v24 = vld [vmem:[%s4698_s8 + $0x24] sm:$0xe]  ;;  %v3242_v1 = vld [vmem:[%s4698_s8 + $0x30] sm:$0xe] }
  0xb7   : > { %3919 = vmatprep.subr.bf16.mxu1 %v4196_v36  ;;  %2093 = vmatprep.mubr.bf16.mxu1 %v5058_v47  ;;  %v4214_v36 = vld [vmem:[%s5512_s1 + $0x290] sm:$0xff]   ;;  %v3246_v9 = vrot.slane %v3242_v1, 9 }
  0xb8   : > { %3881 = vmatprep.subr.bf16.mxu0 %v4199_v42  ;;  %v1078_v10 = vsel %vm4948_vm13, %v1076_v48, %v1077_v14  ;;  %v4219_v42 = vld [vmem:[%s5512_s1 + $0x240] sm:$0xff]   ;;  %v5213_v14 = vld [vmem:[%s4698_s8 + $0x2c] sm:$0x1] }
  0xb9   : > { %2029 = vmatmul.mubr.bf16.gmra.mxu0 %v4819_v18  ;;  %v4206_v18 = vld [vmem:[%s5512_s1 + $0x2a0] sm:$0xff]   ;;  %v1075_v25 = vsel %vm4948_vm13, %v3246_v9, %v1074_v61  ;;  %v1139_v1 = vshll.u32 %v5213_v14, 16 }
  0xba   : > { %3920 = vmatpush3.bf16.msra.mxu1 %v4198_v7  ;;  %3882 = vmatpush3.bf16.msra.mxu0 %v4201_v52  ;;  %v5144_v34 = vcombine.low %v1075_v25, %v1078_v10  ;;  %v5169_v52 = vld [vmem:[%s4698_s8 + $0x1c] sm:$0xf]  ;;  %v3251_v48 = vld [vmem:[%s4698_s8 + $0x24] sm:$0xf]  ;;  %v4231_v10 = vld [vmem:[%s5512_s1 + $0x3b0] sm:$0xff]  }
  0xbb   : > { %3921 = vmatprep.subr.bf16.mxu1 %v4200_v19  ;;  %3883 = vmatprep.subr.bf16.mxu0 %v4203_v35  ;;  %v4222_v19 = vld [vmem:[%s5512_s1 + $0x280] sm:$0xff]   ;;  %v1099_v35 = vshll.u32 %v3249_v50, 16  ;;  %v1105_v53 = vshll.u32 %v5169_v52, 16  ;;  %v4234_v25 = vld [vmem:[%s5512_s1 + $0x3e8] sm:$0xff]  }
  0xbc   : > { %2036 = vmatprep.mubr.bf16.mxu0 %v3320_v29  ;;  %v3430_v29 = vcombine.low %v3249_v50, %v5169_v52 }
  0xbd   : > { %2094 = vmatmul.mubr.bf16.gmra.mxu1 %v4842_v16  ;;  %v1101_v57 = vrot.slane %v1099_v35, 5  ;;  %v1107_v60 = vrot.slane %v1105_v53, 5 }
  0xbe   : > { %3922 = vmatpush3.bf16.msra.mxu1 %v4202_v49  ;;  %3884 = vmatpush3.bf16.msra.mxu0 %v4205_v56  ;;  %v1109_v49 = vshrl.u32 %v5169_v52, 16  ;;  %v1098_v56 = vrot.slane %v1096_v28, 4  ;;  %v4239_v28 = vld [vmem:[%s5512_s1 + $0x320] sm:$0xff]  }
  0xbf   : > { %3923 = vmatprep.subr.bf16.mxu1 %v4204_v40  ;;  %3885 = vmatprep.subr.bf16.mxu0 %v4207_v22 }
  0xc0   : > { %2101 = vmatprep.mubr.bf16.mxu1 %v5104_v0  ;;  %v1111_v61 = vrot.slane %v1109_v49, 4  ;;  %v1102_v45 = vor.u32 %v1101_v57, %v1098_v56  ;;  %v4240_v49 = vld [vmem:[%s5512_s1 + $0x3a0] sm:$0xff]   ;;  %v5257_v56 = vld [vmem:[%s4698_s8 + $0x34] sm:$0xf]  ;;  %v5260_v57 = vld [vmem:[%s4698_s8 + $0x38] sm:$0x1] }
  0xc1   : > { %2037 = vmatmul.mubr.bf16.gmra.mxu0 %v4889_v6  ;;  %v3224_v6 = vrot.slane %v879_v24, 9 }
  0xc2   : > { %3924 = vmatpush3.bf16.msra.mxu1 %v4206_v18  ;;  %3886 = vmatpush3.bf16.msra.mxu0 %v4209_v37  ;;  %v4225_v18 = vld [vmem:[%s5512_s1 + $0x3f8] sm:$0xff]   ;;  %v1112_v62 = vor.u32 %v1111_v61, %v1107_v60  ;;  %v1103_v22 = vrot.slane %v1102_v45, 4  ;;  %v4230_v37 = vld [vmem:[%s5512_s1 + $0x330] sm:$0xff]   ;;  %v1157_v45 = vshrl.u32 %v5257_v56, 16 }
  0xc3   : > { %3925 = vmatprep.subr.bf16.mxu1 %v4208_v5  ;;  %3887 = vmatprep.subr.bf16.mxu0 %v4211_v31  ;;  %v919_v13 = vsel %vm4948_vm13, %v3224_v6, %v918_v55  ;;  %v4224_v55 = vld [vmem:[%s5512_s1 + $0x378] sm:$0xff]   ;;  %v5210_v31 = vld [vmem:[%s4698_s8 + $0x28] sm:$0xf] }
  0xc4   : > { %v3321_v7 = vcombine.low %v919_v13, %v922_v39  ;;  %v1113_v51 = vrot.slane %v1112_v62, 4  ;;  %v4227_v5 = vld [vmem:[%s5512_s1 + $0x3b8] sm:$0xff]   ;;  %v1108_v30 = vsel %vm4727_vm10, %v1103_v22, %v1107_v60  ;;  %v1133_v24 = vshrl.u32 %v5210_v31, 16  ;;  %v4233_v6 = vld [vmem:[%s5512_s1 + $0x368] sm:$0xff]  }
  0xc5   : > { %2102 = vmatmul.mubr.bf16.gmra.mxu1 %v4915_v32  ;;  %v3431_v53 = vcombine.low %v3251_v48, %v5210_v31  ;;  %v1163_v62 = vshll.u32 %v5260_v57, 16 }
  0xc6   : > { %3926 = vmatpush3.bf16.msra.mxu1 %v4210_v3  ;;  %3888 = vmatpush3.bf16.msra.mxu0 %v4213_v23  ;;  %v4229_v3 = vld [vmem:[%s5512_s1 + $0x3f0] sm:$0xff]   ;;  %v1123_v23 = vshll.u32 %v3251_v48, 16  ;;  %v1135_v13 = vrot.slane %v1133_v24, 4 }
  0xc7   : > { %3927 = vmatprep.subr.bf16.mxu1 %v4212_v4  ;;  %3889 = vmatprep.subr.bf16.mxu0 %v4215_v12  ;;  %v1120_v4 = vshrl.u32 %v3251_v48, 16 }
  0xc8   : > { %2044 = vmatprep.mubr.bf16.mxu0 %v3321_v7  ;;  %2109 = vmatprep.mubr.bf16.mxu1 %v5144_v34  ;;  %v1125_v9 = vrot.slane %v1123_v23, 5  ;;  %v4235_v7 = vld [vmem:[%s5512_s1 + $0x328] sm:$0xff]   ;;  %v4247_v23 = vld [vmem:[%s5512_s1 + $0x3d0] sm:$0xff]  }
  0xc9   : > { %2045 = vmatmul.mubr.bf16.gmra.mxu0 %v4968_v46  ;;  %v5173_v46 = vld [vmem:[%s4698_s8 + $0x20] sm:$0x1]  ;;  %v1122_v39 = vrot.slane %v1120_v4, 4  ;;  %v4246_v4 = vld [vmem:[%s5512_s1 + $0x350] sm:$0xff]  }
  0xca   : > { %3928 = vmatpush3.bf16.msra.mxu1 %v4214_v36  ;;  %3890 = vmatpush3.bf16.msra.mxu0 %v4217_v17  ;;  %v1115_v40 = vshll.u32 %v5173_v46, 16  ;;  %v1129_v36 = vshll.u32 %v5210_v31, 16 }
  0xcb   : > { %3929 = vmatprep.subr.bf16.mxu1 %v4216_v27  ;;  %3891 = vmatprep.subr.bf16.mxu0 %v4219_v42  ;;  %v1126_v27 = vor.u32 %v1125_v9, %v1122_v39  ;;  %v4236_v42 = vld [vmem:[%s5512_s1 + $0x3a8] sm:$0xff]   ;;  %v1209_v39 = vrot.slane %v5169_v52, 5 }
  0xcc   : > { %2524 = vmatprep.mubr.bf16.mxu0 %v4766_v21  ;;  %v1117_v33 = vrot.slane %v1115_v40, 5  ;;  %v1131_v12 = vrot.slane %v1129_v36, 5 }
  0xcd   : > { %2110 = vmatmul.mubr.bf16.gmra.mxu1 %v4989_v59 }
  0xce   : > { %3930 = vmatpush3.bf16.msra.mxu1 %v4218_v41  ;;  %3892 = vmatpush3.bf16.msra.mxu0 %v4221_v44  ;;  %v1136_v17 = vor.u32 %v1135_v13, %v1131_v12  ;;  %v1141_v41 = vrot.slane %v1139_v1, 5  ;;  %v5302_v13 = vld [vmem:[%s4698_s8 + $0x40] sm:$0xf] }
  0xcf   : > { %3931 = vmatprep.subr.bf16.mxu1 %v4220_v43  ;;  %3957 = vmatprep.subr.bf16.mxu0 %v4224_v55  ;;  %v4237_v43 = vld [vmem:[%s5512_s1 + $0x360] sm:$0xff]   ;;  %v3253_v55 = vld [vmem:[%s4698_s8 + $0x30] sm:$0xf]  ;;  %v1177_v52 = vshll.u32 %v5302_v13, 16 }
  0xd0   : > { %v1137_v44 = vrot.slane %v1136_v17, 4  ;;  %v1144_v60 = vshrl.u32 %v3253_v55, 16  ;;  %v1147_v61 = vshll.u32 %v3253_v55, 16  ;;  %v3432_v1 = vcombine.low %v3253_v55, %v5257_v56 }
  0xd1   : > { %2525 = vmatmul.mubr.bf16.vlgmr.msra.gmra.mxu0 %v4754_v15  ;;  %v1118_v15 = vsel %vm4727_vm10, %v1113_v51, %v1117_v33  ;;  %v4242_v33 = vld [vmem:[%s5512_s1 + $0x358] sm:$0xff]   ;;  %v1216_v55 = vrot.slane %v5210_v31, 5 }
  0xd2   : > { %3932 = vmatpush3.bf16.msra.mxu1 %v4222_v19  ;;  %3958 = vmatpush3.bf16.msra.mxu0 %v4226_v63  ;;  %v5203_v20 = vcombine.low %v1108_v30, %v1118_v15  ;;  %v4238_v19 = vld [vmem:[%s5512_s1 + $0x3e0] sm:$0xff]   ;;  %v1142_v35 = vsel %vm4727_vm10, %v1137_v44, %v1141_v41  ;;  %v1146_v63 = vrot.slane %v1144_v60, 4  ;;  %v1149_v22 = vrot.slane %v1147_v61, 5 }
  0xd3   : > { %3997 = vmatprep.subr.bf16.mxu1 %v4225_v18  ;;  %2532 = vmatprep.mubr.bf16.mxu0 %v4842_v16  ;;  %v1153_v18 = vshll.u32 %v5257_v56, 16  ;;  %v1165_v15 = vrot.slane %v1163_v62, 5  ;;  %v1181_v41 = vshrl.u32 %v5302_v13, 16 }
  0xd4   : > { %3959 = vmatprep.subr.bf16.mxu0 %v4228_v38  ;;  %2589 = vmatprep.mubr.bf16.mxu1 %v5203_v20  ;;  %v1159_v38 = vrot.slane %v1157_v45, 4  ;;  %v4256_v45 = vld [vmem:[%s5512_s1 + $0x3c0] sm:$0xff]  }
  0xd5   : > { %2590 = vmatmul.mubr.bf16.vlgmr.msra.gmra.mxu1 %v3430_v29  ;;  %v1155_v51 = vrot.slane %v1153_v18, 5  ;;  %v4244_v29 = vld [vmem:[%s5512_s1 + $0x318] sm:$0xff]   ;;  %v1183_v44 = vrot.slane %v1181_v41, 4  ;;  %v4255_v18 = vld [vmem:[%s5512_s1 + $0x340] sm:$0xff]  }
  0xd6   : > { %3960 = vmatpush3.bf16.msra.mxu0 %v4230_v37  ;;  %3998 = vmatpush3.bf16.msra.mxu1 %v4227_v5  ;;  %v1150_v5 = vor.u32 %v1149_v22, %v1146_v63  ;;  %v4245_v37 = vld [vmem:[%s5512_s1 + $0x398] sm:$0xff]   ;;  %v4257_v63 = vld [vmem:[%s5512_s1 + $0x300] sm:$0xff]  }
  0xd7   : > { %3999 = vmatprep.subr.bf16.mxu1 %v4229_v3  ;;  %3961 = vmatprep.subr.bf16.mxu0 %v4233_v6  ;;  %v1160_v30 = vor.u32 %v1159_v38, %v1155_v51  ;;  %v4248_v6 = vld [vmem:[%s5512_s1 + $0x310] sm:$0xff]   ;;  %v3261_v38 = vld [vmem:[%s4698_s8 + $0x18] sm:$0xe] }
  0xd8   : > { %v1151_v3 = vrot.slane %v1150_v5, 4  ;;  %v3262_v5 = vld [vmem:[%s4698_s8 + $0x24] sm:$0xe] }
  0xd9   : > { %2533 = vmatmul.mubr.bf16.gmra.mxu0 %v4833_v11  ;;  %v1127_v11 = vrot.slane %v1126_v27, 4  ;;  %v1161_v48 = vrot.slane %v1160_v30, 4  ;;  %v5307_v27 = vld [vmem:[%s4698_s8 + $0x44] sm:$0x1]  ;;  %v1218_v30 = vrot.slane %v1216_v55, 4 }
  0xda   : > { %2540 = vmatprep.mubr.bf16.mxu0 %v4915_v32  ;;  %3962 = vmatpush3.bf16.msra.mxu0 %v4235_v7  ;;  %v1156_v36 = vsel %vm4727_vm10, %v1151_v3, %v1155_v51  ;;  %v4258_v51 = vld [vmem:[%s5512_s1 + $0x380] sm:$0xff]  }
  0xdb   : > { %4000 = vmatpush3.bf16.msra.mxu1 %v4231_v10  ;;  %v1132_v50 = vsel %vm4727_vm10, %v1127_v11, %v1131_v12  ;;  %3963 = vmatprep.subr.bf16.mxu0 %v4237_v43  ;;  %v1166_v24 = vsel %vm4727_vm10, %v1161_v48, %v1165_v15  ;;  %v4249_v10 = vld [vmem:[%s5512_s1 + $0x390] sm:$0xff]   ;;  %v3255_v12 = vld [vmem:[%s4698_s8 + $0x3c] sm:$0xf]  ;;  %v1179_v43 = vrot.slane %v1177_v52, 5  ;;  %v1219_v15 = vrot.slane %v5213_v14, 5 }
  0xdc   : > { %4001 = vmatprep.subr.bf16.mxu1 %v4234_v25  ;;  %v5253_v40 = vcombine.low %v1132_v50, %v1142_v35  ;;  %v5295_v9 = vcombine.low %v1156_v36, %v1166_v24  ;;  %v1212_v25 = vrot.slane %v5173_v46, 5  ;;  %v1168_v7 = vshrl.u32 %v3255_v12, 16 }
  0xdd   : > { %v1171_v17 = vshll.u32 %v3255_v12, 16  ;;  %v3433_v31 = vcombine.low %v3255_v12, %v5302_v13  ;;  %v1223_v14 = vrot.slane %v5257_v56, 5  ;;  %v1230_v56 = vrot.slane %v5302_v13, 5 }
  0xde   : > { %3964 = vmatpush3.bf16.msra.mxu0 %v4239_v28  ;;  %2597 = vmatprep.mubr.bf16.mxu1 %v5253_v40  ;;  %v1170_v46 = vrot.slane %v1168_v7, 4  ;;  %v1184_v28 = vor.u32 %v1183_v44, %v1179_v43 }
  0xdf   : > { %4002 = vmatpush3.bf16.msra.mxu1 %v4236_v42  ;;  %3965 = vmatprep.subr.bf16.mxu0 %v4242_v33  ;;  %v1187_v42 = vshll.u32 %v5307_v27, 16  ;;  %v1173_v11 = vrot.slane %v1171_v17, 5 }
  0xe0   : > { %4003 = vmatprep.subr.bf16.mxu1 %v4238_v19  ;;  %2598 = vmatmul.mubr.bf16.gmra.mxu1 %v3431_v53  ;;  %v4252_v19 = vld [vmem:[%s5512_s1 + $0x3c8] sm:$0xff]   ;;  %v1185_v61 = vrot.slane %v1184_v28, 4 }
  0xe1   : > { %2541 = vmatmul.mubr.bf16.gmra.mxu0 %v4903_v26  ;;  %v4243_v26 = vld [vmem:[%s5512_s1 + $0x3d8] sm:$0xff]   ;;  %2605 = vmatprep.mubr.bf16.mxu1 %v5295_v9  ;;  %v1174_v50 = vor.u32 %v1173_v11, %v1170_v46  ;;  %v1189_v35 = vrot.slane %v1187_v42, 5  ;;  %v4253_v53 = vld [vmem:[%s5512_s1 + $0x308] sm:$0xff]  }
  0xe2   : > { %2548 = vmatprep.mubr.bf16.mxu0 %v4989_v59  ;;  %3966 = vmatpush3.bf16.msra.mxu0 %v4244_v29  ;;  %v3266_v29 = vrot.slane %v3262_v5, 9 }
  0xe3   : > { %4004 = vmatpush3.bf16.msra.mxu1 %v4240_v49  ;;  %3967 = vmatprep.subr.bf16.mxu0 %v4246_v4  ;;  %v4254_v49 = vld [vmem:[%s5512_s1 + $0x388] sm:$0xff]   ;;  %v1175_v60 = vrot.slane %v1174_v50, 4  ;;  %v1190_v33 = vsel %vm4727_vm10, %v1185_v61, %v1189_v35  ;;  %v1220_v4 = vsel %vm4948_vm13, %v1218_v30, %v1219_v15 }
  0xe4   : > { %4005 = vmatprep.subr.bf16.mxu1 %v4243_v26  ;;  %v3265_v26 = vrot.slane %v3261_v38, 9  ;;  %v1217_v48 = vsel %vm4948_vm13, %v3266_v29, %v1216_v55 }
  0xe5   : > { %v1180_v62 = vsel %vm4727_vm10, %v1175_v60, %v1179_v43  ;;  %v3535_v36 = vcombine.low %v1217_v48, %v1220_v4 }
  0xe6   : > { %3968 = vmatpush3.bf16.msra.mxu0 %v4248_v6  ;;  %v3437_v22 = vcombine.low %v1180_v62, %v1190_v33  ;;  %v1226_v6 = vrot.slane %v5260_v57, 5  ;;  %v1233_v57 = vrot.slane %v5307_v27, 5 }
  0xe7   : > { %4006 = vmatpush3.bf16.msra.mxu1 %v4245_v37  ;;  %v1210_v37 = vsel %vm4948_vm13, %v3265_v26, %v1209_v39 }
  0xe8   : > { %4007 = vmatprep.subr.bf16.mxu1 %v4247_v23  ;;  %2606 = vmatmul.mubr.bf16.gmra.mxu1 %v3432_v1  ;;  %v3263_v23 = vld [vmem:[%s4698_s8 + $0x30] sm:$0xe]  ;;  %v1225_v1 = vrot.slane %v1223_v14, 4 }
  0xe9   : > { %2549 = vmatmul.mubr.bf16.gmra.mxu0 %v4982_v54  ;;  %v4251_v54 = vld [vmem:[%s5512_s1 + $0x348] sm:$0xff]   ;;  %2613 = vmatprep.mubr.bf16.mxu1 %v3437_v22  ;;  %v3267_v24 = vrot.slane %v3263_v23, 9 }
  0xea   : > { %2927 = vmatprep.mubr.bf16.mxu0 %v5016_v2  ;;  %3969 = vmatprep.subr.bf16.mxu0 %v4251_v54  ;;  %v1211_v2 = vrot.slane %v1209_v39, 4  ;;  %v3264_v39 = vld [vmem:[%s4698_s8 + $0x3c] sm:$0xe] }
  0xeb   : > { %4008 = vmatpush3.bf16.msra.mxu1 %v4249_v10  ;;  %3970 = vmatpush3.bf16.msra.mxu0 %v4253_v53  ;;  %v3268_v12 = vrot.slane %v3264_v39, 9 }
  0xec   : > { %4009 = vmatprep.subr.bf16.mxu1 %v4252_v19  ;;  %3971 = vmatprep.subr.bf16.mxu0 %v4255_v18  ;;  %v1213_v58 = vsel %vm4948_vm13, %v1211_v2, %v1212_v25  ;;  %v1232_v25 = vrot.slane %v1230_v56, 4 }
  0xed   : > { %v3534_v3 = vcombine.low %v1210_v37, %v1213_v58 }
  0xef   : > { %4010 = vmatpush3.bf16.msra.mxu1 %v4254_v49  ;;  %3972 = vmatpush3.bf16.msra.mxu0 %v4257_v63 }
  0xf0   : > { %4011 = vmatprep.subr.bf16.mxu1 %v4256_v45  ;;  %2614 = vmatmul.mubr.bf16.gmra.mxu1 %v3433_v31 }
  0xf1   : > { %2992 = vmatprep.mubr.bf16.mxu1 %v3534_v3 }
  0xf2   : > { %2928 = vmatmul.mubr.bf16.vlgmr.msra.gmra.mxu0 %v4766_v21  ;;  %v1224_v21 = vsel %vm4948_vm13, %v3267_v24, %v1223_v14 }
  0xf3   : > { %4012 = vmatpush3.bf16.msra.mxu1 %v4258_v51  ;;  %2935 = vmatprep.mubr.bf16.mxu0 %v5058_v47  ;;  %v1227_v47 = vsel %vm4948_vm13, %v1225_v1, %v1226_v6 }
  0xf4   : > { %v3536_v10 = vcombine.low %v1224_v21, %v1227_v47 }
  0xf8   : > { %2993 = vmatmul.mubr.bf16.vlgmr.msra.gmra.mxu1 %v5203_v20 }
  0xf9   : > { %3000 = vmatprep.mubr.bf16.mxu1 %v3535_v36 }
  0xfa   : > { %2936 = vmatmul.mubr.bf16.gmra.mxu0 %v4842_v16  ;;  %v1231_v16 = vsel %vm4948_vm13, %v3268_v12, %v1230_v56 }
  0xfb   : > { %2943 = vmatprep.mubr.bf16.mxu0 %v5104_v0  ;;  %v1234_v0 = vsel %vm4948_vm13, %v1232_v25, %v1233_v57 }
  0xfc   : > { %v3537_v20 = vcombine.low %v1231_v16, %v1234_v0 }
 0x100   : > { %3001 = vmatmul.mubr.bf16.gmra.mxu1 %v5253_v40 }
 0x101   : > { %3008 = vmatprep.mubr.bf16.mxu1 %v3536_v10 }
 0x102   : > { %2944 = vmatmul.mubr.bf16.gmra.mxu0 %v4915_v32  ;;  %v5382_v32 = vld [vmem:[%s5513_s2] ss:$0 sm:$0xff] }
 0x103   : > { %2951 = vmatprep.mubr.bf16.mxu0 %v5144_v34 }
 0x108   : > { %3009 = vmatmul.mubr.bf16.gmra.mxu1 %v5295_v9 }
 0x109   : > { %3016 = vmatprep.mubr.bf16.mxu1 %v3537_v20 }
 0x10a   : > { %2952 = vmatmul.mubr.bf16.gmra.mxu0 %v4989_v59 }
 0x110   : > { %3017 = vmatmul.mubr.bf16.gmra.mxu1 %v3437_v22 }
 0x14e   : > { %v3733_v13 = vpop.f32.mrf.mxu0 }
 0x14f   : > { %v3773_v40 = vpop.f32.mrf.mxu1 }
 0x150   : > { %v3734_v34 = vpop.f32.mrf.mxu0 }
 0x151   : > { %v3735_v27 = vadd.f32 %v3734_v34, %v3733_v13  ;;  %v3774_v17 = vpop.f32.mrf.mxu1 }
 0x152   : > { %v3736_v7 = vpop.f32.mrf.mxu0  ;;  %v3775_v52 = vadd.f32 %v3774_v17, %v3773_v40 }
 0x153   : > { %v1604_v8 = vadd.f32 %v3735_v27, %v5382_v32  ;;  %v3776_v9 = vpop.f32.mrf.mxu1 }
 0x154   : > { %v3737_v41 = vpop.f32.mrf.mxu0 }
 0x155   : > { %v3738_v42 = vadd.f32 %v3737_v41, %v3736_v7  ;;  %v5385_v54 = vadd.f32 %v3775_v52, %v1604_v8  ;;  %v3777_v46 = vpop.f32.mrf.mxu1 }
 0x156   : > { %v3778_v11 = vadd.f32 %v3777_v46, %v3776_v9  ;;  %v3739_v44 = vpop.f32.mrf.mxu0 }
 0x157   : > { %v1607_v59 = vadd.f32 %v3738_v42, %v5382_v32 }
 0x158   : > { %v3740_v19 = vpop.f32.mrf.mxu0 }
 0x159   : > { %v5388_v43 = vadd.f32 %v3778_v11, %v1607_v59  ;;  %v3779_v2 = vpop.f32.mrf.mxu1  ;;  %v3741_v50 = vadd.f32 %v3740_v19, %v3739_v44 }
 0x15a   : > { %v3742_v28 = vpop.f32.mrf.mxu0 }
 0x15b   : > { %v1612_v35 = vadd.f32 %v3741_v50, %v5382_v32  ;;  %v3780_v53 = vpop.f32.mrf.mxu1 }
 0x15c   : > { %v3781_v49 = vadd.f32 %v3780_v53, %v3779_v2  ;;  %v3743_v55 = vpop.f32.mrf.mxu0 }
 0x15d   : > { %v3782_v60 = vpop.f32.mrf.mxu1  ;;  %v3744_v61 = vadd.f32 %v3743_v55, %v3742_v28 }
 0x15e   : > { %v5391_v18 = vadd.f32 %v3781_v49, %v1612_v35 }
 0x15f   : > { %v1615_v45 = vadd.f32 %v3744_v61, %v5382_v32  ;;  %v3783_v62 = vpop.f32.mrf.mxu1 }
 0x160   : > { %v3784_v33 = vadd.f32 %v3783_v62, %v3782_v60 }
 0x161   : > { %v3745_v63 = vpop.f32.mrf.mxu0 }
 0x162   : > { %v5394_v31 = vadd.f32 %v3784_v33, %v1615_v45 }
 0x163   : > { %v3746_v22 = vpop.f32.mrf.mxu0  ;;  %v3785_v51 = vpop.f32.mrf.mxu1 }
 0x164   : > { %v3747_v38 = vadd.f32 %v3746_v22, %v3745_v63 }
 0x165   : > { %v3748_v26 = vpop.f32.mrf.mxu0  ;;  %v3786_v5 = vpop.f32.mrf.mxu1 }
 0x166   : > { %v1620_v58 = vadd.f32 %v3747_v38, %v5382_v32  ;;  %v3787_v30 = vadd.f32 %v3786_v5, %v3785_v51 }
 0x167   : > { %v3749_v15 = vpop.f32.mrf.mxu0  ;;  %v3788_v29 = vpop.f32.mrf.mxu1 }
 0x168   : > { %v3750_v37 = vadd.f32 %v3749_v15, %v3748_v26  ;;  %v5397_v3 = vadd.f32 %v3787_v30, %v1620_v58 }
 0x169   : > { %v3789_v4 = vpop.f32.mrf.mxu1  ;;  %v3751_v36 = vpop.f32.mrf.mxu0 }
 0x16a   : > { %v1623_v48 = vadd.f32 %v3750_v37, %v5382_v32  ;;  %v3790_v14 = vadd.f32 %v3789_v4, %v3788_v29 }
 0x16b   : > { %v3752_v24 = vpop.f32.mrf.mxu0 }
 0x16c   : > { %v5400_v23 = vadd.f32 %v3790_v14, %v1623_v48  ;;  %v3753_v6 = vadd.f32 %v3752_v24, %v3751_v36 }
 0x16d   : > { %v3791_v1 = vpop.f32.mrf.mxu1  ;;  %v3754_v21 = vpop.f32.mrf.mxu0 }
 0x16e   : > { %v1628_v47 = vadd.f32 %v3753_v6, %v5382_v32 }
 0x16f   : > { %v3792_v56 = vpop.f32.mrf.mxu1  ;;  %v3755_v10 = vpop.f32.mrf.mxu0 }
 0x170   : > { %v3793_v39 = vadd.f32 %v3792_v56, %v3791_v1  ;;  %v3756_v25 = vadd.f32 %v3755_v10, %v3754_v21 }
 0x171   : > { %v3794_v12 = vpop.f32.mrf.mxu1  ;;  %v3813_v16 = vpop.f32.mrf.mxu0 }
 0x172   : > { %v5403_v57 = vadd.f32 %v3793_v39, %v1628_v47  ;;  %v1631_v0 = vadd.f32 %v3756_v25, %v5382_v32 }
 0x173   : > { %v3795_v20 = vpop.f32.mrf.mxu1  ;;  %v3814_v34 = vpop.f32.mrf.mxu0 }
 0x174   : > { %v3796_v13 = vadd.f32 %v3795_v20, %v3794_v12  ;;  %v3815_v7 = vadd.f32 %v3814_v34, %v3813_v16 }
 0x175   : > { %v3853_v40 = vpop.f32.mrf.mxu1  ;;  %v3816_v8 = vpop.f32.mrf.mxu0 }
 0x176   : > { %v5406_v27 = vadd.f32 %v3796_v13, %v1631_v0  ;;  %v2023_v42 = vadd.f32 %v3815_v7, %v5382_v32 }
 0x177   : > { %v3854_v17 = vpop.f32.mrf.mxu1  ;;  %v3817_v52 = vpop.f32.mrf.mxu0 }
 0x178   : > { %v3818_v9 = vadd.f32 %v3817_v52, %v3816_v8  ;;  %v3855_v44 = vadd.f32 %v3854_v17, %v3853_v40 }
 0x179   : > { %v3856_v41 = vpop.f32.mrf.mxu1  ;;  %v3819_v59 = vpop.f32.mrf.mxu0 }
 0x17a   : > { %v2026_v46 = vadd.f32 %v3818_v9, %v5382_v32  ;;  %v2088_v28 = vadd.f32 %v3855_v44, %v2023_v42 }
 0x17b   : > { %v3857_v11 = vpop.f32.mrf.mxu1  ;;  %v3820_v2 = vpop.f32.mrf.mxu0 }
 0x17c   : > { %v3858_v19 = vadd.f32 %v3857_v11, %v3856_v41  ;;  %v3821_v53 = vadd.f32 %v3820_v2, %v3819_v59 }
 0x17d   : > { %v3859_v50 = vpop.f32.mrf.mxu1  ;;  %v3822_v49 = vpop.f32.mrf.mxu0 }
 0x17e   : > { %v2091_v35 = vadd.f32 %v3858_v19, %v2026_v46  ;;  %v2031_v33 = vadd.f32 %v3821_v53, %v5382_v32 }
 0x17f   : > { %v3860_v55 = vpop.f32.mrf.mxu1  ;;  %v3823_v60 = vpop.f32.mrf.mxu0 }
 0x180   : > { %v4079_v61 = vpack.i.bf16 %v2091_v35, %v2088_v28  ;;  %v3824_v62 = vadd.f32 %v3823_v60, %v3822_v49  ;;  %v3861_v38 = vadd.f32 %v3860_v55, %v3859_v50 }
 0x181   : > { %v3862_v45 = vpop.f32.mrf.mxu1  ;;  %v3825_v63 = vpop.f32.mrf.mxu0 }
 0x182   : > { %4080 = vrot.lane.b32.xlu0 %v4079_v61, %s4300_s28  ;;  %v2034_v22 = vadd.f32 %v3824_v62, %v5382_v32  ;;  %v2096_v30 = vadd.f32 %v3861_v38, %v2031_v33 }
 0x183   : > { %v3863_v51 = vpop.f32.mrf.mxu1  ;;  %v3826_v58 = vpop.f32.mrf.mxu0 }
 0x184   : > { %v3864_v26 = vadd.f32 %v3863_v51, %v3862_v45  ;;  %v3827_v29 = vadd.f32 %v3826_v58, %v3825_v63 }
 0x185   : > { %v3865_v5 = vpop.f32.mrf.mxu1  ;;  %v3828_v37 = vpop.f32.mrf.mxu0 }
 0x186   : > { %v2099_v15 = vadd.f32 %v3864_v26, %v2034_v22  ;;  %v2039_v1 = vadd.f32 %v3827_v29, %v5382_v32 }
 0x187   : > { %v3866_v48 = vpop.f32.mrf.mxu1  ;;  %v3829_v4 = vpop.f32.mrf.mxu0 }
 0x188   : > { %v4084_v14 = vpack.i.bf16 %v2099_v15, %v2096_v30  ;;  %v3830_v24 = vadd.f32 %v3829_v4, %v3828_v37  ;;  %v3867_v56 = vadd.f32 %v3866_v48, %v3865_v5 }
 0x189   : > { %v3868_v36 = vpop.f32.mrf.mxu1  ;;  %v3831_v47 = vpop.f32.mrf.mxu0 }
 0x18a   : > { %4085 = vrot.lane.b32.xlu0 %v4084_v14, %s4300_s28  ;;  %v2042_v6 = vadd.f32 %v3830_v24, %v5382_v32  ;;  %v2104_v25 = vadd.f32 %v3867_v56, %v2039_v1 }
 0x18b   : > { %v3869_v21 = vpop.f32.mrf.mxu1  ;;  %v3832_v12 = vpop.f32.mrf.mxu0 }
 0x18c   : > { %v3870_v39 = vadd.f32 %v3869_v21, %v3868_v36  ;;  %v3833_v0 = vadd.f32 %v3832_v12, %v3831_v47 }
 0x18d   : > { %v3871_v10 = vpop.f32.mrf.mxu1  ;;  %v3834_v13 = vpop.f32.mrf.mxu0 }
 0x18e   : > { %v2107_v16 = vadd.f32 %v3870_v39, %v2042_v6  ;;  %v2047_v8 = vadd.f32 %v3833_v0, %v5382_v32 }
 0x18f   : > { %v3872_v20 = vpop.f32.mrf.mxu1  ;;  %v3835_v7 = vpop.f32.mrf.mxu0 }
 0x190   : > { %v4089_v34 = vpack.i.bf16 %v2107_v16, %v2104_v25  ;;  %v3836_v17 = vadd.f32 %v3835_v7, %v3834_v13  ;;  %v3873_v9 = vadd.f32 %v3872_v20, %v3871_v10 }
 0x191   : > { %v3874_v40 = vpop.f32.mrf.mxu1  ;;  %v3893_v41 = vpop.f32.mrf.mxu0 }
 0x192   : > { %4090 = vrot.lane.b32.xlu1 %v4089_v34, %s4300_s28  ;;  %v2050_v42 = vadd.f32 %v3836_v17, %v5382_v32  ;;  %v2112_v11 = vadd.f32 %v3873_v9, %v2047_v8 }
 0x193   : > { %v3875_v52 = vpop.f32.mrf.mxu1  ;;  %v3894_v46 = vpop.f32.mrf.mxu0 }
 0x194   : > { %v3876_v59 = vadd.f32 %v3875_v52, %v3874_v40  ;;  %v3895_v19 = vadd.f32 %v3894_v46, %v3893_v41 }
 0x195   : > { %v3896_v2 = vpop.f32.mrf.mxu0  ;;  %v3933_v35 = vpop.f32.mrf.mxu1 }
 0x196   : > { %v2115_v44 = vadd.f32 %v3876_v59, %v2050_v42  ;;  %v2527_v49 = vadd.f32 %v3895_v19, %v5382_v32 }
 0x197   : > { %v3897_v28 = vpop.f32.mrf.mxu0  ;;  %v3934_v60 = vpop.f32.mrf.mxu1 }
 0x198   : > { %v4094_v50 = vpack.i.bf16 %v2115_v44, %v2112_v11  ;;  %v3898_v53 = vadd.f32 %v3897_v28, %v3896_v2  ;;  %v3935_v61 = vadd.f32 %v3934_v60, %v3933_v35 }
 0x199   : > { %v3899_v55 = vpop.f32.mrf.mxu0  ;;  %v3936_v62 = vpop.f32.mrf.mxu1 }
 0x19a   : > { %4095 = vrot.lane.b32.xlu1 %v4094_v50, %s4300_s28  ;;  %v5421_v63 = vadd.f32 %v3935_v61, %v2527_v49  ;;  %v2530_v22 = vadd.f32 %v3898_v53, %v5382_v32 }
 0x19b   : > { %v3900_v45 = vpop.f32.mrf.mxu0  ;;  %v3937_v38 = vpop.f32.mrf.mxu1 }
 0x19c   : > { %v3901_v33 = vadd.f32 %v3900_v45, %v3899_v55  ;;  %v3938_v26 = vadd.f32 %v3937_v38, %v3936_v62 }
 0x19d   : > { %v3902_v51 = vpop.f32.mrf.mxu0 }
 0x19e   : > { %v5424_v30 = vadd.f32 %v3938_v26, %v2530_v22  ;;  %v2535_v48 = vadd.f32 %v3901_v33, %v5382_v32 }
 0x19f   : > { %v3903_v58 = vpop.f32.mrf.mxu0 }
 0x1a0   : > { %v3904_v5 = vadd.f32 %v3903_v58, %v3902_v51  ;;  %v3939_v29 = vpop.f32.mrf.mxu1 }
 0x1a1   : > { %v3905_v15 = vpop.f32.mrf.mxu0 }
 0x1a2   : > { %v3940_v14 = vpop.f32.mrf.mxu1  ;;  %v2538_v47 = vadd.f32 %v3904_v5, %v5382_v32 }
 0x1a3   : > { %v3906_v37 = vpop.f32.mrf.mxu0  ;;  %v3941_v24 = vadd.f32 %v3940_v14, %v3939_v29 }
 0x1a4   : > { %v3907_v4 = vadd.f32 %v3906_v37, %v3905_v15  ;;  %v3942_v1 = vpop.f32.mrf.mxu1 }
 0x1a5   : > { %v3908_v36 = vpop.f32.mrf.mxu0  ;;  %v5427_v21 = vadd.f32 %v3941_v24, %v2535_v48 }
 0x1a6   : > { %v3943_v39 = vpop.f32.mrf.mxu1  ;;  %v2543_v13 = vadd.f32 %v3907_v4, %v5382_v32 }
 0x1a7   : > { %v3909_v6 = vpop.f32.mrf.mxu0  ;;  %v3944_v10 = vadd.f32 %v3943_v39, %v3942_v1 }
 0x1a8   : > { %v3910_v56 = vadd.f32 %v3909_v6, %v3908_v36  ;;  %v3945_v0 = vpop.f32.mrf.mxu1 }
 0x1a9   : > { %v3911_v12 = vpop.f32.mrf.mxu0  ;;  %v5430_v25 = vadd.f32 %v3944_v10, %v2538_v47 }
 0x1aa   : > { %v3946_v40 = vpop.f32.mrf.mxu1  ;;  %v2546_v9 = vadd.f32 %v3910_v56, %v5382_v32 }
 0x1ab   : > { %v3912_v16 = vpop.f32.mrf.mxu0  ;;  %v3947_v7 = vadd.f32 %v3946_v40, %v3945_v0 }
 0x1ac   : > { %v3913_v20 = vadd.f32 %v3912_v16, %v3911_v12  ;;  %v3948_v17 = vpop.f32.mrf.mxu1 }
 0x1ad   : > { %v3914_v34 = vpop.f32.mrf.mxu0  ;;  %v5433_v41 = vadd.f32 %v3947_v7, %v2543_v13 }
 0x1ae   : > { %v3949_v42 = vpop.f32.mrf.mxu1  ;;  %v2551_v44 = vadd.f32 %v3913_v20, %v5382_v32 }
 0x1af   : > { %v3915_v8 = vpop.f32.mrf.mxu0  ;;  %v3950_v59 = vadd.f32 %v3949_v42, %v3948_v17 }
 0x1b0   : > { %v3916_v52 = vadd.f32 %v3915_v8, %v3914_v34  ;;  %v3951_v11 = vpop.f32.mrf.mxu1 }
 0x1b1   : > { %v5436_v46 = vadd.f32 %v3950_v59, %v2546_v9 }
 0x1b2   : > { %v3973_v19 = vpop.f32.mrf.mxu0  ;;  %v3952_v2 = vpop.f32.mrf.mxu1  ;;  %v2554_v49 = vadd.f32 %v3916_v52, %v5382_v32 }
 0x1b3   : > { %v3953_v50 = vadd.f32 %v3952_v2, %v3951_v11 }
 0x1b4   : > { %v3974_v28 = vpop.f32.mrf.mxu0  ;;  %v3954_v35 = vpop.f32.mrf.mxu1 }
 0x1b5   : > { %v5439_v53 = vadd.f32 %v3953_v50, %v2551_v44  ;;  %v3975_v22 = vadd.f32 %v3974_v28, %v3973_v19 }
 0x1b6   : > { %v3976_v55 = vpop.f32.mrf.mxu0  ;;  %v3955_v60 = vpop.f32.mrf.mxu1 }
 0x1b7   : > { %v3956_v61 = vadd.f32 %v3955_v60, %v3954_v35  ;;  %v2930_v15 = vadd.f32 %v3975_v22, %v5382_v32 }
 0x1b8   : > { %v3977_v45 = vpop.f32.mrf.mxu0  ;;  %v4013_v62 = vpop.f32.mrf.mxu1 }
 0x1b9   : > { %v5442_v33 = vadd.f32 %v3956_v61, %v2554_v49  ;;  %v3978_v51 = vadd.f32 %v3977_v45, %v3976_v55 }
 0x1ba   : > { %v3979_v38 = vpop.f32.mrf.mxu0  ;;  %v4014_v26 = vpop.f32.mrf.mxu1 }
 0x1bb   : > { %v2933_v29 = vadd.f32 %v3978_v51, %v5382_v32  ;;  %v4015_v4 = vadd.f32 %v4014_v26, %v4013_v62 }
 0x1bc   : > { %v3980_v58 = vpop.f32.mrf.mxu0  ;;  %v4016_v5 = vpop.f32.mrf.mxu1 }
 0x1bd   : > { %v2995_v1 = vadd.f32 %v4015_v4, %v2930_v15  ;;  %v3981_v47 = vadd.f32 %v3980_v58, %v3979_v38 }
 0x1be   : > { %v3982_v37 = vpop.f32.mrf.mxu0  ;;  %v4017_v48 = vpop.f32.mrf.mxu1 }
 0x1bf   : > { %v4018_v14 = vadd.f32 %v4017_v48, %v4016_v5  ;;  %v2938_v20 = vadd.f32 %v3981_v47, %v5382_v32 }
 0x1c0   : > { %v3983_v36 = vpop.f32.mrf.mxu0  ;;  %v4019_v24 = vpop.f32.mrf.mxu1 }
 0x1c1   : > { %v2998_v6 = vadd.f32 %v4018_v14, %v2933_v29  ;;  %v3984_v56 = vadd.f32 %v3983_v36, %v3982_v37 }
 0x1c2   : > { %v3985_v39 = vpop.f32.mrf.mxu0  ;;  %v4020_v10 = vpop.f32.mrf.mxu1 }
 0x1c3   : > { %v4099_v12 = vpack.i.bf16 %v2998_v6, %v2995_v1  ;;  %v2941_v13 = vadd.f32 %v3984_v56, %v5382_v32  ;;  %v4021_v7 = vadd.f32 %v4020_v10, %v4019_v24 }
 0x1c4   : > { %v3986_v16 = vpop.f32.mrf.mxu0  ;;  %v4022_v0 = vpop.f32.mrf.mxu1 }
 0x1c5   : > { %4100 = vrot.lane.b32.xlu0 %v4099_v12, %s4300_s28  ;;  %v3003_v9 = vadd.f32 %v4021_v7, %v2938_v20  ;;  %v3987_v59 = vadd.f32 %v3986_v16, %v3985_v39 }
 0x1c6   : > { %v3988_v34 = vpop.f32.mrf.mxu0  ;;  %v4023_v40 = vpop.f32.mrf.mxu1 }
 0x1c7   : > { %v4024_v8 = vadd.f32 %v4023_v40, %v4022_v0  ;;  %v2946_v35 = vadd.f32 %v3987_v59, %v5382_v32 }
 0x1c8   : > { %v3989_v17 = vpop.f32.mrf.mxu0  ;;  %v4025_v52 = vpop.f32.mrf.mxu1 }
 0x1c9   : > { %v3006_v42 = vadd.f32 %v4024_v8, %v2941_v13  ;;  %v3990_v11 = vadd.f32 %v3989_v17, %v3988_v34 }
 0x1ca   : > { %v3991_v44 = vpop.f32.mrf.mxu0  ;;  %v4026_v19 = vpop.f32.mrf.mxu1 }
 0x1cb   : > { %v4104_v2 = vpack.i.bf16 %v3006_v42, %v3003_v9  ;;  %v2949_v49 = vadd.f32 %v3990_v11, %v5382_v32  ;;  %v4027_v61 = vadd.f32 %v4026_v19, %v4025_v52 }
 0x1cc   : > { %v3992_v50 = vpop.f32.mrf.mxu0  ;;  %v4028_v28 = vpop.f32.mrf.mxu1 }
 0x1cd   : > { %4105 = vrot.lane.b32.xlu1 %v4104_v2, %s4300_s28  ;;  %v3011_v51 = vadd.f32 %v4027_v61, %v2946_v35  ;;  %v3993_v26 = vadd.f32 %v3992_v50, %v3991_v44 }
 0x1ce   : > { %v3994_v55 = vpop.f32.mrf.mxu0  ;;  %v4029_v60 = vpop.f32.mrf.mxu1 }
 0x1cf   : > { %v4030_v45 = vadd.f32 %v4029_v60, %v4028_v28  ;;  %v2954_v37 = vadd.f32 %v3993_v26, %v5382_v32 }
 0x1d0   : > { %v3995_v62 = vpop.f32.mrf.mxu0  ;;  %v4031_v22 = vpop.f32.mrf.mxu1 }
 0x1d1   : > { %v3014_v38 = vadd.f32 %v4030_v45, %v2949_v49  ;;  %v3996_v58 = vadd.f32 %v3995_v62, %v3994_v55 }
 0x1d2   : > { %v4032_v5 = vpop.f32.mrf.mxu1 }
 0x1d3   : > { %v4109_v15 = vpack.i.bf16 %v3014_v38, %v3011_v51  ;;  %v2957_v48 = vadd.f32 %v3996_v58, %v5382_v32  ;;  %v4033_v14 = vadd.f32 %v4032_v5, %v4031_v22 }
 0x1d4   : > { %v4034_v29 = vpop.f32.mrf.mxu1 }
 0x1d5   : > { %4110 = vrot.lane.b32.xlu0 %v4109_v15, %s4300_s28  ;;  %v3019_v24 = vadd.f32 %v4033_v14, %v2954_v37 }
 0x1d6   : > { %v4035_v4 = vpop.f32.mrf.mxu1 }
 0x1d7   : > { %v4036_v36 = vadd.f32 %v4035_v4, %v4034_v29 }
 0x1d9   : > { %v3022_v1 = vadd.f32 %v4036_v36, %v2957_v48 }
 0x1db   : > { %v4114_v6 = vpack.i.bf16 %v3022_v1, %v3019_v24 }
 0x1dd   : > { %4115 = vrot.lane.b32.xlu1 %v4114_v6, %s4300_s28 }
 0x1f4   : > { %v4081_v47 = vpop.permute.xlu0 %4080 }
 0x1f5   : > { %v4083_v56 = vunpack.i.h.bf16 %v4081_v47  ;;  %v4082_v39 = vunpack.i.l.bf16 %v4081_v47 }
 0x1f7   : > { %v2151_v10 = vsel %vm2150_vm14, %v5385_v54, %v4082_v39  ;;  %v2152_v32 = vsel %vm2150_vm14, %v5388_v43, %v4083_v56 }
 0x1f8   : > { %v3673_v12 = vpack.c.bf16 %v2152_v32, %v2151_v10 }
 0x1fa   : > { %3674 = vst [vmem:[%s4362_s30] sm:$0xff] %v3673_v12  }
 0x1fc   : > { %v4086_v16 = vpop.permute.xlu0 %4085 }
 0x1fd   : > { %v4088_v0 = vunpack.i.h.bf16 %v4086_v16  ;;  %v4087_v20 = vunpack.i.l.bf16 %v4086_v16 }
 0x1ff   : > { %v2153_v13 = vsel %vm2150_vm14, %v5391_v18, %v4087_v20  ;;  %v2154_v34 = vsel %vm2150_vm14, %v5394_v31, %v4088_v0 }
 0x200   : > { %v3678_v40 = vpack.c.bf16 %v2154_v34, %v2153_v13 }
 0x202   : > { %3710 = vst [vmem:[%s4362_s30 + $0x10] sm:$0xff] %v3678_v40  }
 0x204   : > { %v4091_v7 = vpop.permute.xlu1 %4090 }
 0x205   : > { %v4093_v54 = vunpack.i.h.bf16 %v4091_v7  ;;  %v4092_v8 = vunpack.i.l.bf16 %v4091_v7 }
 0x207   : > { %v2155_v43 = vsel %vm2150_vm14, %v5397_v3, %v4092_v8  ;;  %v2156_v17 = vsel %vm2150_vm14, %v5400_v23, %v4093_v54 }
 0x208   : > { %v3683_v52 = vpack.c.bf16 %v2156_v17, %v2155_v43 }
 0x20a   : > { %3711 = vst [vmem:[%s4362_s30 + $0x20] sm:$0xff] %v3683_v52  }
 0x20c   : > { %v4096_v9 = vpop.permute.xlu1 %4095 }
 0x20d   : > { %v4098_v18 = vunpack.i.h.bf16 %v4096_v9  ;;  %v4097_v42 = vunpack.i.l.bf16 %v4096_v9 }
 0x20f   : > { %v2157_v31 = vsel %vm2150_vm14, %v5403_v57, %v4097_v42  ;;  %v2158_v59 = vsel %vm2150_vm14, %v5406_v27, %v4098_v18 }
 0x210   : > { %v3688_v11 = vpack.c.bf16 %v2158_v59, %v2157_v31 }
 0x212   : > { %3712 = vst [vmem:[%s4362_s30 + $0x30] sm:$0xff] %v3688_v11  }
 0x237   : > { %v4101_v44 = vpop.permute.xlu0 %4100 }
 0x238   : > { %v4103_v3 = vunpack.i.h.bf16 %v4101_v44  ;;  %v4102_v19 = vunpack.i.l.bf16 %v4101_v44 }
 0x23a   : > { %v3058_v23 = vsel %vm2150_vm14, %v5424_v30, %v4103_v3  ;;  %v3057_v2 = vsel %vm2150_vm14, %v5421_v63, %v4102_v19 }
 0x23b   : > { %v3693_v50 = vpack.c.bf16 %v3058_v23, %v3057_v2 }
 0x23d   : > { %3713 = vst [vmem:[%s4362_s30 + $0x8] sm:$0xff] %v3693_v50  }
 0x23f   : > { %v4106_v28 = vpop.permute.xlu1 %4105 }
 0x240   : > { %v4108_v57 = vunpack.i.h.bf16 %v4106_v28  ;;  %v4107_v35 = vunpack.i.l.bf16 %v4106_v28 }
 0x242   : > { %v3060_v27 = vsel %vm2150_vm14, %v5430_v25, %v4108_v57  ;;  %v3059_v49 = vsel %vm2150_vm14, %v5427_v21, %v4107_v35 }
 0x243   : > { %v3698_v55 = vpack.c.bf16 %v3060_v27, %v3059_v49 }
 0x245   : > { %3714 = vst [vmem:[%s4362_s30 + $0x18] sm:$0xff] %v3698_v55  }
 0x247   : > { %v4111_v60 = vpop.permute.xlu0 %4110 }
 0x248   : > { %v4113_v30 = vunpack.i.h.bf16 %v4111_v60  ;;  %v4112_v61 = vunpack.i.l.bf16 %v4111_v60 }
 0x24a   : > { %v3062_v63 = vsel %vm2150_vm14, %v5436_v46, %v4113_v30  ;;  %v3061_v45 = vsel %vm2150_vm14, %v5433_v41, %v4112_v61 }
 0x24b   : > { %v3703_v62 = vpack.c.bf16 %v3062_v63, %v3061_v45 }
 0x24d   : > { %3715 = vst [vmem:[%s4362_s30 + $0x28] sm:$0xff] %v3703_v62  }
 0x24f   : > { %v4116_v22 = vpop.permute.xlu1 %4115 }
 0x250   : > { %v4118_v51 = vunpack.i.h.bf16 %v4116_v22  ;;  %v4117_v25 = vunpack.i.l.bf16 %v4116_v22 }
 0x252   : > { %v3064_v21 = vsel %vm2150_vm14, %v5442_v33, %v4118_v51  ;;  %v3063_v38 = vsel %vm2150_vm14, %v5439_v53, %v4117_v25 }
 0x253   : > { %v3708_v26 = vpack.c.bf16 %v3064_v21, %v3063_v38 }
 0x255   : > { %3716 = vst [vmem:[%s4362_s30 + $0x38] sm:$0xff] %v3708_v26  }
 0x256 PF: > { %s13_s16 = sadd.s32 1, %s4297_s16   ;;  %s5525_s12 = smov %s4289_s14 }
 0x257   : > { %p10_p8 = scmp.ge.s32.totalorder %s13_s16, 10   ;;  %s5526_s13 = smov %s4293_s15 }
 0x258   : > { %s5527_s14 = smov %s5530_s17  ;;  %s5528_s15 = smov %s5534_s18 }
 0x259   :  { %12 = sbr.rel (!%p10_p8) target bundleno = 3 (0x3), region = 74 }

</bundles_post_ra>
